<compile_context>
chip_gen: v7x
topology: tpu7x:2x2x1
jax: 0.10.0
libtpu: 0.0.40
codegen_flags: <defaults>
</compile_context>

<pallas_src>
import functools
import math

import jax
import jax.numpy as jnp
from jax.experimental import pallas as pl
from jax.experimental.pallas import tpu as pltpu

NUM_CLASSES = 10
BN_EPS = 1e-5


def _round_up(v, m):
    return ((v + m - 1) // m) * m


# ---------------------------------------------------------------------------
# Pallas kernels
# ---------------------------------------------------------------------------
def _gemm_bias_act_kernel(x_ref, w_ref, b_ref, o_ref, *, apply_relu):
    """One (TILE_M, K) x (K, N) tile: bf16 operands, f32 accumulate, fused bias/ReLU."""
    x = x_ref[...]
    if x.dtype != jnp.bfloat16:
        x = x.astype(jnp.bfloat16)
    acc = jnp.dot(x, w_ref[...], preferred_element_type=jnp.float32)
    acc = acc + b_ref[...]                      # (1, N) f32 bias broadcast
    if apply_relu:
        acc = jnp.maximum(acc, 0.0)
    o_ref[...] = acc.astype(o_ref.dtype)


def gemm_bias_act(x, w, b, *, apply_relu, tile_m=512):
    """y = act(x @ w + b). 1-D grid over rows; weight/bias stay VMEM-resident."""
    m, k = x.shape
    _, n = w.shape
    tile_m = min(tile_m, _round_up(m, 16))
    m_pad = _round_up(m, tile_m)
    if m_pad != m:
        x = jnp.pad(x, ((0, m_pad - m), (0, 0)))
    out = pl.pallas_call(
        functools.partial(_gemm_bias_act_kernel, apply_relu=apply_relu),
        out_shape=jax.ShapeDtypeStruct((m_pad, n), jnp.float32),
        grid_spec=pltpu.PrefetchScalarGridSpec(
            num_scalar_prefetch=0,
            grid=(m_pad // tile_m,),
            in_specs=[
                pl.BlockSpec((tile_m, k), lambda i: (i, 0)),
                pl.BlockSpec((k, n), lambda i: (0, 0)),   # resident weights
                pl.BlockSpec((1, n), lambda i: (0, 0)),   # resident bias
            ],
            out_specs=pl.BlockSpec((tile_m, n), lambda i: (i, 0)),
        ),
        compiler_params=pltpu.CompilerParams(dimension_semantics=("parallel",)),
    )(x, w, b)
    return out[:m] if m_pad != m else out


def _mlp_kernel(x_ref, w1_ref, b1_ref, w2_ref, b2_ref, w3_ref, b3_ref, o_ref):
    """Fused FC head: Linear(3072,1024)+ReLU -> Linear(1024,256)+ReLU -> Linear(256,10).
    Dropout layers are identity at inference. bf16 matmuls, f32 accumulation."""
    h = x_ref[...].astype(jnp.bfloat16)
    h = jnp.dot(h, w1_ref[...], preferred_element_type=jnp.float32) + b1_ref[...]
    h = jnp.maximum(h, 0.0).astype(jnp.bfloat16)
    h = jnp.dot(h, w2_ref[...], preferred_element_type=jnp.float32) + b2_ref[...]
    h = jnp.maximum(h, 0.0).astype(jnp.bfloat16)
    h = jnp.dot(h, w3_ref[...], preferred_element_type=jnp.float32) + b3_ref[...]
    o_ref[...] = h                              # (TILE_B, 10): tiny masked store, by design


def mlp_head(x, w1, b1, w2, b2, w3, b3, *, tile_b=256):
    b, k = x.shape
    n_out = w3.shape[1]
    tile_b = min(tile_b, _round_up(b, 8))
    b_pad = _round_up(b, tile_b)
    if b_pad != b:
        x = jnp.pad(x, ((0, b_pad - b), (0, 0)))
    const = lambda i: (0, 0)
    out = pl.pallas_call(
        _mlp_kernel,
        out_shape=jax.ShapeDtypeStruct((b_pad, n_out), jnp.float32),
        grid_spec=pltpu.PrefetchScalarGridSpec(
            num_scalar_prefetch=0,
            grid=(b_pad // tile_b,),
            in_specs=[
                pl.BlockSpec((tile_b, k), lambda i: (i, 0)),
                pl.BlockSpec(w1.shape, const), pl.BlockSpec(b1.shape, const),
                pl.BlockSpec(w2.shape, const), pl.BlockSpec(b2.shape, const),
                pl.BlockSpec(w3.shape, const), pl.BlockSpec(b3.shape, const),
            ],
            out_specs=pl.BlockSpec((tile_b, n_out), lambda i: (i, 0)),
        ),
        compiler_params=pltpu.CompilerParams(
            dimension_semantics=("parallel",),
            # ~7 MiB of resident bf16 weights (x2 buffering) + activation tiles;
            # explicit limit keeps v5e's 16 MiB default scoped VMEM from binding.
            vmem_limit_bytes=48 * 1024 * 1024),
    )(x, w1, b1, w2, b2, w3, b3)
    return out[:b] if b_pad != b else out


# ---------------------------------------------------------------------------
# Wrapper-side layout plumbing (XLA: pad / im2col / max-pool / flatten)
# ---------------------------------------------------------------------------
def _extract_patches(xp, k, out_h=None, out_w=None):
    """im2col on a spatially pre-padded NHWC tensor -> (B, out_h, out_w, k*k*C).
    Feature order is [(kh, kw) major, channel minor], matching the
    (k, k, Cin, Cout) -> (k*k*Cin, Cout) GEMM weight reshape."""
    _, hp, wp, _ = xp.shape
    out_h = hp - k + 1 if out_h is None else out_h
    out_w = wp - k + 1 if out_w is None else out_w
    taps = [xp[:, i:i + out_h, j:j + out_w, :] for i in range(k) for j in range(k)]
    return jnp.concatenate(taps, axis=-1)


def _max_pool(x, k):
    bsz, h, w, c = x.shape
    ho, wo = h // k, w // k
    x = x[:, :ho * k, :wo * k, :]
    return jnp.max(x.reshape(bsz, ho, k, wo, k, c), axis=(2, 4))


def _conv_block(h, w_gemm, b, ksize, *, out_hw=None, tile_m=512):
    """Conv2d(stride=1, padding=1) + folded BatchNorm2d + ReLU as an im2col GEMM."""
    bsz = h.shape[0]
    xp = jnp.pad(h, ((0, 0), (1, 1), (1, 1), (0, 0))).astype(jnp.bfloat16)
    out_h, out_w = out_hw if out_hw is not None else (h.shape[1], h.shape[2])
    patches = _extract_patches(xp, ksize, out_h, out_w)
    kdim = patches.shape[-1]
    y = gemm_bias_act(patches.reshape(-1, kdim), w_gemm, b,
                      apply_relu=True, tile_m=tile_m)
    return y.reshape(bsz, out_h, out_w, w_gemm.shape[1])


@jax.jit
def spect_cnn_forward(x_nchw, ip):
    """Inference forward of SpectCnn. x_nchw: (B, 1, H, W) float32 -> (B, 10)."""
    bsz = x_nchw.shape[0]
    h = jnp.transpose(x_nchw, (0, 2, 3, 1))                            # NHWC

    # conv block 1: Conv2d(1, 32, 3, p=1) + BN + ReLU + MaxPool2d(2)
    h = _max_pool(_conv_block(h, ip["c1_w"], ip["c1_b"], 3), 2)
    # conv block 2: Conv2d(32, 32, 3, p=1) + BN + ReLU + MaxPool2d(2)
    h = _max_pool(_conv_block(h, ip["c2_w"], ip["c2_b"], 3), 2)
    # conv block 3: Conv2d(32, 32, 2, p=1) + BN + ReLU + MaxPool2d(4).
    # Only the top-left 4*floor((H+1)/4) x 4*floor((W+1)/4) region of the conv
    # output survives MaxPool2d(4), so only that region is computed.
    h3 = 4 * ((h.shape[1] + 1) // 4)
    w3 = 4 * ((h.shape[2] + 1) // 4)
    h = _max_pool(_conv_block(h, ip["c3_w"], ip["c3_b"], 2, out_hw=(h3, w3)), 4)

    # nn.Flatten() flattens torch's NCHW layout -> transpose NHWC->NCHW first.
    flat = jnp.transpose(h, (0, 3, 1, 2)).reshape(bsz, -1)
    return mlp_head(flat, ip["fc1_w"], ip["fc1_b"], ip["fc2_w"], ip["fc2_b"],
                    ip["fc3_w"], ip["fc3_b"])


# ---------------------------------------------------------------------------
# Parameters
# ---------------------------------------------------------------------------
def init_params(key):
    """Synthetic parameters with the same shapes/semantics as the torch module.
    Conv weights are stored (Kh, Kw, Cin, Cout) (torch: (Cout, Cin, Kh, Kw)),
    Linear weights (in, out) (torch: (out, in)); BN uses running stats (inference)."""
    p = {}
    keys = iter(jax.random.split(key, 24))
    for name, k, cin, cout in (("1", 3, 1, 32), ("2", 3, 32, 32), ("3", 2, 32, 32)):
        bound = 1.0 / math.sqrt(cin * k * k)
        p[f"conv{name}_w"] = jax.random.uniform(next(keys), (k, k, cin, cout),
                                                jnp.float32, -bound, bound)
        p[f"conv{name}_b"] = jax.random.uniform(next(keys), (cout,),
                                                jnp.float32, -bound, bound)
        p[f"bn{name}_gamma"] = 1.0 + 0.1 * jax.random.normal(next(keys), (cout,), jnp.float32)
        p[f"bn{name}_beta"] = 0.1 * jax.random.normal(next(keys), (cout,), jnp.float32)
        p[f"bn{name}_mean"] = 0.1 * jax.random.normal(next(keys), (cout,), jnp.float32)
        p[f"bn{name}_var"] = jax.random.uniform(next(keys), (cout,), jnp.float32, 0.5, 1.5)
    for name, fin, fout in (("1", 3072, 1024), ("2", 1024, 256), ("3", 256, NUM_CLASSES)):
        bound = 1.0 / math.sqrt(fin)
        p[f"fc{name}_w"] = jax.random.uniform(next(keys), (fin, fout),
                                              jnp.float32, -bound, bound)
        p[f"fc{name}_b"] = jax.random.uniform(next(keys), (fout,),
                                              jnp.float32, -bound, bound)
    return p


def prepare_inference_params(p):
    """Fold BatchNorm2d (inference affine) into conv weights/bias, cast weight
    matrices to bf16 for the MXU (biases stay f32)."""
    ip = {}
    for i in ("1", "2", "3"):
        w = p[f"conv{i}_w"]
        kh, kw, cin, cout = w.shape
        scale = p[f"bn{i}_gamma"] * jax.lax.rsqrt(p[f"bn{i}_var"] + BN_EPS)
        w_fold = (w * scale[None, None, None, :]).reshape(kh * kw * cin, cout)
        b_fold = (p[f"conv{i}_b"] - p[f"bn{i}_mean"]) * scale + p[f"bn{i}_beta"]
        ip[f"c{i}_w"] = w_fold.astype(jnp.bfloat16)
        ip[f"c{i}_b"] = b_fold.reshape(1, cout).astype(jnp.float32)
    for i in ("1", "2", "3"):
        ip[f"fc{i}_w"] = p[f"fc{i}_w"].astype(jnp.bfloat16)
        ip[f"fc{i}_b"] = p[f"fc{i}_b"].reshape(1, -1).astype(jnp.float32)
    return ip


# ---------------------------------------------------------------------------
# Pure-JAX reference (lax.conv + reduce_window, same folded bf16 weights)
# ---------------------------------------------------------------------------
def reference_forward(x_nchw, ip):
    def conv_bn_relu(h, w_gemm, b, k):
        cout = w_gemm.shape[1]
        cin = w_gemm.shape[0] // (k * k)
        w = w_gemm.reshape(k, k, cin, cout)
        y = jax.lax.conv_general_dilated(
            h.astype(jnp.bfloat16), w, window_strides=(1, 1),
            padding=((1, 1), (1, 1)),
            dimension_numbers=("NHWC", "HWIO", "NHWC"),
            preferred_element_type=jnp.float32)
        return jnp.maximum(y + b.reshape(1, 1, 1, cout), 0.0)

    def max_pool(h, k):
        return jax.lax.reduce_window(h, -jnp.inf, jax.lax.max,
                                     (1, k, k, 1), (1, k, k, 1), "VALID")

    h = jnp.transpose(x_nchw, (0, 2, 3, 1))
    h = max_pool(conv_bn_relu(h, ip["c1_w"], ip["c1_b"], 3), 2)
    h = max_pool(conv_bn_relu(h, ip["c2_w"], ip["c2_b"], 3), 2)
    h = max_pool(conv_bn_relu(h, ip["c3_w"], ip["c3_b"], 2), 4)
    flat = jnp.transpose(h, (0, 3, 1, 2)).reshape(h.shape[0], -1)
    h = jnp.maximum(jnp.dot(flat.astype(jnp.bfloat16), ip["fc1_w"],
                            preferred_element_type=jnp.float32) + ip["fc1_b"], 0.0)
    h = jnp.maximum(jnp.dot(h.astype(jnp.bfloat16), ip["fc2_w"],
                            preferred_element_type=jnp.float32) + ip["fc2_b"], 0.0)
    return jnp.dot(h.astype(jnp.bfloat16), ip["fc3_w"],
                   preferred_element_type=jnp.float32) + ip["fc3_b"]


if __name__ == "__main__":
    key = jax.random.PRNGKey(0)
    pkey, xkey = jax.random.split(key)
    params = init_params(pkey)
    ip = prepare_inference_params(params)

    # Smallest spatial size consistent with the module's hard-coded Linear(3072, 1024):
    # 32 * floor((H/4 + 1)/4) * floor((W/4 + 1)/4) == 3072  ->  H=128, W=192 (8 x 12 x 32).
    batch, height, width = 2, 128, 192
    x = jax.random.normal(xkey, (batch, 1, height, width), jnp.float32)

    out = jax.block_until_ready(spect_cnn_forward(x, ip))
    ref = jax.block_until_ready(reference_forward(x, ip))

    assert out.shape == (batch, NUM_CLASSES), out.shape
    max_err = float(jnp.max(jnp.abs(out - ref)))
    assert jnp.allclose(out, ref, atol=1e-2, rtol=1e-2), f"mismatch vs reference: {max_err}"
    print("KERNEL_OK")
</pallas_src>

<mosaic_0001>
module attributes {stable_mosaic.version = 11 : i64} {
  func.func @_gemm_bias_act_kernel(%arg0: i32, %arg1: memref<512x9xbf16, #tpu.memory_space<vmem>>, %arg2: memref<9x32xbf16, #tpu.memory_space<vmem>>, %arg3: memref<1x32xf32, #tpu.memory_space<vmem>>, %arg4: memref<512x32xf32, #tpu.memory_space<vmem>>) attributes {dimension_semantics = [#tpu.dimension_semantics<parallel>], iteration_bounds = array<i64: 96>, scalar_prefetch = 0 : i64, scratch_operands = 0 : i64, tpu.core_type = #tpu.core_type<tc>, window_params = [{transform_indices = @transform_0, window_bounds = array<i64: 512, 9>}, {pipeline_mode = #tpu.pipeline_mode<synchronous>, transform_indices = @transform_1, window_bounds = array<i64: 9, 32>}, {pipeline_mode = #tpu.pipeline_mode<synchronous>, transform_indices = @transform_2, window_bounds = array<i64: 1, 32>}, {transform_indices = @transform_3, window_bounds = array<i64: 512, 32>}]} {
    %c0 = arith.constant 0 : index
    %c0_0 = arith.constant 0 : index
    %0 = vector.load %arg1[%c0, %c0_0] : memref<512x9xbf16, #tpu.memory_space<vmem>>, vector<512x9xbf16>
    %c0_1 = arith.constant 0 : index
    %c0_2 = arith.constant 0 : index
    %1 = vector.load %arg2[%c0_1, %c0_2] : memref<9x32xbf16, #tpu.memory_space<vmem>>, vector<9x32xbf16>
    %cst = arith.constant dense<0.000000e+00> : vector<512x32xf32>
    %2 = tpu.matmul %0, %1, %cst {dimension_numbers = #tpu.dot_dimension_numbers<[1], [0], [0], [1], [0, 0, 1, 1], [], []>} : vector<512x9xbf16>, vector<9x32xbf16>, vector<512x32xf32> -> vector<512x32xf32>
    %c0_3 = arith.constant 0 : index
    %c0_4 = arith.constant 0 : index
    %3 = vector.load %arg3[%c0_3, %c0_4] : memref<1x32xf32, #tpu.memory_space<vmem>>, vector<1x32xf32>
    %4 = vector.broadcast %3 : vector<1x32xf32> to vector<512x32xf32>
    %5 = arith.addf %2, %4 : vector<512x32xf32>
    %cst_5 = arith.constant 0.000000e+00 : f32
    %6 = vector.broadcast %cst_5 : f32 to vector<512x32xf32>
    %7 = arith.maximumf %5, %6 : vector<512x32xf32>
    %c0_6 = arith.constant 0 : index
    %c0_7 = arith.constant 0 : index
    %8 = vector.load %arg4[%c0_6, %c0_7] : memref<512x32xf32, #tpu.memory_space<vmem>>, vector<512x32xf32>
    tpu.vector_store %arg4[%c0_6, %c0_7], %7 {strides = array<i32>} : memref<512x32xf32, #tpu.memory_space<vmem>>, vector<512x32xf32>,
    return
  }
  func.func @transform_0(%arg0: i32) -> (i32, i32) {
    %c0_i32 = arith.constant 0 : i32
    %c0_i32_0 = arith.constant 0 : i32
    return %arg0, %c0_i32 : i32, i32
  }
  func.func @transform_1(%arg0: i32) -> (i32, i32) {
    %c0_i32 = arith.constant 0 : i32
    %c0_i32_0 = arith.constant 0 : i32
    %c0_i32_1 = arith.constant 0 : i32
    return %c0_i32, %c0_i32_0 : i32, i32
  }
  func.func @transform_2(%arg0: i32) -> (i32, i32) {
    %c0_i32 = arith.constant 0 : i32
    %c0_i32_0 = arith.constant 0 : i32
    %c0_i32_1 = arith.constant 0 : i32
    return %c0_i32, %c0_i32_0 : i32, i32
  }
  func.func @transform_3(%arg0: i32) -> (i32, i32) {
    %c0_i32 = arith.constant 0 : i32
    %c0_i32_0 = arith.constant 0 : i32
    return %arg0, %c0_i32 : i32, i32
  }
}

module attributes {stable_mosaic.version = 11 : i64} {
  func.func @_gemm_bias_act_kernel(%arg0: i32, %arg1: memref<512x288xbf16, #tpu.memory_space<vmem>>, %arg2: memref<288x32xbf16, #tpu.memory_space<vmem>>, %arg3: memref<1x32xf32, #tpu.memory_space<vmem>>, %arg4: memref<512x32xf32, #tpu.memory_space<vmem>>) attributes {dimension_semantics = [#tpu.dimension_semantics<parallel>], iteration_bounds = array<i64: 24>, scalar_prefetch = 0 : i64, scratch_operands = 0 : i64, tpu.core_type = #tpu.core_type<tc>, window_params = [{transform_indices = @transform_0, window_bounds = array<i64: 512, 288>}, {pipeline_mode = #tpu.pipeline_mode<synchronous>, transform_indices = @transform_1, window_bounds = array<i64: 288, 32>}, {pipeline_mode = #tpu.pipeline_mode<synchronous>, transform_indices = @transform_2, window_bounds = array<i64: 1, 32>}, {transform_indices = @transform_3, window_bounds = array<i64: 512, 32>}]} {
    %c0 = arith.constant 0 : index
    %c0_0 = arith.constant 0 : index
    %0 = vector.load %arg1[%c0, %c0_0] : memref<512x288xbf16, #tpu.memory_space<vmem>>, vector<512x288xbf16>
    %c0_1 = arith.constant 0 : index
    %c0_2 = arith.constant 0 : index
    %1 = vector.load %arg2[%c0_1, %c0_2] : memref<288x32xbf16, #tpu.memory_space<vmem>>, vector<288x32xbf16>
    %cst = arith.constant dense<0.000000e+00> : vector<512x32xf32>
    %2 = tpu.matmul %0, %1, %cst {dimension_numbers = #tpu.dot_dimension_numbers<[1], [0], [0], [1], [0, 0, 1, 1], [], []>} : vector<512x288xbf16>, vector<288x32xbf16>, vector<512x32xf32> -> vector<512x32xf32>
    %c0_3 = arith.constant 0 : index
    %c0_4 = arith.constant 0 : index
    %3 = vector.load %arg3[%c0_3, %c0_4] : memref<1x32xf32, #tpu.memory_space<vmem>>, vector<1x32xf32>
    %4 = vector.broadcast %3 : vector<1x32xf32> to vector<512x32xf32>
    %5 = arith.addf %2, %4 : vector<512x32xf32>
    %cst_5 = arith.constant 0.000000e+00 : f32
    %6 = vector.broadcast %cst_5 : f32 to vector<512x32xf32>
    %7 = arith.maximumf %5, %6 : vector<512x32xf32>
    %c0_6 = arith.constant 0 : index
    %c0_7 = arith.constant 0 : index
    %8 = vector.load %arg4[%c0_6, %c0_7] : memref<512x32xf32, #tpu.memory_space<vmem>>, vector<512x32xf32>
    tpu.vector_store %arg4[%c0_6, %c0_7], %7 {strides = array<i32>} : memref<512x32xf32, #tpu.memory_space<vmem>>, vector<512x32xf32>,
    return
  }
  func.func @transform_0(%arg0: i32) -> (i32, i32) {
    %c0_i32 = arith.constant 0 : i32
    %c0_i32_0 = arith.constant 0 : i32
    return %arg0, %c0_i32 : i32, i32
  }
  func.func @transform_1(%arg0: i32) -> (i32, i32) {
    %c0_i32 = arith.constant 0 : i32
    %c0_i32_0 = arith.constant 0 : i32
    %c0_i32_1 = arith.constant 0 : i32
    return %c0_i32, %c0_i32_0 : i32, i32
  }
  func.func @transform_2(%arg0: i32) -> (i32, i32) {
    %c0_i32 = arith.constant 0 : i32
    %c0_i32_0 = arith.constant 0 : i32
    %c0_i32_1 = arith.constant 0 : i32
    return %c0_i32, %c0_i32_0 : i32, i32
  }
  func.func @transform_3(%arg0: i32) -> (i32, i32) {
    %c0_i32 = arith.constant 0 : i32
    %c0_i32_0 = arith.constant 0 : i32
    return %arg0, %c0_i32 : i32, i32
  }
}

module attributes {stable_mosaic.version = 11 : i64} {
  func.func @_gemm_bias_act_kernel(%arg0: i32, %arg1: memref<512x128xbf16, #tpu.memory_space<vmem>>, %arg2: memref<128x32xbf16, #tpu.memory_space<vmem>>, %arg3: memref<1x32xf32, #tpu.memory_space<vmem>>, %arg4: memref<512x32xf32, #tpu.memory_space<vmem>>) attributes {dimension_semantics = [#tpu.dimension_semantics<parallel>], iteration_bounds = array<i64: 6>, scalar_prefetch = 0 : i64, scratch_operands = 0 : i64, tpu.core_type = #tpu.core_type<tc>, window_params = [{transform_indices = @transform_0, window_bounds = array<i64: 512, 128>}, {pipeline_mode = #tpu.pipeline_mode<synchronous>, transform_indices = @transform_1, window_bounds = array<i64: 128, 32>}, {pipeline_mode = #tpu.pipeline_mode<synchronous>, transform_indices = @transform_2, window_bounds = array<i64: 1, 32>}, {transform_indices = @transform_3, window_bounds = array<i64: 512, 32>}]} {
    %c0 = arith.constant 0 : index
    %c0_0 = arith.constant 0 : index
    %0 = vector.load %arg1[%c0, %c0_0] : memref<512x128xbf16, #tpu.memory_space<vmem>>, vector<512x128xbf16>
    %c0_1 = arith.constant 0 : index
    %c0_2 = arith.constant 0 : index
    %1 = vector.load %arg2[%c0_1, %c0_2] : memref<128x32xbf16, #tpu.memory_space<vmem>>, vector<128x32xbf16>
    %cst = arith.constant dense<0.000000e+00> : vector<512x32xf32>
    %2 = tpu.matmul %0, %1, %cst {dimension_numbers = #tpu.dot_dimension_numbers<[1], [0], [0], [1], [0, 0, 1, 1], [], []>} : vector<512x128xbf16>, vector<128x32xbf16>, vector<512x32xf32> -> vector<512x32xf32>
    %c0_3 = arith.constant 0 : index
    %c0_4 = arith.constant 0 : index
    %3 = vector.load %arg3[%c0_3, %c0_4] : memref<1x32xf32, #tpu.memory_space<vmem>>, vector<1x32xf32>
    %4 = vector.broadcast %3 : vector<1x32xf32> to vector<512x32xf32>
    %5 = arith.addf %2, %4 : vector<512x32xf32>
    %cst_5 = arith.constant 0.000000e+00 : f32
    %6 = vector.broadcast %cst_5 : f32 to vector<512x32xf32>
    %7 = arith.maximumf %5, %6 : vector<512x32xf32>
    %c0_6 = arith.constant 0 : index
    %c0_7 = arith.constant 0 : index
    %8 = vector.load %arg4[%c0_6, %c0_7] : memref<512x32xf32, #tpu.memory_space<vmem>>, vector<512x32xf32>
    tpu.vector_store %arg4[%c0_6, %c0_7], %7 {strides = array<i32>} : memref<512x32xf32, #tpu.memory_space<vmem>>, vector<512x32xf32>,
    return
  }
  func.func @transform_0(%arg0: i32) -> (i32, i32) {
    %c0_i32 = arith.constant 0 : i32
    %c0_i32_0 = arith.constant 0 : i32
    return %arg0, %c0_i32 : i32, i32
  }
  func.func @transform_1(%arg0: i32) -> (i32, i32) {
    %c0_i32 = arith.constant 0 : i32
    %c0_i32_0 = arith.constant 0 : i32
    %c0_i32_1 = arith.constant 0 : i32
    return %c0_i32, %c0_i32_0 : i32, i32
  }
  func.func @transform_2(%arg0: i32) -> (i32, i32) {
    %c0_i32 = arith.constant 0 : i32
    %c0_i32_0 = arith.constant 0 : i32
    %c0_i32_1 = arith.constant 0 : i32
    return %c0_i32, %c0_i32_0 : i32, i32
  }
  func.func @transform_3(%arg0: i32) -> (i32, i32) {
    %c0_i32 = arith.constant 0 : i32
    %c0_i32_0 = arith.constant 0 : i32
    return %arg0, %c0_i32 : i32, i32
  }
}

module attributes {stable_mosaic.version = 11 : i64} {
  func.func @_mlp_kernel(%arg0: i32, %arg1: memref<8x3072xf32, #tpu.memory_space<vmem>>, %arg2: memref<3072x1024xbf16, #tpu.memory_space<vmem>>, %arg3: memref<1x1024xf32, #tpu.memory_space<vmem>>, %arg4: memref<1024x256xbf16, #tpu.memory_space<vmem>>, %arg5: memref<1x256xf32, #tpu.memory_space<vmem>>, %arg6: memref<256x10xbf16, #tpu.memory_space<vmem>>, %arg7: memref<1x10xf32, #tpu.memory_space<vmem>>, %arg8: memref<8x10xf32, #tpu.memory_space<vmem>>) attributes {dimension_semantics = [#tpu.dimension_semantics<parallel>], iteration_bounds = array<i64: 1>, scalar_prefetch = 0 : i64, scratch_operands = 0 : i64, tpu.core_type = #tpu.core_type<tc>, window_params = [{transform_indices = @transform_0, window_bounds = array<i64: 8, 3072>}, {pipeline_mode = #tpu.pipeline_mode<synchronous>, transform_indices = @transform_1, window_bounds = array<i64: 3072, 1024>}, {pipeline_mode = #tpu.pipeline_mode<synchronous>, transform_indices = @transform_2, window_bounds = array<i64: 1, 1024>}, {pipeline_mode = #tpu.pipeline_mode<synchronous>, transform_indices = @transform_3, window_bounds = array<i64: 1024, 256>}, {pipeline_mode = #tpu.pipeline_mode<synchronous>, transform_indices = @transform_4, window_bounds = array<i64: 1, 256>}, {pipeline_mode = #tpu.pipeline_mode<synchronous>, transform_indices = @transform_5, window_bounds = array<i64: 256, 10>}, {pipeline_mode = #tpu.pipeline_mode<synchronous>, transform_indices = @transform_6, window_bounds = array<i64: 1, 10>}, {transform_indices = @transform_7, window_bounds = array<i64: 8, 10>}]} {
    %c0 = arith.constant 0 : index
    %c0_0 = arith.constant 0 : index
    %0 = vector.load %arg1[%c0, %c0_0] : memref<8x3072xf32, #tpu.memory_space<vmem>>, vector<8x3072xf32>
    %1 = arith.truncf %0 : vector<8x3072xf32> to vector<8x3072xbf16>
    %c0_1 = arith.constant 0 : index
    %c0_2 = arith.constant 0 : index
    %2 = vector.load %arg2[%c0_1, %c0_2] : memref<3072x1024xbf16, #tpu.memory_space<vmem>>, vector<3072x1024xbf16>
    %cst = arith.constant dense<0.000000e+00> : vector<8x1024xf32>
    %3 = tpu.matmul %1, %2, %cst {dimension_numbers = #tpu.dot_dimension_numbers<[1], [0], [0], [1], [0, 0, 1, 1], [], []>} : vector<8x3072xbf16>, vector<3072x1024xbf16>, vector<8x1024xf32> -> vector<8x1024xf32>
    %c0_3 = arith.constant 0 : index
    %c0_4 = arith.constant 0 : index
    %4 = vector.load %arg3[%c0_3, %c0_4] : memref<1x1024xf32, #tpu.memory_space<vmem>>, vector<1x1024xf32>
    %5 = vector.broadcast %4 : vector<1x1024xf32> to vector<8x1024xf32>
    %6 = arith.addf %3, %5 : vector<8x1024xf32>
    %cst_5 = arith.constant 0.000000e+00 : f32
    %7 = vector.broadcast %cst_5 : f32 to vector<8x1024xf32>
    %8 = arith.maximumf %6, %7 : vector<8x1024xf32>
    %9 = arith.truncf %8 : vector<8x1024xf32> to vector<8x1024xbf16>
    %c0_6 = arith.constant 0 : index
    %c0_7 = arith.constant 0 : index
    %10 = vector.load %arg4[%c0_6, %c0_7] : memref<1024x256xbf16, #tpu.memory_space<vmem>>, vector<1024x256xbf16>
    %cst_8 = arith.constant dense<0.000000e+00> : vector<8x256xf32>
    %11 = tpu.matmul %9, %10, %cst_8 {dimension_numbers = #tpu.dot_dimension_numbers<[1], [0], [0], [1], [0, 0, 1, 1], [], []>} : vector<8x1024xbf16>, vector<1024x256xbf16>, vector<8x256xf32> -> vector<8x256xf32>
    %c0_9 = arith.constant 0 : index
    %c0_10 = arith.constant 0 : index
    %12 = vector.load %arg5[%c0_9, %c0_10] : memref<1x256xf32, #tpu.memory_space<vmem>>, vector<1x256xf32>
    %13 = vector.broadcast %12 : vector<1x256xf32> to vector<8x256xf32>
    %14 = arith.addf %11, %13 : vector<8x256xf32>
    %cst_11 = arith.constant 0.000000e+00 : f32
    %15 = vector.broadcast %cst_11 : f32 to vector<8x256xf32>
    %16 = arith.maximumf %14, %15 : vector<8x256xf32>
    %17 = arith.truncf %16 : vector<8x256xf32> to vector<8x256xbf16>
    %c0_12 = arith.constant 0 : index
    %c0_13 = arith.constant 0 : index
    %18 = vector.load %arg6[%c0_12, %c0_13] : memref<256x10xbf16, #tpu.memory_space<vmem>>, vector<256x10xbf16>
    %cst_14 = arith.constant dense<0.000000e+00> : vector<8x10xf32>
    %19 = tpu.matmul %17, %18, %cst_14 {dimension_numbers = #tpu.dot_dimension_numbers<[1], [0], [0], [1], [0, 0, 1, 1], [], []>} : vector<8x256xbf16>, vector<256x10xbf16>, vector<8x10xf32> -> vector<8x10xf32>
    %c0_15 = arith.constant 0 : index
    %c0_16 = arith.constant 0 : index
    %20 = vector.load %arg7[%c0_15, %c0_16] : memref<1x10xf32, #tpu.memory_space<vmem>>, vector<1x10xf32>
    %21 = vector.broadcast %20 : vector<1x10xf32> to vector<8x10xf32>
    %22 = arith.addf %19, %21 : vector<8x10xf32>
    %c0_17 = arith.constant 0 : index
    %c0_18 = arith.constant 0 : index
    %23 = vector.load %arg8[%c0_17, %c0_18] : memref<8x10xf32, #tpu.memory_space<vmem>>, vector<8x10xf32>
    tpu.vector_store %arg8[%c0_17, %c0_18], %22 {strides = array<i32>} : memref<8x10xf32, #tpu.memory_space<vmem>>, vector<8x10xf32>,
    return
  }
  func.func @transform_0(%arg0: i32) -> (i32, i32) {
    %c0_i32 = arith.constant 0 : i32
    %c0_i32_0 = arith.constant 0 : i32
    return %arg0, %c0_i32 : i32, i32
  }
  func.func @transform_1(%arg0: i32) -> (i32, i32) {
    %c0_i32 = arith.constant 0 : i32
    %c0_i32_0 = arith.constant 0 : i32
    %c0_i32_1 = arith.constant 0 : i32
    return %c0_i32, %c0_i32_0 : i32, i32
  }
  func.func @transform_2(%arg0: i32) -> (i32, i32) {
    %c0_i32 = arith.constant 0 : i32
    %c0_i32_0 = arith.constant 0 : i32
    %c0_i32_1 = arith.constant 0 : i32
    return %c0_i32, %c0_i32_0 : i32, i32
  }
  func.func @transform_3(%arg0: i32) -> (i32, i32) {
    %c0_i32 = arith.constant 0 : i32
    %c0_i32_0 = arith.constant 0 : i32
    %c0_i32_1 = arith.constant 0 : i32
    return %c0_i32, %c0_i32_0 : i32, i32
  }
  func.func @transform_4(%arg0: i32) -> (i32, i32) {
    %c0_i32 = arith.constant 0 : i32
    %c0_i32_0 = arith.constant 0 : i32
    %c0_i32_1 = arith.constant 0 : i32
    return %c0_i32, %c0_i32_0 : i32, i32
  }
  func.func @transform_5(%arg0: i32) -> (i32, i32) {
    %c0_i32 = arith.constant 0 : i32
    %c0_i32_0 = arith.constant 0 : i32
    %c0_i32_1 = arith.constant 0 : i32
    return %c0_i32, %c0_i32_0 : i32, i32
  }
  func.func @transform_6(%arg0: i32) -> (i32, i32) {
    %c0_i32 = arith.constant 0 : i32
    %c0_i32_0 = arith.constant 0 : i32
    %c0_i32_1 = arith.constant 0 : i32
    return %c0_i32, %c0_i32_0 : i32, i32
  }
  func.func @transform_7(%arg0: i32) -> (i32, i32) {
    %c0_i32 = arith.constant 0 : i32
    %c0_i32_0 = arith.constant 0 : i32
    return %arg0, %c0_i32 : i32, i32
  }
}

</mosaic_0001>

<bundles_post_ra>
// kernel: spect_cnn_forward.4
= control target key start
LH: loop header
LB: loop body
LE: loop exit
PB: predicated region body
PF: predicated region fallthrough
CT: control target
= control target key end

     0   :  { %8 = vsyncpa [#allocation3], 0  ;;  %s1742_s0 = inlined_call_operand.hbm [shape: bf16[49152,9], index: 0, kind: input, shape index: {}]   ;;  %s1743_s1 = inlined_call_operand.vmem [shape: bf16[9,32], index: 1, kind: input, shape index: {}]   ;;  %s1744_s2 = inlined_call_operand.vmem [shape: f32[1,32], index: 2, kind: input, shape index: {}]   ;;  %s1745_s3 = inlined_call_operand.vmem [shape: f32[49152,32], index: 3, kind: output, shape index: {}]  }
   0x1   :  { %10 = vsyncpa [#allocation3 + $0x1], 0  ;;  %s1367_s12 = smov 0   ;;  %s1369_s13 = smov 0  }
   0x2   :  { %s1371_s14 = smov 0   ;;  %s1373_s15 = smov 0  }
   0x3 LB: > { %s1021_s16 = sadd.s32 4294967295, %s1341_s15   ;;  %s1387_s17 = sadd.s32 1, %s1341_s15   ;;  %s1341_s15 = sphi %s1373_s15, %s1752_s15   ;;  %s1337_s14 = sphi %s1371_s14, %s1751_s14   ;;  %s1333_s13 = sphi %s1369_s13, %s1750_s13   ;;  %s1329_s12 = sphi %s1367_s12, %s1749_s12  }
   0x4   : > { %s20_s18 = ssub.s32 %s1341_s15, %s1387_s17  ;;  %s23_s19 = sadd.s32 1, %s1337_s14 }
   0x5   : > { %p21_p0 = scmp.eq.s32.totalorder %s20_s18, 0  ;;  %p30_p1 = scmp.ne.s32.totalorder %s1337_s14, %s1333_s13 }
   0x6   : > { %p31_p2 = scmp.eq.s32.totalorder %s1341_s15, 0  ;;  %p36_p3 = scmp.ne.s32.totalorder %s1333_s13, %s1329_s12 }
   0x7   : > { %s1397_s20 = scalar_select %p21_p0, %s1337_s14, %s23_s19  }
   0x8   : > { %p32_p4 = por %p31_p2, %p30_p1  ;;  %p37_p5 = scmp.eq.s32.totalorder %s1021_s16, 0 }
   0x9   : > { %p1208_p6 = scmp.lt.s32.totalorder %s1341_s15, 96  ;;  %s134_s22 = sand.u32 1, %s1337_s14  }
   0xa   : > { %p1402_p7 = por %p37_p5, %p36_p3  ;;  %s1025_s23 = sshll.u32 %s134_s22, 8 }
   0xb   : > { %s1100_s24 = sshll.u32 %s1341_s15, 12  ;;  %s138_s28 = scalar_lea.vmem [#allocation2], %s1025_s23 }
   0xc   : > { %s1411_s27 = scalar_lea.hbm %s1742_s0, %s1100_s24  ;;  %s145_s29 = sshll.u32 %s138_s28, 4  ;;  %s1413_s29 = int_to_ptr.vmem [resolvable:$true] %s145_s29 }
   0xd   : > { %p1415_p8 = pnand %p1208_p6, %p32_p4  ;;  %s1420_s4 = scalar_lea.sflag [#allocation3], %s134_s22 }
   0xe   : > { %s1277_s5 = scalar_lea.hbm %s1411_s27, 4096  ;;  %s1282_s8 = scalar_lea.hbm %s1742_s0, 393216 }
   0xf   : > { %p1278_p10 = scmp.ne.s32.totalorder %s1411_s27, %s1277_s5  ;;  %p1279_p11 = pneg %p1415_p8 }
  0x10   : > { %p1283_p0 = scmp.lt.u32.totalorder %s1411_s27, %s1742_s0  ;;  %p1284_p1 = scmp.lt.u32.totalorder %s1282_s8, %s1277_s5 }
  0x11   : > { %p1280_p12 = pnand %p1279_p11, %p1278_p10  ;;  %p1286_p3 = scmp.lt.u32.totalorder %s1277_s5, %s1411_s27 }
  0x12   : > { %p1285_p2 = por %p1284_p1, %p1283_p0 }
  0x13   : > { %p1281_p13 = pneg %p1280_p12 }
  0x14   : > { %p1287_p4 = por %p1286_p3, %p1285_p2 }
  0x16   : > { %p1288_p5 = pnand %p1287_p4, %p1281_p13 }
  0x18   : > { %1291 = shalt.err (!%p1288_p5)
}
  0x19   : > { %s1292_s11 = scalar_lea.vmem %s1413_s29, 4096  ;;  %s1343_s12 = smov [#allocation2]  }
  0x1a   : > { %p1293_p6 = scmp.ne.s32.totalorder %s1413_s29, %s1292_s11  ;;  %s1297_s18 = sshll.u32 %s1343_s12, 4  ;;  %s1298_s18 = int_to_ptr.vmem [resolvable:$false] %s1297_s18 }
  0x1b   : > { %s1299_s19 = scalar_lea.vmem %s1298_s18, 8192  ;;  %p1300_p9 = scmp.lt.s32.totalorder %s1413_s29, %s1298_s18 }
  0x1c   : > { %p1295_p10 = pnand %p1293_p6, %p1279_p11  ;;  %p1301_p0 = scmp.lt.s32.totalorder %s1299_s19, %s1292_s11 }
  0x1e   : > { %p1296_p12 = pneg %p1295_p10  ;;  %p1302_p1 = por %p1301_p0, %p1300_p9 }
  0x20   : > { %p1303_p2 = pnand %p1302_p1, %p1296_p12 }
  0x22   : > { %1306 = shalt.err (!%p1303_p2)
}
  0x23   : > { %s1344_s22 = smov 64   ;;  %s1345_s23 = smov 4  }
  0x24   : > { %1207 = dma.hbm_to_vmem [thread:$0]  (!%p1415_p8), %s1411_s27, 4096, %s1413_s29, %s1420_s4, %s1344_s22, %s1344_s22, %s1345_s23  }
  0x25   : > { %p153_p11 = scmp.lt.s32.totalorder %s1341_s15, 97  ;;  %p1748_p13 = scmp.ge.s32.totalorder %s1341_s15, 1 }
  0x27   : > { %p154_p3 = pnand %p1748_p13, %p153_p11 }
  0x28   : > { %s159_s24 = sand.u32 (!%p154_p3), 1, %s1333_s13  }
  0x29   : > { %157 = sbr.rel (%p154_p3) target bundleno = 334 (0x14e), region = 32  ;;  %s1029_s25 = sshll.u32 (!%p154_p3), %s159_s24, 8 }
  0x2a   : > { %s160_s26 = scalar_lea.sflag (!%p154_p3), [#allocation3], %s159_s24  ;;  %s1452_s28 = scalar_lea.vmem (!%p154_p3), [#allocation2], %s1029_s25 }
  0x30   : > { %1324 = dma.done.wait (%p1402_p7), %s160_s26, 4096  }
  0x31   : > { %1326 = vsyncadd (%p1402_p7), %s160_s26, 4294963200  ;;  %vm529_vm0 = vcmask 1043456   ;;  %vm530_vm1 = vcmask 1044480   ;;  %v1346_v0 = vmov 65535   ;;  %vm432_vm2 = vcmask 72704   ;;  %v1245_v4 = vld [vmem:[%s1452_s28] sm:$0xff]  }
  0x32   : > { %v531_v1 = vsel %vm529_vm0, 4294967295, %v1346_v0  ;;  %v1244_v3 = vld [vmem:[%s1743_s1] sm:$0x1f]   ;;  %1136 = vmatprep.mubr.msk.bf16.mxu0 %vm432_vm2, %v1245_v4  ;;  %v1247_v7 = vld [vmem:[%s1452_s28 + $0x8] sm:$0xff]   ;;  %v1249_v9 = vld [vmem:[%s1452_s28 + $0x10] sm:$0xff]   ;;  %s1030_s21 = sshll.u32 %s1021_s16, 6 }
  0x33   : > { %v532_v2 = vsel %vm530_vm1, %v531_v1, 0  ;;  %v1246_v6 = vld [vmem:[%s1452_s28 + $0x80] sm:$0xff]   ;;  %v1248_v8 = vld [vmem:[%s1452_s28 + $0x88] sm:$0xff]   ;;  %v1250_v10 = vld [vmem:[%s1452_s28 + $0x90] sm:$0xff]   ;;  %p188_p7 = scmp.lt.s32.totalorder %s1030_s21, 6143  ;;  %vm889_vm3 = vcmask 261120  }
  0x34   : > { %v534_v5 = vand.u32 %v1244_v3, %v532_v2  ;;  %1168 = vmatprep.mubr.msk.bf16.mxu1 %vm432_vm2, %v1246_v6  ;;  %v1251_v11 = vld [vmem:[%s1452_s28 + $0x18] sm:$0xff]   ;;  %v1253_v13 = vld [vmem:[%s1452_s28 + $0x20] sm:$0xff]   ;;  %v1255_v15 = vld [vmem:[%s1452_s28 + $0x28] sm:$0xff]  }
  0x35   : > { %v1252_v12 = vld [vmem:[%s1452_s28 + $0x98] sm:$0xff]   ;;  %v1254_v14 = vld [vmem:[%s1452_s28 + $0xa0] sm:$0xff]   ;;  %v1256_v16 = vld [vmem:[%s1452_s28 + $0xa8] sm:$0xff]   ;;  %s1754_s21 = smov (!%p188_p7, %s1030_s21), 6143 }
  0x36   : > { %1134 = vmatprep.subr.bf16.mxu0 %v534_v5  ;;  %1200 = vmatprep.subr.bf16.mxu1 %v534_v5  ;;  %v1257_v17 = vld [vmem:[%s1452_s28 + $0x30] sm:$0xff]   ;;  %v1259_v19 = vld [vmem:[%s1452_s28 + $0x38] sm:$0xff]   ;;  %v1261_v21 = vld [vmem:[%s1452_s28 + $0x40] sm:$0xff]   ;;  %s1031_s5 = sshll.u32 %s1754_s21, 3 }
  0x37   : > { %1135 = vmatpush3.bf16.msra.mxu0 %v534_v5  ;;  %1201 = vmatpush3.bf16.msra.mxu1 %v534_v5  ;;  %v1258_v18 = vld [vmem:[%s1452_s28 + $0xb0] sm:$0xff]   ;;  %v1260_v20 = vld [vmem:[%s1452_s28 + $0xb8] sm:$0xff]   ;;  %v1262_v22 = vld [vmem:[%s1452_s28 + $0xc0] sm:$0xff]   ;;  %s1537_s15 = scalar_lea.vmem %s1745_s3, %s1031_s5 }
  0x38   : > { %v1263_v23 = vld [vmem:[%s1452_s28 + $0x48] sm:$0xff]   ;;  %v1265_v25 = vld [vmem:[%s1452_s28 + $0x50] sm:$0xff]   ;;  %v1267_v27 = vld [vmem:[%s1452_s28 + $0x58] sm:$0xff]  }
  0x39   : > { %v1264_v24 = vld [vmem:[%s1452_s28 + $0xc8] sm:$0xff]   ;;  %v1266_v26 = vld [vmem:[%s1452_s28 + $0xd0] sm:$0xff]   ;;  %v1268_v28 = vld [vmem:[%s1452_s28 + $0xd8] sm:$0xff]  }
  0x3a   : > { %1137 = vmatmul.mubr.msk.bf16.vlgmr.msra.gmra.mrb[0].mxu0 %vm432_vm2, %v1247_v7  ;;  %1169 = vmatmul.mubr.msk.bf16.vlgmr.msra.gmra.mrb[0].mxu1 %vm432_vm2, %v1248_v8  ;;  %v1269_v29 = vld [vmem:[%s1452_s28 + $0x60] sm:$0xff]   ;;  %v1271_v31 = vld [vmem:[%s1452_s28 + $0x68] sm:$0xff]   ;;  %v1273_v33 = vld [vmem:[%s1452_s28 + $0x70] sm:$0xff]  }
  0x3b   : > { %1140 = vmatprep.mubr.msk.bf16.mxu0 %vm432_vm2, %v1249_v9  ;;  %1172 = vmatprep.mubr.msk.bf16.mxu1 %vm432_vm2, %v1250_v10  ;;  %v1270_v30 = vld [vmem:[%s1452_s28 + $0xe0] sm:$0xff]   ;;  %v1272_v32 = vld [vmem:[%s1452_s28 + $0xe8] sm:$0xff]   ;;  %v1274_v34 = vld [vmem:[%s1452_s28 + $0xf0] sm:$0xff]  }
  0x3c   : > { %v1275_v35 = vld [vmem:[%s1452_s28 + $0x78] sm:$0xff]   ;;  %v1530_v37 = vld [vmem:[%s1744_s2] ss:$0 sm:$0xff] }
  0x3d   : > { %v1276_v36 = vld [vmem:[%s1452_s28 + $0xf8] sm:$0xff]  }
  0x42   : > { %1141 = vmatmul.mubr.msk.bf16.gmra.mrb[4].mxu0 %vm432_vm2, %v1251_v11  ;;  %1173 = vmatmul.mubr.msk.bf16.gmra.mrb[4].mxu1 %vm432_vm2, %v1252_v12 }
  0x43   : > { %1144 = vmatprep.mubr.msk.bf16.mxu0 %vm432_vm2, %v1253_v13  ;;  %1176 = vmatprep.mubr.msk.bf16.mxu1 %vm432_vm2, %v1254_v14 }
  0x4a   : > { %1145 = vmatmul.mubr.msk.bf16.gmra.mrb[8].mxu0 %vm432_vm2, %v1255_v15  ;;  %1177 = vmatmul.mubr.msk.bf16.gmra.mrb[8].mxu1 %vm432_vm2, %v1256_v16 }
  0x4b   : > { %1148 = vmatprep.mubr.msk.bf16.mxu0 %vm432_vm2, %v1257_v17  ;;  %1180 = vmatprep.mubr.msk.bf16.mxu1 %vm432_vm2, %v1258_v18 }
  0x52   : > { %1149 = vmatmul.mubr.msk.bf16.gmra.mrb[12].mxu0 %vm432_vm2, %v1259_v19  ;;  %1181 = vmatmul.mubr.msk.bf16.gmra.mrb[12].mxu1 %vm432_vm2, %v1260_v20 }
  0x53   : > { %1152 = vmatprep.mubr.msk.bf16.mxu0 %vm432_vm2, %v1261_v21  ;;  %1184 = vmatprep.mubr.msk.bf16.mxu1 %vm432_vm2, %v1262_v22 }
  0x5a   : > { %1153 = vmatmul.mubr.msk.bf16.gmra.mrb[16].mxu0 %vm432_vm2, %v1263_v23  ;;  %1185 = vmatmul.mubr.msk.bf16.gmra.mrb[16].mxu1 %vm432_vm2, %v1264_v24 }
  0x5b   : > { %1156 = vmatprep.mubr.msk.bf16.mxu0 %vm432_vm2, %v1265_v25  ;;  %1188 = vmatprep.mubr.msk.bf16.mxu1 %vm432_vm2, %v1266_v26 }
  0x62   : > { %1157 = vmatmul.mubr.msk.bf16.gmra.mrb[20].mxu0 %vm432_vm2, %v1267_v27  ;;  %1189 = vmatmul.mubr.msk.bf16.gmra.mrb[20].mxu1 %vm432_vm2, %v1268_v28 }
  0x63   : > { %1160 = vmatprep.mubr.msk.bf16.mxu0 %vm432_vm2, %v1269_v29  ;;  %1192 = vmatprep.mubr.msk.bf16.mxu1 %vm432_vm2, %v1270_v30 }
  0x6a   : > { %1161 = vmatmul.mubr.msk.bf16.gmra.mrb[24].mxu0 %vm432_vm2, %v1271_v31  ;;  %1193 = vmatmul.mubr.msk.bf16.gmra.mrb[24].mxu1 %vm432_vm2, %v1272_v32 }
  0x6b   : > { %1164 = vmatprep.mubr.msk.bf16.mxu0 %vm432_vm2, %v1273_v33  ;;  %1196 = vmatprep.mubr.msk.bf16.mxu1 %vm432_vm2, %v1274_v34 }
  0x72   : > { %1165 = vmatmul.mubr.msk.bf16.gmra.mrb[28].mxu0 %vm432_vm2, %v1275_v35  ;;  %1197 = vmatmul.mubr.msk.bf16.gmra.mrb[28].mxu1 %vm432_vm2, %v1276_v36 }
 0x10d   : > { %v1138_v38 = vpop.f32.mrb[0].mxu0  ;;  %v1170_v39 = vpop.f32.mrb[0].mxu1 }
 0x10e   : > { %v579_v40 = vadd.f32 %v1138_v38, %v1530_v37  ;;  %v707_v41 = vadd.f32 %v1170_v39, %v1530_v37  ;;  %v570_v42 = vpop.f32.mrb[1].mxu0  ;;  %v698_v43 = vpop.f32.mrb[1].mxu1 }
 0x10f   : > { %v571_v44 = vadd.f32 %v1530_v37, %v570_v42  ;;  %v699_v45 = vadd.f32 %v1530_v37, %v698_v43  ;;  %v1139_v46 = vpop.f32.mrb[2].mxu0  ;;  %v1171_v47 = vpop.f32.mrb[2].mxu1 }
 0x110   : > { %v827_v48 = vmax.f32 %v579_v40, 0.0  ;;  %v859_v49 = vmax.f32 %v707_v41, 0.0  ;;  %v582_v50 = vadd.f32 %v1139_v46, %v1530_v37  ;;  %v710_v51 = vadd.f32 %v1171_v47, %v1530_v37  ;;  %v573_v52 = vpop.f32.mrb[3].mxu0  ;;  %v701_v53 = vpop.f32.mrb[3].mxu1 }
 0x111   : > { %v825_v54 = vmax.f32 %v571_v44, 0.0  ;;  %v857_v55 = vmax.f32 %v699_v45, 0.0  ;;  %v574_v56 = vadd.f32 %v1530_v37, %v573_v52  ;;  %v702_v57 = vadd.f32 %v1530_v37, %v701_v53 }
 0x112   : > { %892 = vst.msk [vmem:[%s1537_s15 + $0x10] sm:$0xff] %vm889_vm3, %v827_v48  ;;  %924 = vst.msk [vmem:[%s1537_s15 + $0x110] sm:$0xff] %vm889_vm3, %v859_v49  ;;  %v828_v58 = vmax.f32 %v582_v50, 0.0  ;;  %v860_v59 = vmax.f32 %v710_v51, 0.0 }
 0x113   : > { %890 = vst.msk [vmem:[%s1537_s15] sm:$0xff] %vm889_vm3, %v825_v54  ;;  %922 = vst.msk [vmem:[%s1537_s15 + $0x100] sm:$0xff] %vm889_vm3, %v857_v55  ;;  %v826_v60 = vmax.f32 %v574_v56, 0.0  ;;  %v858_v61 = vmax.f32 %v702_v57, 0.0 }
 0x114   : > { %893 = vst.msk [vmem:[%s1537_s15 + $0x18] sm:$0xff] %vm889_vm3, %v828_v58  ;;  %925 = vst.msk [vmem:[%s1537_s15 + $0x118] sm:$0xff] %vm889_vm3, %v860_v59 }
 0x115   : > { %891 = vst.msk [vmem:[%s1537_s15 + $0x8] sm:$0xff] %vm889_vm3, %v826_v60  ;;  %923 = vst.msk [vmem:[%s1537_s15 + $0x108] sm:$0xff] %vm889_vm3, %v858_v61  ;;  %v1142_v62 = vpop.f32.mrb[4].mxu0  ;;  %v1174_v63 = vpop.f32.mrb[4].mxu1 }
 0x116   : > { %v595_v0 = vadd.f32 %v1142_v62, %v1530_v37  ;;  %v723_v1 = vadd.f32 %v1174_v63, %v1530_v37  ;;  %v586_v2 = vpop.f32.mrb[5].mxu0  ;;  %v714_v3 = vpop.f32.mrb[5].mxu1 }
 0x117   : > { %v587_v4 = vadd.f32 %v1530_v37, %v586_v2  ;;  %v715_v5 = vadd.f32 %v1530_v37, %v714_v3  ;;  %v1143_v6 = vpop.f32.mrb[6].mxu0  ;;  %v1175_v7 = vpop.f32.mrb[6].mxu1 }
 0x118   : > { %v831_v8 = vmax.f32 %v595_v0, 0.0  ;;  %v863_v9 = vmax.f32 %v723_v1, 0.0  ;;  %v598_v10 = vadd.f32 %v1143_v6, %v1530_v37  ;;  %v726_v11 = vadd.f32 %v1175_v7, %v1530_v37  ;;  %v589_v12 = vpop.f32.mrb[7].mxu0  ;;  %v717_v13 = vpop.f32.mrb[7].mxu1 }
 0x119   : > { %v829_v14 = vmax.f32 %v587_v4, 0.0  ;;  %v861_v15 = vmax.f32 %v715_v5, 0.0  ;;  %v590_v16 = vadd.f32 %v1530_v37, %v589_v12  ;;  %v718_v17 = vadd.f32 %v1530_v37, %v717_v13 }
 0x11a   : > { %896 = vst.msk [vmem:[%s1537_s15 + $0x30] sm:$0xff] %vm889_vm3, %v831_v8  ;;  %928 = vst.msk [vmem:[%s1537_s15 + $0x130] sm:$0xff] %vm889_vm3, %v863_v9  ;;  %v832_v18 = vmax.f32 %v598_v10, 0.0  ;;  %v864_v19 = vmax.f32 %v726_v11, 0.0 }
 0x11b   : > { %894 = vst.msk [vmem:[%s1537_s15 + $0x20] sm:$0xff] %vm889_vm3, %v829_v14  ;;  %926 = vst.msk [vmem:[%s1537_s15 + $0x120] sm:$0xff] %vm889_vm3, %v861_v15  ;;  %v830_v20 = vmax.f32 %v590_v16, 0.0  ;;  %v862_v21 = vmax.f32 %v718_v17, 0.0 }
 0x11c   : > { %897 = vst.msk [vmem:[%s1537_s15 + $0x38] sm:$0xff] %vm889_vm3, %v832_v18  ;;  %929 = vst.msk [vmem:[%s1537_s15 + $0x138] sm:$0xff] %vm889_vm3, %v864_v19 }
 0x11d   : > { %895 = vst.msk [vmem:[%s1537_s15 + $0x28] sm:$0xff] %vm889_vm3, %v830_v20  ;;  %927 = vst.msk [vmem:[%s1537_s15 + $0x128] sm:$0xff] %vm889_vm3, %v862_v21  ;;  %v1146_v22 = vpop.f32.mrb[8].mxu0  ;;  %v1178_v23 = vpop.f32.mrb[8].mxu1 }
 0x11e   : > { %v611_v24 = vadd.f32 %v1146_v22, %v1530_v37  ;;  %v739_v25 = vadd.f32 %v1178_v23, %v1530_v37  ;;  %v602_v26 = vpop.f32.mrb[9].mxu0  ;;  %v730_v27 = vpop.f32.mrb[9].mxu1 }
 0x11f   : > { %v603_v28 = vadd.f32 %v1530_v37, %v602_v26  ;;  %v731_v29 = vadd.f32 %v1530_v37, %v730_v27  ;;  %v1147_v30 = vpop.f32.mrb[10].mxu0  ;;  %v1179_v31 = vpop.f32.mrb[10].mxu1 }
 0x120   : > { %v835_v32 = vmax.f32 %v611_v24, 0.0  ;;  %v867_v33 = vmax.f32 %v739_v25, 0.0  ;;  %v614_v34 = vadd.f32 %v1147_v30, %v1530_v37  ;;  %v742_v35 = vadd.f32 %v1179_v31, %v1530_v37  ;;  %v605_v36 = vpop.f32.mrb[11].mxu0  ;;  %v733_v38 = vpop.f32.mrb[11].mxu1 }
 0x121   : > { %v833_v39 = vmax.f32 %v603_v28, 0.0  ;;  %v865_v40 = vmax.f32 %v731_v29, 0.0  ;;  %v606_v41 = vadd.f32 %v1530_v37, %v605_v36  ;;  %v734_v42 = vadd.f32 %v1530_v37, %v733_v38 }
 0x122   : > { %900 = vst.msk [vmem:[%s1537_s15 + $0x50] sm:$0xff] %vm889_vm3, %v835_v32  ;;  %932 = vst.msk [vmem:[%s1537_s15 + $0x150] sm:$0xff] %vm889_vm3, %v867_v33  ;;  %v836_v43 = vmax.f32 %v614_v34, 0.0  ;;  %v868_v44 = vmax.f32 %v742_v35, 0.0 }
 0x123   : > { %898 = vst.msk [vmem:[%s1537_s15 + $0x40] sm:$0xff] %vm889_vm3, %v833_v39  ;;  %930 = vst.msk [vmem:[%s1537_s15 + $0x140] sm:$0xff] %vm889_vm3, %v865_v40  ;;  %v834_v45 = vmax.f32 %v606_v41, 0.0  ;;  %v866_v46 = vmax.f32 %v734_v42, 0.0 }
 0x124   : > { %901 = vst.msk [vmem:[%s1537_s15 + $0x58] sm:$0xff] %vm889_vm3, %v836_v43  ;;  %933 = vst.msk [vmem:[%s1537_s15 + $0x158] sm:$0xff] %vm889_vm3, %v868_v44 }
 0x125   : > { %899 = vst.msk [vmem:[%s1537_s15 + $0x48] sm:$0xff] %vm889_vm3, %v834_v45  ;;  %931 = vst.msk [vmem:[%s1537_s15 + $0x148] sm:$0xff] %vm889_vm3, %v866_v46  ;;  %v1150_v47 = vpop.f32.mrb[12].mxu0  ;;  %v1182_v48 = vpop.f32.mrb[12].mxu1 }
 0x126   : > { %v627_v49 = vadd.f32 %v1150_v47, %v1530_v37  ;;  %v755_v50 = vadd.f32 %v1182_v48, %v1530_v37  ;;  %v618_v51 = vpop.f32.mrb[13].mxu0  ;;  %v746_v52 = vpop.f32.mrb[13].mxu1 }
 0x127   : > { %v619_v53 = vadd.f32 %v1530_v37, %v618_v51  ;;  %v747_v54 = vadd.f32 %v1530_v37, %v746_v52  ;;  %v1151_v55 = vpop.f32.mrb[14].mxu0  ;;  %v1183_v56 = vpop.f32.mrb[14].mxu1 }
 0x128   : > { %v839_v57 = vmax.f32 %v627_v49, 0.0  ;;  %v871_v58 = vmax.f32 %v755_v50, 0.0  ;;  %v630_v59 = vadd.f32 %v1151_v55, %v1530_v37  ;;  %v758_v60 = vadd.f32 %v1183_v56, %v1530_v37  ;;  %v621_v61 = vpop.f32.mrb[15].mxu0  ;;  %v749_v62 = vpop.f32.mrb[15].mxu1 }
 0x129   : > { %v837_v63 = vmax.f32 %v619_v53, 0.0  ;;  %v869_v0 = vmax.f32 %v747_v54, 0.0  ;;  %v622_v1 = vadd.f32 %v1530_v37, %v621_v61  ;;  %v750_v2 = vadd.f32 %v1530_v37, %v749_v62 }
 0x12a   : > { %904 = vst.msk [vmem:[%s1537_s15 + $0x70] sm:$0xff] %vm889_vm3, %v839_v57  ;;  %936 = vst.msk [vmem:[%s1537_s15 + $0x170] sm:$0xff] %vm889_vm3, %v871_v58  ;;  %v840_v3 = vmax.f32 %v630_v59, 0.0  ;;  %v872_v4 = vmax.f32 %v758_v60, 0.0 }
 0x12b   : > { %902 = vst.msk [vmem:[%s1537_s15 + $0x60] sm:$0xff] %vm889_vm3, %v837_v63  ;;  %934 = vst.msk [vmem:[%s1537_s15 + $0x160] sm:$0xff] %vm889_vm3, %v869_v0  ;;  %v838_v5 = vmax.f32 %v622_v1, 0.0  ;;  %v870_v6 = vmax.f32 %v750_v2, 0.0 }
 0x12c   : > { %905 = vst.msk [vmem:[%s1537_s15 + $0x78] sm:$0xff] %vm889_vm3, %v840_v3  ;;  %937 = vst.msk [vmem:[%s1537_s15 + $0x178] sm:$0xff] %vm889_vm3, %v872_v4 }
 0x12d   : > { %903 = vst.msk [vmem:[%s1537_s15 + $0x68] sm:$0xff] %vm889_vm3, %v838_v5  ;;  %935 = vst.msk [vmem:[%s1537_s15 + $0x168] sm:$0xff] %vm889_vm3, %v870_v6  ;;  %v1154_v7 = vpop.f32.mrb[16].mxu0  ;;  %v1186_v8 = vpop.f32.mrb[16].mxu1 }
 0x12e   : > { %v643_v9 = vadd.f32 %v1154_v7, %v1530_v37  ;;  %v771_v10 = vadd.f32 %v1186_v8, %v1530_v37  ;;  %v634_v11 = vpop.f32.mrb[17].mxu0  ;;  %v762_v12 = vpop.f32.mrb[17].mxu1 }
 0x12f   : > { %v635_v13 = vadd.f32 %v1530_v37, %v634_v11  ;;  %v763_v14 = vadd.f32 %v1530_v37, %v762_v12  ;;  %v1155_v15 = vpop.f32.mrb[18].mxu0  ;;  %v1187_v16 = vpop.f32.mrb[18].mxu1 }
 0x130   : > { %v843_v17 = vmax.f32 %v643_v9, 0.0  ;;  %v875_v18 = vmax.f32 %v771_v10, 0.0  ;;  %v646_v19 = vadd.f32 %v1155_v15, %v1530_v37  ;;  %v774_v20 = vadd.f32 %v1187_v16, %v1530_v37  ;;  %v637_v21 = vpop.f32.mrb[19].mxu0  ;;  %v765_v22 = vpop.f32.mrb[19].mxu1 }
 0x131   : > { %v841_v23 = vmax.f32 %v635_v13, 0.0  ;;  %v873_v24 = vmax.f32 %v763_v14, 0.0  ;;  %v638_v25 = vadd.f32 %v1530_v37, %v637_v21  ;;  %v766_v26 = vadd.f32 %v1530_v37, %v765_v22 }
 0x132   : > { %908 = vst.msk [vmem:[%s1537_s15 + $0x90] sm:$0xff] %vm889_vm3, %v843_v17  ;;  %940 = vst.msk [vmem:[%s1537_s15 + $0x190] sm:$0xff] %vm889_vm3, %v875_v18  ;;  %v844_v27 = vmax.f32 %v646_v19, 0.0  ;;  %v876_v28 = vmax.f32 %v774_v20, 0.0 }
 0x133   : > { %906 = vst.msk [vmem:[%s1537_s15 + $0x80] sm:$0xff] %vm889_vm3, %v841_v23  ;;  %938 = vst.msk [vmem:[%s1537_s15 + $0x180] sm:$0xff] %vm889_vm3, %v873_v24  ;;  %v842_v29 = vmax.f32 %v638_v25, 0.0  ;;  %v874_v30 = vmax.f32 %v766_v26, 0.0 }
 0x134   : > { %909 = vst.msk [vmem:[%s1537_s15 + $0x98] sm:$0xff] %vm889_vm3, %v844_v27  ;;  %941 = vst.msk [vmem:[%s1537_s15 + $0x198] sm:$0xff] %vm889_vm3, %v876_v28 }
 0x135   : > { %907 = vst.msk [vmem:[%s1537_s15 + $0x88] sm:$0xff] %vm889_vm3, %v842_v29  ;;  %939 = vst.msk [vmem:[%s1537_s15 + $0x188] sm:$0xff] %vm889_vm3, %v874_v30  ;;  %v1158_v31 = vpop.f32.mrb[20].mxu0  ;;  %v1190_v32 = vpop.f32.mrb[20].mxu1 }
 0x136   : > { %v659_v33 = vadd.f32 %v1158_v31, %v1530_v37  ;;  %v787_v34 = vadd.f32 %v1190_v32, %v1530_v37  ;;  %v650_v35 = vpop.f32.mrb[21].mxu0  ;;  %v778_v36 = vpop.f32.mrb[21].mxu1 }
 0x137   : > { %v651_v38 = vadd.f32 %v1530_v37, %v650_v35  ;;  %v779_v39 = vadd.f32 %v1530_v37, %v778_v36  ;;  %v1159_v40 = vpop.f32.mrb[22].mxu0  ;;  %v1191_v41 = vpop.f32.mrb[22].mxu1 }
 0x138   : > { %v847_v42 = vmax.f32 %v659_v33, 0.0  ;;  %v879_v43 = vmax.f32 %v787_v34, 0.0  ;;  %v662_v44 = vadd.f32 %v1159_v40, %v1530_v37  ;;  %v790_v45 = vadd.f32 %v1191_v41, %v1530_v37  ;;  %v653_v46 = vpop.f32.mrb[23].mxu0  ;;  %v781_v47 = vpop.f32.mrb[23].mxu1 }
 0x139   : > { %v845_v48 = vmax.f32 %v651_v38, 0.0  ;;  %v877_v49 = vmax.f32 %v779_v39, 0.0  ;;  %v654_v50 = vadd.f32 %v1530_v37, %v653_v46  ;;  %v782_v51 = vadd.f32 %v1530_v37, %v781_v47 }
 0x13a   : > { %912 = vst.msk [vmem:[%s1537_s15 + $0xb0] sm:$0xff] %vm889_vm3, %v847_v42  ;;  %944 = vst.msk [vmem:[%s1537_s15 + $0x1b0] sm:$0xff] %vm889_vm3, %v879_v43  ;;  %v848_v52 = vmax.f32 %v662_v44, 0.0  ;;  %v880_v53 = vmax.f32 %v790_v45, 0.0 }
 0x13b   : > { %910 = vst.msk [vmem:[%s1537_s15 + $0xa0] sm:$0xff] %vm889_vm3, %v845_v48  ;;  %942 = vst.msk [vmem:[%s1537_s15 + $0x1a0] sm:$0xff] %vm889_vm3, %v877_v49  ;;  %v846_v54 = vmax.f32 %v654_v50, 0.0  ;;  %v878_v55 = vmax.f32 %v782_v51, 0.0 }
 0x13c   : > { %913 = vst.msk [vmem:[%s1537_s15 + $0xb8] sm:$0xff] %vm889_vm3, %v848_v52  ;;  %945 = vst.msk [vmem:[%s1537_s15 + $0x1b8] sm:$0xff] %vm889_vm3, %v880_v53 }
 0x13d   : > { %911 = vst.msk [vmem:[%s1537_s15 + $0xa8] sm:$0xff] %vm889_vm3, %v846_v54  ;;  %943 = vst.msk [vmem:[%s1537_s15 + $0x1a8] sm:$0xff] %vm889_vm3, %v878_v55  ;;  %v1162_v56 = vpop.f32.mrb[24].mxu0  ;;  %v1194_v57 = vpop.f32.mrb[24].mxu1 }
 0x13e   : > { %v675_v58 = vadd.f32 %v1162_v56, %v1530_v37  ;;  %v803_v59 = vadd.f32 %v1194_v57, %v1530_v37  ;;  %v666_v60 = vpop.f32.mrb[25].mxu0  ;;  %v794_v61 = vpop.f32.mrb[25].mxu1 }
 0x13f   : > { %v667_v62 = vadd.f32 %v1530_v37, %v666_v60  ;;  %v795_v63 = vadd.f32 %v1530_v37, %v794_v61  ;;  %v1163_v0 = vpop.f32.mrb[26].mxu0  ;;  %v1195_v1 = vpop.f32.mrb[26].mxu1 }
 0x140   : > { %v851_v2 = vmax.f32 %v675_v58, 0.0  ;;  %v883_v3 = vmax.f32 %v803_v59, 0.0  ;;  %v678_v4 = vadd.f32 %v1163_v0, %v1530_v37  ;;  %v806_v5 = vadd.f32 %v1195_v1, %v1530_v37  ;;  %v669_v6 = vpop.f32.mrb[27].mxu0  ;;  %v797_v7 = vpop.f32.mrb[27].mxu1 }
 0x141   : > { %v849_v8 = vmax.f32 %v667_v62, 0.0  ;;  %v881_v9 = vmax.f32 %v795_v63, 0.0  ;;  %v670_v10 = vadd.f32 %v1530_v37, %v669_v6  ;;  %v798_v11 = vadd.f32 %v1530_v37, %v797_v7 }
 0x142   : > { %916 = vst.msk [vmem:[%s1537_s15 + $0xd0] sm:$0xff] %vm889_vm3, %v851_v2  ;;  %948 = vst.msk [vmem:[%s1537_s15 + $0x1d0] sm:$0xff] %vm889_vm3, %v883_v3  ;;  %v852_v12 = vmax.f32 %v678_v4, 0.0  ;;  %v884_v13 = vmax.f32 %v806_v5, 0.0 }
 0x143   : > { %914 = vst.msk [vmem:[%s1537_s15 + $0xc0] sm:$0xff] %vm889_vm3, %v849_v8  ;;  %946 = vst.msk [vmem:[%s1537_s15 + $0x1c0] sm:$0xff] %vm889_vm3, %v881_v9  ;;  %v850_v14 = vmax.f32 %v670_v10, 0.0  ;;  %v882_v15 = vmax.f32 %v798_v11, 0.0 }
 0x144   : > { %917 = vst.msk [vmem:[%s1537_s15 + $0xd8] sm:$0xff] %vm889_vm3, %v852_v12  ;;  %949 = vst.msk [vmem:[%s1537_s15 + $0x1d8] sm:$0xff] %vm889_vm3, %v884_v13 }
 0x145   : > { %915 = vst.msk [vmem:[%s1537_s15 + $0xc8] sm:$0xff] %vm889_vm3, %v850_v14  ;;  %947 = vst.msk [vmem:[%s1537_s15 + $0x1c8] sm:$0xff] %vm889_vm3, %v882_v15  ;;  %v1166_v16 = vpop.f32.mrb[28].mxu0  ;;  %v1198_v17 = vpop.f32.mrb[28].mxu1 }
 0x146   : > { %v691_v18 = vadd.f32 %v1166_v16, %v1530_v37  ;;  %v819_v19 = vadd.f32 %v1198_v17, %v1530_v37  ;;  %v682_v20 = vpop.f32.mrb[29].mxu0  ;;  %v810_v21 = vpop.f32.mrb[29].mxu1 }
 0x147   : > { %v683_v22 = vadd.f32 %v1530_v37, %v682_v20  ;;  %v811_v23 = vadd.f32 %v1530_v37, %v810_v21  ;;  %v1167_v24 = vpop.f32.mrb[30].mxu0  ;;  %v1199_v25 = vpop.f32.mrb[30].mxu1 }
 0x148   : > { %v855_v26 = vmax.f32 %v691_v18, 0.0  ;;  %v887_v27 = vmax.f32 %v819_v19, 0.0  ;;  %v694_v28 = vadd.f32 %v1167_v24, %v1530_v37  ;;  %v822_v29 = vadd.f32 %v1199_v25, %v1530_v37  ;;  %v685_v30 = vpop.f32.mrb[31].mxu0  ;;  %v813_v31 = vpop.f32.mrb[31].mxu1 }
 0x149   : > { %v853_v32 = vmax.f32 %v683_v22, 0.0  ;;  %v885_v33 = vmax.f32 %v811_v23, 0.0  ;;  %v686_v34 = vadd.f32 %v1530_v37, %v685_v30  ;;  %v814_v35 = vadd.f32 %v1530_v37, %v813_v31 }
 0x14a   : > { %920 = vst.msk [vmem:[%s1537_s15 + $0xf0] sm:$0xff] %vm889_vm3, %v855_v26  ;;  %952 = vst.msk [vmem:[%s1537_s15 + $0x1f0] sm:$0xff] %vm889_vm3, %v887_v27  ;;  %v856_v36 = vmax.f32 %v694_v28, 0.0  ;;  %v888_v38 = vmax.f32 %v822_v29, 0.0 }
 0x14b   : > { %918 = vst.msk [vmem:[%s1537_s15 + $0xe0] sm:$0xff] %vm889_vm3, %v853_v32  ;;  %950 = vst.msk [vmem:[%s1537_s15 + $0x1e0] sm:$0xff] %vm889_vm3, %v885_v33  ;;  %v854_v39 = vmax.f32 %v686_v34, 0.0  ;;  %v886_v40 = vmax.f32 %v814_v35, 0.0 }
 0x14c   : > { %921 = vst.msk [vmem:[%s1537_s15 + $0xf8] sm:$0xff] %vm889_vm3, %v856_v36  ;;  %953 = vst.msk [vmem:[%s1537_s15 + $0x1f8] sm:$0xff] %vm889_vm3, %v888_v38 }
 0x14d   : > { %919 = vst.msk [vmem:[%s1537_s15 + $0xe8] sm:$0xff] %vm889_vm3, %v854_v39  ;;  %951 = vst.msk [vmem:[%s1537_s15 + $0x1e8] sm:$0xff] %vm889_vm3, %v886_v40 }
 0x14e PF: > { %p13_p8 = scmp.ge.s32.totalorder %s1387_s17, 98   ;;  %s1749_s12 = smov %s1333_s13 }
 0x14f   : > { %s1750_s13 = smov %s1337_s14  ;;  %s1751_s14 = smov %s1397_s20 }
 0x150   : > { %s1752_s15 = smov %s1387_s17  ;;  %15 = sbr.rel (!%p13_p8) target bundleno = 3 (0x3), region = 72 }
 0x157   :  { %976 = vsyncpa [#allocation3], 1 }
 0x158   :  { %978 = vsyncpa [#allocation3 + $0x1], 1 }

// kernel: spect_cnn_forward.5
= control target key start
LH: loop header
LB: loop body
LE: loop exit
PB: predicated region body
PF: predicated region fallthrough
CT: control target
= control target key end

     0   :  { %s2273_s12 = smov 0   ;;  %s2835_s0 = inlined_call_operand.vmem [shape: bf16[12288,288], index: 0, kind: input, shape index: {}]   ;;  %s2836_s1 = inlined_call_operand.vmem [shape: bf16[288,32], index: 1, kind: input, shape index: {}]   ;;  %s2837_s2 = inlined_call_operand.vmem [shape: f32[1,32], index: 2, kind: input, shape index: {}]   ;;  %s2838_s3 = inlined_call_operand.vmem [shape: f32[12288,32], index: 3, kind: output, shape index: {}]  }
   0x1 LB: > { %s1796_s13 = sadd.s32 4294967295, %s2250_s12   ;;  %p1800_p0 = scmp.ge.s32.totalorder %s2250_s12, 1  ;;  %s2250_s12 = sphi %s2273_s12, %s13_s12  }
   0x2   : > { %p139_p1 = scmp.lt.s32.totalorder %s2250_s12, 25 }
   0x4   : > { %p140_p2 = pnand %p1800_p0, %p139_p1 }
   0x5   : > { %v2098_v0 = vld [vmem:[%s2836_s1] sm:$0xff] (!%p140_p2)   ;;  %v2252_v1 = vmov (!%p140_p2), 0   ;;  %s1801_s16 = sshll.u32 (!%p140_p2), %s1796_s13, 6  ;;  %v2099_v2 = vld [vmem:[%s2836_s1 + $0x8] sm:$0xff] (!%p140_p2)   ;;  %v2100_v3 = vld [vmem:[%s2836_s1 + $0x10] sm:$0xff] (!%p140_p2)   ;;  %vm937_vm0 = vcmask (!%p140_p2), 261120  }
   0x6   : > { %143 = sbr.rel (%p140_p2) target bundleno = 475 (0x1db), region = 32  ;;  %1034 = vmatprep.subr.bf16.mxu0 (!%p140_p2), %v2252_v1  ;;  %2056 = vmatprep.subr.bf16.mxu1 (!%p140_p2), %v2252_v1  ;;  %p165_p3 = scmp.lt.s32.totalorder (!%p140_p2), %s1801_s16, 1535  ;;  %v2101_v4 = vld [vmem:[%s2836_s1 + $0x18] sm:$0xff] (!%p140_p2)   ;;  %v2102_v5 = vld [vmem:[%s2836_s1 + $0x20] sm:$0xff] (!%p140_p2)   ;;  %v2103_v7 = vld [vmem:[%s2836_s1 + $0x28] sm:$0xff] (!%p140_p2)  }
   0x7   : > { %1035 = vmatpush1.bf16.msra.mxu0 (!%p140_p2), %v2098_v0  ;;  %2072 = vmatpush1.bf16.msra.mxu1 (!%p140_p2), %v2098_v0  ;;  %v2104_v9 = vld [vmem:[%s2836_s1 + $0x30] sm:$0xff] (!%p140_p2)   ;;  %v2105_v10 = vld [vmem:[%s2836_s1 + $0x38] sm:$0xff] (!%p140_p2)   ;;  %v2106_v11 = vld [vmem:[%s2836_s1 + $0x40] sm:$0xff] (!%p140_p2)  }
   0x8   : > { %1036 = vmatprep.subr.bf16.mxu0 (!%p140_p2), %v2252_v1  ;;  %2057 = vmatprep.subr.bf16.mxu1 (!%p140_p2), %v2252_v1  ;;  %v2107_v12 = vld [vmem:[%s2836_s1 + $0x48] sm:$0xff] (!%p140_p2)   ;;  %v2108_v13 = vld [vmem:[%s2836_s1 + $0x50] sm:$0xff] (!%p140_p2)   ;;  %v2109_v14 = vld [vmem:[%s2836_s1 + $0x58] sm:$0xff] (!%p140_p2)  }
   0x9   : > { %v2110_v15 = vld [vmem:[%s2836_s1 + $0x60] sm:$0xff] (!%p140_p2)   ;;  %v2111_v16 = vld [vmem:[%s2836_s1 + $0x68] sm:$0xff] (!%p140_p2)   ;;  %v2112_v17 = vld [vmem:[%s2836_s1 + $0x70] sm:$0xff] (!%p140_p2)  }
   0xa   : > { %v2113_v18 = vld [vmem:[%s2836_s1 + $0x78] sm:$0xff] (!%p140_p2)   ;;  %v2120_v19 = vld [vmem:[%s2836_s1 + $0x80] sm:$0xff] (!%p140_p2)   ;;  %v2145_v24 = vld [vmem:[%s2836_s1 + $0x88] sm:$0xff] (!%p140_p2)  }
   0xb   : > { %1037 = vmatpush1.bf16.msra.mxu0 (!%p140_p2), %v2099_v2  ;;  %2073 = vmatpush1.bf16.msra.mxu1 (!%p140_p2), %v2099_v2 }
   0xc   : > { %1038 = vmatprep.subr.bf16.mxu0 (!%p140_p2), %v2252_v1  ;;  %2058 = vmatprep.subr.bf16.mxu1 (!%p140_p2), %v2252_v1 }
   0xd   : > { %s2840_s16 = smov (!%p165_p3, %s1801_s16), 1535 }
   0xe   : > { %s2088_s23 = smul.u32 12, %s2840_s16  ;;  %s1804_s5 = sshll.u32 %s2840_s16, 3 }
   0xf   : > { %1039 = vmatpush1.bf16.msra.mxu0 %v2100_v3  ;;  %2074 = vmatpush1.bf16.msra.mxu1 %v2100_v3  ;;  %s2580_s8 = scalar_lea.vmem %s2838_s3, %s1804_s5 }
  0x10   : > { %1040 = vmatprep.subr.bf16.mxu0 %v2252_v1  ;;  %2059 = vmatprep.subr.bf16.mxu1 %v2252_v1  ;;  %s2310_s28 = scalar_lea.vmem %s2835_s0, %s2088_s23 }
  0x11   : > { %v2116_v6 = vld [vmem:[%s2310_s28 + $0x4] ss:$12 sps:$4 sm:$0xff]   ;;  %v2114_v20 = vld [vmem:[%s2310_s28] ss:$12 sps:$4 sm:$0xff]   ;;  %v2121_v22 = vld [vmem:[%s2310_s28 + $0x1c] ss:$12 sps:$4 sm:$0xff]  }
  0x12   : > { %v2119_v8 = vld [vmem:[%s2310_s28 + $0x244] ss:$12 sps:$4 sm:$0xff]   ;;  %1066 = vmatprep.mubr.bf16.mxu0 %v2116_v6  ;;  %v2117_v21 = vld [vmem:[%s2310_s28 + $0x240] ss:$12 sps:$4 sm:$0xff]   ;;  %v2123_v23 = vld [vmem:[%s2310_s28 + $0x25c] ss:$12 sps:$4 sm:$0xff]  }
  0x13   : > { %1041 = vmatpush1.bf16.msra.mxu0 %v2101_v4  ;;  %2075 = vmatpush1.bf16.msra.mxu1 %v2101_v4  ;;  %v2125_v25 = vld [vmem:[%s2310_s28 + $0x18] ss:$12 sps:$4 sm:$0xff]   ;;  %v2127_v27 = vld [vmem:[%s2310_s28 + $0x34] ss:$12 sps:$4 sm:$0xff]   ;;  %v2131_v29 = vld [vmem:[%s2310_s28 + $0x30] ss:$12 sps:$4 sm:$0xff]  }
  0x14   : > { %1042 = vmatprep.subr.bf16.mxu0 %v2252_v1  ;;  %2060 = vmatprep.subr.bf16.mxu1 %v2252_v1  ;;  %v2126_v26 = vld [vmem:[%s2310_s28 + $0x258] ss:$12 sps:$4 sm:$0xff]   ;;  %v2129_v28 = vld [vmem:[%s2310_s28 + $0x274] ss:$12 sps:$4 sm:$0xff]   ;;  %v2132_v30 = vld [vmem:[%s2310_s28 + $0x270] ss:$12 sps:$4 sm:$0xff]  }
  0x15   : > { %1258 = vmatprep.mubr.bf16.mxu1 %v2119_v8  ;;  %v2133_v31 = vld [vmem:[%s2310_s28 + $0x4c] ss:$12 sps:$4 sm:$0xff]   ;;  %v2137_v33 = vld [vmem:[%s2310_s28 + $0x48] ss:$12 sps:$4 sm:$0xff]   ;;  %v2139_v35 = vld [vmem:[%s2310_s28 + $0x64] ss:$12 sps:$4 sm:$0xff]  }
  0x16   : > { %v2135_v32 = vld [vmem:[%s2310_s28 + $0x28c] ss:$12 sps:$4 sm:$0xff]   ;;  %v2138_v34 = vld [vmem:[%s2310_s28 + $0x288] ss:$12 sps:$4 sm:$0xff]   ;;  %v2141_v36 = vld [vmem:[%s2310_s28 + $0x2a4] ss:$12 sps:$4 sm:$0xff]  }
  0x17   : > { %1043 = vmatpush1.bf16.msra.mxu0 %v2102_v5  ;;  %2076 = vmatpush1.bf16.msra.mxu1 %v2102_v5  ;;  %v2143_v37 = vld [vmem:[%s2310_s28 + $0x60] ss:$12 sps:$4 sm:$0xff]   ;;  %v2146_v39 = vld [vmem:[%s2310_s28 + $0x7c] ss:$12 sps:$4 sm:$0xff]   ;;  %v2150_v41 = vld [vmem:[%s2310_s28 + $0x78] ss:$12 sps:$4 sm:$0xff]  }
  0x18   : > { %1044 = vmatprep.subr.bf16.mxu0 %v2252_v1  ;;  %2061 = vmatprep.subr.bf16.mxu1 %v2252_v1  ;;  %v2144_v38 = vld [vmem:[%s2310_s28 + $0x2a0] ss:$12 sps:$4 sm:$0xff]   ;;  %v2148_v40 = vld [vmem:[%s2310_s28 + $0x2bc] ss:$12 sps:$4 sm:$0xff]   ;;  %v2151_v42 = vld [vmem:[%s2310_s28 + $0x2b8] ss:$12 sps:$4 sm:$0xff]  }
  0x19   : > { %v2152_v43 = vld [vmem:[%s2310_s28 + $0x94] ss:$12 sps:$4 sm:$0xff]   ;;  %v2156_v45 = vld [vmem:[%s2310_s28 + $0x90] ss:$12 sps:$4 sm:$0xff]   ;;  %v2158_v47 = vld [vmem:[%s2310_s28 + $0xac] ss:$12 sps:$4 sm:$0xff]  }
  0x1a   : > { %v2154_v44 = vld [vmem:[%s2310_s28 + $0x2d4] ss:$12 sps:$4 sm:$0xff]   ;;  %v2157_v46 = vld [vmem:[%s2310_s28 + $0x2d0] ss:$12 sps:$4 sm:$0xff]   ;;  %v2160_v48 = vld [vmem:[%s2310_s28 + $0x2ec] ss:$12 sps:$4 sm:$0xff]  }
  0x1b   : > { %1045 = vmatpush1.bf16.msra.mxu0 %v2103_v7  ;;  %2077 = vmatpush1.bf16.msra.mxu1 %v2103_v7  ;;  %v2162_v49 = vld [vmem:[%s2310_s28 + $0xa8] ss:$12 sps:$4 sm:$0xff]   ;;  %v2164_v51 = vld [vmem:[%s2310_s28 + $0xc4] ss:$12 sps:$4 sm:$0xff]   ;;  %v2167_v53 = vld [vmem:[%s2310_s28 + $0xc0] ss:$12 sps:$4 sm:$0xff]  }
  0x1c   : > { %1046 = vmatprep.subr.bf16.mxu0 %v2252_v1  ;;  %2062 = vmatprep.subr.bf16.mxu1 %v2252_v1  ;;  %v2163_v50 = vld [vmem:[%s2310_s28 + $0x2e8] ss:$12 sps:$4 sm:$0xff]   ;;  %v2168_v54 = vld [vmem:[%s2310_s28 + $0x20] ss:$12 sps:$4 sm:$0xff]   ;;  %v2171_v56 = vld [vmem:[%s2310_s28 + $0x38] ss:$12 sps:$4 sm:$0xff]  }
  0x1d   : > { %v2166_v52 = vld [vmem:[%s2310_s28 + $0x8] ss:$12 sps:$4 sm:$0xff]   ;;  %v2172_v57 = vld [vmem:[%s2310_s28 + $0xd8] ss:$12 sps:$4 sm:$0xff]   ;;  %v2173_v58 = vld [vmem:[%s2310_s28 + $0x50] ss:$12 sps:$4 sm:$0xff]  }
  0x1e   : > { %v2169_v55 = vld [vmem:[%s2310_s28 + $0xdc] ss:$12 sps:$4 sm:$0xff]   ;;  %v2174_v59 = vld [vmem:[%s2310_s28 + $0xf4] ss:$12 sps:$4 sm:$0xff]   ;;  %v2179_v63 = vld [vmem:[%s2310_s28 + $0x10c] ss:$12 sps:$4 sm:$0xff]  }
  0x1f   : > { %1047 = vmatpush1.bf16.msra.mxu0 %v2104_v9  ;;  %2078 = vmatpush1.bf16.msra.mxu1 %v2104_v9  ;;  %v2176_v60 = vld [vmem:[%s2310_s28 + $0x68] ss:$12 sps:$4 sm:$0xff]   ;;  %v2177_v61 = vld [vmem:[%s2310_s28 + $0xf0] ss:$12 sps:$4 sm:$0xff]   ;;  %v2178_v62 = vld [vmem:[%s2310_s28 + $0x80] ss:$12 sps:$4 sm:$0xff]  }
  0x20   : > { %1048 = vmatprep.subr.bf16.mxu0 %v2252_v1  ;;  %2063 = vmatprep.subr.bf16.mxu1 %v2252_v1  ;;  %v2181_v0 = vld [vmem:[%s2310_s28 + $0x98] ss:$12 sps:$4 sm:$0xff]   ;;  %v2183_v2 = vld [vmem:[%s2310_s28 + $0xb0] ss:$12 sps:$4 sm:$0xff]   ;;  %v2186_v4 = vld [vmem:[%s2310_s28 + $0xc8] ss:$12 sps:$4 sm:$0xff]  }
  0x21   : > { %v2184_v3 = vld [vmem:[%s2310_s28 + $0x124] ss:$12 sps:$4 sm:$0xff]   ;;  %v2187_v5 = vld [vmem:[%s2310_s28 + $0x120] ss:$12 sps:$4 sm:$0xff]   ;;  %v2189_v7 = vld [vmem:[%s2310_s28 + $0x13c] ss:$12 sps:$4 sm:$0xff]  }
  0x22   : > { %v2188_v6 = vld [vmem:[%s2310_s28 + $0xe0] ss:$12 sps:$4 sm:$0xff]   ;;  %v2191_v8 = vld [vmem:[%s2310_s28 + $0xf8] ss:$12 sps:$4 sm:$0xff]  }
  0x23   : > { %1049 = vmatpush1.bf16.msra.mxu0 %v2105_v10  ;;  %2079 = vmatpush1.bf16.msra.mxu1 %v2105_v10  ;;  %v2192_v9 = vld [vmem:[%s2310_s28 + $0x138] ss:$12 sps:$4 sm:$0xff]   ;;  %v2193_v10 = vld [vmem:[%s2310_s28 + $0x110] ss:$12 sps:$4 sm:$0xff]  }
  0x24   : > { %1050 = vmatprep.subr.bf16.mxu0 %v2252_v1  ;;  %2064 = vmatprep.subr.bf16.mxu1 %v2252_v1 }
  0x27   : > { %1051 = vmatpush1.bf16.msra.mxu0 %v2106_v11  ;;  %2080 = vmatpush1.bf16.msra.mxu1 %v2106_v11  ;;  %v2194_v11 = vld [vmem:[%s2310_s28 + $0x154] ss:$12 sps:$4 sm:$0xff]  }
  0x28   : > { %1052 = vmatprep.subr.bf16.mxu0 %v2252_v1  ;;  %2065 = vmatprep.subr.bf16.mxu1 %v2252_v1 }
  0x2b   : > { %1053 = vmatpush1.bf16.msra.mxu0 %v2107_v12  ;;  %2081 = vmatpush1.bf16.msra.mxu1 %v2107_v12  ;;  %v2196_v12 = vld [vmem:[%s2310_s28 + $0x128] ss:$12 sps:$4 sm:$0xff]  }
  0x2c   : > { %1054 = vmatprep.subr.bf16.mxu0 %v2252_v1  ;;  %2066 = vmatprep.subr.bf16.mxu1 %v2252_v1 }
  0x2f   : > { %1055 = vmatpush1.bf16.msra.mxu0 %v2108_v13  ;;  %2082 = vmatpush1.bf16.msra.mxu1 %v2108_v13  ;;  %v2197_v13 = vld [vmem:[%s2310_s28 + $0x150] ss:$12 sps:$4 sm:$0xff]  }
  0x30   : > { %1056 = vmatprep.subr.bf16.mxu0 %v2252_v1  ;;  %2067 = vmatprep.subr.bf16.mxu1 %v2252_v1 }
  0x33   : > { %1057 = vmatpush1.bf16.msra.mxu0 %v2109_v14  ;;  %2083 = vmatpush1.bf16.msra.mxu1 %v2109_v14  ;;  %v2198_v14 = vld [vmem:[%s2310_s28 + $0x140] ss:$12 sps:$4 sm:$0xff]  }
  0x34   : > { %1058 = vmatprep.subr.bf16.mxu0 %v2252_v1  ;;  %2068 = vmatprep.subr.bf16.mxu1 %v2252_v1 }
  0x37   : > { %1059 = vmatpush1.bf16.msra.mxu0 %v2110_v15  ;;  %2084 = vmatpush1.bf16.msra.mxu1 %v2110_v15  ;;  %v2199_v15 = vld [vmem:[%s2310_s28 + $0x16c] ss:$12 sps:$4 sm:$0xff]  }
  0x38   : > { %1060 = vmatprep.subr.bf16.mxu0 %v2252_v1  ;;  %2069 = vmatprep.subr.bf16.mxu1 %v2252_v1 }
  0x3b   : > { %1061 = vmatpush1.bf16.msra.mxu0 %v2111_v16  ;;  %2085 = vmatpush1.bf16.msra.mxu1 %v2111_v16  ;;  %v2201_v16 = vld [vmem:[%s2310_s28 + $0x158] ss:$12 sps:$4 sm:$0xff]  }
  0x3c   : > { %1062 = vmatprep.subr.bf16.mxu0 %v2252_v1  ;;  %2070 = vmatprep.subr.bf16.mxu1 %v2252_v1 }
  0x3f   : > { %1063 = vmatpush1.bf16.msra.mxu0 %v2112_v17  ;;  %2086 = vmatpush1.bf16.msra.mxu1 %v2112_v17  ;;  %v2202_v17 = vld [vmem:[%s2310_s28 + $0x168] ss:$12 sps:$4 sm:$0xff]  }
  0x40   : > { %1064 = vmatprep.subr.bf16.mxu0 %v2252_v1  ;;  %2071 = vmatprep.subr.bf16.mxu1 %v2252_v1  ;;  %v2182_v1 = vld [vmem:[%s2310_s28 + $0x108] ss:$12 sps:$4 sm:$0xff]  }
  0x43   : > { %1065 = vmatpush1.bf16.msra.mxu0 %v2113_v18  ;;  %2087 = vmatpush1.bf16.msra.mxu1 %v2113_v18  ;;  %v2203_v18 = vld [vmem:[%s2310_s28 + $0x170] ss:$12 sps:$4 sm:$0xff]  }
  0x44   : > { %1988 = vmatprep.subr.bf16.mxu1 %v2120_v19 }
  0x46   : > { %1067 = vmatmul.mubr.bf16.vlgmr.msra.gmra.mrb[0].mxu0 %v2114_v20  ;;  %1259 = vmatmul.mubr.bf16.vlgmr.msra.gmra.mrb[0].mxu1 %v2117_v21  ;;  %v2206_v20 = vld [vmem:[%s2310_s28 + $0x188] ss:$12 sps:$4 sm:$0xff]   ;;  %v2207_v21 = vld [vmem:[%s2310_s28 + $0x180] ss:$12 sps:$4 sm:$0xff]  }
  0x47   : > { %1989 = vmatpush3.bf16.msra.mxu1 %v2120_v19  ;;  %1074 = vmatprep.mubr.bf16.mxu0 %v2121_v22  ;;  %v2204_v19 = vld [vmem:[%s2310_s28 + $0x184] ss:$12 sps:$4 sm:$0xff]   ;;  %v2208_v22 = vld [vmem:[%s2310_s28 + $0x1a0] ss:$12 sps:$4 sm:$0xff]  }
  0x48   : > { %1266 = vmatprep.mubr.bf16.mxu1 %v2123_v23  ;;  %1990 = vmatprep.subr.bf16.mxu1 %v2145_v24  ;;  %v2209_v23 = vld [vmem:[%s2310_s28 + $0x19c] ss:$12 sps:$4 sm:$0xff]  }
  0x4b   : > { %1991 = vmatpush3.bf16.msra.mxu1 %v2145_v24  ;;  %v2211_v24 = vld [vmem:[%s2310_s28 + $0x1b8] ss:$12 sps:$4 sm:$0xff]  }
  0x4e   : > { %1075 = vmatmul.mubr.bf16.gmra.mrb[4].mxu0 %v2125_v25  ;;  %1267 = vmatmul.mubr.bf16.gmra.mrb[4].mxu1 %v2126_v26  ;;  %v2212_v25 = vld [vmem:[%s2310_s28 + $0x198] ss:$12 sps:$4 sm:$0xff]   ;;  %v2213_v26 = vld [vmem:[%s2310_s28 + $0x1d0] ss:$12 sps:$4 sm:$0xff]  }
  0x4f   : > { %1082 = vmatprep.mubr.bf16.mxu0 %v2127_v27  ;;  %1274 = vmatprep.mubr.bf16.mxu1 %v2129_v28  ;;  %v2214_v27 = vld [vmem:[%s2310_s28 + $0x1b4] ss:$12 sps:$4 sm:$0xff]  }
  0x50   : > { %v2216_v28 = vld [vmem:[%s2310_s28 + $0x1e8] ss:$12 sps:$4 sm:$0xff]  }
  0x56   : > { %1083 = vmatmul.mubr.bf16.gmra.mrb[8].mxu0 %v2131_v29  ;;  %1275 = vmatmul.mubr.bf16.gmra.mrb[8].mxu1 %v2132_v30  ;;  %v2217_v29 = vld [vmem:[%s2310_s28 + $0x1b0] ss:$12 sps:$4 sm:$0xff]   ;;  %v2218_v30 = vld [vmem:[%s2310_s28 + $0x200] ss:$12 sps:$4 sm:$0xff]  }
  0x57   : > { %1090 = vmatprep.mubr.bf16.mxu0 %v2133_v31  ;;  %1282 = vmatprep.mubr.bf16.mxu1 %v2135_v32  ;;  %v2219_v31 = vld [vmem:[%s2310_s28 + $0x1cc] ss:$12 sps:$4 sm:$0xff]  }
  0x58   : > { %v2221_v32 = vld [vmem:[%s2310_s28 + $0x218] ss:$12 sps:$4 sm:$0xff]  }
  0x5e   : > { %1091 = vmatmul.mubr.bf16.gmra.mrb[12].mxu0 %v2137_v33  ;;  %1283 = vmatmul.mubr.bf16.gmra.mrb[12].mxu1 %v2138_v34  ;;  %v2222_v33 = vld [vmem:[%s2310_s28 + $0x1c8] ss:$12 sps:$4 sm:$0xff]   ;;  %v2223_v34 = vld [vmem:[%s2310_s28 + $0x230] ss:$12 sps:$4 sm:$0xff]  }
  0x5f   : > { %1098 = vmatprep.mubr.bf16.mxu0 %v2139_v35  ;;  %1290 = vmatprep.mubr.bf16.mxu1 %v2141_v36  ;;  %v2224_v35 = vld [vmem:[%s2310_s28 + $0x1e4] ss:$12 sps:$4 sm:$0xff]   ;;  %v2226_v36 = vld [vmem:[%s2310_s28 + $0x248] ss:$12 sps:$4 sm:$0xff]  }
  0x66   : > { %1099 = vmatmul.mubr.bf16.gmra.mrb[16].mxu0 %v2143_v37  ;;  %1291 = vmatmul.mubr.bf16.gmra.mrb[16].mxu1 %v2144_v38  ;;  %v2227_v37 = vld [vmem:[%s2310_s28 + $0x1e0] ss:$12 sps:$4 sm:$0xff]  }
  0x67   : > { %1106 = vmatprep.mubr.bf16.mxu0 %v2146_v39  ;;  %1298 = vmatprep.mubr.bf16.mxu1 %v2148_v40  ;;  %v2228_v38 = vld [vmem:[%s2310_s28 + $0x260] ss:$12 sps:$4 sm:$0xff]   ;;  %v2229_v39 = vld [vmem:[%s2310_s28 + $0x1fc] ss:$12 sps:$4 sm:$0xff]   ;;  %v2231_v40 = vld [vmem:[%s2310_s28 + $0x278] ss:$12 sps:$4 sm:$0xff]  }
  0x6e   : > { %1107 = vmatmul.mubr.bf16.gmra.mrb[20].mxu0 %v2150_v41  ;;  %1299 = vmatmul.mubr.bf16.gmra.mrb[20].mxu1 %v2151_v42  ;;  %v2232_v41 = vld [vmem:[%s2310_s28 + $0x1f8] ss:$12 sps:$4 sm:$0xff]   ;;  %v2233_v42 = vld [vmem:[%s2310_s28 + $0x290] ss:$12 sps:$4 sm:$0xff]  }
  0x6f   : > { %1114 = vmatprep.mubr.bf16.mxu0 %v2152_v43  ;;  %1306 = vmatprep.mubr.bf16.mxu1 %v2154_v44  ;;  %v2234_v43 = vld [vmem:[%s2310_s28 + $0x214] ss:$12 sps:$4 sm:$0xff]  }
  0x70   : > { %v2236_v44 = vld [vmem:[%s2310_s28 + $0x2a8] ss:$12 sps:$4 sm:$0xff]  }
  0x76   : > { %1115 = vmatmul.mubr.bf16.gmra.mrb[24].mxu0 %v2156_v45  ;;  %1307 = vmatmul.mubr.bf16.gmra.mrb[24].mxu1 %v2157_v46  ;;  %v2237_v45 = vld [vmem:[%s2310_s28 + $0x210] ss:$12 sps:$4 sm:$0xff]   ;;  %v2238_v46 = vld [vmem:[%s2310_s28 + $0x2c0] ss:$12 sps:$4 sm:$0xff]  }
  0x77   : > { %1122 = vmatprep.mubr.bf16.mxu0 %v2158_v47  ;;  %1314 = vmatprep.mubr.bf16.mxu1 %v2160_v48  ;;  %v2239_v47 = vld [vmem:[%s2310_s28 + $0x22c] ss:$12 sps:$4 sm:$0xff]  }
  0x78   : > { %v2241_v48 = vld [vmem:[%s2310_s28 + $0x2d8] ss:$12 sps:$4 sm:$0xff]  }
  0x7e   : > { %1123 = vmatmul.mubr.bf16.gmra.mrb[28].mxu0 %v2162_v49  ;;  %1315 = vmatmul.mubr.bf16.gmra.mrb[28].mxu1 %v2163_v50  ;;  %v2242_v49 = vld [vmem:[%s2310_s28 + $0x228] ss:$12 sps:$4 sm:$0xff]   ;;  %v2243_v50 = vld [vmem:[%s2310_s28 + $0x2f0] ss:$12 sps:$4 sm:$0xff]  }
  0x7f   : > { %1130 = vmatprep.mubr.bf16.mxu0 %v2164_v51  ;;  %1992 = vmatprep.mubr.msk.bf16.mxu1 %vm937_vm0, %v2166_v52 }
  0x86   : > { %1131 = vmatmul.mubr.bf16.gmra.mrb[32].mxu0 %v2167_v53  ;;  %1993 = vmatmul.mubr.msk.bf16.vlgmr.msra.gmra.mrb[32].mxu1 %vm937_vm0, %v2168_v54 }
  0x87   : > { %1138 = vmatprep.mubr.bf16.mxu0 %v2169_v55  ;;  %1996 = vmatprep.mubr.msk.bf16.mxu1 %vm937_vm0, %v2171_v56 }
  0x8e   : > { %1139 = vmatmul.mubr.bf16.gmra.mrb[36].mxu0 %v2172_v57  ;;  %1997 = vmatmul.mubr.msk.bf16.gmra.mrb[36].mxu1 %vm937_vm0, %v2173_v58 }
  0x8f   : > { %1146 = vmatprep.mubr.bf16.mxu0 %v2174_v59  ;;  %2000 = vmatprep.mubr.msk.bf16.mxu1 %vm937_vm0, %v2176_v60 }
  0x96   : > { %1147 = vmatmul.mubr.bf16.gmra.mrb[40].mxu0 %v2177_v61  ;;  %2001 = vmatmul.mubr.msk.bf16.gmra.mrb[40].mxu1 %vm937_vm0, %v2178_v62 }
  0x97   : > { %1154 = vmatprep.mubr.bf16.mxu0 %v2179_v63  ;;  %2004 = vmatprep.mubr.msk.bf16.mxu1 %vm937_vm0, %v2181_v0 }
  0x9e   : > { %1155 = vmatmul.mubr.bf16.gmra.mrb[44].mxu0 %v2182_v1  ;;  %2005 = vmatmul.mubr.msk.bf16.gmra.mrb[44].mxu1 %vm937_vm0, %v2183_v2 }
  0x9f   : > { %1162 = vmatprep.mubr.bf16.mxu0 %v2184_v3  ;;  %2008 = vmatprep.mubr.msk.bf16.mxu1 %vm937_vm0, %v2186_v4 }
  0xa6   : > { %1163 = vmatmul.mubr.bf16.gmra.mrb[48].mxu0 %v2187_v5  ;;  %2009 = vmatmul.mubr.msk.bf16.gmra.mrb[48].mxu1 %vm937_vm0, %v2188_v6 }
  0xa7   : > { %1170 = vmatprep.mubr.bf16.mxu0 %v2189_v7  ;;  %2012 = vmatprep.mubr.msk.bf16.mxu1 %vm937_vm0, %v2191_v8 }
  0xae   : > { %1171 = vmatmul.mubr.bf16.gmra.mrb[52].mxu0 %v2192_v9  ;;  %2013 = vmatmul.mubr.msk.bf16.gmra.mrb[52].mxu1 %vm937_vm0, %v2193_v10 }
  0xaf   : > { %1178 = vmatprep.mubr.bf16.mxu0 %v2194_v11  ;;  %2016 = vmatprep.mubr.msk.bf16.mxu1 %vm937_vm0, %v2196_v12 }
  0xb6   : > { %1179 = vmatmul.mubr.bf16.gmra.mrb[56].mxu0 %v2197_v13  ;;  %2017 = vmatmul.mubr.msk.bf16.gmra.mrb[56].mxu1 %vm937_vm0, %v2198_v14 }
  0xb7   : > { %1186 = vmatprep.mubr.bf16.mxu0 %v2199_v15  ;;  %2020 = vmatprep.mubr.msk.bf16.mxu1 %vm937_vm0, %v2201_v16 }
  0xbe   : > { %1187 = vmatmul.mubr.bf16.gmra.mrb[60].mxu0 %v2202_v17  ;;  %2021 = vmatmul.mubr.msk.bf16.gmra.mrb[60].mxu1 %vm937_vm0, %v2203_v18 }
  0xbf   : > { %1194 = vmatprep.mubr.bf16.mxu0 %v2204_v19  ;;  %2024 = vmatprep.mubr.msk.bf16.mxu1 %vm937_vm0, %v2206_v20 }
  0xc6   : > { %1195 = vmatmul.mubr.bf16.gmra.mrb[64].mxu0 %v2207_v21  ;;  %2025 = vmatmul.mubr.msk.bf16.gmra.mrb[64].mxu1 %vm937_vm0, %v2208_v22 }
  0xc7   : > { %1202 = vmatprep.mubr.bf16.mxu0 %v2209_v23  ;;  %2028 = vmatprep.mubr.msk.bf16.mxu1 %vm937_vm0, %v2211_v24 }
  0xce   : > { %1203 = vmatmul.mubr.bf16.gmra.mrb[68].mxu0 %v2212_v25  ;;  %2029 = vmatmul.mubr.msk.bf16.gmra.mrb[68].mxu1 %vm937_vm0, %v2213_v26 }
  0xcf   : > { %1210 = vmatprep.mubr.bf16.mxu0 %v2214_v27  ;;  %2032 = vmatprep.mubr.msk.bf16.mxu1 %vm937_vm0, %v2216_v28 }
  0xd6   : > { %1211 = vmatmul.mubr.bf16.gmra.mrb[72].mxu0 %v2217_v29  ;;  %2033 = vmatmul.mubr.msk.bf16.gmra.mrb[72].mxu1 %vm937_vm0, %v2218_v30 }
  0xd7   : > { %1218 = vmatprep.mubr.bf16.mxu0 %v2219_v31  ;;  %2036 = vmatprep.mubr.msk.bf16.mxu1 %vm937_vm0, %v2221_v32 }
  0xde   : > { %1219 = vmatmul.mubr.bf16.gmra.mrb[76].mxu0 %v2222_v33  ;;  %2037 = vmatmul.mubr.msk.bf16.gmra.mrb[76].mxu1 %vm937_vm0, %v2223_v34 }
  0xdf   : > { %1226 = vmatprep.mubr.bf16.mxu0 %v2224_v35  ;;  %2040 = vmatprep.mubr.msk.bf16.mxu1 %vm937_vm0, %v2226_v36 }
  0xe6   : > { %1227 = vmatmul.mubr.bf16.gmra.mrb[80].mxu0 %v2227_v37  ;;  %2041 = vmatmul.mubr.msk.bf16.gmra.mrb[80].mxu1 %vm937_vm0, %v2228_v38 }
  0xe7   : > { %1234 = vmatprep.mubr.bf16.mxu0 %v2229_v39  ;;  %2044 = vmatprep.mubr.msk.bf16.mxu1 %vm937_vm0, %v2231_v40 }
  0xee   : > { %1235 = vmatmul.mubr.bf16.gmra.mrb[84].mxu0 %v2232_v41  ;;  %2045 = vmatmul.mubr.msk.bf16.gmra.mrb[84].mxu1 %vm937_vm0, %v2233_v42 }
  0xef   : > { %1242 = vmatprep.mubr.bf16.mxu0 %v2234_v43  ;;  %2048 = vmatprep.mubr.msk.bf16.mxu1 %vm937_vm0, %v2236_v44 }
  0xf6   : > { %1243 = vmatmul.mubr.bf16.gmra.mrb[88].mxu0 %v2237_v45  ;;  %2049 = vmatmul.mubr.msk.bf16.gmra.mrb[88].mxu1 %vm937_vm0, %v2238_v46 }
  0xf7   : > { %1250 = vmatprep.mubr.bf16.mxu0 %v2239_v47  ;;  %2052 = vmatprep.mubr.msk.bf16.mxu1 %vm937_vm0, %v2241_v48 }
  0xfe   : > { %1251 = vmatmul.mubr.bf16.gmra.mrb[92].mxu0 %v2242_v49  ;;  %2053 = vmatmul.mubr.msk.bf16.gmra.mrb[92].mxu1 %vm937_vm0, %v2243_v50 }
 0x119   : > { %v2503_v51 = vpop.f32.mrb[0].mxu0  ;;  %v2505_v52 = vpop.f32.mrb[0].mxu1 }
 0x11a   : > { %v1070_v53 = vpop.f32.mrb[1].mxu0  ;;  %v1262_v54 = vpop.f32.mrb[1].mxu1 }
 0x11b   : > { %v2507_v55 = vpop.f32.mrb[2].mxu0  ;;  %v2509_v56 = vpop.f32.mrb[2].mxu1  ;;  %v2566_v53 = vld [vmem:[%s2837_s2] ss:$0 sm:$0xff] }
 0x11c   : > { %v1073_v57 = vpop.f32.mrb[3].mxu0  ;;  %v1265_v58 = vpop.f32.mrb[3].mxu1 }
 0x11d   : > { %v1069_v57 = vadd.f32 %v2566_v53, %v2503_v51 }
 0x121   : > { %v1076_v59 = vpop.f32.mrb[4].mxu0  ;;  %v2511_v60 = vpop.f32.mrb[4].mxu1 }
 0x122   : > { %v1078_v61 = vpop.f32.mrb[5].mxu0  ;;  %v1270_v62 = vpop.f32.mrb[5].mxu1  ;;  %v1077_v54 = vadd.f32 %v2566_v53, %v1076_v59 }
 0x123   : > { %v1079_v63 = vpop.f32.mrb[6].mxu0  ;;  %v2513_v0 = vpop.f32.mrb[6].mxu1 }
 0x124   : > { %v1081_v1 = vpop.f32.mrb[7].mxu0  ;;  %v1273_v2 = vpop.f32.mrb[7].mxu1  ;;  %v1080_v62 = vadd.f32 %v2566_v53, %v1079_v63 }
 0x129   : > { %v2515_v3 = vpop.f32.mrb[8].mxu0  ;;  %v2517_v4 = vpop.f32.mrb[8].mxu1 }
 0x12a   : > { %v1086_v5 = vpop.f32.mrb[9].mxu0  ;;  %v1278_v6 = vpop.f32.mrb[9].mxu1 }
 0x12b   : > { %v2519_v7 = vpop.f32.mrb[10].mxu0  ;;  %v2521_v8 = vpop.f32.mrb[10].mxu1  ;;  %v1072_v6 = vadd.f32 %v2566_v53, %v2507_v55 }
 0x12c   : > { %v1089_v9 = vpop.f32.mrb[11].mxu0  ;;  %v1281_v10 = vpop.f32.mrb[11].mxu1 }
 0x131   : > { %v2523_v11 = vpop.f32.mrb[12].mxu0  ;;  %v2525_v12 = vpop.f32.mrb[12].mxu1 }
 0x132   : > { %v1094_v13 = vpop.f32.mrb[13].mxu0  ;;  %v1286_v14 = vpop.f32.mrb[13].mxu1 }
 0x133   : > { %v2527_v15 = vpop.f32.mrb[14].mxu0  ;;  %v2529_v16 = vpop.f32.mrb[14].mxu1 }
 0x134   : > { %v1097_v17 = vpop.f32.mrb[15].mxu0  ;;  %v1289_v18 = vpop.f32.mrb[15].mxu1 }
 0x139   : > { %v2531_v19 = vpop.f32.mrb[16].mxu0  ;;  %v2533_v20 = vpop.f32.mrb[16].mxu1 }
 0x13a   : > { %v1102_v21 = vpop.f32.mrb[17].mxu0  ;;  %v1294_v22 = vpop.f32.mrb[17].mxu1 }
 0x13b   : > { %v2535_v23 = vpop.f32.mrb[18].mxu0  ;;  %v2537_v24 = vpop.f32.mrb[18].mxu1  ;;  %v1093_v22 = vadd.f32 %v2566_v53, %v2523_v11  ;;  %v1088_v11 = vadd.f32 %v2566_v53, %v2519_v7 }
 0x13c   : > { %v1105_v25 = vpop.f32.mrb[19].mxu0  ;;  %v1297_v26 = vpop.f32.mrb[19].mxu1 }
 0x13d   : > { %v1085_v25 = vadd.f32 %v2566_v53, %v2515_v3 }
 0x141   : > { %v2539_v27 = vpop.f32.mrb[20].mxu0  ;;  %v2541_v28 = vpop.f32.mrb[20].mxu1 }
 0x142   : > { %v1110_v29 = vpop.f32.mrb[21].mxu0  ;;  %v1302_v30 = vpop.f32.mrb[21].mxu1  ;;  %v1109_v7 = vadd.f32 %v2566_v53, %v2539_v27  ;;  %v1104_v27 = vadd.f32 %v2566_v53, %v2535_v23 }
 0x143   : > { %v2543_v31 = vpop.f32.mrb[22].mxu0  ;;  %v2545_v32 = vpop.f32.mrb[22].mxu1  ;;  %v1096_v30 = vadd.f32 %v2566_v53, %v2527_v15 }
 0x144   : > { %v1113_v33 = vpop.f32.mrb[23].mxu0  ;;  %v1305_v34 = vpop.f32.mrb[23].mxu1 }
 0x149   : > { %v2547_v35 = vpop.f32.mrb[24].mxu0  ;;  %v2549_v36 = vpop.f32.mrb[24].mxu1 }
 0x14a   : > { %v1118_v37 = vpop.f32.mrb[25].mxu0  ;;  %v1310_v38 = vpop.f32.mrb[25].mxu1 }
 0x14b   : > { %v2551_v39 = vpop.f32.mrb[26].mxu0  ;;  %v2553_v40 = vpop.f32.mrb[26].mxu1 }
 0x14c   : > { %v1121_v41 = vpop.f32.mrb[27].mxu0  ;;  %v1313_v42 = vpop.f32.mrb[27].mxu1 }
 0x151   : > { %v2555_v43 = vpop.f32.mrb[28].mxu0  ;;  %v2557_v44 = vpop.f32.mrb[28].mxu1 }
 0x152   : > { %v1126_v45 = vpop.f32.mrb[29].mxu0  ;;  %v1318_v46 = vpop.f32.mrb[29].mxu1  ;;  %v1125_v23 = vadd.f32 %v2566_v53, %v2555_v43  ;;  %v1120_v43 = vadd.f32 %v2566_v53, %v2551_v39 }
 0x153   : > { %v2559_v47 = vpop.f32.mrb[30].mxu0  ;;  %v2561_v48 = vpop.f32.mrb[30].mxu1 }
 0x154   : > { %v1129_v49 = vpop.f32.mrb[31].mxu0  ;;  %v1321_v50 = vpop.f32.mrb[31].mxu1 }
 0x159   : > { %v2572_v58 = vpop.f32.mrb[32].mxu0  ;;  %v1994_v61 = vpop.f32.mrb[32].mxu1 }
 0x15a   : > { %v1366_v1 = vadd.f32 %v1994_v61, %v1077_v54  ;;  %v1134_v2 = vpop.f32.mrb[33].mxu0  ;;  %v1357_v5 = vpop.f32.mrb[33].mxu1  ;;  %v1101_v61 = vadd.f32 %v2566_v53, %v2531_v19  ;;  %v1133_v39 = vadd.f32 %v2566_v53, %v2572_v58 }
 0x15b   : > { %v1358_v51 = vadd.f32 %v1357_v5, %v1069_v57  ;;  %v2582_v59 = vpop.f32.mrb[34].mxu0  ;;  %v1995_v9 = vpop.f32.mrb[34].mxu1  ;;  %v1112_v2 = vadd.f32 %v2566_v53, %v2543_v31 }
 0x15c   : > { %v1614_v63 = vmax.f32 %v1366_v1, 0.0  ;;  %v1369_v10 = vadd.f32 %v1995_v9, %v1080_v62  ;;  %v1137_v13 = vpop.f32.mrb[35].mxu0  ;;  %v1360_v14 = vpop.f32.mrb[35].mxu1 }
 0x15d   : > { %v1612_v17 = vmax.f32 %v1358_v51, 0.0  ;;  %v1361_v18 = vadd.f32 %v1360_v14, %v1072_v6 }
 0x15e   : > { %1678 = vst.msk [vmem:[%s2580_s8 + $0x10] sm:$0xff] %vm937_vm0, %v1614_v63  ;;  %v1615_v55 = vmax.f32 %v1369_v10, 0.0 }
 0x15f   : > { %1676 = vst.msk [vmem:[%s2580_s8] sm:$0xff] %vm937_vm0, %v1612_v17  ;;  %v1613_v21 = vmax.f32 %v1361_v18, 0.0 }
 0x160   : > { %1679 = vst.msk [vmem:[%s2580_s8 + $0x18] sm:$0xff] %vm937_vm0, %v1615_v55 }
 0x161   : > { %1677 = vst.msk [vmem:[%s2580_s8 + $0x8] sm:$0xff] %vm937_vm0, %v1613_v21  ;;  %v2596_v26 = vpop.f32.mrb[36].mxu0  ;;  %v1998_v29 = vpop.f32.mrb[36].mxu1 }
 0x162   : > { %v1382_v33 = vadd.f32 %v1998_v29, %v1093_v22  ;;  %v1142_v34 = vpop.f32.mrb[37].mxu0  ;;  %v1373_v37 = vpop.f32.mrb[37].mxu1  ;;  %v1117_v22 = vadd.f32 %v2566_v53, %v2547_v35 }
 0x163   : > { %v1374_v38 = vadd.f32 %v1373_v37, %v1085_v25  ;;  %v2602_v3 = vpop.f32.mrb[38].mxu0  ;;  %v1999_v41 = vpop.f32.mrb[38].mxu1 }
 0x164   : > { %v1618_v42 = vmax.f32 %v1382_v33, 0.0  ;;  %v1385_v45 = vadd.f32 %v1999_v41, %v1096_v30  ;;  %v1145_v46 = vpop.f32.mrb[39].mxu0  ;;  %v1376_v49 = vpop.f32.mrb[39].mxu1  ;;  %v1128_v30 = vadd.f32 %v2566_v53, %v2559_v47 }
 0x165   : > { %v1616_v50 = vmax.f32 %v1374_v38, 0.0  ;;  %v1377_v54 = vadd.f32 %v1376_v49, %v1088_v11 }
 0x166   : > { %1682 = vst.msk [vmem:[%s2580_s8 + $0x30] sm:$0xff] %vm937_vm0, %v1618_v42  ;;  %v1619_v15 = vmax.f32 %v1385_v45, 0.0 }
 0x167   : > { %1680 = vst.msk [vmem:[%s2580_s8 + $0x20] sm:$0xff] %vm937_vm0, %v1616_v50  ;;  %v1617_v57 = vmax.f32 %v1377_v54, 0.0 }
 0x168   : > { %1683 = vst.msk [vmem:[%s2580_s8 + $0x38] sm:$0xff] %vm937_vm0, %v1619_v15  ;;  %v1141_v15 = vadd.f32 %v2566_v53, %v2596_v26  ;;  %v1136_v26 = vadd.f32 %v2566_v53, %v2582_v59 }
 0x169   : > { %1681 = vst.msk [vmem:[%s2580_s8 + $0x28] sm:$0xff] %vm937_vm0, %v1617_v57  ;;  %v2616_v62 = vpop.f32.mrb[40].mxu0  ;;  %v2002_v1 = vpop.f32.mrb[40].mxu1 }
 0x16a   : > { %v1398_v5 = vadd.f32 %v2002_v1, %v1109_v7  ;;  %v1150_v6 = vpop.f32.mrb[41].mxu0  ;;  %v1389_v51 = vpop.f32.mrb[41].mxu1  ;;  %v1149_v59 = vadd.f32 %v2566_v53, %v2616_v62 }
 0x16b   : > { %v1390_v9 = vadd.f32 %v1389_v51, %v1101_v61  ;;  %v2622_v19 = vpop.f32.mrb[42].mxu0  ;;  %v2003_v63 = vpop.f32.mrb[42].mxu1  ;;  %v1144_v61 = vadd.f32 %v2566_v53, %v2602_v3 }
 0x16c   : > { %v1622_v10 = vmax.f32 %v1398_v5, 0.0  ;;  %v1401_v13 = vadd.f32 %v2003_v63, %v1112_v2  ;;  %v1153_v14 = vpop.f32.mrb[43].mxu0  ;;  %v1392_v17 = vpop.f32.mrb[43].mxu1 }
 0x16d   : > { %v1620_v18 = vmax.f32 %v1390_v9, 0.0  ;;  %v1393_v55 = vadd.f32 %v1392_v17, %v1104_v27 }
 0x16e   : > { %1686 = vst.msk [vmem:[%s2580_s8 + $0x50] sm:$0xff] %vm937_vm0, %v1622_v10  ;;  %v1623_v31 = vmax.f32 %v1401_v13, 0.0 }
 0x16f   : > { %1684 = vst.msk [vmem:[%s2580_s8 + $0x40] sm:$0xff] %vm937_vm0, %v1620_v18  ;;  %v1621_v21 = vmax.f32 %v1393_v55, 0.0 }
 0x170   : > { %1687 = vst.msk [vmem:[%s2580_s8 + $0x58] sm:$0xff] %vm937_vm0, %v1623_v31 }
 0x171   : > { %1685 = vst.msk [vmem:[%s2580_s8 + $0x48] sm:$0xff] %vm937_vm0, %v1621_v21  ;;  %v1156_v25 = vpop.f32.mrb[44].mxu0  ;;  %v2006_v29 = vpop.f32.mrb[44].mxu1 }
 0x172   : > { %v1414_v33 = vadd.f32 %v2006_v29, %v1125_v23  ;;  %v1158_v34 = vpop.f32.mrb[45].mxu0  ;;  %v1405_v37 = vpop.f32.mrb[45].mxu1  ;;  %v1157_v18 = vadd.f32 %v2566_v53, %v1156_v25  ;;  %v1152_v25 = vadd.f32 %v2566_v53, %v2622_v19 }
 0x173   : > { %v1406_v11 = vadd.f32 %v1405_v37, %v1117_v22  ;;  %v1159_v38 = vpop.f32.mrb[46].mxu0  ;;  %v2007_v35 = vpop.f32.mrb[46].mxu1 }
 0x174   : > { %v1626_v41 = vmax.f32 %v1414_v33, 0.0  ;;  %v1417_v42 = vadd.f32 %v2007_v35, %v1128_v30  ;;  %v1161_v45 = vpop.f32.mrb[47].mxu0  ;;  %v1408_v46 = vpop.f32.mrb[47].mxu1  ;;  %v1160_v21 = vadd.f32 %v2566_v53, %v1159_v38 }
 0x175   : > { %v1624_v49 = vmax.f32 %v1406_v11, 0.0  ;;  %v1409_v50 = vadd.f32 %v1408_v46, %v1120_v43 }
 0x176   : > { %1690 = vst.msk [vmem:[%s2580_s8 + $0x70] sm:$0xff] %vm937_vm0, %v1626_v41  ;;  %v1627_v47 = vmax.f32 %v1417_v42, 0.0 }
 0x177   : > { %1688 = vst.msk [vmem:[%s2580_s8 + $0x60] sm:$0xff] %vm937_vm0, %v1624_v49  ;;  %v1625_v54 = vmax.f32 %v1409_v50, 0.0 }
 0x178   : > { %1691 = vst.msk [vmem:[%s2580_s8 + $0x78] sm:$0xff] %vm937_vm0, %v1627_v47 }
 0x179   : > { %1689 = vst.msk [vmem:[%s2580_s8 + $0x68] sm:$0xff] %vm937_vm0, %v1625_v54  ;;  %v1164_v57 = vpop.f32.mrb[48].mxu0  ;;  %v2010_v7 = vpop.f32.mrb[48].mxu1 }
 0x17a   : > { %v1430_v1 = vadd.f32 %v2010_v7, %v1141_v15  ;;  %v1166_v2 = vpop.f32.mrb[49].mxu0  ;;  %v1421_v5 = vpop.f32.mrb[49].mxu1  ;;  %v1165_v19 = vadd.f32 %v2566_v53, %v1164_v57 }
 0x17b   : > { %v1422_v6 = vadd.f32 %v1421_v5, %v1133_v39  ;;  %v1167_v51 = vpop.f32.mrb[50].mxu0  ;;  %v2011_v58 = vpop.f32.mrb[50].mxu1 }
 0x17c   : > { %v1630_v27 = vmax.f32 %v1430_v1, 0.0  ;;  %v1433_v9 = vadd.f32 %v2011_v58, %v1144_v61  ;;  %v1169_v63 = vpop.f32.mrb[51].mxu0  ;;  %v1424_v10 = vpop.f32.mrb[51].mxu1  ;;  %v1168_v39 = vadd.f32 %v2566_v53, %v1167_v51 }
 0x17d   : > { %v1628_v13 = vmax.f32 %v1422_v6, 0.0  ;;  %v1425_v14 = vadd.f32 %v1424_v10, %v1136_v26 }
 0x17e   : > { %1694 = vst.msk [vmem:[%s2580_s8 + $0x90] sm:$0xff] %vm937_vm0, %v1630_v27  ;;  %v1631_v3 = vmax.f32 %v1433_v9, 0.0 }
 0x17f   : > { %1692 = vst.msk [vmem:[%s2580_s8 + $0x80] sm:$0xff] %vm937_vm0, %v1628_v13  ;;  %v1629_v17 = vmax.f32 %v1425_v14, 0.0 }
 0x180   : > { %1695 = vst.msk [vmem:[%s2580_s8 + $0x98] sm:$0xff] %vm937_vm0, %v1631_v3 }
 0x181   : > { %1693 = vst.msk [vmem:[%s2580_s8 + $0x88] sm:$0xff] %vm937_vm0, %v1629_v17  ;;  %v1172_v55 = vpop.f32.mrb[52].mxu0  ;;  %v2014_v31 = vpop.f32.mrb[52].mxu1 }
 0x182   : > { %v1446_v23 = vadd.f32 %v2014_v31, %v1157_v18  ;;  %v1174_v22 = vpop.f32.mrb[53].mxu0  ;;  %v1437_v29 = vpop.f32.mrb[53].mxu1  ;;  %v1173_v45 = vadd.f32 %v2566_v53, %v1172_v55 }
 0x183   : > { %v1438_v30 = vadd.f32 %v1437_v29, %v1149_v59  ;;  %v1175_v33 = vpop.f32.mrb[54].mxu0  ;;  %v2015_v34 = vpop.f32.mrb[54].mxu1 }
 0x184   : > { %v1634_v62 = vmax.f32 %v1446_v23, 0.0  ;;  %v1449_v37 = vadd.f32 %v2015_v34, %v1160_v21  ;;  %v1177_v43 = vpop.f32.mrb[55].mxu0  ;;  %v1440_v11 = vpop.f32.mrb[55].mxu1  ;;  %v1176_v50 = vadd.f32 %v2566_v53, %v1175_v33 }
 0x185   : > { %v1632_v35 = vmax.f32 %v1438_v30, 0.0  ;;  %v1441_v41 = vadd.f32 %v1440_v11, %v1152_v25 }
 0x186   : > { %1698 = vst.msk [vmem:[%s2580_s8 + $0xb0] sm:$0xff] %vm937_vm0, %v1634_v62  ;;  %v1635_v38 = vmax.f32 %v1449_v37, 0.0 }
 0x187   : > { %1696 = vst.msk [vmem:[%s2580_s8 + $0xa0] sm:$0xff] %vm937_vm0, %v1632_v35  ;;  %v1633_v42 = vmax.f32 %v1441_v41, 0.0 }
 0x188   : > { %1699 = vst.msk [vmem:[%s2580_s8 + $0xb8] sm:$0xff] %vm937_vm0, %v1635_v38 }
 0x189   : > { %1697 = vst.msk [vmem:[%s2580_s8 + $0xa8] sm:$0xff] %vm937_vm0, %v1633_v42  ;;  %v1180_v46 = vpop.f32.mrb[56].mxu0  ;;  %v2018_v49 = vpop.f32.mrb[56].mxu1 }
 0x18a   : > { %v1462_v47 = vadd.f32 %v2018_v49, %v1173_v45  ;;  %v1182_v54 = vpop.f32.mrb[57].mxu0  ;;  %v1453_v15 = vpop.f32.mrb[57].mxu1  ;;  %v1181_v51 = vadd.f32 %v2566_v53, %v1180_v46 }
 0x18b   : > { %v1454_v7 = vadd.f32 %v1453_v15, %v1165_v19  ;;  %v1183_v61 = vpop.f32.mrb[58].mxu0  ;;  %v2019_v1 = vpop.f32.mrb[58].mxu1 }
 0x18c   : > { %v1638_v2 = vmax.f32 %v1462_v47, 0.0  ;;  %v1465_v57 = vadd.f32 %v2019_v1, %v1176_v50  ;;  %v1185_v5 = vpop.f32.mrb[59].mxu0  ;;  %v1456_v26 = vpop.f32.mrb[59].mxu1  ;;  %v1184_v17 = vadd.f32 %v2566_v53, %v1183_v61 }
 0x18d   : > { %v1636_v6 = vmax.f32 %v1454_v7, 0.0  ;;  %v1457_v58 = vadd.f32 %v1456_v26, %v1168_v39 }
 0x18e   : > { %1702 = vst.msk [vmem:[%s2580_s8 + $0xd0] sm:$0xff] %vm937_vm0, %v1638_v2  ;;  %v1639_v27 = vmax.f32 %v1465_v57, 0.0 }
 0x18f   : > { %1700 = vst.msk [vmem:[%s2580_s8 + $0xc0] sm:$0xff] %vm937_vm0, %v1636_v6  ;;  %v1637_v9 = vmax.f32 %v1457_v58, 0.0 }
 0x190   : > { %1703 = vst.msk [vmem:[%s2580_s8 + $0xd8] sm:$0xff] %vm937_vm0, %v1639_v27 }
 0x191   : > { %1701 = vst.msk [vmem:[%s2580_s8 + $0xc8] sm:$0xff] %vm937_vm0, %v1637_v9  ;;  %v1188_v63 = vpop.f32.mrb[60].mxu0  ;;  %v2022_v10 = vpop.f32.mrb[60].mxu1 }
 0x192   : > { %v1189_v13 = vadd.f32 %v2566_v53, %v1188_v63  ;;  %v1190_v14 = vpop.f32.mrb[61].mxu0  ;;  %v1469_v3 = vpop.f32.mrb[61].mxu1 }
 0x193   : > { %v1470_v18 = vadd.f32 %v1469_v3, %v1181_v51  ;;  %v1191_v59 = vpop.f32.mrb[62].mxu0  ;;  %v2023_v55 = vpop.f32.mrb[62].mxu1 }
 0x194   : > { %v1478_v31 = vadd.f32 %v2022_v10, %v1189_v13  ;;  %v1192_v21 = vadd.f32 %v2566_v53, %v1191_v59  ;;  %v1193_v23 = vpop.f32.mrb[63].mxu0  ;;  %v1472_v22 = vpop.f32.mrb[63].mxu1 }
 0x195   : > { %v1640_v29 = vmax.f32 %v1470_v18, 0.0  ;;  %v1473_v25 = vadd.f32 %v1472_v22, %v1184_v17 }
 0x196   : > { %v1642_v30 = vmax.f32 %v1478_v31, 0.0  ;;  %v1481_v33 = vadd.f32 %v2023_v55, %v1192_v21 }
 0x197   : > { %1704 = vst.msk [vmem:[%s2580_s8 + $0xe0] sm:$0xff] %vm937_vm0, %v1640_v29  ;;  %v1641_v34 = vmax.f32 %v1473_v25, 0.0 }
 0x198   : > { %1706 = vst.msk [vmem:[%s2580_s8 + $0xf0] sm:$0xff] %vm937_vm0, %v1642_v30  ;;  %v1643_v62 = vmax.f32 %v1481_v33, 0.0 }
 0x199   : > { %1705 = vst.msk [vmem:[%s2580_s8 + $0xe8] sm:$0xff] %vm937_vm0, %v1641_v34  ;;  %v1196_v37 = vpop.f32.mrb[64].mxu0  ;;  %v2026_v43 = vpop.f32.mrb[64].mxu1 }
 0x19a   : > { %1707 = vst.msk [vmem:[%s2580_s8 + $0xf8] sm:$0xff] %vm937_vm0, %v1643_v62  ;;  %v1197_v11 = vadd.f32 %v2566_v53, %v1196_v37  ;;  %v1198_v35 = vpop.f32.mrb[65].mxu0  ;;  %v1485_v41 = vpop.f32.mrb[65].mxu1 }
 0x19b   : > { %v1199_v38 = vpop.f32.mrb[66].mxu0  ;;  %v2027_v42 = vpop.f32.mrb[66].mxu1 }
 0x19c   : > { %v1486_v45 = vadd.f32 %v1485_v41, %v1197_v11  ;;  %v1200_v19 = vadd.f32 %v2566_v53, %v1199_v38  ;;  %v1201_v46 = vpop.f32.mrb[67].mxu0  ;;  %v1488_v49 = vpop.f32.mrb[67].mxu1 }
 0x19e   : > { %v1644_v50 = vmax.f32 %v1486_v45, 0.0  ;;  %v1489_v47 = vadd.f32 %v1488_v49, %v1200_v19  ;;  %v1269_v19 = vadd.f32 %v2566_v53, %v2511_v60  ;;  %v1261_v49 = vadd.f32 %v2566_v53, %v2505_v52 }
 0x19f   : > { %v1264_v60 = vadd.f32 %v2566_v53, %v2509_v56 }
 0x1a0   : > { %1708 = vst.msk [vmem:[%s2580_s8 + $0x100] sm:$0xff] %vm937_vm0, %v1644_v50  ;;  %v1645_v54 = vmax.f32 %v1489_v47, 0.0 }
 0x1a1   : > { %v1204_v15 = vpop.f32.mrb[68].mxu0  ;;  %v2030_v39 = vpop.f32.mrb[68].mxu1 }
 0x1a2   : > { %1709 = vst.msk [vmem:[%s2580_s8 + $0x108] sm:$0xff] %vm937_vm0, %v1645_v54  ;;  %v1205_v7 = vadd.f32 %v2566_v53, %v1204_v15  ;;  %v1206_v61 = vpop.f32.mrb[69].mxu0  ;;  %v1501_v1 = vpop.f32.mrb[69].mxu1  ;;  %v1272_v54 = vadd.f32 %v2566_v53, %v2513_v0 }
 0x1a3   : > { %v1207_v2 = vpop.f32.mrb[70].mxu0  ;;  %v2031_v57 = vpop.f32.mrb[70].mxu1 }
 0x1a4   : > { %v1494_v5 = vadd.f32 %v2026_v43, %v1205_v7  ;;  %v1208_v26 = vadd.f32 %v2566_v53, %v1207_v2  ;;  %v1209_v6 = vpop.f32.mrb[71].mxu0  ;;  %v1504_v58 = vpop.f32.mrb[71].mxu1 }
 0x1a6   : > { %v1646_v27 = vmax.f32 %v1494_v5, 0.0  ;;  %v1497_v9 = vadd.f32 %v2027_v42, %v1208_v26 }
 0x1a8   : > { %1710 = vst.msk [vmem:[%s2580_s8 + $0x110] sm:$0xff] %vm937_vm0, %v1646_v27  ;;  %v1647_v51 = vmax.f32 %v1497_v9, 0.0 }
 0x1a9   : > { %v1212_v63 = vpop.f32.mrb[72].mxu0  ;;  %v2712_v10 = vpop.f32.mrb[72].mxu1 }
 0x1aa   : > { %1711 = vst.msk [vmem:[%s2580_s8 + $0x118] sm:$0xff] %vm937_vm0, %v1647_v51  ;;  %v1213_v13 = vadd.f32 %v2566_v53, %v1212_v63  ;;  %v1214_v14 = vpop.f32.mrb[73].mxu0  ;;  %v1517_v3 = vpop.f32.mrb[73].mxu1 }
 0x1ab   : > { %v1215_v17 = vpop.f32.mrb[74].mxu0  ;;  %v2717_v18 = vpop.f32.mrb[74].mxu1  ;;  %v1285_v14 = vadd.f32 %v2566_v53, %v2525_v12 }
 0x1ac   : > { %v1502_v59 = vadd.f32 %v1501_v1, %v1213_v13  ;;  %v1216_v55 = vadd.f32 %v2566_v53, %v1215_v17  ;;  %v1217_v31 = vpop.f32.mrb[75].mxu0  ;;  %v1520_v21 = vpop.f32.mrb[75].mxu1  ;;  %v1277_v17 = vadd.f32 %v2566_v53, %v2517_v4 }
 0x1ad   : > { %v1288_v31 = vadd.f32 %v2566_v53, %v2529_v16 }
 0x1ae   : > { %v1648_v23 = vmax.f32 %v1502_v59, 0.0  ;;  %v1505_v22 = vadd.f32 %v1504_v58, %v1216_v55 }
 0x1b0   : > { %1712 = vst.msk [vmem:[%s2580_s8 + $0x120] sm:$0xff] %vm937_vm0, %v1648_v23  ;;  %v1649_v29 = vmax.f32 %v1505_v22, 0.0 }
 0x1b1   : > { %v1220_v25 = vpop.f32.mrb[76].mxu0  ;;  %v2722_v30 = vpop.f32.mrb[76].mxu1 }
 0x1b2   : > { %1713 = vst.msk [vmem:[%s2580_s8 + $0x128] sm:$0xff] %vm937_vm0, %v1649_v29  ;;  %v1221_v33 = vadd.f32 %v2566_v53, %v1220_v25  ;;  %v1222_v34 = vpop.f32.mrb[77].mxu0  ;;  %v2727_v62 = vpop.f32.mrb[77].mxu1  ;;  %v1280_v29 = vadd.f32 %v2566_v53, %v2521_v8 }
 0x1b3   : > { %v1223_v37 = vpop.f32.mrb[78].mxu0  ;;  %v2729_v43 = vpop.f32.mrb[78].mxu1 }
 0x1b4   : > { %v1510_v11 = vadd.f32 %v2030_v39, %v1221_v33  ;;  %v1224_v35 = vadd.f32 %v2566_v53, %v1223_v37  ;;  %v1225_v41 = vpop.f32.mrb[79].mxu0  ;;  %v2732_v38 = vpop.f32.mrb[79].mxu1 }
 0x1b6   : > { %v1650_v42 = vmax.f32 %v1510_v11, 0.0  ;;  %v1513_v45 = vadd.f32 %v2031_v57, %v1224_v35 }
 0x1b8   : > { %1714 = vst.msk [vmem:[%s2580_s8 + $0x130] sm:$0xff] %vm937_vm0, %v1650_v42  ;;  %v1651_v46 = vmax.f32 %v1513_v45, 0.0 }
 0x1b9   : > { %v1228_v50 = vpop.f32.mrb[80].mxu0  ;;  %v2042_v47 = vpop.f32.mrb[80].mxu1 }
 0x1ba   : > { %1715 = vst.msk [vmem:[%s2580_s8 + $0x138] sm:$0xff] %vm937_vm0, %v1651_v46  ;;  %v1229_v15 = vadd.f32 %v2566_v53, %v1228_v50  ;;  %v1558_v39 = vadd.f32 %v2042_v47, %v1269_v19  ;;  %v1230_v7 = vpop.f32.mrb[81].mxu0  ;;  %v1549_v61 = vpop.f32.mrb[81].mxu1  ;;  %v1293_v47 = vadd.f32 %v2566_v53, %v2533_v20 }
 0x1bb   : > { %v1550_v1 = vadd.f32 %v1549_v61, %v1261_v49  ;;  %v1231_v2 = vpop.f32.mrb[82].mxu0  ;;  %v2043_v52 = vpop.f32.mrb[82].mxu1  ;;  %v1301_v49 = vadd.f32 %v2566_v53, %v2541_v28 }
 0x1bc   : > { %v1518_v57 = vadd.f32 %v1517_v3, %v1229_v15  ;;  %v1662_v5 = vmax.f32 %v1558_v39, 0.0  ;;  %v1232_v0 = vadd.f32 %v2566_v53, %v1231_v2  ;;  %v1561_v26 = vadd.f32 %v2043_v52, %v1272_v54  ;;  %v1233_v6 = vpop.f32.mrb[83].mxu0  ;;  %v1552_v58 = vpop.f32.mrb[83].mxu1 }
 0x1bd   : > { %v1660_v27 = vmax.f32 %v1550_v1, 0.0  ;;  %v1553_v9 = vadd.f32 %v1552_v58, %v1264_v60  ;;  %v1296_v60 = vadd.f32 %v2566_v53, %v2537_v24 }
 0x1be   : > { %v1652_v51 = vmax.f32 %v1518_v57, 0.0  ;;  %1726 = vst.msk [vmem:[%s2580_s8 + $0x190] sm:$0xff] %vm937_vm0, %v1662_v5  ;;  %v1521_v56 = vadd.f32 %v1520_v21, %v1232_v0  ;;  %v1663_v63 = vmax.f32 %v1561_v26, 0.0 }
 0x1bf   : > { %1724 = vst.msk [vmem:[%s2580_s8 + $0x180] sm:$0xff] %vm937_vm0, %v1660_v27  ;;  %v1661_v13 = vmax.f32 %v1553_v9, 0.0 }
 0x1c0   : > { %1716 = vst.msk [vmem:[%s2580_s8 + $0x140] sm:$0xff] %vm937_vm0, %v1652_v51  ;;  %v1653_v3 = vmax.f32 %v1521_v56, 0.0  ;;  %1727 = vst.msk [vmem:[%s2580_s8 + $0x198] sm:$0xff] %vm937_vm0, %v1663_v63  ;;  %v1317_v51 = vadd.f32 %v2566_v53, %v2557_v44  ;;  %v1309_v63 = vadd.f32 %v2566_v53, %v2549_v36 }
 0x1c1   : > { %1725 = vst.msk [vmem:[%s2580_s8 + $0x188] sm:$0xff] %vm937_vm0, %v1661_v13  ;;  %v1236_v59 = vpop.f32.mrb[84].mxu0  ;;  %v2046_v55 = vpop.f32.mrb[84].mxu1 }
 0x1c2   : > { %1717 = vst.msk [vmem:[%s2580_s8 + $0x148] sm:$0xff] %vm937_vm0, %v1653_v3  ;;  %v1237_v21 = vadd.f32 %v2566_v53, %v1236_v59  ;;  %v1574_v12 = vadd.f32 %v2046_v55, %v1285_v14  ;;  %v1238_v23 = vpop.f32.mrb[85].mxu0  ;;  %v1565_v22 = vpop.f32.mrb[85].mxu1  ;;  %v1312_v55 = vadd.f32 %v2566_v53, %v2553_v40 }
 0x1c3   : > { %v1566_v4 = vadd.f32 %v1565_v22, %v1277_v17  ;;  %v1239_v25 = vpop.f32.mrb[86].mxu0  ;;  %v2047_v33 = vpop.f32.mrb[86].mxu1 }
 0x1c4   : > { %v1526_v34 = vadd.f32 %v2712_v10, %v1237_v21  ;;  %v1666_v37 = vmax.f32 %v1574_v12, 0.0  ;;  %v1240_v16 = vadd.f32 %v2566_v53, %v1239_v25  ;;  %v1577_v11 = vadd.f32 %v2047_v33, %v1288_v31  ;;  %v1241_v35 = vpop.f32.mrb[87].mxu0  ;;  %v1568_v41 = vpop.f32.mrb[87].mxu1 }
 0x1c5   : > { %v1664_v42 = vmax.f32 %v1566_v4, 0.0  ;;  %v1569_v45 = vadd.f32 %v1568_v41, %v1280_v29 }
 0x1c6   : > { %v1654_v19 = vmax.f32 %v1526_v34, 0.0  ;;  %1730 = vst.msk [vmem:[%s2580_s8 + $0x1b0] sm:$0xff] %vm937_vm0, %v1666_v37  ;;  %v1529_v8 = vadd.f32 %v2717_v18, %v1240_v16  ;;  %v1667_v46 = vmax.f32 %v1577_v11, 0.0  ;;  %v1304_v18 = vadd.f32 %v2566_v53, %v2545_v32 }
 0x1c7   : > { %1728 = vst.msk [vmem:[%s2580_s8 + $0x1a0] sm:$0xff] %vm937_vm0, %v1664_v42  ;;  %v1665_v10 = vmax.f32 %v1569_v45, 0.0 }
 0x1c8   : > { %1718 = vst.msk [vmem:[%s2580_s8 + $0x150] sm:$0xff] %vm937_vm0, %v1654_v19  ;;  %v1655_v50 = vmax.f32 %v1529_v8, 0.0  ;;  %1731 = vst.msk [vmem:[%s2580_s8 + $0x1b8] sm:$0xff] %vm937_vm0, %v1667_v46 }
 0x1c9   : > { %1729 = vst.msk [vmem:[%s2580_s8 + $0x1a8] sm:$0xff] %vm937_vm0, %v1665_v10  ;;  %v1244_v54 = vpop.f32.mrb[88].mxu0  ;;  %v2050_v15 = vpop.f32.mrb[88].mxu1 }
 0x1ca   : > { %1719 = vst.msk [vmem:[%s2580_s8 + $0x158] sm:$0xff] %vm937_vm0, %v1655_v50  ;;  %v1245_v39 = vadd.f32 %v2566_v53, %v1244_v54  ;;  %v1590_v28 = vadd.f32 %v2050_v15, %v1301_v49  ;;  %v1246_v7 = vpop.f32.mrb[89].mxu0  ;;  %v1581_v61 = vpop.f32.mrb[89].mxu1 }
 0x1cb   : > { %v1582_v20 = vadd.f32 %v1581_v61, %v1293_v47  ;;  %v1247_v1 = vpop.f32.mrb[90].mxu0  ;;  %v2051_v2 = vpop.f32.mrb[90].mxu1 }
 0x1cc   : > { %v1534_v52 = vadd.f32 %v2727_v62, %v1245_v39  ;;  %v1670_v57 = vmax.f32 %v1590_v28, 0.0  ;;  %v1248_v32 = vadd.f32 %v2566_v53, %v1247_v1  ;;  %v1593_v5 = vadd.f32 %v2051_v2, %v1304_v18  ;;  %v1249_v0 = vpop.f32.mrb[91].mxu0  ;;  %v1584_v26 = vpop.f32.mrb[91].mxu1 }
 0x1cd   : > { %v1668_v6 = vmax.f32 %v1582_v20, 0.0  ;;  %v1585_v58 = vadd.f32 %v1584_v26, %v1296_v60 }
 0x1ce   : > { %v1656_v27 = vmax.f32 %v1534_v52, 0.0  ;;  %1734 = vst.msk [vmem:[%s2580_s8 + $0x1d0] sm:$0xff] %vm937_vm0, %v1670_v57  ;;  %v1537_v24 = vadd.f32 %v2732_v38, %v1248_v32  ;;  %v1671_v9 = vmax.f32 %v1593_v5, 0.0  ;;  %v1320_v38 = vadd.f32 %v2566_v53, %v2561_v48 }
 0x1cf   : > { %1732 = vst.msk [vmem:[%s2580_s8 + $0x1c0] sm:$0xff] %vm937_vm0, %v1668_v6  ;;  %v1669_v62 = vmax.f32 %v1585_v58, 0.0 }
 0x1d0   : > { %1720 = vst.msk [vmem:[%s2580_s8 + $0x160] sm:$0xff] %vm937_vm0, %v1656_v27  ;;  %v1657_v56 = vmax.f32 %v1537_v24, 0.0  ;;  %1735 = vst.msk [vmem:[%s2580_s8 + $0x1d8] sm:$0xff] %vm937_vm0, %v1671_v9 }
 0x1d1   : > { %1733 = vst.msk [vmem:[%s2580_s8 + $0x1c8] sm:$0xff] %vm937_vm0, %v1669_v62  ;;  %v1252_v13 = vpop.f32.mrb[92].mxu0  ;;  %v2054_v14 = vpop.f32.mrb[92].mxu1 }
 0x1d2   : > { %1721 = vst.msk [vmem:[%s2580_s8 + $0x168] sm:$0xff] %vm937_vm0, %v1657_v56  ;;  %v1253_v3 = vadd.f32 %v2566_v53, %v1252_v13  ;;  %v1606_v44 = vadd.f32 %v2054_v14, %v1317_v51  ;;  %v1254_v17 = vpop.f32.mrb[93].mxu0  ;;  %v1597_v59 = vpop.f32.mrb[93].mxu1 }
 0x1d3   : > { %v1598_v36 = vadd.f32 %v1597_v59, %v1309_v63  ;;  %v1255_v31 = vpop.f32.mrb[94].mxu0  ;;  %v2055_v21 = vpop.f32.mrb[94].mxu1 }
 0x1d4   : > { %v1542_v12 = vadd.f32 %v2722_v30, %v1253_v3  ;;  %v1674_v48 = vmax.f32 %v1606_v44, 0.0  ;;  %v1256_v23 = vadd.f32 %v2566_v53, %v1255_v31  ;;  %v1609_v22 = vadd.f32 %v2055_v21, %v1320_v38  ;;  %v1257_v29 = vpop.f32.mrb[95].mxu0  ;;  %v1600_v4 = vpop.f32.mrb[95].mxu1 }
 0x1d5   : > { %v1672_v25 = vmax.f32 %v1598_v36, 0.0  ;;  %v1601_v33 = vadd.f32 %v1600_v4, %v1312_v55 }
 0x1d6   : > { %v1658_v34 = vmax.f32 %v1542_v12, 0.0  ;;  %1738 = vst.msk [vmem:[%s2580_s8 + $0x1f0] sm:$0xff] %vm937_vm0, %v1674_v48  ;;  %v1545_v40 = vadd.f32 %v2729_v43, %v1256_v23  ;;  %v1675_v37 = vmax.f32 %v1609_v22, 0.0 }
 0x1d7   : > { %1736 = vst.msk [vmem:[%s2580_s8 + $0x1e0] sm:$0xff] %vm937_vm0, %v1672_v25  ;;  %v1673_v30 = vmax.f32 %v1601_v33, 0.0 }
 0x1d8   : > { %1722 = vst.msk [vmem:[%s2580_s8 + $0x170] sm:$0xff] %vm937_vm0, %v1658_v34  ;;  %v1659_v16 = vmax.f32 %v1545_v40, 0.0  ;;  %1739 = vst.msk [vmem:[%s2580_s8 + $0x1f8] sm:$0xff] %vm937_vm0, %v1675_v37 }
 0x1d9   : > { %1737 = vst.msk [vmem:[%s2580_s8 + $0x1e8] sm:$0xff] %vm937_vm0, %v1673_v30 }
 0x1da   : > { %1723 = vst.msk [vmem:[%s2580_s8 + $0x178] sm:$0xff] %vm937_vm0, %v1659_v16 }
 0x1db PF: > { %s13_s12 = sadd.s32 1, %s2250_s12  }
 0x1dc   : > { %p10_p4 = scmp.ge.s32.totalorder %s13_s12, 26  }
 0x1de   :  { %12 = sbr.rel (!%p10_p4) target bundleno = 1 (0x1), region = 62 }

// kernel: spect_cnn_forward.6
= control target key start
LH: loop header
LB: loop body
LE: loop exit
PB: predicated region body
PF: predicated region fallthrough
CT: control target
= control target key end

     0   :  { %s1240_s12 = smov 0   ;;  %s1518_s0 = inlined_call_operand.vmem [shape: bf16[3072,128], index: 0, kind: input, shape index: {}]   ;;  %s1519_s1 = inlined_call_operand.vmem [shape: bf16[128,32], index: 1, kind: input, shape index: {}]   ;;  %s1520_s2 = inlined_call_operand.vmem [shape: f32[1,32], index: 2, kind: input, shape index: {}]   ;;  %s1521_s3 = inlined_call_operand.vmem [shape: f32[3072,32], index: 3, kind: output, shape index: {}]  }
   0x1 LB: > { %s976_s13 = sadd.s32 4294967295, %s1218_s12   ;;  %p980_p0 = scmp.ge.s32.totalorder %s1218_s12, 1  ;;  %s1218_s12 = sphi %s1240_s12, %s13_s12  }
   0x2   : > { %p138_p1 = scmp.lt.s32.totalorder %s1218_s12, 7 }
   0x4   : > { %p139_p2 = pnand %p980_p0, %p138_p1 }
   0x5   : > { %v1172_v0 = vld [vmem:[%s1519_s1] sm:$0xff] (!%p139_p2)   ;;  %s981_s16 = sshll.u32 (!%p139_p2), %s976_s13, 6  ;;  %v1173_v1 = vld [vmem:[%s1519_s1 + $0x8] sm:$0xff] (!%p139_p2)   ;;  %v1174_v2 = vld [vmem:[%s1519_s1 + $0x10] sm:$0xff] (!%p139_p2)   ;;  %vm855_vm0 = vcmask (!%p139_p2), 261120  }
   0x6   : > { %142 = sbr.rel (%p139_p2) target bundleno = 314 (0x13a), region = 32  ;;  %p163_p3 = scmp.lt.s32.totalorder (!%p139_p2), %s981_s16, 383  ;;  %1068 = vmatprep.subr.bf16.mxu0 (!%p139_p2), %v1172_v0  ;;  %1148 = vmatprep.subr.bf16.mxu1 (!%p139_p2), %v1172_v0  ;;  %v1175_v3 = vld [vmem:[%s1519_s1 + $0x18] sm:$0xff] (!%p139_p2)   ;;  %v1176_v6 = vld [vmem:[%s1519_s1 + $0x20] sm:$0xff] (!%p139_p2)   ;;  %v1177_v7 = vld [vmem:[%s1519_s1 + $0x28] sm:$0xff] (!%p139_p2)  }
   0x7   : > { %1069 = vmatpush3.bf16.msra.mxu0 (!%p139_p2), %v1172_v0  ;;  %1156 = vmatpush3.bf16.msra.mxu1 (!%p139_p2), %v1172_v0  ;;  %v1178_v8 = vld [vmem:[%s1519_s1 + $0x30] sm:$0xff] (!%p139_p2)   ;;  %v1179_v9 = vld [vmem:[%s1519_s1 + $0x38] sm:$0xff] (!%p139_p2)   ;;  %v1315_v40 = vld [vmem:[%s1520_s2] ss:$0 sm:$0xff] (!%p139_p2) }
   0x8   : > { %1070 = vmatprep.subr.bf16.mxu0 (!%p139_p2), %v1173_v1  ;;  %1149 = vmatprep.subr.bf16.mxu1 (!%p139_p2), %v1173_v1 }
   0xb   : > { %1071 = vmatpush3.bf16.msra.mxu0 (!%p139_p2), %v1173_v1  ;;  %1157 = vmatpush3.bf16.msra.mxu1 (!%p139_p2), %v1173_v1 }
   0xc   : > { %1072 = vmatprep.subr.bf16.mxu0 (!%p139_p2), %v1174_v2  ;;  %1150 = vmatprep.subr.bf16.mxu1 (!%p139_p2), %v1174_v2 }
   0xd   : > { %s1523_s16 = smov (!%p163_p3, %s981_s16), 383 }
   0xe   : > { %s982_s21 = sshll.u32 %s1523_s16, 2  ;;  %s984_s10 = sshll.u32 %s1523_s16, 3 }
   0xf   : > { %s1263_s24 = scalar_lea.vmem %s1518_s0, %s982_s21  ;;  %1073 = vmatpush3.bf16.msra.mxu0 %v1174_v2  ;;  %1158 = vmatpush3.bf16.msra.mxu1 %v1174_v2  ;;  %s1323_s14 = scalar_lea.vmem %s1521_s3, %s984_s10 }
  0x10   : > { %v1180_v4 = vld [vmem:[%s1263_s24] sm:$0xff]   ;;  %1074 = vmatprep.subr.bf16.mxu0 %v1175_v3  ;;  %1151 = vmatprep.subr.bf16.mxu1 %v1175_v3  ;;  %v1182_v10 = vld [vmem:[%s1263_s24 + $0x8] sm:$0xff]   ;;  %v1184_v12 = vld [vmem:[%s1263_s24 + $0x10] sm:$0xff]  }
  0x11   : > { %v1181_v5 = vld [vmem:[%s1263_s24 + $0x80] sm:$0xff]   ;;  %1084 = vmatprep.mubr.bf16.mxu0 %v1180_v4  ;;  %v1183_v11 = vld [vmem:[%s1263_s24 + $0x88] sm:$0xff]   ;;  %v1185_v13 = vld [vmem:[%s1263_s24 + $0x90] sm:$0xff]  }
  0x12   : > { %1116 = vmatprep.mubr.bf16.mxu1 %v1181_v5  ;;  %v1186_v14 = vld [vmem:[%s1263_s24 + $0x18] sm:$0xff]   ;;  %v1188_v16 = vld [vmem:[%s1263_s24 + $0x20] sm:$0xff]   ;;  %v1190_v18 = vld [vmem:[%s1263_s24 + $0x28] sm:$0xff]  }
  0x13   : > { %1075 = vmatpush3.bf16.msra.mxu0 %v1175_v3  ;;  %1159 = vmatpush3.bf16.msra.mxu1 %v1175_v3  ;;  %v1187_v15 = vld [vmem:[%s1263_s24 + $0x98] sm:$0xff]   ;;  %v1189_v17 = vld [vmem:[%s1263_s24 + $0xa0] sm:$0xff]   ;;  %v1191_v19 = vld [vmem:[%s1263_s24 + $0xa8] sm:$0xff]  }
  0x14   : > { %1076 = vmatprep.subr.bf16.mxu0 %v1176_v6  ;;  %1152 = vmatprep.subr.bf16.mxu1 %v1176_v6  ;;  %v1192_v20 = vld [vmem:[%s1263_s24 + $0x30] sm:$0xff]   ;;  %v1194_v22 = vld [vmem:[%s1263_s24 + $0x38] sm:$0xff]   ;;  %v1196_v24 = vld [vmem:[%s1263_s24 + $0x40] sm:$0xff]  }
  0x15   : > { %v1193_v21 = vld [vmem:[%s1263_s24 + $0xb0] sm:$0xff]   ;;  %v1195_v23 = vld [vmem:[%s1263_s24 + $0xb8] sm:$0xff]   ;;  %v1197_v25 = vld [vmem:[%s1263_s24 + $0xc0] sm:$0xff]  }
  0x16   : > { %v1198_v26 = vld [vmem:[%s1263_s24 + $0x48] sm:$0xff]   ;;  %v1200_v28 = vld [vmem:[%s1263_s24 + $0x50] sm:$0xff]   ;;  %v1202_v30 = vld [vmem:[%s1263_s24 + $0x58] sm:$0xff]  }
  0x17   : > { %1077 = vmatpush3.bf16.msra.mxu0 %v1176_v6  ;;  %1160 = vmatpush3.bf16.msra.mxu1 %v1176_v6  ;;  %v1199_v27 = vld [vmem:[%s1263_s24 + $0xc8] sm:$0xff]   ;;  %v1201_v29 = vld [vmem:[%s1263_s24 + $0xd0] sm:$0xff]   ;;  %v1203_v31 = vld [vmem:[%s1263_s24 + $0xd8] sm:$0xff]  }
  0x18   : > { %1078 = vmatprep.subr.bf16.mxu0 %v1177_v7  ;;  %1153 = vmatprep.subr.bf16.mxu1 %v1177_v7  ;;  %v1204_v32 = vld [vmem:[%s1263_s24 + $0x60] sm:$0xff]   ;;  %v1206_v34 = vld [vmem:[%s1263_s24 + $0x68] sm:$0xff]   ;;  %v1208_v36 = vld [vmem:[%s1263_s24 + $0x70] sm:$0xff]  }
  0x19   : > { %v1205_v33 = vld [vmem:[%s1263_s24 + $0xe0] sm:$0xff]   ;;  %v1207_v35 = vld [vmem:[%s1263_s24 + $0xe8] sm:$0xff]   ;;  %v1209_v37 = vld [vmem:[%s1263_s24 + $0xf0] sm:$0xff]  }
  0x1a   : > { %v1210_v38 = vld [vmem:[%s1263_s24 + $0x78] sm:$0xff]  }
  0x1b   : > { %1079 = vmatpush3.bf16.msra.mxu0 %v1177_v7  ;;  %1161 = vmatpush3.bf16.msra.mxu1 %v1177_v7  ;;  %v1211_v39 = vld [vmem:[%s1263_s24 + $0xf8] sm:$0xff]  }
  0x1c   : > { %1080 = vmatprep.subr.bf16.mxu0 %v1178_v8  ;;  %1154 = vmatprep.subr.bf16.mxu1 %v1178_v8 }
  0x1f   : > { %1081 = vmatpush3.bf16.msra.mxu0 %v1178_v8  ;;  %1162 = vmatpush3.bf16.msra.mxu1 %v1178_v8 }
  0x20   : > { %1082 = vmatprep.subr.bf16.mxu0 %v1179_v9  ;;  %1155 = vmatprep.subr.bf16.mxu1 %v1179_v9 }
  0x23   : > { %1083 = vmatpush3.bf16.msra.mxu0 %v1179_v9  ;;  %1163 = vmatpush3.bf16.msra.mxu1 %v1179_v9 }
  0x26   : > { %1085 = vmatmul.mubr.bf16.vlgmr.msra.gmra.mrb[0].mxu0 %v1182_v10  ;;  %1117 = vmatmul.mubr.bf16.vlgmr.msra.gmra.mrb[0].mxu1 %v1183_v11 }
  0x27   : > { %1088 = vmatprep.mubr.bf16.mxu0 %v1184_v12  ;;  %1120 = vmatprep.mubr.bf16.mxu1 %v1185_v13 }
  0x2e   : > { %1089 = vmatmul.mubr.bf16.gmra.mrb[4].mxu0 %v1186_v14  ;;  %1121 = vmatmul.mubr.bf16.gmra.mrb[4].mxu1 %v1187_v15 }
  0x2f   : > { %1092 = vmatprep.mubr.bf16.mxu0 %v1188_v16  ;;  %1124 = vmatprep.mubr.bf16.mxu1 %v1189_v17 }
  0x36   : > { %1093 = vmatmul.mubr.bf16.gmra.mrb[8].mxu0 %v1190_v18  ;;  %1125 = vmatmul.mubr.bf16.gmra.mrb[8].mxu1 %v1191_v19 }
  0x37   : > { %1096 = vmatprep.mubr.bf16.mxu0 %v1192_v20  ;;  %1128 = vmatprep.mubr.bf16.mxu1 %v1193_v21 }
  0x3e   : > { %1097 = vmatmul.mubr.bf16.gmra.mrb[12].mxu0 %v1194_v22  ;;  %1129 = vmatmul.mubr.bf16.gmra.mrb[12].mxu1 %v1195_v23 }
  0x3f   : > { %1100 = vmatprep.mubr.bf16.mxu0 %v1196_v24  ;;  %1132 = vmatprep.mubr.bf16.mxu1 %v1197_v25 }
  0x46   : > { %1101 = vmatmul.mubr.bf16.gmra.mrb[16].mxu0 %v1198_v26  ;;  %1133 = vmatmul.mubr.bf16.gmra.mrb[16].mxu1 %v1199_v27 }
  0x47   : > { %1104 = vmatprep.mubr.bf16.mxu0 %v1200_v28  ;;  %1136 = vmatprep.mubr.bf16.mxu1 %v1201_v29 }
  0x4e   : > { %1105 = vmatmul.mubr.bf16.gmra.mrb[20].mxu0 %v1202_v30  ;;  %1137 = vmatmul.mubr.bf16.gmra.mrb[20].mxu1 %v1203_v31 }
  0x4f   : > { %1108 = vmatprep.mubr.bf16.mxu0 %v1204_v32  ;;  %1140 = vmatprep.mubr.bf16.mxu1 %v1205_v33 }
  0x56   : > { %1109 = vmatmul.mubr.bf16.gmra.mrb[24].mxu0 %v1206_v34  ;;  %1141 = vmatmul.mubr.bf16.gmra.mrb[24].mxu1 %v1207_v35 }
  0x57   : > { %1112 = vmatprep.mubr.bf16.mxu0 %v1208_v36  ;;  %1144 = vmatprep.mubr.bf16.mxu1 %v1209_v37 }
  0x5e   : > { %1113 = vmatmul.mubr.bf16.gmra.mrb[28].mxu0 %v1210_v38  ;;  %1145 = vmatmul.mubr.bf16.gmra.mrb[28].mxu1 %v1211_v39 }
  0xf9   : > { %v1086_v41 = vpop.f32.mrb[0].mxu0  ;;  %v1118_v42 = vpop.f32.mrb[0].mxu1 }
  0xfa   : > { %v545_v43 = vadd.f32 %v1086_v41, %v1315_v40  ;;  %v673_v44 = vadd.f32 %v1118_v42, %v1315_v40  ;;  %v536_v45 = vpop.f32.mrb[1].mxu0  ;;  %v664_v46 = vpop.f32.mrb[1].mxu1 }
  0xfb   : > { %v537_v47 = vadd.f32 %v1315_v40, %v536_v45  ;;  %v665_v48 = vadd.f32 %v1315_v40, %v664_v46  ;;  %v1087_v49 = vpop.f32.mrb[2].mxu0  ;;  %v1119_v50 = vpop.f32.mrb[2].mxu1 }
  0xfc   : > { %v793_v51 = vmax.f32 %v545_v43, 0.0  ;;  %v825_v52 = vmax.f32 %v673_v44, 0.0  ;;  %v548_v53 = vadd.f32 %v1087_v49, %v1315_v40  ;;  %v676_v54 = vadd.f32 %v1119_v50, %v1315_v40  ;;  %v539_v55 = vpop.f32.mrb[3].mxu0  ;;  %v667_v56 = vpop.f32.mrb[3].mxu1 }
  0xfd   : > { %v791_v57 = vmax.f32 %v537_v47, 0.0  ;;  %v823_v58 = vmax.f32 %v665_v48, 0.0  ;;  %v540_v59 = vadd.f32 %v1315_v40, %v539_v55  ;;  %v668_v60 = vadd.f32 %v1315_v40, %v667_v56 }
  0xfe   : > { %858 = vst.msk [vmem:[%s1323_s14 + $0x10] sm:$0xff] %vm855_vm0, %v793_v51  ;;  %890 = vst.msk [vmem:[%s1323_s14 + $0x110] sm:$0xff] %vm855_vm0, %v825_v52  ;;  %v794_v61 = vmax.f32 %v548_v53, 0.0  ;;  %v826_v62 = vmax.f32 %v676_v54, 0.0 }
  0xff   : > { %856 = vst.msk [vmem:[%s1323_s14] sm:$0xff] %vm855_vm0, %v791_v57  ;;  %888 = vst.msk [vmem:[%s1323_s14 + $0x100] sm:$0xff] %vm855_vm0, %v823_v58  ;;  %v792_v63 = vmax.f32 %v540_v59, 0.0  ;;  %v824_v0 = vmax.f32 %v668_v60, 0.0 }
 0x100   : > { %859 = vst.msk [vmem:[%s1323_s14 + $0x18] sm:$0xff] %vm855_vm0, %v794_v61  ;;  %891 = vst.msk [vmem:[%s1323_s14 + $0x118] sm:$0xff] %vm855_vm0, %v826_v62 }
 0x101   : > { %857 = vst.msk [vmem:[%s1323_s14 + $0x8] sm:$0xff] %vm855_vm0, %v792_v63  ;;  %889 = vst.msk [vmem:[%s1323_s14 + $0x108] sm:$0xff] %vm855_vm0, %v824_v0  ;;  %v1090_v1 = vpop.f32.mrb[4].mxu0  ;;  %v1122_v2 = vpop.f32.mrb[4].mxu1 }
 0x102   : > { %v561_v3 = vadd.f32 %v1090_v1, %v1315_v40  ;;  %v689_v4 = vadd.f32 %v1122_v2, %v1315_v40  ;;  %v552_v5 = vpop.f32.mrb[5].mxu0  ;;  %v680_v6 = vpop.f32.mrb[5].mxu1 }
 0x103   : > { %v553_v7 = vadd.f32 %v1315_v40, %v552_v5  ;;  %v681_v8 = vadd.f32 %v1315_v40, %v680_v6  ;;  %v1091_v9 = vpop.f32.mrb[6].mxu0  ;;  %v1123_v10 = vpop.f32.mrb[6].mxu1 }
 0x104   : > { %v797_v11 = vmax.f32 %v561_v3, 0.0  ;;  %v829_v12 = vmax.f32 %v689_v4, 0.0  ;;  %v564_v13 = vadd.f32 %v1091_v9, %v1315_v40  ;;  %v692_v14 = vadd.f32 %v1123_v10, %v1315_v40  ;;  %v555_v15 = vpop.f32.mrb[7].mxu0  ;;  %v683_v16 = vpop.f32.mrb[7].mxu1 }
 0x105   : > { %v795_v17 = vmax.f32 %v553_v7, 0.0  ;;  %v827_v18 = vmax.f32 %v681_v8, 0.0  ;;  %v556_v19 = vadd.f32 %v1315_v40, %v555_v15  ;;  %v684_v20 = vadd.f32 %v1315_v40, %v683_v16 }
 0x106   : > { %862 = vst.msk [vmem:[%s1323_s14 + $0x30] sm:$0xff] %vm855_vm0, %v797_v11  ;;  %894 = vst.msk [vmem:[%s1323_s14 + $0x130] sm:$0xff] %vm855_vm0, %v829_v12  ;;  %v798_v21 = vmax.f32 %v564_v13, 0.0  ;;  %v830_v22 = vmax.f32 %v692_v14, 0.0 }
 0x107   : > { %860 = vst.msk [vmem:[%s1323_s14 + $0x20] sm:$0xff] %vm855_vm0, %v795_v17  ;;  %892 = vst.msk [vmem:[%s1323_s14 + $0x120] sm:$0xff] %vm855_vm0, %v827_v18  ;;  %v796_v23 = vmax.f32 %v556_v19, 0.0  ;;  %v828_v24 = vmax.f32 %v684_v20, 0.0 }
 0x108   : > { %863 = vst.msk [vmem:[%s1323_s14 + $0x38] sm:$0xff] %vm855_vm0, %v798_v21  ;;  %895 = vst.msk [vmem:[%s1323_s14 + $0x138] sm:$0xff] %vm855_vm0, %v830_v22 }
 0x109   : > { %861 = vst.msk [vmem:[%s1323_s14 + $0x28] sm:$0xff] %vm855_vm0, %v796_v23  ;;  %893 = vst.msk [vmem:[%s1323_s14 + $0x128] sm:$0xff] %vm855_vm0, %v828_v24  ;;  %v1094_v25 = vpop.f32.mrb[8].mxu0  ;;  %v1126_v26 = vpop.f32.mrb[8].mxu1 }
 0x10a   : > { %v577_v27 = vadd.f32 %v1094_v25, %v1315_v40  ;;  %v705_v28 = vadd.f32 %v1126_v26, %v1315_v40  ;;  %v568_v29 = vpop.f32.mrb[9].mxu0  ;;  %v696_v30 = vpop.f32.mrb[9].mxu1 }
 0x10b   : > { %v569_v31 = vadd.f32 %v1315_v40, %v568_v29  ;;  %v697_v32 = vadd.f32 %v1315_v40, %v696_v30  ;;  %v1095_v33 = vpop.f32.mrb[10].mxu0  ;;  %v1127_v34 = vpop.f32.mrb[10].mxu1 }
 0x10c   : > { %v801_v35 = vmax.f32 %v577_v27, 0.0  ;;  %v833_v36 = vmax.f32 %v705_v28, 0.0  ;;  %v580_v37 = vadd.f32 %v1095_v33, %v1315_v40  ;;  %v708_v38 = vadd.f32 %v1127_v34, %v1315_v40  ;;  %v571_v39 = vpop.f32.mrb[11].mxu0  ;;  %v699_v41 = vpop.f32.mrb[11].mxu1 }
 0x10d   : > { %v799_v42 = vmax.f32 %v569_v31, 0.0  ;;  %v831_v43 = vmax.f32 %v697_v32, 0.0  ;;  %v572_v44 = vadd.f32 %v1315_v40, %v571_v39  ;;  %v700_v45 = vadd.f32 %v1315_v40, %v699_v41 }
 0x10e   : > { %866 = vst.msk [vmem:[%s1323_s14 + $0x50] sm:$0xff] %vm855_vm0, %v801_v35  ;;  %898 = vst.msk [vmem:[%s1323_s14 + $0x150] sm:$0xff] %vm855_vm0, %v833_v36  ;;  %v802_v46 = vmax.f32 %v580_v37, 0.0  ;;  %v834_v47 = vmax.f32 %v708_v38, 0.0 }
 0x10f   : > { %864 = vst.msk [vmem:[%s1323_s14 + $0x40] sm:$0xff] %vm855_vm0, %v799_v42  ;;  %896 = vst.msk [vmem:[%s1323_s14 + $0x140] sm:$0xff] %vm855_vm0, %v831_v43  ;;  %v800_v48 = vmax.f32 %v572_v44, 0.0  ;;  %v832_v49 = vmax.f32 %v700_v45, 0.0 }
 0x110   : > { %867 = vst.msk [vmem:[%s1323_s14 + $0x58] sm:$0xff] %vm855_vm0, %v802_v46  ;;  %899 = vst.msk [vmem:[%s1323_s14 + $0x158] sm:$0xff] %vm855_vm0, %v834_v47 }
 0x111   : > { %865 = vst.msk [vmem:[%s1323_s14 + $0x48] sm:$0xff] %vm855_vm0, %v800_v48  ;;  %897 = vst.msk [vmem:[%s1323_s14 + $0x148] sm:$0xff] %vm855_vm0, %v832_v49  ;;  %v1098_v50 = vpop.f32.mrb[12].mxu0  ;;  %v1130_v51 = vpop.f32.mrb[12].mxu1 }
 0x112   : > { %v593_v52 = vadd.f32 %v1098_v50, %v1315_v40  ;;  %v721_v53 = vadd.f32 %v1130_v51, %v1315_v40  ;;  %v584_v54 = vpop.f32.mrb[13].mxu0  ;;  %v712_v55 = vpop.f32.mrb[13].mxu1 }
 0x113   : > { %v585_v56 = vadd.f32 %v1315_v40, %v584_v54  ;;  %v713_v57 = vadd.f32 %v1315_v40, %v712_v55  ;;  %v1099_v58 = vpop.f32.mrb[14].mxu0  ;;  %v1131_v59 = vpop.f32.mrb[14].mxu1 }
 0x114   : > { %v805_v60 = vmax.f32 %v593_v52, 0.0  ;;  %v837_v61 = vmax.f32 %v721_v53, 0.0  ;;  %v596_v62 = vadd.f32 %v1099_v58, %v1315_v40  ;;  %v724_v63 = vadd.f32 %v1131_v59, %v1315_v40  ;;  %v587_v0 = vpop.f32.mrb[15].mxu0  ;;  %v715_v1 = vpop.f32.mrb[15].mxu1 }
 0x115   : > { %v803_v2 = vmax.f32 %v585_v56, 0.0  ;;  %v835_v3 = vmax.f32 %v713_v57, 0.0  ;;  %v588_v4 = vadd.f32 %v1315_v40, %v587_v0  ;;  %v716_v5 = vadd.f32 %v1315_v40, %v715_v1 }
 0x116   : > { %870 = vst.msk [vmem:[%s1323_s14 + $0x70] sm:$0xff] %vm855_vm0, %v805_v60  ;;  %902 = vst.msk [vmem:[%s1323_s14 + $0x170] sm:$0xff] %vm855_vm0, %v837_v61  ;;  %v806_v6 = vmax.f32 %v596_v62, 0.0  ;;  %v838_v7 = vmax.f32 %v724_v63, 0.0 }
 0x117   : > { %868 = vst.msk [vmem:[%s1323_s14 + $0x60] sm:$0xff] %vm855_vm0, %v803_v2  ;;  %900 = vst.msk [vmem:[%s1323_s14 + $0x160] sm:$0xff] %vm855_vm0, %v835_v3  ;;  %v804_v8 = vmax.f32 %v588_v4, 0.0  ;;  %v836_v9 = vmax.f32 %v716_v5, 0.0 }
 0x118   : > { %871 = vst.msk [vmem:[%s1323_s14 + $0x78] sm:$0xff] %vm855_vm0, %v806_v6  ;;  %903 = vst.msk [vmem:[%s1323_s14 + $0x178] sm:$0xff] %vm855_vm0, %v838_v7 }
 0x119   : > { %869 = vst.msk [vmem:[%s1323_s14 + $0x68] sm:$0xff] %vm855_vm0, %v804_v8  ;;  %901 = vst.msk [vmem:[%s1323_s14 + $0x168] sm:$0xff] %vm855_vm0, %v836_v9  ;;  %v1102_v10 = vpop.f32.mrb[16].mxu0  ;;  %v1134_v11 = vpop.f32.mrb[16].mxu1 }
 0x11a   : > { %v609_v12 = vadd.f32 %v1102_v10, %v1315_v40  ;;  %v737_v13 = vadd.f32 %v1134_v11, %v1315_v40  ;;  %v600_v14 = vpop.f32.mrb[17].mxu0  ;;  %v728_v15 = vpop.f32.mrb[17].mxu1 }
 0x11b   : > { %v601_v16 = vadd.f32 %v1315_v40, %v600_v14  ;;  %v729_v17 = vadd.f32 %v1315_v40, %v728_v15  ;;  %v1103_v18 = vpop.f32.mrb[18].mxu0  ;;  %v1135_v19 = vpop.f32.mrb[18].mxu1 }
 0x11c   : > { %v809_v20 = vmax.f32 %v609_v12, 0.0  ;;  %v841_v21 = vmax.f32 %v737_v13, 0.0  ;;  %v612_v22 = vadd.f32 %v1103_v18, %v1315_v40  ;;  %v740_v23 = vadd.f32 %v1135_v19, %v1315_v40  ;;  %v603_v24 = vpop.f32.mrb[19].mxu0  ;;  %v731_v25 = vpop.f32.mrb[19].mxu1 }
 0x11d   : > { %v807_v26 = vmax.f32 %v601_v16, 0.0  ;;  %v839_v27 = vmax.f32 %v729_v17, 0.0  ;;  %v604_v28 = vadd.f32 %v1315_v40, %v603_v24  ;;  %v732_v29 = vadd.f32 %v1315_v40, %v731_v25 }
 0x11e   : > { %874 = vst.msk [vmem:[%s1323_s14 + $0x90] sm:$0xff] %vm855_vm0, %v809_v20  ;;  %906 = vst.msk [vmem:[%s1323_s14 + $0x190] sm:$0xff] %vm855_vm0, %v841_v21  ;;  %v810_v30 = vmax.f32 %v612_v22, 0.0  ;;  %v842_v31 = vmax.f32 %v740_v23, 0.0 }
 0x11f   : > { %872 = vst.msk [vmem:[%s1323_s14 + $0x80] sm:$0xff] %vm855_vm0, %v807_v26  ;;  %904 = vst.msk [vmem:[%s1323_s14 + $0x180] sm:$0xff] %vm855_vm0, %v839_v27  ;;  %v808_v32 = vmax.f32 %v604_v28, 0.0  ;;  %v840_v33 = vmax.f32 %v732_v29, 0.0 }
 0x120   : > { %875 = vst.msk [vmem:[%s1323_s14 + $0x98] sm:$0xff] %vm855_vm0, %v810_v30  ;;  %907 = vst.msk [vmem:[%s1323_s14 + $0x198] sm:$0xff] %vm855_vm0, %v842_v31 }
 0x121   : > { %873 = vst.msk [vmem:[%s1323_s14 + $0x88] sm:$0xff] %vm855_vm0, %v808_v32  ;;  %905 = vst.msk [vmem:[%s1323_s14 + $0x188] sm:$0xff] %vm855_vm0, %v840_v33  ;;  %v1106_v34 = vpop.f32.mrb[20].mxu0  ;;  %v1138_v35 = vpop.f32.mrb[20].mxu1 }
 0x122   : > { %v625_v36 = vadd.f32 %v1106_v34, %v1315_v40  ;;  %v753_v37 = vadd.f32 %v1138_v35, %v1315_v40  ;;  %v616_v38 = vpop.f32.mrb[21].mxu0  ;;  %v744_v39 = vpop.f32.mrb[21].mxu1 }
 0x123   : > { %v617_v41 = vadd.f32 %v1315_v40, %v616_v38  ;;  %v745_v42 = vadd.f32 %v1315_v40, %v744_v39  ;;  %v1107_v43 = vpop.f32.mrb[22].mxu0  ;;  %v1139_v44 = vpop.f32.mrb[22].mxu1 }
 0x124   : > { %v813_v45 = vmax.f32 %v625_v36, 0.0  ;;  %v845_v46 = vmax.f32 %v753_v37, 0.0  ;;  %v628_v47 = vadd.f32 %v1107_v43, %v1315_v40  ;;  %v756_v48 = vadd.f32 %v1139_v44, %v1315_v40  ;;  %v619_v49 = vpop.f32.mrb[23].mxu0  ;;  %v747_v50 = vpop.f32.mrb[23].mxu1 }
 0x125   : > { %v811_v51 = vmax.f32 %v617_v41, 0.0  ;;  %v843_v52 = vmax.f32 %v745_v42, 0.0  ;;  %v620_v53 = vadd.f32 %v1315_v40, %v619_v49  ;;  %v748_v54 = vadd.f32 %v1315_v40, %v747_v50 }
 0x126   : > { %878 = vst.msk [vmem:[%s1323_s14 + $0xb0] sm:$0xff] %vm855_vm0, %v813_v45  ;;  %910 = vst.msk [vmem:[%s1323_s14 + $0x1b0] sm:$0xff] %vm855_vm0, %v845_v46  ;;  %v814_v55 = vmax.f32 %v628_v47, 0.0  ;;  %v846_v56 = vmax.f32 %v756_v48, 0.0 }
 0x127   : > { %876 = vst.msk [vmem:[%s1323_s14 + $0xa0] sm:$0xff] %vm855_vm0, %v811_v51  ;;  %908 = vst.msk [vmem:[%s1323_s14 + $0x1a0] sm:$0xff] %vm855_vm0, %v843_v52  ;;  %v812_v57 = vmax.f32 %v620_v53, 0.0  ;;  %v844_v58 = vmax.f32 %v748_v54, 0.0 }
 0x128   : > { %879 = vst.msk [vmem:[%s1323_s14 + $0xb8] sm:$0xff] %vm855_vm0, %v814_v55  ;;  %911 = vst.msk [vmem:[%s1323_s14 + $0x1b8] sm:$0xff] %vm855_vm0, %v846_v56 }
 0x129   : > { %877 = vst.msk [vmem:[%s1323_s14 + $0xa8] sm:$0xff] %vm855_vm0, %v812_v57  ;;  %909 = vst.msk [vmem:[%s1323_s14 + $0x1a8] sm:$0xff] %vm855_vm0, %v844_v58  ;;  %v1110_v59 = vpop.f32.mrb[24].mxu0  ;;  %v1142_v60 = vpop.f32.mrb[24].mxu1 }
 0x12a   : > { %v641_v61 = vadd.f32 %v1110_v59, %v1315_v40  ;;  %v769_v62 = vadd.f32 %v1142_v60, %v1315_v40  ;;  %v632_v63 = vpop.f32.mrb[25].mxu0  ;;  %v760_v0 = vpop.f32.mrb[25].mxu1 }
 0x12b   : > { %v633_v1 = vadd.f32 %v1315_v40, %v632_v63  ;;  %v761_v2 = vadd.f32 %v1315_v40, %v760_v0  ;;  %v1111_v3 = vpop.f32.mrb[26].mxu0  ;;  %v1143_v4 = vpop.f32.mrb[26].mxu1 }
 0x12c   : > { %v817_v5 = vmax.f32 %v641_v61, 0.0  ;;  %v849_v6 = vmax.f32 %v769_v62, 0.0  ;;  %v644_v7 = vadd.f32 %v1111_v3, %v1315_v40  ;;  %v772_v8 = vadd.f32 %v1143_v4, %v1315_v40  ;;  %v635_v9 = vpop.f32.mrb[27].mxu0  ;;  %v763_v10 = vpop.f32.mrb[27].mxu1 }
 0x12d   : > { %v815_v11 = vmax.f32 %v633_v1, 0.0  ;;  %v847_v12 = vmax.f32 %v761_v2, 0.0  ;;  %v636_v13 = vadd.f32 %v1315_v40, %v635_v9  ;;  %v764_v14 = vadd.f32 %v1315_v40, %v763_v10 }
 0x12e   : > { %882 = vst.msk [vmem:[%s1323_s14 + $0xd0] sm:$0xff] %vm855_vm0, %v817_v5  ;;  %914 = vst.msk [vmem:[%s1323_s14 + $0x1d0] sm:$0xff] %vm855_vm0, %v849_v6  ;;  %v818_v15 = vmax.f32 %v644_v7, 0.0  ;;  %v850_v16 = vmax.f32 %v772_v8, 0.0 }
 0x12f   : > { %880 = vst.msk [vmem:[%s1323_s14 + $0xc0] sm:$0xff] %vm855_vm0, %v815_v11  ;;  %912 = vst.msk [vmem:[%s1323_s14 + $0x1c0] sm:$0xff] %vm855_vm0, %v847_v12  ;;  %v816_v17 = vmax.f32 %v636_v13, 0.0  ;;  %v848_v18 = vmax.f32 %v764_v14, 0.0 }
 0x130   : > { %883 = vst.msk [vmem:[%s1323_s14 + $0xd8] sm:$0xff] %vm855_vm0, %v818_v15  ;;  %915 = vst.msk [vmem:[%s1323_s14 + $0x1d8] sm:$0xff] %vm855_vm0, %v850_v16 }
 0x131   : > { %881 = vst.msk [vmem:[%s1323_s14 + $0xc8] sm:$0xff] %vm855_vm0, %v816_v17  ;;  %913 = vst.msk [vmem:[%s1323_s14 + $0x1c8] sm:$0xff] %vm855_vm0, %v848_v18  ;;  %v1114_v19 = vpop.f32.mrb[28].mxu0  ;;  %v1146_v20 = vpop.f32.mrb[28].mxu1 }
 0x132   : > { %v657_v21 = vadd.f32 %v1114_v19, %v1315_v40  ;;  %v785_v22 = vadd.f32 %v1146_v20, %v1315_v40  ;;  %v648_v23 = vpop.f32.mrb[29].mxu0  ;;  %v776_v24 = vpop.f32.mrb[29].mxu1 }
 0x133   : > { %v649_v25 = vadd.f32 %v1315_v40, %v648_v23  ;;  %v777_v26 = vadd.f32 %v1315_v40, %v776_v24  ;;  %v1115_v27 = vpop.f32.mrb[30].mxu0  ;;  %v1147_v28 = vpop.f32.mrb[30].mxu1 }
 0x134   : > { %v821_v29 = vmax.f32 %v657_v21, 0.0  ;;  %v853_v30 = vmax.f32 %v785_v22, 0.0  ;;  %v660_v31 = vadd.f32 %v1115_v27, %v1315_v40  ;;  %v788_v32 = vadd.f32 %v1147_v28, %v1315_v40  ;;  %v651_v33 = vpop.f32.mrb[31].mxu0  ;;  %v779_v34 = vpop.f32.mrb[31].mxu1 }
 0x135   : > { %v819_v35 = vmax.f32 %v649_v25, 0.0  ;;  %v851_v36 = vmax.f32 %v777_v26, 0.0  ;;  %v652_v37 = vadd.f32 %v1315_v40, %v651_v33  ;;  %v780_v38 = vadd.f32 %v1315_v40, %v779_v34 }
 0x136   : > { %886 = vst.msk [vmem:[%s1323_s14 + $0xf0] sm:$0xff] %vm855_vm0, %v821_v29  ;;  %918 = vst.msk [vmem:[%s1323_s14 + $0x1f0] sm:$0xff] %vm855_vm0, %v853_v30  ;;  %v822_v39 = vmax.f32 %v660_v31, 0.0  ;;  %v854_v41 = vmax.f32 %v788_v32, 0.0 }
 0x137   : > { %884 = vst.msk [vmem:[%s1323_s14 + $0xe0] sm:$0xff] %vm855_vm0, %v819_v35  ;;  %916 = vst.msk [vmem:[%s1323_s14 + $0x1e0] sm:$0xff] %vm855_vm0, %v851_v36  ;;  %v820_v42 = vmax.f32 %v652_v37, 0.0  ;;  %v852_v43 = vmax.f32 %v780_v38, 0.0 }
 0x138   : > { %887 = vst.msk [vmem:[%s1323_s14 + $0xf8] sm:$0xff] %vm855_vm0, %v822_v39  ;;  %919 = vst.msk [vmem:[%s1323_s14 + $0x1f8] sm:$0xff] %vm855_vm0, %v854_v41 }
 0x139   : > { %885 = vst.msk [vmem:[%s1323_s14 + $0xe8] sm:$0xff] %vm855_vm0, %v820_v42  ;;  %917 = vst.msk [vmem:[%s1323_s14 + $0x1e8] sm:$0xff] %vm855_vm0, %v852_v43 }
 0x13a PF: > { %s13_s12 = sadd.s32 1, %s1218_s12  }
 0x13b   : > { %p10_p4 = scmp.ge.s32.totalorder %s13_s12, 8  }
 0x13d   :  { %12 = sbr.rel (!%p10_p4) target bundleno = 1 (0x1), region = 62 }

// kernel: spect_cnn_forward.7
= control target key start
LH: loop header
LB: loop body
LE: loop exit
PB: predicated region body
PF: predicated region fallthrough
CT: control target
= control target key end

     0   :  { %vm12440_vm0 = vcmask 80896   ;;  %s19911_s1 = inlined_call_operand.vmem [shape: bf16[3072,1024], index: 1, kind: input, shape index: {}]   ;;  %s19912_s0 = inlined_call_operand.vmem [shape: f32[8,3072], index: 0, kind: input, shape index: {}]   ;;  %s19913_s2 = inlined_call_operand.vmem [shape: f32[1,1024], index: 2, kind: input, shape index: {}]   ;;  %s19914_s3 = inlined_call_operand.vmem [shape: bf16[1024,256], index: 3, kind: input, shape index: {}]   ;;  %s19915_s5 = inlined_call_operand.vmem [shape: bf16[256,10], index: 5, kind: input, shape index: {}]   ;;  %s19916_s4 = inlined_call_operand.vmem [shape: f32[1,256], index: 4, kind: input, shape index: {}]   ;;  %s19917_s6 = inlined_call_operand.vmem [shape: f32[1,10], index: 6, kind: input, shape index: {}]   ;;  %s19918_s7 = inlined_call_operand.vmem [shape: f32[8,10], index: 7, kind: output, shape index: {}]  }
   0x1   :  { %v75_v0 = vld [vmem:[%s19911_s1] sm:$0xff]  ;;  %v28_v53 = vld [vmem:[%s19912_s0 + $0x8] sm:$0xff] }
   0x2   :  { %v79_v1 = vld [vmem:[%s19911_s1 + $0x20] sm:$0xff]  ;;  %v14688_v57 = vpack.c.bf16 %v28_v53, %v28_v53  ;;  %v32_v58 = vld [vmem:[%s19912_s0 + $0x28] sm:$0xff] }
   0x3   :  { %v331_v2 = vld [vmem:[%s19911_s1 + $0x800] sm:$0xff]  ;;  %v12447_v3 = vcombine.high %v75_v0, %v79_v1  ;;  %v12446_v5 = vcombine.low %v75_v0, %v79_v1  ;;  %v14699_v61 = vpack.c.bf16 %v32_v58, %v32_v58 }
   0x4   :  { %v335_v4 = vld [vmem:[%s19911_s1 + $0x820] sm:$0xff]  ;;  %9365 = vmatprep.mubr.bf16.mxu1 %v14688_v57 }
   0x5   :  { %v83_v6 = vld [vmem:[%s19911_s1 + $0x40] sm:$0xff]  ;;  %v12703_v8 = vcombine.high %v331_v2, %v335_v4  ;;  %v12702_v9 = vcombine.low %v331_v2, %v335_v4  ;;  %9333 = vmatprep.subr.bf16.mxu1 %v12447_v3  ;;  %9447 = vmatprep.mubr.bf16.mxu0 %v14699_v61 }
   0x6   :  { %v87_v7 = vld [vmem:[%s19911_s1 + $0x60] sm:$0xff]  ;;  %9334 = vmatpush1.bf16.msra.mxu1 %v12446_v5 }
   0x7   :  { %v12455_v10 = vcombine.high %v83_v6, %v87_v7  ;;  %v339_v11 = vld [vmem:[%s19911_s1 + $0x840] sm:$0xff]  ;;  %9415 = vmatprep.subr.bf16.mxu0 %v12703_v8  ;;  %v12454_v18 = vcombine.low %v83_v6, %v87_v7 }
   0x8   :  { %v343_v12 = vld [vmem:[%s19911_s1 + $0x860] sm:$0xff]  ;;  %9416 = vmatpush1.bf16.msra.mxu0 %v12702_v9 }
   0x9   :  { %v91_v13 = vld [vmem:[%s19911_s1 + $0x80] sm:$0xff]  ;;  %v12711_v14 = vcombine.high %v339_v11, %v343_v12  ;;  %9335 = vmatprep.subr.bf16.mxu1 %v12455_v10  ;;  %v12710_v19 = vcombine.low %v339_v11, %v343_v12 }
   0xa   :  { %v95_v15 = vld [vmem:[%s19911_s1 + $0xa0] sm:$0xff]  ;;  %9336 = vmatpush1.bf16.msra.mxu1 %v12454_v18 }
   0xb   :  { %v347_v16 = vld [vmem:[%s19911_s1 + $0x880] sm:$0xff]  ;;  %v12463_v20 = vcombine.high %v91_v13, %v95_v15  ;;  %9417 = vmatprep.subr.bf16.mxu0 %v12711_v14  ;;  %v12462_v26 = vcombine.low %v91_v13, %v95_v15 }
   0xc   :  { %v351_v17 = vld [vmem:[%s19911_s1 + $0x8a0] sm:$0xff]  ;;  %9418 = vmatpush1.bf16.msra.mxu0 %v12710_v19 }
   0xd   :  { %v12719_v21 = vcombine.high %v347_v16, %v351_v17  ;;  %v99_v22 = vld [vmem:[%s19911_s1 + $0xc0] sm:$0xff]  ;;  %9337 = vmatprep.subr.bf16.mxu1 %v12463_v20  ;;  %v12718_v27 = vcombine.low %v347_v16, %v351_v17 }
   0xe   :  { %v103_v23 = vld [vmem:[%s19911_s1 + $0xe0] sm:$0xff]  ;;  %9338 = vmatpush1.bf16.msra.mxu1 %v12462_v26 }
   0xf   :  { %v355_v24 = vld [vmem:[%s19911_s1 + $0x8c0] sm:$0xff]  ;;  %v12471_v28 = vcombine.high %v99_v22, %v103_v23  ;;  %9419 = vmatprep.subr.bf16.mxu0 %v12719_v21  ;;  %v12470_v34 = vcombine.low %v99_v22, %v103_v23 }
  0x10   :  { %v359_v25 = vld [vmem:[%s19911_s1 + $0x8e0] sm:$0xff]  ;;  %9420 = vmatpush1.bf16.msra.mxu0 %v12718_v27 }
  0x11   :  { %v12727_v29 = vcombine.high %v355_v24, %v359_v25  ;;  %v107_v30 = vld [vmem:[%s19911_s1 + $0x100] sm:$0xff]  ;;  %9339 = vmatprep.subr.bf16.mxu1 %v12471_v28  ;;  %v12726_v35 = vcombine.low %v355_v24, %v359_v25 }
  0x12   :  { %v111_v31 = vld [vmem:[%s19911_s1 + $0x120] sm:$0xff]  ;;  %9340 = vmatpush1.bf16.msra.mxu1 %v12470_v34 }
  0x13   :  { %v363_v32 = vld [vmem:[%s19911_s1 + $0x900] sm:$0xff]  ;;  %v12479_v36 = vcombine.high %v107_v30, %v111_v31  ;;  %9421 = vmatprep.subr.bf16.mxu0 %v12727_v29  ;;  %v12478_v42 = vcombine.low %v107_v30, %v111_v31 }
  0x14   :  { %v367_v33 = vld [vmem:[%s19911_s1 + $0x920] sm:$0xff]  ;;  %9422 = vmatpush1.bf16.msra.mxu0 %v12726_v35 }
  0x15   :  { %v12735_v37 = vcombine.high %v363_v32, %v367_v33  ;;  %v115_v38 = vld [vmem:[%s19911_s1 + $0x140] sm:$0xff]  ;;  %9341 = vmatprep.subr.bf16.mxu1 %v12479_v36  ;;  %v12734_v43 = vcombine.low %v363_v32, %v367_v33 }
  0x16   :  { %v119_v39 = vld [vmem:[%s19911_s1 + $0x160] sm:$0xff]  ;;  %9342 = vmatpush1.bf16.msra.mxu1 %v12478_v42 }
  0x17   :  { %v371_v40 = vld [vmem:[%s19911_s1 + $0x940] sm:$0xff]  ;;  %v12487_v44 = vcombine.high %v115_v38, %v119_v39  ;;  %9423 = vmatprep.subr.bf16.mxu0 %v12735_v37  ;;  %v12486_v50 = vcombine.low %v115_v38, %v119_v39 }
  0x18   :  { %v375_v41 = vld [vmem:[%s19911_s1 + $0x960] sm:$0xff]  ;;  %9424 = vmatpush1.bf16.msra.mxu0 %v12734_v43 }
  0x19   :  { %v12743_v45 = vcombine.high %v371_v40, %v375_v41  ;;  %v123_v46 = vld [vmem:[%s19911_s1 + $0x180] sm:$0xff]  ;;  %9343 = vmatprep.subr.bf16.mxu1 %v12487_v44  ;;  %v12742_v51 = vcombine.low %v371_v40, %v375_v41 }
  0x1a   :  { %v127_v47 = vld [vmem:[%s19911_s1 + $0x1a0] sm:$0xff]  ;;  %9344 = vmatpush1.bf16.msra.mxu1 %v12486_v50 }
  0x1b   :  { %v379_v48 = vld [vmem:[%s19911_s1 + $0x980] sm:$0xff]  ;;  %v12495_v52 = vcombine.high %v123_v46, %v127_v47  ;;  %9425 = vmatprep.subr.bf16.mxu0 %v12743_v45  ;;  %v12494_v62 = vcombine.low %v123_v46, %v127_v47 }
  0x1c   :  { %v383_v49 = vld [vmem:[%s19911_s1 + $0x9a0] sm:$0xff]  ;;  %9426 = vmatpush1.bf16.msra.mxu0 %v12742_v51 }
  0x1d   :  { %v12751_v54 = vcombine.high %v379_v48, %v383_v49  ;;  %v131_v55 = vld [vmem:[%s19911_s1 + $0x1c0] sm:$0xff]  ;;  %9345 = vmatprep.subr.bf16.mxu1 %v12495_v52  ;;  %v12750_v63 = vcombine.low %v379_v48, %v383_v49 }
  0x1e   :  { %v135_v56 = vld [vmem:[%s19911_s1 + $0x1e0] sm:$0xff]  ;;  %9346 = vmatpush1.bf16.msra.mxu1 %v12494_v62 }
  0x1f   :  { %v387_v59 = vld [vmem:[%s19911_s1 + $0x9c0] sm:$0xff]  ;;  %v12503_v0 = vcombine.high %v131_v55, %v135_v56  ;;  %9427 = vmatprep.subr.bf16.mxu0 %v12751_v54  ;;  %v12502_v6 = vcombine.low %v131_v55, %v135_v56 }
  0x20   :  { %v391_v60 = vld [vmem:[%s19911_s1 + $0x9e0] sm:$0xff]  ;;  %9428 = vmatpush1.bf16.msra.mxu0 %v12750_v63 }
  0x21   :  { %v12759_v1 = vcombine.high %v387_v59, %v391_v60  ;;  %v139_v2 = vld [vmem:[%s19911_s1 + $0x200] sm:$0xff]  ;;  %9347 = vmatprep.subr.bf16.mxu1 %v12503_v0  ;;  %v12758_v7 = vcombine.low %v387_v59, %v391_v60 }
  0x22   :  { %v143_v3 = vld [vmem:[%s19911_s1 + $0x220] sm:$0xff]  ;;  %9348 = vmatpush1.bf16.msra.mxu1 %v12502_v6 }
  0x23   :  { %v395_v4 = vld [vmem:[%s19911_s1 + $0xa00] sm:$0xff]  ;;  %v12511_v8 = vcombine.high %v139_v2, %v143_v3  ;;  %9429 = vmatprep.subr.bf16.mxu0 %v12759_v1  ;;  %v12510_v14 = vcombine.low %v139_v2, %v143_v3 }
  0x24   :  { %v399_v5 = vld [vmem:[%s19911_s1 + $0xa20] sm:$0xff]  ;;  %9430 = vmatpush1.bf16.msra.mxu0 %v12758_v7 }
  0x25   :  { %v12767_v9 = vcombine.high %v395_v4, %v399_v5  ;;  %v147_v10 = vld [vmem:[%s19911_s1 + $0x240] sm:$0xff]  ;;  %9349 = vmatprep.subr.bf16.mxu1 %v12511_v8  ;;  %v12766_v15 = vcombine.low %v395_v4, %v399_v5 }
  0x26   :  { %v151_v11 = vld [vmem:[%s19911_s1 + $0x260] sm:$0xff]  ;;  %9350 = vmatpush1.bf16.msra.mxu1 %v12510_v14 }
  0x27   :  { %v403_v12 = vld [vmem:[%s19911_s1 + $0xa40] sm:$0xff]  ;;  %v12519_v16 = vcombine.high %v147_v10, %v151_v11  ;;  %9431 = vmatprep.subr.bf16.mxu0 %v12767_v9  ;;  %v12518_v22 = vcombine.low %v147_v10, %v151_v11 }
  0x28   :  { %v407_v13 = vld [vmem:[%s19911_s1 + $0xa60] sm:$0xff]  ;;  %9432 = vmatpush1.bf16.msra.mxu0 %v12766_v15 }
  0x29   :  { %v12775_v17 = vcombine.high %v403_v12, %v407_v13  ;;  %v155_v18 = vld [vmem:[%s19911_s1 + $0x280] sm:$0xff]  ;;  %9351 = vmatprep.subr.bf16.mxu1 %v12519_v16  ;;  %v12774_v23 = vcombine.low %v403_v12, %v407_v13 }
  0x2a   :  { %v159_v19 = vld [vmem:[%s19911_s1 + $0x2a0] sm:$0xff]  ;;  %9352 = vmatpush1.bf16.msra.mxu1 %v12518_v22  ;;  %v34_v22 = vld [vmem:[%s19912_s0 + $0x38] sm:$0xff] }
  0x2b   :  { %v411_v20 = vld [vmem:[%s19911_s1 + $0xa80] sm:$0xff]  ;;  %v12527_v24 = vcombine.high %v155_v18, %v159_v19  ;;  %9433 = vmatprep.subr.bf16.mxu0 %v12775_v17  ;;  %v12526_v30 = vcombine.low %v155_v18, %v159_v19  ;;  %v30_v19 = vld [vmem:[%s19912_s0 + $0x18] sm:$0xff] }
  0x2c   :  { %v415_v21 = vld [vmem:[%s19911_s1 + $0xaa0] sm:$0xff]  ;;  %9434 = vmatpush1.bf16.msra.mxu0 %v12774_v23 }
  0x2d   :  { %v12783_v25 = vcombine.high %v411_v20, %v415_v21  ;;  %v163_v26 = vld [vmem:[%s19911_s1 + $0x2c0] sm:$0xff]  ;;  %9353 = vmatprep.subr.bf16.mxu1 %v12527_v24  ;;  %v12782_v31 = vcombine.low %v411_v20, %v415_v21 }
  0x2e   :  { %v167_v27 = vld [vmem:[%s19911_s1 + $0x2e0] sm:$0xff]  ;;  %9354 = vmatpush1.bf16.msra.mxu1 %v12526_v30 }
  0x2f   :  { %v419_v28 = vld [vmem:[%s19911_s1 + $0xac0] sm:$0xff]  ;;  %v12535_v32 = vcombine.high %v163_v26, %v167_v27  ;;  %9435 = vmatprep.subr.bf16.mxu0 %v12783_v25  ;;  %v12534_v38 = vcombine.low %v163_v26, %v167_v27 }
  0x30   :  { %v423_v29 = vld [vmem:[%s19911_s1 + $0xae0] sm:$0xff]  ;;  %9436 = vmatpush1.bf16.msra.mxu0 %v12782_v31  ;;  %v14854_v31 = vpack.c.bf16 %v34_v22, %v34_v22 }
  0x31   :  { %v12791_v33 = vcombine.high %v419_v28, %v423_v29  ;;  %v171_v34 = vld [vmem:[%s19911_s1 + $0x300] sm:$0xff]  ;;  %9355 = vmatprep.subr.bf16.mxu1 %v12535_v32  ;;  %v12790_v39 = vcombine.low %v419_v28, %v423_v29  ;;  %v14845_v28 = vpack.c.bf16 %v30_v19, %v30_v19 }
  0x32   :  { %v175_v35 = vld [vmem:[%s19911_s1 + $0x320] sm:$0xff]  ;;  %9356 = vmatpush1.bf16.msra.mxu1 %v12534_v38 }
  0x33   :  { %v427_v36 = vld [vmem:[%s19911_s1 + $0xb00] sm:$0xff]  ;;  %v12543_v40 = vcombine.high %v171_v34, %v175_v35  ;;  %9437 = vmatprep.subr.bf16.mxu0 %v12791_v33  ;;  %v12542_v46 = vcombine.low %v171_v34, %v175_v35 }
  0x34   :  { %v431_v37 = vld [vmem:[%s19911_s1 + $0xb20] sm:$0xff]  ;;  %9438 = vmatpush1.bf16.msra.mxu0 %v12790_v39 }
  0x35   :  { %v12799_v41 = vcombine.high %v427_v36, %v431_v37  ;;  %v179_v42 = vld [vmem:[%s19911_s1 + $0x340] sm:$0xff]  ;;  %9357 = vmatprep.subr.bf16.mxu1 %v12543_v40  ;;  %v12798_v47 = vcombine.low %v427_v36, %v431_v37 }
  0x36   :  { %v183_v43 = vld [vmem:[%s19911_s1 + $0x360] sm:$0xff]  ;;  %9358 = vmatpush1.bf16.msra.mxu1 %v12542_v46 }
  0x37   :  { %v435_v44 = vld [vmem:[%s19911_s1 + $0xb40] sm:$0xff]  ;;  %v12551_v48 = vcombine.high %v179_v42, %v183_v43  ;;  %9439 = vmatprep.subr.bf16.mxu0 %v12799_v41  ;;  %v12550_v54 = vcombine.low %v179_v42, %v183_v43 }
  0x38   :  { %v439_v45 = vld [vmem:[%s19911_s1 + $0xb60] sm:$0xff]  ;;  %9440 = vmatpush1.bf16.msra.mxu0 %v12798_v47 }
  0x39   :  { %v12807_v49 = vcombine.high %v435_v44, %v439_v45  ;;  %v187_v50 = vld [vmem:[%s19911_s1 + $0x380] sm:$0xff]  ;;  %9359 = vmatprep.subr.bf16.mxu1 %v12551_v48  ;;  %v12806_v55 = vcombine.low %v435_v44, %v439_v45 }
  0x3a   :  { %v191_v51 = vld [vmem:[%s19911_s1 + $0x3a0] sm:$0xff]  ;;  %9360 = vmatpush1.bf16.msra.mxu1 %v12550_v54 }
  0x3b   :  { %v443_v52 = vld [vmem:[%s19911_s1 + $0xb80] sm:$0xff]  ;;  %v12559_v56 = vcombine.high %v187_v50, %v191_v51  ;;  %9441 = vmatprep.subr.bf16.mxu0 %v12807_v49  ;;  %v12558_v0 = vcombine.low %v187_v50, %v191_v51 }
  0x3c   :  { %v447_v53 = vld [vmem:[%s19911_s1 + $0xba0] sm:$0xff]  ;;  %9442 = vmatpush1.bf16.msra.mxu0 %v12806_v55 }
  0x3d   :  { %v12815_v58 = vcombine.high %v443_v52, %v447_v53  ;;  %v195_v59 = vld [vmem:[%s19911_s1 + $0x3c0] sm:$0xff]  ;;  %9361 = vmatprep.subr.bf16.mxu1 %v12559_v56  ;;  %v12814_v1 = vcombine.low %v443_v52, %v447_v53 }
  0x3e   :  { %v199_v60 = vld [vmem:[%s19911_s1 + $0x3e0] sm:$0xff]  ;;  %9362 = vmatpush1.bf16.msra.mxu1 %v12558_v0 }
  0x3f   :  { %v451_v62 = vld [vmem:[%s19911_s1 + $0xbc0] sm:$0xff]  ;;  %v12567_v2 = vcombine.high %v195_v59, %v199_v60  ;;  %9443 = vmatprep.subr.bf16.mxu0 %v12815_v58  ;;  %v12566_v8 = vcombine.low %v195_v59, %v199_v60 }
  0x40   :  { %v455_v63 = vld [vmem:[%s19911_s1 + $0xbe0] sm:$0xff]  ;;  %9444 = vmatpush1.bf16.msra.mxu0 %v12814_v1 }
  0x41   :  { %v12823_v3 = vcombine.high %v451_v62, %v455_v63  ;;  %v203_v4 = vld [vmem:[%s19911_s1 + $0x400] sm:$0xff]  ;;  %9363 = vmatprep.subr.bf16.mxu1 %v12567_v2  ;;  %v12822_v10 = vcombine.low %v451_v62, %v455_v63 }
  0x42   :  { %v207_v5 = vld [vmem:[%s19911_s1 + $0x420] sm:$0xff]  ;;  %9364 = vmatpush1.bf16.msra.mxu1 %v12566_v8 }
  0x43   :  { %v459_v6 = vld [vmem:[%s19911_s1 + $0xc00] sm:$0xff]  ;;  %v12575_v11 = vcombine.high %v203_v4, %v207_v5  ;;  %9445 = vmatprep.subr.bf16.mxu0 %v12823_v3  ;;  %v12574_v20 = vcombine.low %v203_v4, %v207_v5 }
  0x44   :  { %v463_v7 = vld [vmem:[%s19911_s1 + $0xc20] sm:$0xff]  ;;  %9446 = vmatpush1.bf16.msra.mxu0 %v12822_v10 }
  0x45   :  { %v27_v9 = vld [vmem:[%s19912_s0] sm:$0xff]  ;;  %v12831_v13 = vcombine.high %v459_v6, %v463_v7  ;;  %9374 = vmatprep.subr.bf16.mxu1 %v12575_v11  ;;  %v12830_v23 = vcombine.low %v459_v6, %v463_v7 }
  0x46   :  { %v31_v12 = vld [vmem:[%s19912_s0 + $0x20] sm:$0xff]  ;;  %v14823_v16 = vpack.c.bf16 %v27_v9, %v27_v9 }
  0x47   :  { %v211_v14 = vld [vmem:[%s19911_s1 + $0x440] sm:$0xff]  ;;  %v14834_v21 = vpack.c.bf16 %v31_v12, %v31_v12  ;;  %9456 = vmatprep.subr.bf16.mxu0 %v12831_v13 }
  0x48   :  { %v215_v15 = vld [vmem:[%s19911_s1 + $0x460] sm:$0xff]  ;;  %9366 = vmatmul.mubr.bf16.vlgmr.msra.gmra.mrb[0].mxu1 %v14823_v16 }
  0x49   :  { %v467_v17 = vld [vmem:[%s19911_s1 + $0xc40] sm:$0xff]  ;;  %v12583_v24 = vcombine.high %v211_v14, %v215_v15  ;;  %9375 = vmatpush1.bf16.msra.mxu1 %v12574_v20  ;;  %9448 = vmatmul.mubr.bf16.vlgmr.msra.gmra.mrb[0].mxu0 %v14834_v21  ;;  %v12582_v32 = vcombine.low %v211_v14, %v215_v15 }
  0x4a   :  { %v471_v18 = vld [vmem:[%s19911_s1 + $0xc60] sm:$0xff]  ;;  %9457 = vmatpush1.bf16.msra.mxu0 %v12830_v23  ;;  %9406 = vmatprep.mubr.bf16.mxu1 %v14845_v28 }
  0x4b   :  { %v12839_v25 = vcombine.high %v467_v17, %v471_v18  ;;  %v219_v26 = vld [vmem:[%s19911_s1 + $0x480] sm:$0xff]  ;;  %9376 = vmatprep.subr.bf16.mxu1 %v12583_v24  ;;  %v12838_v33 = vcombine.low %v467_v17, %v471_v18  ;;  %9488 = vmatprep.mubr.bf16.mxu0 %v14854_v31 }
  0x4c   :  { %v223_v27 = vld [vmem:[%s19911_s1 + $0x4a0] sm:$0xff] }
  0x4d   :  { %v475_v29 = vld [vmem:[%s19911_s1 + $0xc80] sm:$0xff]  ;;  %v12591_v34 = vcombine.high %v219_v26, %v223_v27  ;;  %9458 = vmatprep.subr.bf16.mxu0 %v12839_v25  ;;  %9377 = vmatpush1.bf16.msra.mxu1 %v12582_v32  ;;  %v12590_v40 = vcombine.low %v219_v26, %v223_v27 }
  0x4e   :  { %v479_v30 = vld [vmem:[%s19911_s1 + $0xca0] sm:$0xff]  ;;  %9459 = vmatpush1.bf16.msra.mxu0 %v12838_v33 }
  0x4f   :  { %v12847_v35 = vcombine.high %v475_v29, %v479_v30  ;;  %v227_v36 = vld [vmem:[%s19911_s1 + $0x4c0] sm:$0xff]  ;;  %9378 = vmatprep.subr.bf16.mxu1 %v12591_v34  ;;  %v12846_v41 = vcombine.low %v475_v29, %v479_v30 }
  0x50   :  { %v231_v37 = vld [vmem:[%s19911_s1 + $0x4e0] sm:$0xff] }
  0x51   :  { %v483_v38 = vld [vmem:[%s19911_s1 + $0xcc0] sm:$0xff]  ;;  %v12599_v42 = vcombine.high %v227_v36, %v231_v37  ;;  %9460 = vmatprep.subr.bf16.mxu0 %v12847_v35  ;;  %9379 = vmatpush1.bf16.msra.mxu1 %v12590_v40  ;;  %v12598_v48 = vcombine.low %v227_v36, %v231_v37 }
  0x52   :  { %v487_v39 = vld [vmem:[%s19911_s1 + $0xce0] sm:$0xff]  ;;  %9461 = vmatpush1.bf16.msra.mxu0 %v12846_v41 }
  0x53   :  { %v12855_v43 = vcombine.high %v483_v38, %v487_v39  ;;  %v235_v44 = vld [vmem:[%s19911_s1 + $0x500] sm:$0xff]  ;;  %9380 = vmatprep.subr.bf16.mxu1 %v12599_v42  ;;  %v12854_v49 = vcombine.low %v483_v38, %v487_v39 }
  0x54   :  { %v239_v45 = vld [vmem:[%s19911_s1 + $0x520] sm:$0xff] }
  0x55   :  { %v491_v46 = vld [vmem:[%s19911_s1 + $0xd00] sm:$0xff]  ;;  %v12607_v50 = vcombine.high %v235_v44, %v239_v45  ;;  %9462 = vmatprep.subr.bf16.mxu0 %v12855_v43  ;;  %9381 = vmatpush1.bf16.msra.mxu1 %v12598_v48  ;;  %v12606_v56 = vcombine.low %v235_v44, %v239_v45 }
  0x56   :  { %v495_v47 = vld [vmem:[%s19911_s1 + $0xd20] sm:$0xff]  ;;  %9463 = vmatpush1.bf16.msra.mxu0 %v12854_v49 }
  0x57   :  { %v12863_v51 = vcombine.high %v491_v46, %v495_v47  ;;  %v243_v52 = vld [vmem:[%s19911_s1 + $0x540] sm:$0xff]  ;;  %9382 = vmatprep.subr.bf16.mxu1 %v12607_v50  ;;  %v12862_v58 = vcombine.low %v491_v46, %v495_v47 }
  0x58   :  { %v247_v53 = vld [vmem:[%s19911_s1 + $0x560] sm:$0xff] }
  0x59   :  { %v499_v54 = vld [vmem:[%s19911_s1 + $0xd40] sm:$0xff]  ;;  %v12615_v59 = vcombine.high %v243_v52, %v247_v53  ;;  %9464 = vmatprep.subr.bf16.mxu0 %v12863_v51  ;;  %9383 = vmatpush1.bf16.msra.mxu1 %v12606_v56  ;;  %v12614_v2 = vcombine.low %v243_v52, %v247_v53 }
  0x5a   :  { %v503_v55 = vld [vmem:[%s19911_s1 + $0xd60] sm:$0xff]  ;;  %9465 = vmatpush1.bf16.msra.mxu0 %v12862_v58 }
  0x5b   :  { %v12871_v60 = vcombine.high %v499_v54, %v503_v55  ;;  %v251_v62 = vld [vmem:[%s19911_s1 + $0x580] sm:$0xff]  ;;  %9384 = vmatprep.subr.bf16.mxu1 %v12615_v59  ;;  %v12870_v3 = vcombine.low %v499_v54, %v503_v55 }
  0x5c   :  { %v255_v63 = vld [vmem:[%s19911_s1 + $0x5a0] sm:$0xff] }
  0x5d   :  { %v507_v0 = vld [vmem:[%s19911_s1 + $0xd80] sm:$0xff]  ;;  %v12623_v4 = vcombine.high %v251_v62, %v255_v63  ;;  %9466 = vmatprep.subr.bf16.mxu0 %v12871_v60  ;;  %9385 = vmatpush1.bf16.msra.mxu1 %v12614_v2  ;;  %v12622_v10 = vcombine.low %v251_v62, %v255_v63 }
  0x5e   :  { %v511_v1 = vld [vmem:[%s19911_s1 + $0xda0] sm:$0xff]  ;;  %9467 = vmatpush1.bf16.msra.mxu0 %v12870_v3 }
  0x5f   :  { %v12879_v5 = vcombine.high %v507_v0, %v511_v1  ;;  %v259_v6 = vld [vmem:[%s19911_s1 + $0x5c0] sm:$0xff]  ;;  %9386 = vmatprep.subr.bf16.mxu1 %v12623_v4  ;;  %v12878_v11 = vcombine.low %v507_v0, %v511_v1 }
  0x60   :  { %v263_v7 = vld [vmem:[%s19911_s1 + $0x5e0] sm:$0xff] }
  0x61   :  { %v515_v8 = vld [vmem:[%s19911_s1 + $0xdc0] sm:$0xff]  ;;  %v12631_v12 = vcombine.high %v259_v6, %v263_v7  ;;  %9468 = vmatprep.subr.bf16.mxu0 %v12879_v5  ;;  %9387 = vmatpush1.bf16.msra.mxu1 %v12622_v10  ;;  %v12630_v19 = vcombine.low %v259_v6, %v263_v7 }
  0x62   :  { %v519_v9 = vld [vmem:[%s19911_s1 + $0xde0] sm:$0xff]  ;;  %9469 = vmatpush1.bf16.msra.mxu0 %v12878_v11 }
  0x63   :  { %v12887_v13 = vcombine.high %v515_v8, %v519_v9  ;;  %v267_v14 = vld [vmem:[%s19911_s1 + $0x600] sm:$0xff]  ;;  %9388 = vmatprep.subr.bf16.mxu1 %v12631_v12  ;;  %v12886_v20 = vcombine.low %v515_v8, %v519_v9 }
  0x64   :  { %v271_v15 = vld [vmem:[%s19911_s1 + $0x620] sm:$0xff] }
  0x65   :  { %v523_v17 = vld [vmem:[%s19911_s1 + $0xe00] sm:$0xff]  ;;  %v12639_v22 = vcombine.high %v267_v14, %v271_v15  ;;  %9470 = vmatprep.subr.bf16.mxu0 %v12887_v13  ;;  %9389 = vmatpush1.bf16.msra.mxu1 %v12630_v19  ;;  %v12638_v29 = vcombine.low %v267_v14, %v271_v15 }
  0x66   :  { %v527_v18 = vld [vmem:[%s19911_s1 + $0xe20] sm:$0xff]  ;;  %9471 = vmatpush1.bf16.msra.mxu0 %v12886_v20 }
  0x67   :  { %v12895_v23 = vcombine.high %v523_v17, %v527_v18  ;;  %v275_v24 = vld [vmem:[%s19911_s1 + $0x640] sm:$0xff]  ;;  %9390 = vmatprep.subr.bf16.mxu1 %v12639_v22  ;;  %v12894_v30 = vcombine.low %v523_v17, %v527_v18  ;;  %v76_v22 = vld [vmem:[%s19911_s1 + $0x8] sm:$0xff] }
  0x68   :  { %v279_v25 = vld [vmem:[%s19911_s1 + $0x660] sm:$0xff] }
  0x69   :  { %v531_v26 = vld [vmem:[%s19911_s1 + $0xe40] sm:$0xff]  ;;  %v12647_v32 = vcombine.high %v275_v24, %v279_v25  ;;  %9472 = vmatprep.subr.bf16.mxu0 %v12895_v23  ;;  %9391 = vmatpush1.bf16.msra.mxu1 %v12638_v29  ;;  %v12646_v38 = vcombine.low %v275_v24, %v279_v25  ;;  %v80_v23 = vld [vmem:[%s19911_s1 + $0x28] sm:$0xff] }
  0x6a   :  { %v535_v27 = vld [vmem:[%s19911_s1 + $0xe60] sm:$0xff]  ;;  %9473 = vmatpush1.bf16.msra.mxu0 %v12894_v30  ;;  %v12449_v30 = vcombine.high %v76_v22, %v80_v23 }
  0x6b   :  { %v12903_v33 = vcombine.high %v531_v26, %v535_v27  ;;  %v283_v34 = vld [vmem:[%s19911_s1 + $0x680] sm:$0xff]  ;;  %9392 = vmatprep.subr.bf16.mxu1 %v12647_v32  ;;  %v12902_v39 = vcombine.low %v531_v26, %v535_v27  ;;  %v29_v27 = vld [vmem:[%s19912_s0 + $0x10] sm:$0xff] }
  0x6c   :  { %v287_v35 = vld [vmem:[%s19911_s1 + $0x6a0] sm:$0xff]  ;;  %v33_v32 = vld [vmem:[%s19912_s0 + $0x30] sm:$0xff] }
  0x6d   :  { %v539_v36 = vld [vmem:[%s19911_s1 + $0xe80] sm:$0xff]  ;;  %v12655_v40 = vcombine.high %v283_v34, %v287_v35  ;;  %9474 = vmatprep.subr.bf16.mxu0 %v12903_v33  ;;  %9393 = vmatpush1.bf16.msra.mxu1 %v12646_v38  ;;  %v12654_v46 = vcombine.low %v283_v34, %v287_v35  ;;  %v84_v34 = vld [vmem:[%s19911_s1 + $0x48] sm:$0xff] }
  0x6e   :  { %v543_v37 = vld [vmem:[%s19911_s1 + $0xea0] sm:$0xff]  ;;  %9475 = vmatpush1.bf16.msra.mxu0 %v12902_v39  ;;  %v88_v35 = vld [vmem:[%s19911_s1 + $0x68] sm:$0xff] }
  0x6f   :  { %v12911_v41 = vcombine.high %v539_v36, %v543_v37  ;;  %v291_v42 = vld [vmem:[%s19911_s1 + $0x6c0] sm:$0xff]  ;;  %9394 = vmatprep.subr.bf16.mxu1 %v12655_v40  ;;  %v12910_v47 = vcombine.low %v539_v36, %v543_v37  ;;  %v15039_v36 = vpack.c.bf16 %v29_v27, %v29_v27  ;;  %v36_v39 = vld [vmem:[%s19912_s0 + $0x48] sm:$0xff]  ;;  %v12448_v40 = vcombine.low %v76_v22, %v80_v23 }
  0x70   :  { %v295_v43 = vld [vmem:[%s19911_s1 + $0x6e0] sm:$0xff]  ;;  %v136_v27 = vld [vmem:[%s19911_s1 + $0x1e8] sm:$0xff] }
  0x71   :  { %v547_v44 = vld [vmem:[%s19911_s1 + $0xec0] sm:$0xff]  ;;  %v12663_v48 = vcombine.high %v291_v42, %v295_v43  ;;  %9476 = vmatprep.subr.bf16.mxu0 %v12911_v41  ;;  %9395 = vmatpush1.bf16.msra.mxu1 %v12654_v46  ;;  %v12662_v54 = vcombine.low %v291_v42, %v295_v43  ;;  %v15050_v41 = vpack.c.bf16 %v33_v32, %v33_v32  ;;  %v96_v46 = vld [vmem:[%s19911_s1 + $0xa8] sm:$0xff] }
  0x72   :  { %v551_v45 = vld [vmem:[%s19911_s1 + $0xee0] sm:$0xff]  ;;  %9477 = vmatpush1.bf16.msra.mxu0 %v12910_v47  ;;  %v12457_v43 = vcombine.high %v84_v34, %v88_v35  ;;  %v15058_v47 = vpack.c.bf16 %v36_v39, %v36_v39 }
  0x73   :  { %v12919_v49 = vcombine.high %v547_v44, %v551_v45  ;;  %v299_v50 = vld [vmem:[%s19911_s1 + $0x700] sm:$0xff]  ;;  %9396 = vmatprep.subr.bf16.mxu1 %v12663_v48  ;;  %v12918_v55 = vcombine.low %v547_v44, %v551_v45  ;;  %v92_v45 = vld [vmem:[%s19911_s1 + $0x88] sm:$0xff] }
  0x74   :  { %v303_v51 = vld [vmem:[%s19911_s1 + $0x720] sm:$0xff] }
  0x75   :  { %v555_v52 = vld [vmem:[%s19911_s1 + $0xf00] sm:$0xff]  ;;  %v12671_v56 = vcombine.high %v299_v50, %v303_v51  ;;  %9478 = vmatprep.subr.bf16.mxu0 %v12919_v49  ;;  %9397 = vmatpush1.bf16.msra.mxu1 %v12662_v54  ;;  %v12670_v0 = vcombine.low %v299_v50, %v303_v51  ;;  %v12456_v50 = vcombine.low %v84_v34, %v88_v35  ;;  %v100_v54 = vld [vmem:[%s19911_s1 + $0xc8] sm:$0xff] }
  0x76   :  { %v559_v53 = vld [vmem:[%s19911_s1 + $0xf20] sm:$0xff]  ;;  %9479 = vmatpush1.bf16.msra.mxu0 %v12918_v55  ;;  %v104_v55 = vld [vmem:[%s19911_s1 + $0xe8] sm:$0xff] }
  0x77   :  { %v12927_v58 = vcombine.high %v555_v52, %v559_v53  ;;  %v307_v59 = vld [vmem:[%s19911_s1 + $0x740] sm:$0xff]  ;;  %9398 = vmatprep.subr.bf16.mxu1 %v12671_v56  ;;  %v12926_v1 = vcombine.low %v555_v52, %v559_v53  ;;  %v12465_v52 = vcombine.high %v92_v45, %v96_v46 }
  0x78   :  { %v311_v60 = vld [vmem:[%s19911_s1 + $0x760] sm:$0xff] }
  0x79   :  { %v563_v62 = vld [vmem:[%s19911_s1 + $0xf40] sm:$0xff]  ;;  %v12679_v2 = vcombine.high %v307_v59, %v311_v60  ;;  %9480 = vmatprep.subr.bf16.mxu0 %v12927_v58  ;;  %9399 = vmatpush1.bf16.msra.mxu1 %v12670_v0  ;;  %v12678_v8 = vcombine.low %v307_v59, %v311_v60  ;;  %v12464_v59 = vcombine.low %v92_v45, %v96_v46  ;;  %v108_v0 = vld [vmem:[%s19911_s1 + $0x108] sm:$0xff] }
  0x7a   :  { %v567_v63 = vld [vmem:[%s19911_s1 + $0xf60] sm:$0xff]  ;;  %9481 = vmatpush1.bf16.msra.mxu0 %v12926_v1  ;;  %v112_v1 = vld [vmem:[%s19911_s1 + $0x128] sm:$0xff] }
  0x7b   :  { %v12935_v3 = vcombine.high %v563_v62, %v567_v63  ;;  %v315_v4 = vld [vmem:[%s19911_s1 + $0x780] sm:$0xff]  ;;  %9400 = vmatprep.subr.bf16.mxu1 %v12679_v2  ;;  %v12934_v9 = vcombine.low %v563_v62, %v567_v63  ;;  %v12473_v62 = vcombine.high %v100_v54, %v104_v55  ;;  %v148_v46 = vld [vmem:[%s19911_s1 + $0x248] sm:$0xff] }
  0x7c   :  { %v319_v5 = vld [vmem:[%s19911_s1 + $0x7a0] sm:$0xff] }
  0x7d   :  { %v571_v6 = vld [vmem:[%s19911_s1 + $0xf80] sm:$0xff]  ;;  %v12687_v10 = vcombine.high %v315_v4, %v319_v5  ;;  %9482 = vmatprep.subr.bf16.mxu0 %v12935_v3  ;;  %9401 = vmatpush1.bf16.msra.mxu1 %v12678_v8  ;;  %v12686_v17 = vcombine.low %v315_v4, %v319_v5  ;;  %v12472_v4 = vcombine.low %v100_v54, %v104_v55  ;;  %v116_v8 = vld [vmem:[%s19911_s1 + $0x148] sm:$0xff] }
  0x7e   :  { %v575_v7 = vld [vmem:[%s19911_s1 + $0xfa0] sm:$0xff]  ;;  %9483 = vmatpush1.bf16.msra.mxu0 %v12934_v9  ;;  %v120_v9 = vld [vmem:[%s19911_s1 + $0x168] sm:$0xff] }
  0x7f   :  { %v12943_v11 = vcombine.high %v571_v6, %v575_v7  ;;  %v323_v12 = vld [vmem:[%s19911_s1 + $0x7c0] sm:$0xff]  ;;  %9402 = vmatprep.subr.bf16.mxu1 %v12687_v10  ;;  %v12942_v18 = vcombine.low %v571_v6, %v575_v7  ;;  %v12481_v6 = vcombine.high %v108_v0, %v112_v1  ;;  %v12488_v22 = vcombine.low %v116_v8, %v120_v9  ;;  %v156_v55 = vld [vmem:[%s19911_s1 + $0x288] sm:$0xff] }
  0x80   :  { %v327_v13 = vld [vmem:[%s19911_s1 + $0x7e0] sm:$0xff] }
  0x81   :  { %v579_v14 = vld [vmem:[%s19911_s1 + $0xfc0] sm:$0xff]  ;;  %v12695_v19 = vcombine.high %v323_v12, %v327_v13  ;;  %9484 = vmatprep.subr.bf16.mxu0 %v12943_v11  ;;  %9403 = vmatpush1.bf16.msra.mxu1 %v12686_v17  ;;  %v12694_v26 = vcombine.low %v323_v12, %v327_v13  ;;  %v12480_v12 = vcombine.low %v108_v0, %v112_v1  ;;  %v124_v17 = vld [vmem:[%s19911_s1 + $0x188] sm:$0xff] }
  0x82   :  { %v583_v15 = vld [vmem:[%s19911_s1 + $0xfe0] sm:$0xff]  ;;  %9485 = vmatpush1.bf16.msra.mxu0 %v12942_v18  ;;  %v128_v18 = vld [vmem:[%s19911_s1 + $0x1a8] sm:$0xff] }
  0x83   :  { %v12951_v20 = vcombine.high %v579_v14, %v583_v15  ;;  %v587_v24 = vld [vmem:[%s19911_s1 + $0x1000] sm:$0xff]  ;;  %9404 = vmatprep.subr.bf16.mxu1 %v12695_v19  ;;  %v12950_v29 = vcombine.low %v579_v14, %v583_v15  ;;  %v12489_v14 = vcombine.high %v116_v8, %v120_v9  ;;  %v12496_v32 = vcombine.low %v124_v17, %v128_v18  ;;  %v164_v1 = vld [vmem:[%s19911_s1 + $0x2c8] sm:$0xff] }
  0x84   :  { %v591_v25 = vld [vmem:[%s19911_s1 + $0x1020] sm:$0xff]  ;;  %v172_v9 = vld [vmem:[%s19911_s1 + $0x308] sm:$0xff] }
  0x85   :  { %9486 = vmatprep.subr.bf16.mxu0 %v12951_v20  ;;  %v12959_v33 = vcombine.high %v587_v24, %v591_v25  ;;  %v595_v37 = vld [vmem:[%s19911_s1 + $0x1040] sm:$0xff]  ;;  %9405 = vmatpush1.bf16.msra.mxu1 %v12694_v26  ;;  %v12958_v42 = vcombine.low %v587_v24, %v591_v25  ;;  %v12497_v24 = vcombine.high %v124_v17, %v128_v18  ;;  %v132_v26 = vld [vmem:[%s19911_s1 + $0x1c8] sm:$0xff] }
  0x86   :  { %v599_v38 = vld [vmem:[%s19911_s1 + $0x1060] sm:$0xff]  ;;  %9487 = vmatpush1.bf16.msra.mxu0 %v12950_v29  ;;  %9825 = vmatprep.subr.bf16.mxu1 %v12449_v30  ;;  %v12505_v34 = vcombine.high %v132_v26, %v136_v27  ;;  %v180_v18 = vld [vmem:[%s19911_s1 + $0x348] sm:$0xff] }
  0x87   :  { %9497 = vmatprep.subr.bf16.mxu0 %v12959_v33  ;;  %v12967_v44 = vcombine.high %v595_v37, %v599_v38  ;;  %v603_v48 = vld [vmem:[%s19911_s1 + $0x1080] sm:$0xff]  ;;  %v12966_v51 = vcombine.low %v595_v37, %v599_v38  ;;  %v140_v37 = vld [vmem:[%s19911_s1 + $0x208] sm:$0xff] }
  0x88   :  { %9407 = vmatmul.mubr.bf16.vlgmr.msra.gmra.mrb[0].mxu1 %v15039_v36  ;;  %v607_v49 = vld [vmem:[%s19911_s1 + $0x10a0] sm:$0xff]  ;;  %v144_v38 = vld [vmem:[%s19911_s1 + $0x228] sm:$0xff] }
  0x89   :  { %9489 = vmatmul.mubr.bf16.vlgmr.msra.gmra.mrb[0].mxu0 %v15050_v41  ;;  %9826 = vmatpush1.bf16.msra.mxu1 %v12448_v40  ;;  %v12975_v53 = vcombine.high %v603_v48, %v607_v49  ;;  %v611_v56 = vld [vmem:[%s19911_s1 + $0x10c0] sm:$0xff]  ;;  %v12974_v60 = vcombine.low %v603_v48, %v607_v49  ;;  %v152_v48 = vld [vmem:[%s19911_s1 + $0x268] sm:$0xff] }
  0x8a   :  { %9498 = vmatpush1.bf16.msra.mxu0 %v12958_v42  ;;  %9827 = vmatprep.subr.bf16.mxu1 %v12457_v43  ;;  %v615_v58 = vld [vmem:[%s19911_s1 + $0x10e0] sm:$0xff]  ;;  %v12504_v42 = vcombine.low %v132_v26, %v136_v27  ;;  %v188_v27 = vld [vmem:[%s19911_s1 + $0x388] sm:$0xff] }
  0x8b   :  { %9499 = vmatprep.subr.bf16.mxu0 %v12967_v44  ;;  %9529 = vmatprep.mubr.bf16.mxu0 %v15058_v47  ;;  %v12983_v63 = vcombine.high %v611_v56, %v615_v58  ;;  %v619_v2 = vld [vmem:[%s19911_s1 + $0x1100] sm:$0xff]  ;;  %v12982_v5 = vcombine.low %v611_v56, %v615_v58  ;;  %v12513_v44 = vcombine.high %v140_v37, %v144_v38  ;;  %v160_v56 = vld [vmem:[%s19911_s1 + $0x2a8] sm:$0xff] }
  0x8c   :  { %9857 = vmatprep.mubr.bf16.mxu1 %v14688_v57  ;;  %v623_v3 = vld [vmem:[%s19911_s1 + $0x1120] sm:$0xff] }
  0x8d   :  { %9828 = vmatpush1.bf16.msra.mxu1 %v12456_v50  ;;  %v12991_v7 = vcombine.high %v619_v2, %v623_v3  ;;  %v627_v10 = vld [vmem:[%s19911_s1 + $0x1140] sm:$0xff]  ;;  %v12990_v13 = vcombine.low %v619_v2, %v623_v3  ;;  %v168_v2 = vld [vmem:[%s19911_s1 + $0x2e8] sm:$0xff] }
  0x8e   :  { %9500 = vmatpush1.bf16.msra.mxu0 %v12966_v51  ;;  %9829 = vmatprep.subr.bf16.mxu1 %v12465_v52  ;;  %v631_v11 = vld [vmem:[%s19911_s1 + $0x1160] sm:$0xff]  ;;  %v12512_v51 = vcombine.low %v140_v37, %v144_v38  ;;  %v196_v38 = vld [vmem:[%s19911_s1 + $0x3c8] sm:$0xff] }
  0x8f   :  { %9501 = vmatprep.subr.bf16.mxu0 %v12975_v53  ;;  %v12999_v15 = vcombine.high %v627_v10, %v631_v11  ;;  %v635_v19 = vld [vmem:[%s19911_s1 + $0x1180] sm:$0xff]  ;;  %v12998_v23 = vcombine.low %v627_v10, %v631_v11  ;;  %v12521_v53 = vcombine.high %v148_v46, %v152_v48  ;;  %v176_v10 = vld [vmem:[%s19911_s1 + $0x328] sm:$0xff] }
  0x90   :  { %v639_v20 = vld [vmem:[%s19911_s1 + $0x11a0] sm:$0xff] }
  0x91   :  { %9830 = vmatpush1.bf16.msra.mxu1 %v12464_v59  ;;  %v13007_v25 = vcombine.high %v635_v19, %v639_v20  ;;  %v643_v29 = vld [vmem:[%s19911_s1 + $0x11c0] sm:$0xff]  ;;  %v13006_v33 = vcombine.low %v635_v19, %v639_v20  ;;  %v184_v19 = vld [vmem:[%s19911_s1 + $0x368] sm:$0xff] }
  0x92   :  { %9502 = vmatpush1.bf16.msra.mxu0 %v12974_v60  ;;  %9831 = vmatprep.subr.bf16.mxu1 %v12473_v62  ;;  %v647_v30 = vld [vmem:[%s19911_s1 + $0x11e0] sm:$0xff]  ;;  %v12520_v60 = vcombine.low %v148_v46, %v152_v48  ;;  %v204_v48 = vld [vmem:[%s19911_s1 + $0x408] sm:$0xff] }
  0x93   :  { %9503 = vmatprep.subr.bf16.mxu0 %v12983_v63  ;;  %v13015_v35 = vcombine.high %v643_v29, %v647_v30  ;;  %v651_v39 = vld [vmem:[%s19911_s1 + $0x1200] sm:$0xff]  ;;  %v13014_v43 = vcombine.low %v643_v29, %v647_v30  ;;  %v12529_v63 = vcombine.high %v156_v55, %v160_v56  ;;  %v192_v29 = vld [vmem:[%s19911_s1 + $0x3a8] sm:$0xff] }
  0x94   :  { %v655_v40 = vld [vmem:[%s19911_s1 + $0x1220] sm:$0xff] }
  0x95   :  { %9832 = vmatpush1.bf16.msra.mxu1 %v12472_v4  ;;  %v13023_v45 = vcombine.high %v651_v39, %v655_v40  ;;  %v659_v49 = vld [vmem:[%s19911_s1 + $0x1240] sm:$0xff]  ;;  %v13022_v52 = vcombine.low %v651_v39, %v655_v40  ;;  %v200_v39 = vld [vmem:[%s19911_s1 + $0x3e8] sm:$0xff] }
  0x96   :  { %9504 = vmatpush1.bf16.msra.mxu0 %v12982_v5  ;;  %9833 = vmatprep.subr.bf16.mxu1 %v12481_v6  ;;  %v663_v50 = vld [vmem:[%s19911_s1 + $0x1260] sm:$0xff]  ;;  %v12528_v5 = vcombine.low %v156_v55, %v160_v56 }
  0x97   :  { %9505 = vmatprep.subr.bf16.mxu0 %v12991_v7  ;;  %v13031_v54 = vcombine.high %v659_v49, %v663_v50  ;;  %v667_v58 = vld [vmem:[%s19911_s1 + $0x1280] sm:$0xff]  ;;  %v13030_v62 = vcombine.low %v659_v49, %v663_v50  ;;  %v12537_v7 = vcombine.high %v164_v1, %v168_v2  ;;  %v208_v49 = vld [vmem:[%s19911_s1 + $0x428] sm:$0xff] }
  0x98   :  { %v671_v59 = vld [vmem:[%s19911_s1 + $0x12a0] sm:$0xff] }
  0x99   :  { %9834 = vmatpush1.bf16.msra.mxu1 %v12480_v12  ;;  %v13039_v0 = vcombine.high %v667_v58, %v671_v59  ;;  %v675_v3 = vld [vmem:[%s19911_s1 + $0x12c0] sm:$0xff]  ;;  %v13038_v6 = vcombine.low %v667_v58, %v671_v59  ;;  %v212_v58 = vld [vmem:[%s19911_s1 + $0x448] sm:$0xff] }
  0x9a   :  { %9506 = vmatpush1.bf16.msra.mxu0 %v12990_v13  ;;  %9835 = vmatprep.subr.bf16.mxu1 %v12489_v14  ;;  %v679_v4 = vld [vmem:[%s19911_s1 + $0x12e0] sm:$0xff]  ;;  %v12536_v13 = vcombine.low %v164_v1, %v168_v2  ;;  %v216_v59 = vld [vmem:[%s19911_s1 + $0x468] sm:$0xff] }
  0x9b   :  { %9507 = vmatprep.subr.bf16.mxu0 %v12999_v15  ;;  %v13047_v8 = vcombine.high %v675_v3, %v679_v4  ;;  %v683_v11 = vld [vmem:[%s19911_s1 + $0x1300] sm:$0xff]  ;;  %v13046_v14 = vcombine.low %v675_v3, %v679_v4  ;;  %v12545_v15 = vcombine.high %v172_v9, %v176_v10  ;;  %v12585_v3 = vcombine.high %v212_v58, %v216_v59 }
  0x9c   :  { %v687_v12 = vld [vmem:[%s19911_s1 + $0x1320] sm:$0xff] }
  0x9d   :  { %9836 = vmatpush1.bf16.msra.mxu1 %v12488_v22  ;;  %v13055_v17 = vcombine.high %v683_v11, %v687_v12  ;;  %v691_v20 = vld [vmem:[%s19911_s1 + $0x1340] sm:$0xff] }
  0x9e   :  { %9508 = vmatpush1.bf16.msra.mxu0 %v12998_v23  ;;  %9837 = vmatprep.subr.bf16.mxu1 %v12497_v24  ;;  %v695_v22 = vld [vmem:[%s19911_s1 + $0x1360] sm:$0xff]  ;;  %v12544_v23 = vcombine.low %v172_v9, %v176_v10  ;;  %v13054_v24 = vcombine.low %v683_v11, %v687_v12  ;;  %v12584_v10 = vcombine.low %v212_v58, %v216_v59 }
  0x9f   :  { %9509 = vmatprep.subr.bf16.mxu0 %v13007_v25  ;;  %v12553_v25 = vcombine.high %v180_v18, %v184_v19  ;;  %v13063_v26 = vcombine.high %v691_v20, %v695_v22  ;;  %v699_v30 = vld [vmem:[%s19911_s1 + $0x1380] sm:$0xff] }
  0xa0   :  { %v707_v40 = vld [vmem:[%s19911_s1 + $0x13c0] sm:$0xff] }
  0xa1   :  { %9838 = vmatpush1.bf16.msra.mxu1 %v12496_v32  ;;  %v703_v32 = vld [vmem:[%s19911_s1 + $0x13a0] sm:$0xff] }
  0xa2   :  { %9510 = vmatpush1.bf16.msra.mxu0 %v13006_v33  ;;  %9839 = vmatprep.subr.bf16.mxu1 %v12505_v34  ;;  %v12552_v33 = vcombine.low %v180_v18, %v184_v19  ;;  %v13062_v34 = vcombine.low %v691_v20, %v695_v22  ;;  %v13071_v37 = vcombine.high %v699_v30, %v703_v32  ;;  %v715_v50 = vld [vmem:[%s19911_s1 + $0x1400] sm:$0xff] }
  0xa3   :  { %9511 = vmatprep.subr.bf16.mxu0 %v13015_v35  ;;  %v12561_v35 = vcombine.high %v188_v27, %v192_v29  ;;  %v35_v55 = vld [vmem:[%s19912_s0 + $0x40] sm:$0xff] }
  0xa4   :  { %v15256_v1 = vpack.c.bf16 %v35_v55, %v35_v55  ;;  %v735_v9 = vld [vmem:[%s19911_s1 + $0x14a0] sm:$0xff] }
  0xa5   :  { %9840 = vmatpush1.bf16.msra.mxu1 %v12504_v42  ;;  %v711_v42 = vld [vmem:[%s19911_s1 + $0x13e0] sm:$0xff] }
  0xa6   :  { %9512 = vmatpush1.bf16.msra.mxu0 %v13014_v43  ;;  %9841 = vmatprep.subr.bf16.mxu1 %v12513_v44  ;;  %v12560_v43 = vcombine.low %v188_v27, %v192_v29  ;;  %v13070_v44 = vcombine.low %v699_v30, %v703_v32  ;;  %v13079_v46 = vcombine.high %v707_v40, %v711_v42  ;;  %v743_v18 = vld [vmem:[%s19911_s1 + $0x14e0] sm:$0xff] }
  0xa7   :  { %9513 = vmatprep.subr.bf16.mxu0 %v13023_v45  ;;  %v12569_v45 = vcombine.high %v196_v38, %v200_v39  ;;  %v751_v27 = vld [vmem:[%s19911_s1 + $0x1520] sm:$0xff] }
  0xa8   :  { %v771_v55 = vld [vmem:[%s19911_s1 + $0x15c0] sm:$0xff] }
  0xa9   :  { %9842 = vmatpush1.bf16.msra.mxu1 %v12512_v51  ;;  %v719_v51 = vld [vmem:[%s19911_s1 + $0x1420] sm:$0xff] }
  0xaa   :  { %9514 = vmatpush1.bf16.msra.mxu0 %v13022_v52  ;;  %9843 = vmatprep.subr.bf16.mxu1 %v12521_v53  ;;  %v12568_v52 = vcombine.low %v196_v38, %v200_v39  ;;  %v13078_v53 = vcombine.low %v707_v40, %v711_v42  ;;  %v13087_v56 = vcombine.high %v715_v50, %v719_v51  ;;  %v759_v38 = vld [vmem:[%s19911_s1 + $0x1560] sm:$0xff] }
  0xab   :  { %9515 = vmatprep.subr.bf16.mxu0 %v13031_v54  ;;  %v12577_v54 = vcombine.high %v204_v48, %v208_v49  ;;  %v13086_v2 = vcombine.low %v715_v50, %v719_v51 }
  0xad   :  { %9844 = vmatpush1.bf16.msra.mxu1 %v12520_v60  ;;  %v723_v60 = vld [vmem:[%s19911_s1 + $0x1440] sm:$0xff] }
  0xae   :  { %9516 = vmatpush1.bf16.msra.mxu0 %v13030_v62  ;;  %9845 = vmatprep.subr.bf16.mxu1 %v12529_v63  ;;  %v727_v62 = vld [vmem:[%s19911_s1 + $0x1460] sm:$0xff]  ;;  %v38_v63 = vld [vmem:[%s19912_s0 + $0x58] sm:$0xff] }
  0xaf   :  { %9517 = vmatprep.subr.bf16.mxu0 %v13039_v0  ;;  %v12576_v0 = vcombine.low %v204_v48, %v208_v49  ;;  %v13095_v4 = vcombine.high %v723_v60, %v727_v62  ;;  %v13094_v11 = vcombine.low %v723_v60, %v727_v62  ;;  %v767_v48 = vld [vmem:[%s19911_s1 + $0x15a0] sm:$0xff] }
  0xb1   :  { %9846 = vmatpush1.bf16.msra.mxu1 %v12528_v5  ;;  %v220_v5 = vld [vmem:[%s19911_s1 + $0x488] sm:$0xff] }
  0xb2   :  { %9518 = vmatpush1.bf16.msra.mxu0 %v13038_v6  ;;  %9847 = vmatprep.subr.bf16.mxu1 %v12537_v7  ;;  %v224_v6 = vld [vmem:[%s19911_s1 + $0x4a8] sm:$0xff]  ;;  %v15264_v7 = vpack.c.bf16 %v38_v63, %v38_v63 }
  0xb3   :  { %9519 = vmatprep.subr.bf16.mxu0 %v13047_v8  ;;  %v731_v8 = vld [vmem:[%s19911_s1 + $0x1480] sm:$0xff]  ;;  %v12593_v12 = vcombine.high %v220_v5, %v224_v6  ;;  %v12592_v19 = vcombine.low %v220_v5, %v224_v6  ;;  %v268_v63 = vld [vmem:[%s19911_s1 + $0x608] sm:$0xff] }
  0xb4   :  { %v13102_v20 = vcombine.low %v731_v8, %v735_v9 }
  0xb5   :  { %9848 = vmatpush1.bf16.msra.mxu1 %v12536_v13  ;;  %v13103_v13 = vcombine.high %v731_v8, %v735_v9  ;;  %v276_v9 = vld [vmem:[%s19911_s1 + $0x648] sm:$0xff] }
  0xb6   :  { %9520 = vmatpush1.bf16.msra.mxu0 %v13046_v14  ;;  %9849 = vmatprep.subr.bf16.mxu1 %v12545_v15  ;;  %v228_v14 = vld [vmem:[%s19911_s1 + $0x4c8] sm:$0xff] }
  0xb7   :  { %9521 = vmatprep.subr.bf16.mxu0 %v13055_v17  ;;  %v232_v15 = vld [vmem:[%s19911_s1 + $0x4e8] sm:$0xff]  ;;  %v739_v17 = vld [vmem:[%s19911_s1 + $0x14c0] sm:$0xff] }
  0xb8   :  { %v12601_v22 = vcombine.high %v228_v14, %v232_v15  ;;  %v12600_v29 = vcombine.low %v228_v14, %v232_v15  ;;  %v13110_v30 = vcombine.low %v739_v17, %v743_v18 }
  0xb9   :  { %9850 = vmatpush1.bf16.msra.mxu1 %v12544_v23  ;;  %v13111_v23 = vcombine.high %v739_v17, %v743_v18  ;;  %v284_v18 = vld [vmem:[%s19911_s1 + $0x688] sm:$0xff] }
  0xba   :  { %9522 = vmatpush1.bf16.msra.mxu0 %v13054_v24  ;;  %9851 = vmatprep.subr.bf16.mxu1 %v12553_v25  ;;  %v236_v24 = vld [vmem:[%s19911_s1 + $0x508] sm:$0xff] }
  0xbb   :  { %9523 = vmatprep.subr.bf16.mxu0 %v13063_v26  ;;  %v240_v25 = vld [vmem:[%s19911_s1 + $0x528] sm:$0xff]  ;;  %v747_v26 = vld [vmem:[%s19911_s1 + $0x1500] sm:$0xff] }
  0xbc   :  { %v12609_v32 = vcombine.high %v236_v24, %v240_v25  ;;  %v12608_v39 = vcombine.low %v236_v24, %v240_v25  ;;  %v13118_v40 = vcombine.low %v747_v26, %v751_v27 }
  0xbd   :  { %9852 = vmatpush1.bf16.msra.mxu1 %v12552_v33  ;;  %v13119_v33 = vcombine.high %v747_v26, %v751_v27  ;;  %v292_v27 = vld [vmem:[%s19911_s1 + $0x6c8] sm:$0xff] }
  0xbe   :  { %9524 = vmatpush1.bf16.msra.mxu0 %v13062_v34  ;;  %9853 = vmatprep.subr.bf16.mxu1 %v12561_v35  ;;  %v244_v34 = vld [vmem:[%s19911_s1 + $0x548] sm:$0xff] }
  0xbf   :  { %9525 = vmatprep.subr.bf16.mxu0 %v13071_v37  ;;  %v248_v35 = vld [vmem:[%s19911_s1 + $0x568] sm:$0xff]  ;;  %v755_v37 = vld [vmem:[%s19911_s1 + $0x1540] sm:$0xff] }
  0xc0   :  { %v12617_v42 = vcombine.high %v244_v34, %v248_v35  ;;  %v12616_v49 = vcombine.low %v244_v34, %v248_v35  ;;  %v13126_v50 = vcombine.low %v755_v37, %v759_v38 }
  0xc1   :  { %9854 = vmatpush1.bf16.msra.mxu1 %v12560_v43  ;;  %v13127_v43 = vcombine.high %v755_v37, %v759_v38  ;;  %v300_v38 = vld [vmem:[%s19911_s1 + $0x708] sm:$0xff] }
  0xc2   :  { %9526 = vmatpush1.bf16.msra.mxu0 %v13070_v44  ;;  %9855 = vmatprep.subr.bf16.mxu1 %v12569_v45  ;;  %v252_v44 = vld [vmem:[%s19911_s1 + $0x588] sm:$0xff] }
  0xc3   :  { %9527 = vmatprep.subr.bf16.mxu0 %v13079_v46  ;;  %v256_v45 = vld [vmem:[%s19911_s1 + $0x5a8] sm:$0xff]  ;;  %v763_v46 = vld [vmem:[%s19911_s1 + $0x1580] sm:$0xff] }
  0xc4   :  { %v12625_v51 = vcombine.high %v252_v44, %v256_v45  ;;  %v12624_v58 = vcombine.low %v252_v44, %v256_v45  ;;  %v13134_v59 = vcombine.low %v763_v46, %v767_v48 }
  0xc5   :  { %9856 = vmatpush1.bf16.msra.mxu1 %v12568_v52  ;;  %v13135_v52 = vcombine.high %v763_v46, %v767_v48  ;;  %v308_v48 = vld [vmem:[%s19911_s1 + $0x748] sm:$0xff] }
  0xc6   :  { %9528 = vmatpush1.bf16.msra.mxu0 %v13078_v53  ;;  %9866 = vmatprep.subr.bf16.mxu1 %v12577_v54  ;;  %v260_v53 = vld [vmem:[%s19911_s1 + $0x5c8] sm:$0xff] }
  0xc7   :  { %9538 = vmatprep.subr.bf16.mxu0 %v13087_v56  ;;  %v264_v54 = vld [vmem:[%s19911_s1 + $0x5e8] sm:$0xff]  ;;  %v775_v56 = vld [vmem:[%s19911_s1 + $0x15e0] sm:$0xff] }
  0xc8   :  { %9858 = vmatmul.mubr.bf16.vlgmr.msra.gmra.mrb[4].mxu1 %v14823_v16  ;;  %v12633_v60 = vcombine.high %v260_v53, %v264_v54  ;;  %v13143_v62 = vcombine.high %v771_v55, %v775_v56  ;;  %v13142_v5 = vcombine.low %v771_v55, %v775_v56  ;;  %v316_v56 = vld [vmem:[%s19911_s1 + $0x788] sm:$0xff] }
  0xc9   :  { %9530 = vmatmul.mubr.bf16.vlgmr.msra.gmra.mrb[0].mxu0 %v15256_v1  ;;  %9867 = vmatpush1.bf16.msra.mxu1 %v12576_v0  ;;  %v272_v0 = vld [vmem:[%s19911_s1 + $0x628] sm:$0xff] }
  0xca   :  { %9539 = vmatpush1.bf16.msra.mxu0 %v13086_v2  ;;  %9868 = vmatprep.subr.bf16.mxu1 %v12585_v3  ;;  %v779_v2 = vld [vmem:[%s19911_s1 + $0x1600] sm:$0xff]  ;;  %v12641_v6 = vcombine.high %v268_v63, %v272_v0 }
  0xcb   :  { %9540 = vmatprep.subr.bf16.mxu0 %v13095_v4  ;;  %9570 = vmatprep.mubr.bf16.mxu0 %v15264_v7  ;;  %v783_v3 = vld [vmem:[%s19911_s1 + $0x1620] sm:$0xff]  ;;  %v12632_v4 = vcombine.low %v260_v53, %v264_v54 }
  0xcc   :  { %9898 = vmatprep.mubr.bf16.mxu1 %v14845_v28  ;;  %v13151_v8 = vcombine.high %v779_v2, %v783_v3  ;;  %v13150_v14 = vcombine.low %v779_v2, %v783_v3  ;;  %v324_v3 = vld [vmem:[%s19911_s1 + $0x7c8] sm:$0xff] }
  0xcd   :  { %9869 = vmatpush1.bf16.msra.mxu1 %v12584_v10  ;;  %v280_v10 = vld [vmem:[%s19911_s1 + $0x668] sm:$0xff] }
  0xce   :  { %9541 = vmatpush1.bf16.msra.mxu0 %v13094_v11  ;;  %9870 = vmatprep.subr.bf16.mxu1 %v12593_v12  ;;  %v787_v11 = vld [vmem:[%s19911_s1 + $0x1640] sm:$0xff]  ;;  %v12649_v15 = vcombine.high %v276_v9, %v280_v10 }
  0xcf   :  { %9542 = vmatprep.subr.bf16.mxu0 %v13103_v13  ;;  %v791_v12 = vld [vmem:[%s19911_s1 + $0x1660] sm:$0xff]  ;;  %v12640_v13 = vcombine.low %v268_v63, %v272_v0 }
  0xd0   :  { %v13159_v17 = vcombine.high %v787_v11, %v791_v12  ;;  %v13158_v24 = vcombine.low %v787_v11, %v791_v12  ;;  %v332_v12 = vld [vmem:[%s19911_s1 + $0x808] sm:$0xff] }
  0xd1   :  { %9871 = vmatpush1.bf16.msra.mxu1 %v12592_v19  ;;  %v288_v19 = vld [vmem:[%s19911_s1 + $0x6a8] sm:$0xff] }
  0xd2   :  { %9543 = vmatpush1.bf16.msra.mxu0 %v13102_v20  ;;  %9872 = vmatprep.subr.bf16.mxu1 %v12601_v22  ;;  %v795_v20 = vld [vmem:[%s19911_s1 + $0x1680] sm:$0xff]  ;;  %v12657_v25 = vcombine.high %v284_v18, %v288_v19 }
  0xd3   :  { %9544 = vmatprep.subr.bf16.mxu0 %v13111_v23  ;;  %v799_v22 = vld [vmem:[%s19911_s1 + $0x16a0] sm:$0xff]  ;;  %v12648_v23 = vcombine.low %v276_v9, %v280_v10 }
  0xd4   :  { %v13167_v26 = vcombine.high %v795_v20, %v799_v22  ;;  %v13166_v34 = vcombine.low %v795_v20, %v799_v22  ;;  %v37_v20 = vld [vmem:[%s19912_s0 + $0x50] sm:$0xff] }
  0xd5   :  { %9873 = vmatpush1.bf16.msra.mxu1 %v12600_v29  ;;  %v296_v29 = vld [vmem:[%s19911_s1 + $0x6e8] sm:$0xff] }
  0xd6   :  { %9545 = vmatpush1.bf16.msra.mxu0 %v13110_v30  ;;  %9874 = vmatprep.subr.bf16.mxu1 %v12609_v32  ;;  %v803_v30 = vld [vmem:[%s19911_s1 + $0x16c0] sm:$0xff]  ;;  %v12665_v35 = vcombine.high %v292_v27, %v296_v29 }
  0xd7   :  { %9546 = vmatprep.subr.bf16.mxu0 %v13119_v33  ;;  %v807_v32 = vld [vmem:[%s19911_s1 + $0x16e0] sm:$0xff]  ;;  %v12656_v33 = vcombine.low %v284_v18, %v288_v19 }
  0xd8   :  { %v13175_v37 = vcombine.high %v803_v30, %v807_v32  ;;  %v13174_v44 = vcombine.low %v803_v30, %v807_v32  ;;  %v15462_v30 = vpack.c.bf16 %v37_v20, %v37_v20  ;;  %v388_v20 = vld [vmem:[%s19911_s1 + $0x9c8] sm:$0xff] }
  0xd9   :  { %9875 = vmatpush1.bf16.msra.mxu1 %v12608_v39  ;;  %v304_v39 = vld [vmem:[%s19911_s1 + $0x728] sm:$0xff] }
  0xda   :  { %9547 = vmatpush1.bf16.msra.mxu0 %v13118_v40  ;;  %9876 = vmatprep.subr.bf16.mxu1 %v12617_v42  ;;  %v811_v40 = vld [vmem:[%s19911_s1 + $0x1700] sm:$0xff]  ;;  %v12673_v45 = vcombine.high %v300_v38, %v304_v39 }
  0xdb   :  { %9548 = vmatprep.subr.bf16.mxu0 %v13127_v43  ;;  %v815_v42 = vld [vmem:[%s19911_s1 + $0x1720] sm:$0xff]  ;;  %v12664_v43 = vcombine.low %v292_v27, %v296_v29  ;;  %v40_v27 = vld [vmem:[%s19912_s0 + $0x68] sm:$0xff] }
  0xdc   :  { %v13183_v46 = vcombine.high %v811_v40, %v815_v42  ;;  %v13182_v53 = vcombine.low %v811_v40, %v815_v42  ;;  %v863_v40 = vld [vmem:[%s19911_s1 + $0x18a0] sm:$0xff] }
  0xdd   :  { %9877 = vmatpush1.bf16.msra.mxu1 %v12616_v49  ;;  %v312_v49 = vld [vmem:[%s19911_s1 + $0x768] sm:$0xff] }
  0xde   :  { %9549 = vmatpush1.bf16.msra.mxu0 %v13126_v50  ;;  %9878 = vmatprep.subr.bf16.mxu1 %v12625_v51  ;;  %v819_v50 = vld [vmem:[%s19911_s1 + $0x1740] sm:$0xff]  ;;  %v12681_v54 = vcombine.high %v308_v48, %v312_v49 }
  0xdf   :  { %9550 = vmatprep.subr.bf16.mxu0 %v13135_v52  ;;  %v823_v51 = vld [vmem:[%s19911_s1 + $0x1760] sm:$0xff]  ;;  %v12672_v52 = vcombine.low %v300_v38, %v304_v39  ;;  %v15470_v38 = vpack.c.bf16 %v40_v27, %v40_v27 }
  0xe0   :  { %v13191_v55 = vcombine.high %v819_v50, %v823_v51  ;;  %v13190_v63 = vcombine.low %v819_v50, %v823_v51  ;;  %v859_v39 = vld [vmem:[%s19911_s1 + $0x1880] sm:$0xff] }
  0xe1   :  { %9879 = vmatpush1.bf16.msra.mxu1 %v12624_v58  ;;  %v320_v58 = vld [vmem:[%s19911_s1 + $0x7a8] sm:$0xff]  ;;  %v871_v50 = vld [vmem:[%s19911_s1 + $0x18e0] sm:$0xff] }
  0xe2   :  { %9551 = vmatpush1.bf16.msra.mxu0 %v13134_v59  ;;  %9880 = vmatprep.subr.bf16.mxu1 %v12633_v60  ;;  %v827_v59 = vld [vmem:[%s19911_s1 + $0x1780] sm:$0xff]  ;;  %v12689_v0 = vcombine.high %v316_v56, %v320_v58 }
  0xe3   :  { %9552 = vmatprep.subr.bf16.mxu0 %v13143_v62  ;;  %v831_v60 = vld [vmem:[%s19911_s1 + $0x17a0] sm:$0xff]  ;;  %v12680_v62 = vcombine.low %v308_v48, %v312_v49  ;;  %v360_v48 = vld [vmem:[%s19911_s1 + $0x8e8] sm:$0xff] }
  0xe4   :  { %v13199_v2 = vcombine.high %v827_v59, %v831_v60  ;;  %v13198_v9 = vcombine.low %v827_v59, %v831_v60  ;;  %v867_v49 = vld [vmem:[%s19911_s1 + $0x18c0] sm:$0xff] }
  0xe5   :  { %9881 = vmatpush1.bf16.msra.mxu1 %v12632_v4  ;;  %v328_v4 = vld [vmem:[%s19911_s1 + $0x7e8] sm:$0xff]  ;;  %v879_v59 = vld [vmem:[%s19911_s1 + $0x1920] sm:$0xff] }
  0xe6   :  { %9553 = vmatpush1.bf16.msra.mxu0 %v13142_v5  ;;  %9882 = vmatprep.subr.bf16.mxu1 %v12641_v6  ;;  %v835_v5 = vld [vmem:[%s19911_s1 + $0x17c0] sm:$0xff]  ;;  %v12697_v10 = vcombine.high %v324_v3, %v328_v4 }
  0xe7   :  { %9554 = vmatprep.subr.bf16.mxu0 %v13151_v8  ;;  %v839_v6 = vld [vmem:[%s19911_s1 + $0x17e0] sm:$0xff]  ;;  %v12688_v8 = vcombine.low %v316_v56, %v320_v58  ;;  %v368_v56 = vld [vmem:[%s19911_s1 + $0x928] sm:$0xff] }
  0xe8   :  { %v13207_v11 = vcombine.high %v835_v5, %v839_v6  ;;  %v13206_v18 = vcombine.low %v835_v5, %v839_v6  ;;  %v875_v58 = vld [vmem:[%s19911_s1 + $0x1900] sm:$0xff] }
  0xe9   :  { %9883 = vmatpush1.bf16.msra.mxu1 %v12640_v13  ;;  %v336_v13 = vld [vmem:[%s19911_s1 + $0x828] sm:$0xff]  ;;  %v887_v5 = vld [vmem:[%s19911_s1 + $0x1960] sm:$0xff] }
  0xea   :  { %9555 = vmatpush1.bf16.msra.mxu0 %v13150_v14  ;;  %9884 = vmatprep.subr.bf16.mxu1 %v12649_v15  ;;  %v843_v14 = vld [vmem:[%s19911_s1 + $0x1800] sm:$0xff]  ;;  %v12705_v19 = vcombine.high %v332_v12, %v336_v13  ;;  %v12704_v29 = vcombine.low %v332_v12, %v336_v13  ;;  %v384_v12 = vld [vmem:[%s19911_s1 + $0x9a8] sm:$0xff] }
  0xeb   :  { %9556 = vmatprep.subr.bf16.mxu0 %v13159_v17  ;;  %v847_v15 = vld [vmem:[%s19911_s1 + $0x1820] sm:$0xff]  ;;  %v12696_v17 = vcombine.low %v324_v3, %v328_v4  ;;  %v376_v3 = vld [vmem:[%s19911_s1 + $0x968] sm:$0xff] }
  0xec   :  { %v13215_v22 = vcombine.high %v843_v14, %v847_v15  ;;  %v13214_v32 = vcombine.low %v843_v14, %v847_v15  ;;  %v883_v4 = vld [vmem:[%s19911_s1 + $0x1940] sm:$0xff] }
  0xed   :  { %9885 = vmatpush1.bf16.msra.mxu1 %v12648_v23  ;;  %v340_v23 = vld [vmem:[%s19911_s1 + $0x848] sm:$0xff]  ;;  %v891_v13 = vld [vmem:[%s19911_s1 + $0x1980] sm:$0xff] }
  0xee   :  { %9557 = vmatpush1.bf16.msra.mxu0 %v13158_v24  ;;  %9886 = vmatprep.subr.bf16.mxu1 %v12657_v25  ;;  %v344_v24 = vld [vmem:[%s19911_s1 + $0x868] sm:$0xff]  ;;  %v851_v25 = vld [vmem:[%s19911_s1 + $0x1840] sm:$0xff] }
  0xef   :  { %9558 = vmatprep.subr.bf16.mxu0 %v13167_v26  ;;  %v855_v26 = vld [vmem:[%s19911_s1 + $0x1860] sm:$0xff]  ;;  %v12712_v42 = vcombine.low %v340_v23, %v344_v24 }
  0xf0   :  { %v895_v14 = vld [vmem:[%s19911_s1 + $0x19a0] sm:$0xff] }
  0xf1   :  { %9887 = vmatpush1.bf16.msra.mxu1 %v12656_v33  ;;  %v12713_v33 = vcombine.high %v340_v23, %v344_v24  ;;  %v899_v23 = vld [vmem:[%s19911_s1 + $0x19c0] sm:$0xff] }
  0xf2   :  { %9559 = vmatpush1.bf16.msra.mxu0 %v13166_v34  ;;  %9888 = vmatprep.subr.bf16.mxu1 %v12665_v35  ;;  %v13223_v34 = vcombine.high %v851_v25, %v855_v26  ;;  %v348_v35 = vld [vmem:[%s19911_s1 + $0x888] sm:$0xff]  ;;  %v903_v24 = vld [vmem:[%s19911_s1 + $0x19e0] sm:$0xff] }
  0xf3   :  { %9560 = vmatprep.subr.bf16.mxu0 %v13175_v37  ;;  %v352_v37 = vld [vmem:[%s19911_s1 + $0x8a8] sm:$0xff] }
  0xf4   :  { %v12720_v51 = vcombine.low %v348_v35, %v352_v37 }
  0xf5   :  { %9889 = vmatpush1.bf16.msra.mxu1 %v12664_v43  ;;  %v13222_v43 = vcombine.low %v851_v25, %v855_v26  ;;  %v13262_v26 = vcombine.low %v891_v13, %v895_v14 }
  0xf6   :  { %9561 = vmatpush1.bf16.msra.mxu0 %v13174_v44  ;;  %9890 = vmatprep.subr.bf16.mxu1 %v12673_v45  ;;  %v12721_v44 = vcombine.high %v348_v35, %v352_v37  ;;  %v13231_v45 = vcombine.high %v859_v39, %v863_v40  ;;  %v911_v35 = vld [vmem:[%s19911_s1 + $0x1a20] sm:$0xff] }
  0xf7   :  { %9562 = vmatprep.subr.bf16.mxu0 %v13183_v46  ;;  %v356_v46 = vld [vmem:[%s19911_s1 + $0x8c8] sm:$0xff] }
  0xf8   :  { %v12728_v60 = vcombine.low %v356_v46, %v360_v48 }
  0xf9   :  { %9891 = vmatpush1.bf16.msra.mxu1 %v12672_v52  ;;  %v13230_v52 = vcombine.low %v859_v39, %v863_v40  ;;  %v13270_v39 = vcombine.low %v899_v23, %v903_v24 }
  0xfa   :  { %9563 = vmatpush1.bf16.msra.mxu0 %v13182_v53  ;;  %9892 = vmatprep.subr.bf16.mxu1 %v12681_v54  ;;  %v12729_v53 = vcombine.high %v356_v46, %v360_v48  ;;  %v13239_v54 = vcombine.high %v867_v49, %v871_v50  ;;  %v919_v46 = vld [vmem:[%s19911_s1 + $0x1a60] sm:$0xff] }
  0xfb   :  { %9564 = vmatprep.subr.bf16.mxu0 %v13191_v55  ;;  %v364_v55 = vld [vmem:[%s19911_s1 + $0x908] sm:$0xff] }
  0xfc   :  { %v12736_v6 = vcombine.low %v364_v55, %v368_v56 }
  0xfd   :  { %9893 = vmatpush1.bf16.msra.mxu1 %v12680_v62  ;;  %v13238_v62 = vcombine.low %v867_v49, %v871_v50 }
  0xfe   :  { %9565 = vmatpush1.bf16.msra.mxu0 %v13190_v63  ;;  %9894 = vmatprep.subr.bf16.mxu1 %v12689_v0  ;;  %v12737_v63 = vcombine.high %v364_v55, %v368_v56  ;;  %v13247_v0 = vcombine.high %v875_v58, %v879_v59  ;;  %v927_v55 = vld [vmem:[%s19911_s1 + $0x1aa0] sm:$0xff] }
  0xff   :  { %9566 = vmatprep.subr.bf16.mxu0 %v13199_v2  ;;  %v372_v2 = vld [vmem:[%s19911_s1 + $0x948] sm:$0xff] }
 0x100   :  { %v12744_v15 = vcombine.low %v372_v2, %v376_v3 }
 0x101   :  { %9895 = vmatpush1.bf16.msra.mxu1 %v12688_v8  ;;  %v13246_v8 = vcombine.low %v875_v58, %v879_v59 }
 0x102   :  { %9567 = vmatpush1.bf16.msra.mxu0 %v13198_v9  ;;  %9896 = vmatprep.subr.bf16.mxu1 %v12697_v10  ;;  %v12745_v9 = vcombine.high %v372_v2, %v376_v3  ;;  %v13255_v10 = vcombine.high %v883_v4, %v887_v5  ;;  %v935_v2 = vld [vmem:[%s19911_s1 + $0x1ae0] sm:$0xff] }
 0x103   :  { %9568 = vmatprep.subr.bf16.mxu0 %v13207_v11  ;;  %v380_v11 = vld [vmem:[%s19911_s1 + $0x988] sm:$0xff] }
 0x104   :  { %v12752_v25 = vcombine.low %v380_v11, %v384_v12 }
 0x105   :  { %9897 = vmatpush1.bf16.msra.mxu1 %v12696_v17  ;;  %v13254_v17 = vcombine.low %v883_v4, %v887_v5 }
 0x106   :  { %9569 = vmatpush1.bf16.msra.mxu0 %v13206_v18  ;;  %9907 = vmatprep.subr.bf16.mxu1 %v12705_v19  ;;  %v12753_v18 = vcombine.high %v380_v11, %v384_v12  ;;  %v13263_v19 = vcombine.high %v891_v13, %v895_v14  ;;  %v943_v11 = vld [vmem:[%s19911_s1 + $0x1b20] sm:$0xff] }
 0x107   :  { %9579 = vmatprep.subr.bf16.mxu0 %v13215_v22  ;;  %v392_v22 = vld [vmem:[%s19911_s1 + $0x9e8] sm:$0xff] }
 0x108   :  { %9899 = vmatmul.mubr.bf16.vlgmr.msra.gmra.mrb[4].mxu1 %v15039_v36  ;;  %v12761_v27 = vcombine.high %v388_v20, %v392_v22  ;;  %v12760_v37 = vcombine.low %v388_v20, %v392_v22  ;;  %v951_v20 = vld [vmem:[%s19911_s1 + $0x1b60] sm:$0xff] }
 0x109   :  { %9571 = vmatmul.mubr.bf16.vlgmr.msra.gmra.mrb[0].mxu0 %v15462_v30  ;;  %9908 = vmatpush1.bf16.msra.mxu1 %v12704_v29  ;;  %v13271_v29 = vcombine.high %v899_v23, %v903_v24 }
 0x10a   :  { %9580 = vmatpush1.bf16.msra.mxu0 %v13214_v32  ;;  %9909 = vmatprep.subr.bf16.mxu1 %v12713_v33  ;;  %v396_v32 = vld [vmem:[%s19911_s1 + $0xa08] sm:$0xff] }
 0x10b   :  { %9581 = vmatprep.subr.bf16.mxu0 %v13223_v34  ;;  %9611 = vmatprep.mubr.bf16.mxu0 %v15470_v38  ;;  %v400_v33 = vld [vmem:[%s19911_s1 + $0xa28] sm:$0xff]  ;;  %v907_v34 = vld [vmem:[%s19911_s1 + $0x1a00] sm:$0xff] }
 0x10c   :  { %9939 = vmatprep.mubr.bf16.mxu1 %v14699_v61  ;;  %v12769_v40 = vcombine.high %v396_v32, %v400_v33  ;;  %v12768_v48 = vcombine.low %v396_v32, %v400_v33  ;;  %v13278_v49 = vcombine.low %v907_v34, %v911_v35  ;;  %v959_v32 = vld [vmem:[%s19911_s1 + $0x1ba0] sm:$0xff] }
 0x10d   :  { %9910 = vmatpush1.bf16.msra.mxu1 %v12712_v42  ;;  %v13279_v42 = vcombine.high %v907_v34, %v911_v35 }
 0x10e   :  { %9582 = vmatpush1.bf16.msra.mxu0 %v13222_v43  ;;  %9911 = vmatprep.subr.bf16.mxu1 %v12721_v44  ;;  %v404_v43 = vld [vmem:[%s19911_s1 + $0xa48] sm:$0xff] }
 0x10f   :  { %9583 = vmatprep.subr.bf16.mxu0 %v13231_v45  ;;  %v408_v44 = vld [vmem:[%s19911_s1 + $0xa68] sm:$0xff]  ;;  %v915_v45 = vld [vmem:[%s19911_s1 + $0x1a40] sm:$0xff] }
 0x110   :  { %v12777_v50 = vcombine.high %v404_v43, %v408_v44  ;;  %v12776_v56 = vcombine.low %v404_v43, %v408_v44  ;;  %v13286_v58 = vcombine.low %v915_v45, %v919_v46  ;;  %v967_v43 = vld [vmem:[%s19911_s1 + $0x1be0] sm:$0xff] }
 0x111   :  { %9912 = vmatpush1.bf16.msra.mxu1 %v12720_v51  ;;  %v13287_v51 = vcombine.high %v915_v45, %v919_v46 }
 0x112   :  { %9584 = vmatpush1.bf16.msra.mxu0 %v13230_v52  ;;  %9913 = vmatprep.subr.bf16.mxu1 %v12729_v53  ;;  %v412_v52 = vld [vmem:[%s19911_s1 + $0xa88] sm:$0xff] }
 0x113   :  { %9585 = vmatprep.subr.bf16.mxu0 %v13239_v54  ;;  %v416_v53 = vld [vmem:[%s19911_s1 + $0xaa8] sm:$0xff]  ;;  %v923_v54 = vld [vmem:[%s19911_s1 + $0x1a80] sm:$0xff] }
 0x114   :  { %v12785_v59 = vcombine.high %v412_v52, %v416_v53  ;;  %v12784_v3 = vcombine.low %v412_v52, %v416_v53  ;;  %v13294_v4 = vcombine.low %v923_v54, %v927_v55  ;;  %v975_v52 = vld [vmem:[%s19911_s1 + $0x1c20] sm:$0xff] }
 0x115   :  { %9914 = vmatpush1.bf16.msra.mxu1 %v12728_v60  ;;  %v13295_v60 = vcombine.high %v923_v54, %v927_v55 }
 0x116   :  { %9586 = vmatpush1.bf16.msra.mxu0 %v13238_v62  ;;  %9915 = vmatprep.subr.bf16.mxu1 %v12737_v63  ;;  %v420_v62 = vld [vmem:[%s19911_s1 + $0xac8] sm:$0xff] }
 0x117   :  { %9587 = vmatprep.subr.bf16.mxu0 %v13247_v0  ;;  %v424_v63 = vld [vmem:[%s19911_s1 + $0xae8] sm:$0xff]  ;;  %v931_v0 = vld [vmem:[%s19911_s1 + $0x1ac0] sm:$0xff] }
 0x118   :  { %v12793_v5 = vcombine.high %v420_v62, %v424_v63  ;;  %v12792_v12 = vcombine.low %v420_v62, %v424_v63  ;;  %v13302_v13 = vcombine.low %v931_v0, %v935_v2  ;;  %v979_v62 = vld [vmem:[%s19911_s1 + $0x1c40] sm:$0xff] }
 0x119   :  { %9916 = vmatpush1.bf16.msra.mxu1 %v12736_v6  ;;  %v13303_v6 = vcombine.high %v931_v0, %v935_v2  ;;  %v983_v63 = vld [vmem:[%s19911_s1 + $0x1c60] sm:$0xff]  ;;  %v42_v0 = vld [vmem:[%s19912_s0 + $0x78] sm:$0xff] }
 0x11a   :  { %9588 = vmatpush1.bf16.msra.mxu0 %v13246_v8  ;;  %9917 = vmatprep.subr.bf16.mxu1 %v12745_v9  ;;  %v428_v8 = vld [vmem:[%s19911_s1 + $0xb08] sm:$0xff] }
 0x11b   :  { %9589 = vmatprep.subr.bf16.mxu0 %v13255_v10  ;;  %v432_v9 = vld [vmem:[%s19911_s1 + $0xb28] sm:$0xff]  ;;  %v939_v10 = vld [vmem:[%s19911_s1 + $0x1b00] sm:$0xff] }
 0x11c   :  { %v12801_v14 = vcombine.high %v428_v8, %v432_v9  ;;  %v12800_v22 = vcombine.low %v428_v8, %v432_v9  ;;  %v13310_v23 = vcombine.low %v939_v10, %v943_v11  ;;  %v476_v8 = vld [vmem:[%s19911_s1 + $0xc88] sm:$0xff] }
 0x11d   :  { %9918 = vmatpush1.bf16.msra.mxu1 %v12744_v15  ;;  %v13311_v15 = vcombine.high %v939_v10, %v943_v11  ;;  %v480_v9 = vld [vmem:[%s19911_s1 + $0xca8] sm:$0xff]  ;;  %v15676_v10 = vpack.c.bf16 %v42_v0, %v42_v0  ;;  %v987_v11 = vld [vmem:[%s19911_s1 + $0x1c80] sm:$0xff] }
 0x11e   :  { %9590 = vmatpush1.bf16.msra.mxu0 %v13254_v17  ;;  %9919 = vmatprep.subr.bf16.mxu1 %v12753_v18  ;;  %v436_v17 = vld [vmem:[%s19911_s1 + $0xb48] sm:$0xff]  ;;  %v1027_v0 = vld [vmem:[%s19911_s1 + $0x1dc0] sm:$0xff] }
 0x11f   :  { %9591 = vmatprep.subr.bf16.mxu0 %v13263_v19  ;;  %v440_v18 = vld [vmem:[%s19911_s1 + $0xb68] sm:$0xff]  ;;  %v947_v19 = vld [vmem:[%s19911_s1 + $0x1b40] sm:$0xff] }
 0x120   :  { %v12809_v24 = vcombine.high %v436_v17, %v440_v18  ;;  %v12808_v33 = vcombine.low %v436_v17, %v440_v18  ;;  %v13318_v34 = vcombine.low %v947_v19, %v951_v20  ;;  %v484_v18 = vld [vmem:[%s19911_s1 + $0xcc8] sm:$0xff] }
 0x121   :  { %9920 = vmatpush1.bf16.msra.mxu1 %v12752_v25  ;;  %v13319_v25 = vcombine.high %v947_v19, %v951_v20  ;;  %v488_v19 = vld [vmem:[%s19911_s1 + $0xce8] sm:$0xff]  ;;  %v995_v20 = vld [vmem:[%s19911_s1 + $0x1cc0] sm:$0xff] }
 0x122   :  { %9592 = vmatpush1.bf16.msra.mxu0 %v13262_v26  ;;  %9921 = vmatprep.subr.bf16.mxu1 %v12761_v27  ;;  %v444_v26 = vld [vmem:[%s19911_s1 + $0xb88] sm:$0xff] }
 0x123   :  { %9593 = vmatprep.subr.bf16.mxu0 %v13271_v29  ;;  %v448_v27 = vld [vmem:[%s19911_s1 + $0xba8] sm:$0xff]  ;;  %v955_v29 = vld [vmem:[%s19911_s1 + $0x1b80] sm:$0xff] }
 0x124   :  { %v12817_v35 = vcombine.high %v444_v26, %v448_v27  ;;  %v12816_v44 = vcombine.low %v444_v26, %v448_v27  ;;  %v13326_v45 = vcombine.low %v955_v29, %v959_v32  ;;  %v492_v27 = vld [vmem:[%s19911_s1 + $0xd08] sm:$0xff] }
 0x125   :  { %9922 = vmatpush1.bf16.msra.mxu1 %v12760_v37  ;;  %v13327_v37 = vcombine.high %v955_v29, %v959_v32  ;;  %v496_v29 = vld [vmem:[%s19911_s1 + $0xd28] sm:$0xff]  ;;  %v1003_v32 = vld [vmem:[%s19911_s1 + $0x1d00] sm:$0xff] }
 0x126   :  { %9594 = vmatpush1.bf16.msra.mxu0 %v13270_v39  ;;  %9923 = vmatprep.subr.bf16.mxu1 %v12769_v40  ;;  %v452_v39 = vld [vmem:[%s19911_s1 + $0xbc8] sm:$0xff] }
 0x127   :  { %9595 = vmatprep.subr.bf16.mxu0 %v13279_v42  ;;  %v456_v40 = vld [vmem:[%s19911_s1 + $0xbe8] sm:$0xff]  ;;  %v963_v42 = vld [vmem:[%s19911_s1 + $0x1bc0] sm:$0xff] }
 0x128   :  { %v12825_v46 = vcombine.high %v452_v39, %v456_v40  ;;  %v12824_v53 = vcombine.low %v452_v39, %v456_v40  ;;  %v13334_v54 = vcombine.low %v963_v42, %v967_v43  ;;  %v500_v40 = vld [vmem:[%s19911_s1 + $0xd48] sm:$0xff] }
 0x129   :  { %9924 = vmatpush1.bf16.msra.mxu1 %v12768_v48  ;;  %v13335_v48 = vcombine.high %v963_v42, %v967_v43  ;;  %v504_v42 = vld [vmem:[%s19911_s1 + $0xd68] sm:$0xff]  ;;  %v1011_v43 = vld [vmem:[%s19911_s1 + $0x1d40] sm:$0xff] }
 0x12a   :  { %9596 = vmatpush1.bf16.msra.mxu0 %v13278_v49  ;;  %9925 = vmatprep.subr.bf16.mxu1 %v12777_v50  ;;  %v460_v49 = vld [vmem:[%s19911_s1 + $0xc08] sm:$0xff] }
 0x12b   :  { %9597 = vmatprep.subr.bf16.mxu0 %v13287_v51  ;;  %v464_v50 = vld [vmem:[%s19911_s1 + $0xc28] sm:$0xff]  ;;  %v971_v51 = vld [vmem:[%s19911_s1 + $0x1c00] sm:$0xff] }
 0x12c   :  { %v12833_v55 = vcombine.high %v460_v49, %v464_v50  ;;  %v12832_v2 = vcombine.low %v460_v49, %v464_v50  ;;  %v508_v50 = vld [vmem:[%s19911_s1 + $0xd88] sm:$0xff] }
 0x12d   :  { %9926 = vmatpush1.bf16.msra.mxu1 %v12776_v56  ;;  %v39_v56 = vld [vmem:[%s19912_s0 + $0x60] sm:$0xff] }
 0x12e   :  { %9598 = vmatpush1.bf16.msra.mxu0 %v13286_v58  ;;  %9927 = vmatprep.subr.bf16.mxu1 %v12785_v59  ;;  %v13343_v58 = vcombine.high %v971_v51, %v975_v52  ;;  %v468_v59 = vld [vmem:[%s19911_s1 + $0xc48] sm:$0xff] }
 0x12f   :  { %9599 = vmatprep.subr.bf16.mxu0 %v13295_v60  ;;  %v472_v60 = vld [vmem:[%s19911_s1 + $0xc68] sm:$0xff] }
 0x131   :  { %9928 = vmatpush1.bf16.msra.mxu1 %v12784_v3  ;;  %v15668_v3 = vpack.c.bf16 %v39_v56, %v39_v56 }
 0x132   :  { %9600 = vmatpush1.bf16.msra.mxu0 %v13294_v4  ;;  %9929 = vmatprep.subr.bf16.mxu1 %v12793_v5  ;;  %v13342_v4 = vcombine.low %v971_v51, %v975_v52  ;;  %v12841_v5 = vcombine.high %v468_v59, %v472_v60  ;;  %v512_v51 = vld [vmem:[%s19911_s1 + $0xda8] sm:$0xff]  ;;  %v1019_v52 = vld [vmem:[%s19911_s1 + $0x1d80] sm:$0xff] }
 0x133   :  { %9601 = vmatprep.subr.bf16.mxu0 %v13303_v6  ;;  %v13351_v6 = vcombine.high %v979_v62, %v983_v63  ;;  %v12881_v56 = vcombine.high %v508_v50, %v512_v51 }
 0x135   :  { %9930 = vmatpush1.bf16.msra.mxu1 %v12792_v12  ;;  %v991_v12 = vld [vmem:[%s19911_s1 + $0x1ca0] sm:$0xff] }
 0x136   :  { %9602 = vmatpush1.bf16.msra.mxu0 %v13302_v13  ;;  %9931 = vmatprep.subr.bf16.mxu1 %v12801_v14  ;;  %v12840_v13 = vcombine.low %v468_v59, %v472_v60  ;;  %v13350_v14 = vcombine.low %v979_v62, %v983_v63  ;;  %v13359_v17 = vcombine.high %v987_v11, %v991_v12  ;;  %v516_v60 = vld [vmem:[%s19911_s1 + $0xdc8] sm:$0xff] }
 0x137   :  { %9603 = vmatprep.subr.bf16.mxu0 %v13311_v15  ;;  %v12849_v15 = vcombine.high %v476_v8, %v480_v9  ;;  %v520_v62 = vld [vmem:[%s19911_s1 + $0xde8] sm:$0xff] }
 0x139   :  { %9932 = vmatpush1.bf16.msra.mxu1 %v12800_v22  ;;  %v999_v22 = vld [vmem:[%s19911_s1 + $0x1ce0] sm:$0xff] }
 0x13a   :  { %9604 = vmatpush1.bf16.msra.mxu0 %v13310_v23  ;;  %9933 = vmatprep.subr.bf16.mxu1 %v12809_v24  ;;  %v12848_v23 = vcombine.low %v476_v8, %v480_v9  ;;  %v13358_v24 = vcombine.low %v987_v11, %v991_v12  ;;  %v13367_v26 = vcombine.high %v995_v20, %v999_v22  ;;  %v524_v12 = vld [vmem:[%s19911_s1 + $0xe08] sm:$0xff] }
 0x13b   :  { %9605 = vmatprep.subr.bf16.mxu0 %v13319_v25  ;;  %v12857_v25 = vcombine.high %v484_v18, %v488_v19  ;;  %v12889_v9 = vcombine.high %v516_v60, %v520_v62 }
 0x13d   :  { %9934 = vmatpush1.bf16.msra.mxu1 %v12808_v33  ;;  %v1007_v33 = vld [vmem:[%s19911_s1 + $0x1d20] sm:$0xff] }
 0x13e   :  { %9606 = vmatpush1.bf16.msra.mxu0 %v13318_v34  ;;  %9935 = vmatprep.subr.bf16.mxu1 %v12817_v35  ;;  %v12856_v34 = vcombine.low %v484_v18, %v488_v19  ;;  %v13366_v35 = vcombine.low %v995_v20, %v999_v22  ;;  %v13375_v39 = vcombine.high %v1003_v32, %v1007_v33  ;;  %v532_v22 = vld [vmem:[%s19911_s1 + $0xe48] sm:$0xff] }
 0x13f   :  { %9607 = vmatprep.subr.bf16.mxu0 %v13327_v37  ;;  %v12865_v37 = vcombine.high %v492_v27, %v496_v29 }
 0x141   :  { %9936 = vmatpush1.bf16.msra.mxu1 %v12816_v44  ;;  %v1015_v44 = vld [vmem:[%s19911_s1 + $0x1d60] sm:$0xff] }
 0x142   :  { %9608 = vmatpush1.bf16.msra.mxu0 %v13326_v45  ;;  %9937 = vmatprep.subr.bf16.mxu1 %v12825_v46  ;;  %v12864_v45 = vcombine.low %v492_v27, %v496_v29  ;;  %v13374_v46 = vcombine.low %v1003_v32, %v1007_v33  ;;  %v13383_v49 = vcombine.high %v1011_v43, %v1015_v44  ;;  %v540_v33 = vld [vmem:[%s19911_s1 + $0xe88] sm:$0xff] }
 0x143   :  { %9609 = vmatprep.subr.bf16.mxu0 %v13335_v48  ;;  %v12873_v48 = vcombine.high %v500_v40, %v504_v42 }
 0x145   :  { %9938 = vmatpush1.bf16.msra.mxu1 %v12824_v53  ;;  %v1023_v53 = vld [vmem:[%s19911_s1 + $0x1da0] sm:$0xff] }
 0x146   :  { %9610 = vmatpush1.bf16.msra.mxu0 %v13334_v54  ;;  %9948 = vmatprep.subr.bf16.mxu1 %v12833_v55  ;;  %v12872_v54 = vcombine.low %v500_v40, %v504_v42  ;;  %v13382_v55 = vcombine.low %v1011_v43, %v1015_v44  ;;  %v13391_v59 = vcombine.high %v1019_v52, %v1023_v53  ;;  %v548_v44 = vld [vmem:[%s19911_s1 + $0xec8] sm:$0xff] }
 0x147   :  { %9620 = vmatprep.subr.bf16.mxu0 %v13343_v58  ;;  %v13390_v8 = vcombine.low %v1019_v52, %v1023_v53  ;;  %v556_v53 = vld [vmem:[%s19911_s1 + $0xf08] sm:$0xff] }
 0x148   :  { %9940 = vmatmul.mubr.bf16.vlgmr.msra.gmra.mrb[4].mxu1 %v14834_v21 }
 0x149   :  { %9612 = vmatmul.mubr.bf16.vlgmr.msra.gmra.mrb[0].mxu0 %v15668_v3  ;;  %9949 = vmatpush1.bf16.msra.mxu1 %v12832_v2  ;;  %v1031_v2 = vld [vmem:[%s19911_s1 + $0x1de0] sm:$0xff] }
 0x14a   :  { %9621 = vmatpush1.bf16.msra.mxu0 %v13342_v4  ;;  %9950 = vmatprep.subr.bf16.mxu1 %v12841_v5  ;;  %v12880_v5 = vcombine.low %v508_v50, %v512_v51  ;;  %v13399_v11 = vcombine.high %v1027_v0, %v1031_v2  ;;  %v13398_v18 = vcombine.low %v1027_v0, %v1031_v2  ;;  %v564_v2 = vld [vmem:[%s19911_s1 + $0xf48] sm:$0xff] }
 0x14b   :  { %9622 = vmatprep.subr.bf16.mxu0 %v13351_v6  ;;  %9652 = vmatprep.mubr.bf16.mxu0 %v15676_v10 }
 0x14c   :  { %9980 = vmatprep.mubr.bf16.mxu1 %v14854_v31 }
 0x14d   :  { %9951 = vmatpush1.bf16.msra.mxu1 %v12840_v13  ;;  %v528_v13 = vld [vmem:[%s19911_s1 + $0xe28] sm:$0xff] }
 0x14e   :  { %9623 = vmatpush1.bf16.msra.mxu0 %v13350_v14  ;;  %9952 = vmatprep.subr.bf16.mxu1 %v12849_v15  ;;  %v1035_v14 = vld [vmem:[%s19911_s1 + $0x1e00] sm:$0xff]  ;;  %v12897_v19 = vcombine.high %v524_v12, %v528_v13 }
 0x14f   :  { %9624 = vmatprep.subr.bf16.mxu0 %v13359_v17  ;;  %v1039_v15 = vld [vmem:[%s19911_s1 + $0x1e20] sm:$0xff]  ;;  %v12888_v17 = vcombine.low %v516_v60, %v520_v62 }
 0x150   :  { %v13407_v20 = vcombine.high %v1035_v14, %v1039_v15  ;;  %v13406_v27 = vcombine.low %v1035_v14, %v1039_v15  ;;  %v576_v14 = vld [vmem:[%s19911_s1 + $0xfa8] sm:$0xff]  ;;  %v1083_v15 = vld [vmem:[%s19911_s1 + $0x1f80] sm:$0xff] }
 0x151   :  { %9953 = vmatpush1.bf16.msra.mxu1 %v12848_v23  ;;  %v536_v23 = vld [vmem:[%s19911_s1 + $0xe68] sm:$0xff] }
 0x152   :  { %9625 = vmatpush1.bf16.msra.mxu0 %v13358_v24  ;;  %9954 = vmatprep.subr.bf16.mxu1 %v12857_v25  ;;  %v1043_v24 = vld [vmem:[%s19911_s1 + $0x1e40] sm:$0xff]  ;;  %v12905_v29 = vcombine.high %v532_v22, %v536_v23 }
 0x153   :  { %9626 = vmatprep.subr.bf16.mxu0 %v13367_v26  ;;  %v1047_v25 = vld [vmem:[%s19911_s1 + $0x1e60] sm:$0xff]  ;;  %v12896_v26 = vcombine.low %v524_v12, %v528_v13  ;;  %v572_v13 = vld [vmem:[%s19911_s1 + $0xf88] sm:$0xff] }
 0x154   :  { %v13415_v32 = vcombine.high %v1043_v24, %v1047_v25  ;;  %v13414_v40 = vcombine.low %v1043_v24, %v1047_v25  ;;  %v584_v24 = vld [vmem:[%s19911_s1 + $0xfe8] sm:$0xff]  ;;  %v1091_v25 = vld [vmem:[%s19911_s1 + $0x1fc0] sm:$0xff] }
 0x155   :  { %9955 = vmatpush1.bf16.msra.mxu1 %v12856_v34  ;;  %v544_v34 = vld [vmem:[%s19911_s1 + $0xea8] sm:$0xff] }
 0x156   :  { %9627 = vmatpush1.bf16.msra.mxu0 %v13366_v35  ;;  %9956 = vmatprep.subr.bf16.mxu1 %v12865_v37  ;;  %v1051_v35 = vld [vmem:[%s19911_s1 + $0x1e80] sm:$0xff]  ;;  %v12913_v42 = vcombine.high %v540_v33, %v544_v34 }
 0x157   :  { %9628 = vmatprep.subr.bf16.mxu0 %v13375_v39  ;;  %v1055_v37 = vld [vmem:[%s19911_s1 + $0x1ea0] sm:$0xff]  ;;  %v12904_v39 = vcombine.low %v532_v22, %v536_v23  ;;  %v580_v23 = vld [vmem:[%s19911_s1 + $0xfc8] sm:$0xff] }
 0x158   :  { %v13423_v43 = vcombine.high %v1051_v35, %v1055_v37  ;;  %v13422_v50 = vcombine.low %v1051_v35, %v1055_v37  ;;  %v592_v35 = vld [vmem:[%s19911_s1 + $0x1028] sm:$0xff]  ;;  %v1099_v37 = vld [vmem:[%s19911_s1 + $0x2000] sm:$0xff] }
 0x159   :  { %9957 = vmatpush1.bf16.msra.mxu1 %v12864_v45  ;;  %v552_v45 = vld [vmem:[%s19911_s1 + $0xee8] sm:$0xff] }
 0x15a   :  { %9629 = vmatpush1.bf16.msra.mxu0 %v13374_v46  ;;  %9958 = vmatprep.subr.bf16.mxu1 %v12873_v48  ;;  %v1059_v46 = vld [vmem:[%s19911_s1 + $0x1ec0] sm:$0xff]  ;;  %v12921_v51 = vcombine.high %v548_v44, %v552_v45 }
 0x15b   :  { %v15736_v58 = vpop.f32.mrb[0].mxu1  ;;  %9630 = vmatprep.subr.bf16.mxu0 %v13383_v49  ;;  %v1063_v48 = vld [vmem:[%s19911_s1 + $0x1ee0] sm:$0xff]  ;;  %v12912_v49 = vcombine.low %v540_v33, %v544_v34  ;;  %v588_v34 = vld [vmem:[%s19911_s1 + $0x1008] sm:$0xff] }
 0x15c   :  { %v15744_v63 = vpop.f32.mrb[1].mxu1  ;;  %v13431_v52 = vcombine.high %v1059_v46, %v1063_v48  ;;  %v13430_v60 = vcombine.low %v1059_v46, %v1063_v48  ;;  %v596_v46 = vld [vmem:[%s19911_s1 + $0x1048] sm:$0xff] }
 0x15d   :  { %v9412_v4 = vpop.f32.mrb[2].mxu1  ;;  %9959 = vmatpush1.bf16.msra.mxu1 %v12872_v54  ;;  %v560_v54 = vld [vmem:[%s19911_s1 + $0xf28] sm:$0xff] }
 0x15e   :  { %9631 = vmatpush1.bf16.msra.mxu0 %v13382_v55  ;;  %v9413_v6 = vpop.f32.mrb[3].mxu1  ;;  %9960 = vmatprep.subr.bf16.mxu1 %v12881_v56  ;;  %v1067_v55 = vld [vmem:[%s19911_s1 + $0x1f00] sm:$0xff]  ;;  %v12929_v62 = vcombine.high %v556_v53, %v560_v54  ;;  %v568_v4 = vld [vmem:[%s19911_s1 + $0xf68] sm:$0xff] }
 0x15f   :  { %9632 = vmatprep.subr.bf16.mxu0 %v13391_v59  ;;  %v1071_v56 = vld [vmem:[%s19911_s1 + $0x1f20] sm:$0xff]  ;;  %v12920_v59 = vcombine.low %v548_v44, %v552_v45  ;;  %v41_v44 = vld [vmem:[%s19912_s0 + $0x70] sm:$0xff]  ;;  %v600_v48 = vld [vmem:[%s19911_s1 + $0x1068] sm:$0xff] }
 0x160   :  { %v13439_v0 = vcombine.high %v1067_v55, %v1071_v56  ;;  %v1079_v6 = vld [vmem:[%s19911_s1 + $0x1f60] sm:$0xff] }
 0x161   :  { %9961 = vmatpush1.bf16.msra.mxu1 %v12880_v5  ;;  %v1075_v5 = vld [vmem:[%s19911_s1 + $0x1f40] sm:$0xff] }
 0x162   :  { %9633 = vmatpush1.bf16.msra.mxu0 %v13390_v8  ;;  %9962 = vmatprep.subr.bf16.mxu1 %v12889_v9  ;;  %v12928_v8 = vcombine.low %v556_v53, %v560_v54  ;;  %v13438_v9 = vcombine.low %v1067_v55, %v1071_v56  ;;  %v13447_v12 = vcombine.high %v1075_v5, %v1079_v6 }
 0x163   :  { %9634 = vmatprep.subr.bf16.mxu0 %v13399_v11  ;;  %v12937_v11 = vcombine.high %v564_v2, %v568_v4  ;;  %v15878_v53 = vpack.c.bf16 %v41_v44, %v41_v44  ;;  %v12969_v55 = vcombine.high %v596_v46, %v600_v48  ;;  %v1147_v44 = vld [vmem:[%s19911_s1 + $0x2180] sm:$0xff] }
 0x165   :  { %9963 = vmatpush1.bf16.msra.mxu1 %v12888_v17  ;;  %v1087_v17 = vld [vmem:[%s19911_s1 + $0x1fa0] sm:$0xff] }
 0x166   :  { %9635 = vmatpush1.bf16.msra.mxu0 %v13398_v18  ;;  %9964 = vmatprep.subr.bf16.mxu1 %v12897_v19  ;;  %v12936_v18 = vcombine.low %v564_v2, %v568_v4  ;;  %v13446_v19 = vcombine.low %v1075_v5, %v1079_v6  ;;  %v13455_v22 = vcombine.high %v1083_v15, %v1087_v17  ;;  %v1119_v2 = vld [vmem:[%s19911_s1 + $0x20a0] sm:$0xff] }
 0x167   :  { %9636 = vmatprep.subr.bf16.mxu0 %v13407_v20  ;;  %v12945_v20 = vcombine.high %v572_v13, %v576_v14  ;;  %v12968_v4 = vcombine.low %v596_v46, %v600_v48 }
 0x169   :  { %9965 = vmatpush1.bf16.msra.mxu1 %v12896_v26  ;;  %v1095_v26 = vld [vmem:[%s19911_s1 + $0x1fe0] sm:$0xff] }
 0x16a   :  { %9637 = vmatpush1.bf16.msra.mxu0 %v13406_v27  ;;  %9966 = vmatprep.subr.bf16.mxu1 %v12905_v29  ;;  %v12944_v27 = vcombine.low %v572_v13, %v576_v14  ;;  %v13454_v29 = vcombine.low %v1083_v15, %v1087_v17  ;;  %v13463_v33 = vcombine.high %v1091_v25, %v1095_v26  ;;  %v1127_v13 = vld [vmem:[%s19911_s1 + $0x20e0] sm:$0xff] }
 0x16b   :  { %9638 = vmatprep.subr.bf16.mxu0 %v13415_v32  ;;  %v12953_v32 = vcombine.high %v580_v23, %v584_v24 }
 0x16d   :  { %9967 = vmatpush1.bf16.msra.mxu1 %v12904_v39  ;;  %v1103_v39 = vld [vmem:[%s19911_s1 + $0x2020] sm:$0xff] }
 0x16e   :  { %9639 = vmatpush1.bf16.msra.mxu0 %v13414_v40  ;;  %9968 = vmatprep.subr.bf16.mxu1 %v12913_v42  ;;  %v12952_v40 = vcombine.low %v580_v23, %v584_v24  ;;  %v13462_v42 = vcombine.low %v1091_v25, %v1095_v26  ;;  %v13471_v45 = vcombine.high %v1099_v37, %v1103_v39  ;;  %v1135_v23 = vld [vmem:[%s19911_s1 + $0x2120] sm:$0xff] }
 0x16f   :  { %9640 = vmatprep.subr.bf16.mxu0 %v13423_v43  ;;  %v12961_v43 = vcombine.high %v588_v34, %v592_v35  ;;  %v13470_v54 = vcombine.low %v1099_v37, %v1103_v39 }
 0x171   :  { %9969 = vmatpush1.bf16.msra.mxu1 %v12912_v49  ;;  %v1107_v49 = vld [vmem:[%s19911_s1 + $0x2040] sm:$0xff] }
 0x172   :  { %9641 = vmatpush1.bf16.msra.mxu0 %v13422_v50  ;;  %9970 = vmatprep.subr.bf16.mxu1 %v12921_v51  ;;  %v1111_v50 = vld [vmem:[%s19911_s1 + $0x2060] sm:$0xff]  ;;  %v44_v51 = vld [vmem:[%s19912_s0 + $0x88] sm:$0xff] }
 0x173   :  { %9642 = vmatprep.subr.bf16.mxu0 %v13431_v52  ;;  %v12960_v52 = vcombine.low %v588_v34, %v592_v35  ;;  %v13479_v56 = vcombine.high %v1107_v49, %v1111_v50  ;;  %v13478_v5 = vcombine.low %v1107_v49, %v1111_v50  ;;  %v1143_v34 = vld [vmem:[%s19911_s1 + $0x2160] sm:$0xff] }
 0x175   :  { %9971 = vmatpush1.bf16.msra.mxu1 %v12920_v59  ;;  %v604_v59 = vld [vmem:[%s19911_s1 + $0x1088] sm:$0xff] }
 0x176   :  { %9643 = vmatpush1.bf16.msra.mxu0 %v13430_v60  ;;  %9972 = vmatprep.subr.bf16.mxu1 %v12929_v62  ;;  %v608_v60 = vld [vmem:[%s19911_s1 + $0x10a8] sm:$0xff]  ;;  %v15886_v62 = vpack.c.bf16 %v44_v51, %v44_v51 }
 0x177   :  { %9644 = vmatprep.subr.bf16.mxu0 %v13439_v0  ;;  %v1115_v0 = vld [vmem:[%s19911_s1 + $0x2080] sm:$0xff]  ;;  %v12977_v6 = vcombine.high %v604_v59, %v608_v60  ;;  %v12976_v14 = vcombine.low %v604_v59, %v608_v60  ;;  %v644_v51 = vld [vmem:[%s19911_s1 + $0x11c8] sm:$0xff] }
 0x178   :  { %v13486_v15 = vcombine.low %v1115_v0, %v1119_v2 }
 0x179   :  { %9973 = vmatpush1.bf16.msra.mxu1 %v12928_v8  ;;  %v13487_v8 = vcombine.high %v1115_v0, %v1119_v2  ;;  %v652_v2 = vld [vmem:[%s19911_s1 + $0x1208] sm:$0xff] }
 0x17a   :  { %9645 = vmatpush1.bf16.msra.mxu0 %v13438_v9  ;;  %9974 = vmatprep.subr.bf16.mxu1 %v12937_v11  ;;  %v612_v9 = vld [vmem:[%s19911_s1 + $0x10c8] sm:$0xff] }
 0x17b   :  { %9646 = vmatprep.subr.bf16.mxu0 %v13447_v12  ;;  %v616_v11 = vld [vmem:[%s19911_s1 + $0x10e8] sm:$0xff]  ;;  %v1123_v12 = vld [vmem:[%s19911_s1 + $0x20c0] sm:$0xff] }
 0x17c   :  { %v12985_v17 = vcombine.high %v612_v9, %v616_v11  ;;  %v12984_v24 = vcombine.low %v612_v9, %v616_v11  ;;  %v13494_v25 = vcombine.low %v1123_v12, %v1127_v13 }
 0x17d   :  { %9975 = vmatpush1.bf16.msra.mxu1 %v12936_v18  ;;  %v13495_v18 = vcombine.high %v1123_v12, %v1127_v13  ;;  %v660_v13 = vld [vmem:[%s19911_s1 + $0x1248] sm:$0xff] }
 0x17e   :  { %9647 = vmatpush1.bf16.msra.mxu0 %v13446_v19  ;;  %9976 = vmatprep.subr.bf16.mxu1 %v12945_v20  ;;  %v620_v19 = vld [vmem:[%s19911_s1 + $0x1108] sm:$0xff] }
 0x17f   :  { %9648 = vmatprep.subr.bf16.mxu0 %v13455_v22  ;;  %v624_v20 = vld [vmem:[%s19911_s1 + $0x1128] sm:$0xff]  ;;  %v1131_v22 = vld [vmem:[%s19911_s1 + $0x2100] sm:$0xff] }
 0x180   :  { %v12993_v26 = vcombine.high %v620_v19, %v624_v20  ;;  %v12992_v35 = vcombine.low %v620_v19, %v624_v20  ;;  %v13502_v37 = vcombine.low %v1131_v22, %v1135_v23 }
 0x181   :  { %9977 = vmatpush1.bf16.msra.mxu1 %v12944_v27  ;;  %v13503_v27 = vcombine.high %v1131_v22, %v1135_v23  ;;  %v668_v23 = vld [vmem:[%s19911_s1 + $0x1288] sm:$0xff] }
 0x182   :  { %9649 = vmatpush1.bf16.msra.mxu0 %v13454_v29  ;;  %9978 = vmatprep.subr.bf16.mxu1 %v12953_v32  ;;  %v628_v29 = vld [vmem:[%s19911_s1 + $0x1148] sm:$0xff] }
 0x183   :  { %9650 = vmatprep.subr.bf16.mxu0 %v13463_v33  ;;  %v632_v32 = vld [vmem:[%s19911_s1 + $0x1168] sm:$0xff]  ;;  %v1139_v33 = vld [vmem:[%s19911_s1 + $0x2140] sm:$0xff] }
 0x184   :  { %v13001_v39 = vcombine.high %v628_v29, %v632_v32  ;;  %v13000_v46 = vcombine.low %v628_v29, %v632_v32  ;;  %v13510_v48 = vcombine.low %v1139_v33, %v1143_v34 }
 0x185   :  { %9979 = vmatpush1.bf16.msra.mxu1 %v12952_v40  ;;  %v13511_v40 = vcombine.high %v1139_v33, %v1143_v34  ;;  %v676_v34 = vld [vmem:[%s19911_s1 + $0x12c8] sm:$0xff] }
 0x186   :  { %9651 = vmatpush1.bf16.msra.mxu0 %v13462_v42  ;;  %9989 = vmatprep.subr.bf16.mxu1 %v12961_v43  ;;  %v636_v42 = vld [vmem:[%s19911_s1 + $0x1188] sm:$0xff] }
 0x187   :  { %9661 = vmatprep.subr.bf16.mxu0 %v13471_v45  ;;  %v640_v43 = vld [vmem:[%s19911_s1 + $0x11a8] sm:$0xff]  ;;  %v1151_v45 = vld [vmem:[%s19911_s1 + $0x21a0] sm:$0xff] }
 0x188   :  { %9981 = vmatmul.mubr.bf16.vlgmr.msra.gmra.mrb[4].mxu1 %v15050_v41  ;;  %v13009_v49 = vcombine.high %v636_v42, %v640_v43  ;;  %v13519_v50 = vcombine.high %v1147_v44, %v1151_v45  ;;  %v13518_v59 = vcombine.low %v1147_v44, %v1151_v45  ;;  %v684_v45 = vld [vmem:[%s19911_s1 + $0x1308] sm:$0xff] }
 0x189   :  { %9653 = vmatmul.mubr.bf16.vlgmr.msra.gmra.mrb[0].mxu0 %v15878_v53  ;;  %9990 = vmatpush1.bf16.msra.mxu1 %v12960_v52  ;;  %v648_v52 = vld [vmem:[%s19911_s1 + $0x11e8] sm:$0xff] }
 0x18a   :  { %9662 = vmatpush1.bf16.msra.mxu0 %v13470_v54  ;;  %9991 = vmatprep.subr.bf16.mxu1 %v12969_v55  ;;  %v1155_v54 = vld [vmem:[%s19911_s1 + $0x21c0] sm:$0xff]  ;;  %v13017_v60 = vcombine.high %v644_v51, %v648_v52 }
 0x18b   :  { %9663 = vmatprep.subr.bf16.mxu0 %v13479_v56  ;;  %9693 = vmatprep.mubr.bf16.mxu0 %v15886_v62  ;;  %v1159_v55 = vld [vmem:[%s19911_s1 + $0x21e0] sm:$0xff]  ;;  %v13008_v56 = vcombine.low %v636_v42, %v640_v43 }
 0x18c   :  { %10021 = vmatprep.mubr.bf16.mxu1 %v15058_v47  ;;  %v13527_v0 = vcombine.high %v1155_v54, %v1159_v55  ;;  %v13526_v9 = vcombine.low %v1155_v54, %v1159_v55  ;;  %v692_v55 = vld [vmem:[%s19911_s1 + $0x1348] sm:$0xff] }
 0x18d   :  { %9992 = vmatpush1.bf16.msra.mxu1 %v12968_v4  ;;  %v656_v4 = vld [vmem:[%s19911_s1 + $0x1228] sm:$0xff] }
 0x18e   :  { %9664 = vmatpush1.bf16.msra.mxu0 %v13478_v5  ;;  %9993 = vmatprep.subr.bf16.mxu1 %v12977_v6  ;;  %v1163_v5 = vld [vmem:[%s19911_s1 + $0x2200] sm:$0xff]  ;;  %v13025_v11 = vcombine.high %v652_v2, %v656_v4 }
 0x18f   :  { %9665 = vmatprep.subr.bf16.mxu0 %v13487_v8  ;;  %v1167_v6 = vld [vmem:[%s19911_s1 + $0x2220] sm:$0xff]  ;;  %v13016_v8 = vcombine.low %v644_v51, %v648_v52 }
 0x190   :  { %v13535_v12 = vcombine.high %v1163_v5, %v1167_v6  ;;  %v13534_v19 = vcombine.low %v1163_v5, %v1167_v6  ;;  %v700_v6 = vld [vmem:[%s19911_s1 + $0x1388] sm:$0xff] }
 0x191   :  { %9994 = vmatpush1.bf16.msra.mxu1 %v12976_v14  ;;  %v664_v14 = vld [vmem:[%s19911_s1 + $0x1268] sm:$0xff] }
 0x192   :  { %9666 = vmatpush1.bf16.msra.mxu0 %v13486_v15  ;;  %9995 = vmatprep.subr.bf16.mxu1 %v12985_v17  ;;  %v1171_v15 = vld [vmem:[%s19911_s1 + $0x2240] sm:$0xff]  ;;  %v13033_v20 = vcombine.high %v660_v13, %v664_v14 }
 0x193   :  { %9667 = vmatprep.subr.bf16.mxu0 %v13495_v18  ;;  %v1175_v17 = vld [vmem:[%s19911_s1 + $0x2260] sm:$0xff]  ;;  %v13024_v18 = vcombine.low %v652_v2, %v656_v4 }
 0x194   :  { %v13543_v22 = vcombine.high %v1171_v15, %v1175_v17  ;;  %v13542_v29 = vcombine.low %v1171_v15, %v1175_v17  ;;  %v708_v17 = vld [vmem:[%s19911_s1 + $0x13c8] sm:$0xff] }
 0x195   :  { %9996 = vmatpush1.bf16.msra.mxu1 %v12984_v24  ;;  %v672_v24 = vld [vmem:[%s19911_s1 + $0x12a8] sm:$0xff] }
 0x196   :  { %9668 = vmatpush1.bf16.msra.mxu0 %v13494_v25  ;;  %9997 = vmatprep.subr.bf16.mxu1 %v12993_v26  ;;  %v1179_v25 = vld [vmem:[%s19911_s1 + $0x2280] sm:$0xff]  ;;  %v13041_v32 = vcombine.high %v668_v23, %v672_v24 }
 0x197   :  { %9669 = vmatprep.subr.bf16.mxu0 %v13503_v27  ;;  %v1183_v26 = vld [vmem:[%s19911_s1 + $0x22a0] sm:$0xff]  ;;  %v13032_v27 = vcombine.low %v660_v13, %v664_v14 }
 0x198   :  { %v13551_v33 = vcombine.high %v1179_v25, %v1183_v26  ;;  %v13550_v42 = vcombine.low %v1179_v25, %v1183_v26  ;;  %v716_v26 = vld [vmem:[%s19911_s1 + $0x1408] sm:$0xff] }
 0x199   :  { %9998 = vmatpush1.bf16.msra.mxu1 %v12992_v35  ;;  %v680_v35 = vld [vmem:[%s19911_s1 + $0x12e8] sm:$0xff] }
 0x19a   :  { %9670 = vmatpush1.bf16.msra.mxu0 %v13502_v37  ;;  %9999 = vmatprep.subr.bf16.mxu1 %v13001_v39  ;;  %v1187_v37 = vld [vmem:[%s19911_s1 + $0x22c0] sm:$0xff]  ;;  %v13049_v43 = vcombine.high %v676_v34, %v680_v35 }
 0x19b   :  { %9671 = vmatprep.subr.bf16.mxu0 %v13511_v40  ;;  %v1191_v39 = vld [vmem:[%s19911_s1 + $0x22e0] sm:$0xff]  ;;  %v13040_v40 = vcombine.low %v668_v23, %v672_v24 }
 0x19c   :  { %v13559_v44 = vcombine.high %v1187_v37, %v1191_v39  ;;  %v13558_v51 = vcombine.low %v1187_v37, %v1191_v39  ;;  %v43_v37 = vld [vmem:[%s19912_s0 + $0x80] sm:$0xff] }
 0x19d   :  { %10000 = vmatpush1.bf16.msra.mxu1 %v13000_v46  ;;  %v688_v46 = vld [vmem:[%s19911_s1 + $0x1328] sm:$0xff] }
 0x19e   :  { %9672 = vmatpush1.bf16.msra.mxu0 %v13510_v48  ;;  %10001 = vmatprep.subr.bf16.mxu1 %v13009_v49  ;;  %v1195_v48 = vld [vmem:[%s19911_s1 + $0x2300] sm:$0xff]  ;;  %v13057_v52 = vcombine.high %v684_v45, %v688_v46 }
 0x19f   :  { %9673 = vmatprep.subr.bf16.mxu0 %v13519_v50  ;;  %v1199_v49 = vld [vmem:[%s19911_s1 + $0x2320] sm:$0xff]  ;;  %v13048_v50 = vcombine.low %v676_v34, %v680_v35 }
 0x1a0   :  { %v13567_v54 = vcombine.high %v1195_v48, %v1199_v49  ;;  %v13566_v2 = vcombine.low %v1195_v48, %v1199_v49  ;;  %v16084_v48 = vpack.c.bf16 %v43_v37, %v43_v37  ;;  %v764_v37 = vld [vmem:[%s19911_s1 + $0x1588] sm:$0xff] }
 0x1a1   :  { %10002 = vmatpush1.bf16.msra.mxu1 %v13008_v56  ;;  %v696_v56 = vld [vmem:[%s19911_s1 + $0x1368] sm:$0xff] }
 0x1a2   :  { %9674 = vmatpush1.bf16.msra.mxu0 %v13518_v59  ;;  %10003 = vmatprep.subr.bf16.mxu1 %v13017_v60  ;;  %v1203_v59 = vld [vmem:[%s19911_s1 + $0x2340] sm:$0xff]  ;;  %v13065_v4 = vcombine.high %v692_v55, %v696_v56 }
 0x1a3   :  { %9675 = vmatprep.subr.bf16.mxu0 %v13527_v0  ;;  %v1207_v60 = vld [vmem:[%s19911_s1 + $0x2360] sm:$0xff]  ;;  %v13056_v0 = vcombine.low %v684_v45, %v688_v46  ;;  %v46_v45 = vld [vmem:[%s19912_s0 + $0x98] sm:$0xff] }
 0x1a4   :  { %v13575_v5 = vcombine.high %v1203_v59, %v1207_v60  ;;  %v13574_v13 = vcombine.low %v1203_v59, %v1207_v60  ;;  %v1247_v59 = vld [vmem:[%s19911_s1 + $0x24a0] sm:$0xff] }
 0x1a5   :  { %10004 = vmatpush1.bf16.msra.mxu1 %v13016_v8  ;;  %v704_v8 = vld [vmem:[%s19911_s1 + $0x13a8] sm:$0xff] }
 0x1a6   :  { %9676 = vmatpush1.bf16.msra.mxu0 %v13526_v9  ;;  %10005 = vmatprep.subr.bf16.mxu1 %v13025_v11  ;;  %v1211_v9 = vld [vmem:[%s19911_s1 + $0x2380] sm:$0xff]  ;;  %v13073_v14 = vcombine.high %v700_v6, %v704_v8 }
 0x1a7   :  { %9677 = vmatprep.subr.bf16.mxu0 %v13535_v12  ;;  %v1215_v11 = vld [vmem:[%s19911_s1 + $0x23a0] sm:$0xff]  ;;  %v13064_v12 = vcombine.low %v692_v55, %v696_v56  ;;  %v16092_v55 = vpack.c.bf16 %v46_v45, %v46_v45 }
 0x1a8   :  { %v13583_v15 = vcombine.high %v1211_v9, %v1215_v11  ;;  %v13582_v23 = vcombine.low %v1211_v9, %v1215_v11  ;;  %v1243_v56 = vld [vmem:[%s19911_s1 + $0x2480] sm:$0xff] }
 0x1a9   :  { %10006 = vmatpush1.bf16.msra.mxu1 %v13024_v18  ;;  %v712_v18 = vld [vmem:[%s19911_s1 + $0x13e8] sm:$0xff]  ;;  %v1255_v9 = vld [vmem:[%s19911_s1 + $0x24e0] sm:$0xff] }
 0x1aa   :  { %9678 = vmatpush1.bf16.msra.mxu0 %v13534_v19  ;;  %10007 = vmatprep.subr.bf16.mxu1 %v13033_v20  ;;  %v1219_v19 = vld [vmem:[%s19911_s1 + $0x23c0] sm:$0xff]  ;;  %v13081_v24 = vcombine.high %v708_v17, %v712_v18 }
 0x1ab   :  { %9679 = vmatprep.subr.bf16.mxu0 %v13543_v22  ;;  %v1223_v20 = vld [vmem:[%s19911_s1 + $0x23e0] sm:$0xff]  ;;  %v13072_v22 = vcombine.low %v700_v6, %v704_v8  ;;  %v744_v6 = vld [vmem:[%s19911_s1 + $0x14e8] sm:$0xff] }
 0x1ac   :  { %v13591_v25 = vcombine.high %v1219_v19, %v1223_v20  ;;  %v13590_v34 = vcombine.low %v1219_v19, %v1223_v20  ;;  %v1251_v8 = vld [vmem:[%s19911_s1 + $0x24c0] sm:$0xff] }
 0x1ad   :  { %10008 = vmatpush1.bf16.msra.mxu1 %v13032_v27  ;;  %v720_v27 = vld [vmem:[%s19911_s1 + $0x1428] sm:$0xff]  ;;  %v1263_v19 = vld [vmem:[%s19911_s1 + $0x2520] sm:$0xff] }
 0x1ae   :  { %9680 = vmatpush1.bf16.msra.mxu0 %v13542_v29  ;;  %10009 = vmatprep.subr.bf16.mxu1 %v13041_v32  ;;  %v1227_v29 = vld [vmem:[%s19911_s1 + $0x2400] sm:$0xff]  ;;  %v13089_v35 = vcombine.high %v716_v26, %v720_v27  ;;  %v13088_v46 = vcombine.low %v716_v26, %v720_v27  ;;  %v760_v26 = vld [vmem:[%s19911_s1 + $0x1568] sm:$0xff] }
 0x1af   :  { %9681 = vmatprep.subr.bf16.mxu0 %v13551_v33  ;;  %v1231_v32 = vld [vmem:[%s19911_s1 + $0x2420] sm:$0xff]  ;;  %v13080_v33 = vcombine.low %v708_v17, %v712_v18  ;;  %v752_v17 = vld [vmem:[%s19911_s1 + $0x1528] sm:$0xff] }
 0x1b0   :  { %v13599_v39 = vcombine.high %v1227_v29, %v1231_v32  ;;  %v13598_v49 = vcombine.low %v1227_v29, %v1231_v32  ;;  %v1259_v18 = vld [vmem:[%s19911_s1 + $0x2500] sm:$0xff] }
 0x1b1   :  { %10010 = vmatpush1.bf16.msra.mxu1 %v13040_v40  ;;  %v724_v40 = vld [vmem:[%s19911_s1 + $0x1448] sm:$0xff]  ;;  %v1267_v27 = vld [vmem:[%s19911_s1 + $0x2540] sm:$0xff] }
 0x1b2   :  { %9682 = vmatpush1.bf16.msra.mxu0 %v13550_v42  ;;  %10011 = vmatprep.subr.bf16.mxu1 %v13049_v43  ;;  %v728_v42 = vld [vmem:[%s19911_s1 + $0x1468] sm:$0xff]  ;;  %v1235_v43 = vld [vmem:[%s19911_s1 + $0x2440] sm:$0xff] }
 0x1b3   :  { %9683 = vmatprep.subr.bf16.mxu0 %v13559_v44  ;;  %v1239_v44 = vld [vmem:[%s19911_s1 + $0x2460] sm:$0xff]  ;;  %v13096_v60 = vcombine.low %v724_v40, %v728_v42 }
 0x1b4   :  { %v1271_v29 = vld [vmem:[%s19911_s1 + $0x2560] sm:$0xff] }
 0x1b5   :  { %10012 = vmatpush1.bf16.msra.mxu1 %v13048_v50  ;;  %v13097_v50 = vcombine.high %v724_v40, %v728_v42  ;;  %v1275_v40 = vld [vmem:[%s19911_s1 + $0x2580] sm:$0xff] }
 0x1b6   :  { %9684 = vmatpush1.bf16.msra.mxu0 %v13558_v51  ;;  %10013 = vmatprep.subr.bf16.mxu1 %v13057_v52  ;;  %v13607_v51 = vcombine.high %v1235_v43, %v1239_v44  ;;  %v732_v52 = vld [vmem:[%s19911_s1 + $0x1488] sm:$0xff]  ;;  %v1279_v42 = vld [vmem:[%s19911_s1 + $0x25a0] sm:$0xff] }
 0x1b7   :  { %9685 = vmatprep.subr.bf16.mxu0 %v13567_v54  ;;  %v736_v54 = vld [vmem:[%s19911_s1 + $0x14a8] sm:$0xff] }
 0x1b8   :  { %v13104_v11 = vcombine.low %v732_v52, %v736_v54 }
 0x1b9   :  { %10014 = vmatpush1.bf16.msra.mxu1 %v13056_v0  ;;  %v13606_v0 = vcombine.low %v1235_v43, %v1239_v44  ;;  %v13638_v44 = vcombine.low %v1267_v27, %v1271_v29 }
 0x1ba   :  { %9686 = vmatpush1.bf16.msra.mxu0 %v13566_v2  ;;  %10015 = vmatprep.subr.bf16.mxu1 %v13065_v4  ;;  %v13105_v2 = vcombine.high %v732_v52, %v736_v54  ;;  %v13615_v4 = vcombine.high %v1243_v56, %v1247_v59  ;;  %v1287_v52 = vld [vmem:[%s19911_s1 + $0x25e0] sm:$0xff] }
 0x1bb   :  { %9687 = vmatprep.subr.bf16.mxu0 %v13575_v5  ;;  %v740_v5 = vld [vmem:[%s19911_s1 + $0x14c8] sm:$0xff] }
 0x1bc   :  { %v13112_v20 = vcombine.low %v740_v5, %v744_v6 }
 0x1bd   :  { %10016 = vmatpush1.bf16.msra.mxu1 %v13064_v12  ;;  %v13614_v12 = vcombine.low %v1243_v56, %v1247_v59  ;;  %v13646_v56 = vcombine.low %v1275_v40, %v1279_v42 }
 0x1be   :  { %9688 = vmatpush1.bf16.msra.mxu0 %v13574_v13  ;;  %10017 = vmatprep.subr.bf16.mxu1 %v13073_v14  ;;  %v13113_v13 = vcombine.high %v740_v5, %v744_v6  ;;  %v13623_v14 = vcombine.high %v1251_v8, %v1255_v9  ;;  %v1295_v5 = vld [vmem:[%s19911_s1 + $0x2620] sm:$0xff] }
 0x1bf   :  { %9689 = vmatprep.subr.bf16.mxu0 %v13583_v15  ;;  %v748_v15 = vld [vmem:[%s19911_s1 + $0x1508] sm:$0xff] }
 0x1c0   :  { %v13120_v32 = vcombine.low %v748_v15, %v752_v17 }
 0x1c1   :  { %10018 = vmatpush1.bf16.msra.mxu1 %v13072_v22  ;;  %v13622_v22 = vcombine.low %v1251_v8, %v1255_v9 }
 0x1c2   :  { %9690 = vmatpush1.bf16.msra.mxu0 %v13582_v23  ;;  %10019 = vmatprep.subr.bf16.mxu1 %v13081_v24  ;;  %v13121_v23 = vcombine.high %v748_v15, %v752_v17  ;;  %v13631_v24 = vcombine.high %v1259_v18, %v1263_v19  ;;  %v1303_v15 = vld [vmem:[%s19911_s1 + $0x2660] sm:$0xff] }
 0x1c3   :  { %9691 = vmatprep.subr.bf16.mxu0 %v13591_v25  ;;  %v756_v25 = vld [vmem:[%s19911_s1 + $0x1548] sm:$0xff] }
 0x1c4   :  { %v13128_v43 = vcombine.low %v756_v25, %v760_v26 }
 0x1c5   :  { %10020 = vmatpush1.bf16.msra.mxu1 %v13080_v33  ;;  %v13630_v33 = vcombine.low %v1259_v18, %v1263_v19 }
 0x1c6   :  { %9692 = vmatpush1.bf16.msra.mxu0 %v13590_v34  ;;  %10030 = vmatprep.subr.bf16.mxu1 %v13089_v35  ;;  %v13129_v34 = vcombine.high %v756_v25, %v760_v26  ;;  %v13639_v35 = vcombine.high %v1267_v27, %v1271_v29  ;;  %v1311_v25 = vld [vmem:[%s19911_s1 + $0x26a0] sm:$0xff] }
 0x1c7   :  { %9702 = vmatprep.subr.bf16.mxu0 %v13599_v39  ;;  %v768_v39 = vld [vmem:[%s19911_s1 + $0x15a8] sm:$0xff] }
 0x1c8   :  { %10022 = vmatmul.mubr.bf16.vlgmr.msra.gmra.mrb[4].mxu1 %v15256_v1  ;;  %v13137_v45 = vcombine.high %v764_v37, %v768_v39  ;;  %v13136_v54 = vcombine.low %v764_v37, %v768_v39  ;;  %v1319_v37 = vld [vmem:[%s19911_s1 + $0x26e0] sm:$0xff] }
 0x1c9   :  { %9694 = vmatmul.mubr.bf16.vlgmr.msra.gmra.mrb[0].mxu0 %v16084_v48  ;;  %10031 = vmatpush1.bf16.msra.mxu1 %v13088_v46  ;;  %v13647_v46 = vcombine.high %v1275_v40, %v1279_v42 }
 0x1ca   :  { %9703 = vmatpush1.bf16.msra.mxu0 %v13598_v49  ;;  %10032 = vmatprep.subr.bf16.mxu1 %v13097_v50  ;;  %v772_v49 = vld [vmem:[%s19911_s1 + $0x15c8] sm:$0xff] }
 0x1cb   :  { %9704 = vmatprep.subr.bf16.mxu0 %v13607_v51  ;;  %9734 = vmatprep.mubr.bf16.mxu0 %v16092_v55  ;;  %v776_v50 = vld [vmem:[%s19911_s1 + $0x15e8] sm:$0xff]  ;;  %v1283_v51 = vld [vmem:[%s19911_s1 + $0x25c0] sm:$0xff] }
 0x1cc   :  { %10062 = vmatprep.mubr.bf16.mxu1 %v15264_v7  ;;  %v13145_v59 = vcombine.high %v772_v49, %v776_v50  ;;  %v13144_v6 = vcombine.low %v772_v49, %v776_v50  ;;  %v13654_v8 = vcombine.low %v1283_v51, %v1287_v52  ;;  %v1327_v49 = vld [vmem:[%s19911_s1 + $0x2720] sm:$0xff] }
 0x1cd   :  { %10033 = vmatpush1.bf16.msra.mxu1 %v13096_v60  ;;  %v13655_v60 = vcombine.high %v1283_v51, %v1287_v52 }
 0x1ce   :  { %9705 = vmatpush1.bf16.msra.mxu0 %v13606_v0  ;;  %10034 = vmatprep.subr.bf16.mxu1 %v13105_v2  ;;  %v780_v0 = vld [vmem:[%s19911_s1 + $0x1608] sm:$0xff] }
 0x1cf   :  { %9706 = vmatprep.subr.bf16.mxu0 %v13615_v4  ;;  %v784_v2 = vld [vmem:[%s19911_s1 + $0x1628] sm:$0xff]  ;;  %v1291_v4 = vld [vmem:[%s19911_s1 + $0x2600] sm:$0xff] }
 0x1d0   :  { %v13153_v9 = vcombine.high %v780_v0, %v784_v2  ;;  %v13152_v17 = vcombine.low %v780_v0, %v784_v2  ;;  %v13662_v18 = vcombine.low %v1291_v4, %v1295_v5  ;;  %v1335_v0 = vld [vmem:[%s19911_s1 + $0x2760] sm:$0xff] }
 0x1d1   :  { %10035 = vmatpush1.bf16.msra.mxu1 %v13104_v11  ;;  %v13663_v11 = vcombine.high %v1291_v4, %v1295_v5 }
 0x1d2   :  { %9707 = vmatpush1.bf16.msra.mxu0 %v13614_v12  ;;  %10036 = vmatprep.subr.bf16.mxu1 %v13113_v13  ;;  %v788_v12 = vld [vmem:[%s19911_s1 + $0x1648] sm:$0xff] }
 0x1d3   :  { %9708 = vmatprep.subr.bf16.mxu0 %v13623_v14  ;;  %v792_v13 = vld [vmem:[%s19911_s1 + $0x1668] sm:$0xff]  ;;  %v1299_v14 = vld [vmem:[%s19911_s1 + $0x2640] sm:$0xff] }
 0x1d4   :  { %v13161_v19 = vcombine.high %v788_v12, %v792_v13  ;;  %v13160_v26 = vcombine.low %v788_v12, %v792_v13  ;;  %v13670_v27 = vcombine.low %v1299_v14, %v1303_v15  ;;  %v1343_v12 = vld [vmem:[%s19911_s1 + $0x27a0] sm:$0xff] }
 0x1d5   :  { %10037 = vmatpush1.bf16.msra.mxu1 %v13112_v20  ;;  %v13671_v20 = vcombine.high %v1299_v14, %v1303_v15 }
 0x1d6   :  { %9709 = vmatpush1.bf16.msra.mxu0 %v13622_v22  ;;  %10038 = vmatprep.subr.bf16.mxu1 %v13121_v23  ;;  %v796_v22 = vld [vmem:[%s19911_s1 + $0x1688] sm:$0xff] }
 0x1d7   :  { %9710 = vmatprep.subr.bf16.mxu0 %v13631_v24  ;;  %v800_v23 = vld [vmem:[%s19911_s1 + $0x16a8] sm:$0xff]  ;;  %v1307_v24 = vld [vmem:[%s19911_s1 + $0x2680] sm:$0xff] }
 0x1d8   :  { %v13169_v29 = vcombine.high %v796_v22, %v800_v23  ;;  %v13168_v39 = vcombine.low %v796_v22, %v800_v23  ;;  %v13678_v40 = vcombine.low %v1307_v24, %v1311_v25  ;;  %v1351_v22 = vld [vmem:[%s19911_s1 + $0x27e0] sm:$0xff] }
 0x1d9   :  { %10039 = vmatpush1.bf16.msra.mxu1 %v13120_v32  ;;  %v13679_v32 = vcombine.high %v1307_v24, %v1311_v25 }
 0x1da   :  { %9711 = vmatpush1.bf16.msra.mxu0 %v13630_v33  ;;  %10040 = vmatprep.subr.bf16.mxu1 %v13129_v34  ;;  %v804_v33 = vld [vmem:[%s19911_s1 + $0x16c8] sm:$0xff] }
 0x1db   :  { %9712 = vmatprep.subr.bf16.mxu0 %v13639_v35  ;;  %v808_v34 = vld [vmem:[%s19911_s1 + $0x16e8] sm:$0xff]  ;;  %v1315_v35 = vld [vmem:[%s19911_s1 + $0x26c0] sm:$0xff] }
 0x1dc   :  { %v13177_v42 = vcombine.high %v804_v33, %v808_v34  ;;  %v13176_v50 = vcombine.low %v804_v33, %v808_v34  ;;  %v13686_v51 = vcombine.low %v1315_v35, %v1319_v37  ;;  %v1359_v33 = vld [vmem:[%s19911_s1 + $0x2820] sm:$0xff] }
 0x1dd   :  { %10041 = vmatpush1.bf16.msra.mxu1 %v13128_v43  ;;  %v13687_v43 = vcombine.high %v1315_v35, %v1319_v37 }
 0x1de   :  { %9713 = vmatpush1.bf16.msra.mxu0 %v13638_v44  ;;  %10042 = vmatprep.subr.bf16.mxu1 %v13137_v45  ;;  %v812_v44 = vld [vmem:[%s19911_s1 + $0x1708] sm:$0xff] }
 0x1df   :  { %9714 = vmatprep.subr.bf16.mxu0 %v13647_v46  ;;  %v816_v45 = vld [vmem:[%s19911_s1 + $0x1728] sm:$0xff]  ;;  %v1323_v46 = vld [vmem:[%s19911_s1 + $0x2700] sm:$0xff] }
 0x1e0   :  { %v13185_v52 = vcombine.high %v812_v44, %v816_v45  ;;  %v13184_v2 = vcombine.low %v812_v44, %v816_v45  ;;  %v13694_v4 = vcombine.low %v1323_v46, %v1327_v49  ;;  %v1363_v44 = vld [vmem:[%s19911_s1 + $0x2840] sm:$0xff] }
 0x1e1   :  { %10043 = vmatpush1.bf16.msra.mxu1 %v13136_v54  ;;  %v13695_v54 = vcombine.high %v1323_v46, %v1327_v49  ;;  %v1367_v45 = vld [vmem:[%s19911_s1 + $0x2860] sm:$0xff]  ;;  %v48_v46 = vld [vmem:[%s19912_s0 + $0xa8] sm:$0xff] }
 0x1e2   :  { %9715 = vmatpush1.bf16.msra.mxu0 %v13646_v56  ;;  %10044 = vmatprep.subr.bf16.mxu1 %v13145_v59  ;;  %v820_v56 = vld [vmem:[%s19911_s1 + $0x1748] sm:$0xff] }
 0x1e3   :  { %9716 = vmatprep.subr.bf16.mxu0 %v13655_v60  ;;  %v824_v59 = vld [vmem:[%s19911_s1 + $0x1768] sm:$0xff]  ;;  %v1331_v60 = vld [vmem:[%s19911_s1 + $0x2740] sm:$0xff] }
 0x1e4   :  { %v13193_v5 = vcombine.high %v820_v56, %v824_v59  ;;  %v13192_v13 = vcombine.low %v820_v56, %v824_v59  ;;  %v13702_v14 = vcombine.low %v1331_v60, %v1335_v0  ;;  %v860_v56 = vld [vmem:[%s19911_s1 + $0x1888] sm:$0xff] }
 0x1e5   :  { %10045 = vmatpush1.bf16.msra.mxu1 %v13144_v6  ;;  %v13703_v6 = vcombine.high %v1331_v60, %v1335_v0  ;;  %v864_v59 = vld [vmem:[%s19911_s1 + $0x18a8] sm:$0xff]  ;;  %v16298_v60 = vpack.c.bf16 %v48_v46, %v48_v46  ;;  %v1371_v0 = vld [vmem:[%s19911_s1 + $0x2880] sm:$0xff] }
 0x1e6   :  { %9717 = vmatpush1.bf16.msra.mxu0 %v13654_v8  ;;  %10046 = vmatprep.subr.bf16.mxu1 %v13153_v9  ;;  %v828_v8 = vld [vmem:[%s19911_s1 + $0x1788] sm:$0xff] }
 0x1e7   :  { %9718 = vmatprep.subr.bf16.mxu0 %v13663_v11  ;;  %v832_v9 = vld [vmem:[%s19911_s1 + $0x17a8] sm:$0xff]  ;;  %v1339_v11 = vld [vmem:[%s19911_s1 + $0x2780] sm:$0xff] }
 0x1e8   :  { %v13201_v15 = vcombine.high %v828_v8, %v832_v9  ;;  %v13200_v23 = vcombine.low %v828_v8, %v832_v9  ;;  %v13710_v24 = vcombine.low %v1339_v11, %v1343_v12  ;;  %v868_v9 = vld [vmem:[%s19911_s1 + $0x18c8] sm:$0xff] }
 0x1e9   :  { %10047 = vmatpush1.bf16.msra.mxu1 %v13152_v17  ;;  %v13711_v17 = vcombine.high %v1339_v11, %v1343_v12  ;;  %v872_v11 = vld [vmem:[%s19911_s1 + $0x18e8] sm:$0xff]  ;;  %v1379_v12 = vld [vmem:[%s19911_s1 + $0x28c0] sm:$0xff] }
 0x1ea   :  { %9719 = vmatpush1.bf16.msra.mxu0 %v13662_v18  ;;  %10048 = vmatprep.subr.bf16.mxu1 %v13161_v19  ;;  %v836_v18 = vld [vmem:[%s19911_s1 + $0x17c8] sm:$0xff] }
 0x1eb   :  { %9720 = vmatprep.subr.bf16.mxu0 %v13671_v20  ;;  %v840_v19 = vld [vmem:[%s19911_s1 + $0x17e8] sm:$0xff]  ;;  %v1347_v20 = vld [vmem:[%s19911_s1 + $0x27c0] sm:$0xff] }
 0x1ec   :  { %v13209_v25 = vcombine.high %v836_v18, %v840_v19  ;;  %v13208_v34 = vcombine.low %v836_v18, %v840_v19  ;;  %v13718_v35 = vcombine.low %v1347_v20, %v1351_v22  ;;  %v876_v19 = vld [vmem:[%s19911_s1 + $0x1908] sm:$0xff] }
 0x1ed   :  { %10049 = vmatpush1.bf16.msra.mxu1 %v13160_v26  ;;  %v13719_v26 = vcombine.high %v1347_v20, %v1351_v22  ;;  %v880_v20 = vld [vmem:[%s19911_s1 + $0x1928] sm:$0xff]  ;;  %v1387_v22 = vld [vmem:[%s19911_s1 + $0x2900] sm:$0xff] }
 0x1ee   :  { %9721 = vmatpush1.bf16.msra.mxu0 %v13670_v27  ;;  %10050 = vmatprep.subr.bf16.mxu1 %v13169_v29  ;;  %v844_v27 = vld [vmem:[%s19911_s1 + $0x1808] sm:$0xff] }
 0x1ef   :  { %9722 = vmatprep.subr.bf16.mxu0 %v13679_v32  ;;  %v848_v29 = vld [vmem:[%s19911_s1 + $0x1828] sm:$0xff]  ;;  %v1355_v32 = vld [vmem:[%s19911_s1 + $0x2800] sm:$0xff] }
 0x1f0   :  { %v13217_v37 = vcombine.high %v844_v27, %v848_v29  ;;  %v13216_v49 = vcombine.low %v844_v27, %v848_v29  ;;  %v884_v29 = vld [vmem:[%s19911_s1 + $0x1948] sm:$0xff] }
 0x1f1   :  { %10051 = vmatpush1.bf16.msra.mxu1 %v13168_v39  ;;  %v45_v39 = vld [vmem:[%s19912_s0 + $0x90] sm:$0xff] }
 0x1f2   :  { %9723 = vmatpush1.bf16.msra.mxu0 %v13678_v40  ;;  %10052 = vmatprep.subr.bf16.mxu1 %v13177_v42  ;;  %v13727_v40 = vcombine.high %v1355_v32, %v1359_v33  ;;  %v852_v42 = vld [vmem:[%s19911_s1 + $0x1848] sm:$0xff] }
 0x1f3   :  { %9724 = vmatprep.subr.bf16.mxu0 %v13687_v43  ;;  %v856_v43 = vld [vmem:[%s19911_s1 + $0x1868] sm:$0xff] }
 0x1f5   :  { %10053 = vmatpush1.bf16.msra.mxu1 %v13176_v50  ;;  %v16290_v50 = vpack.c.bf16 %v45_v39, %v45_v39 }
 0x1f6   :  { %9725 = vmatpush1.bf16.msra.mxu0 %v13686_v51  ;;  %10054 = vmatprep.subr.bf16.mxu1 %v13185_v52  ;;  %v13726_v51 = vcombine.low %v1355_v32, %v1359_v33  ;;  %v13225_v52 = vcombine.high %v852_v42, %v856_v43  ;;  %v888_v32 = vld [vmem:[%s19911_s1 + $0x1968] sm:$0xff]  ;;  %v1395_v33 = vld [vmem:[%s19911_s1 + $0x2940] sm:$0xff] }
 0x1f7   :  { %9726 = vmatprep.subr.bf16.mxu0 %v13695_v54  ;;  %v13735_v54 = vcombine.high %v1363_v44, %v1367_v45  ;;  %v13257_v39 = vcombine.high %v884_v29, %v888_v32  ;;  %v13256_v46 = vcombine.low %v884_v29, %v888_v32  ;;  %v928_v29 = vld [vmem:[%s19911_s1 + $0x1aa8] sm:$0xff]  ;;  %v1435_v32 = vld [vmem:[%s19911_s1 + $0x2a80] sm:$0xff] }
 0x1f9   :  { %10055 = vmatpush1.bf16.msra.mxu1 %v13184_v2  ;;  %v1375_v2 = vld [vmem:[%s19911_s1 + $0x28a0] sm:$0xff] }
 0x1fa   :  { %9727 = vmatpush1.bf16.msra.mxu0 %v13694_v4  ;;  %10056 = vmatprep.subr.bf16.mxu1 %v13193_v5  ;;  %v13224_v4 = vcombine.low %v852_v42, %v856_v43  ;;  %v13734_v5 = vcombine.low %v1363_v44, %v1367_v45  ;;  %v13743_v8 = vcombine.high %v1371_v0, %v1375_v2  ;;  %v892_v42 = vld [vmem:[%s19911_s1 + $0x1988] sm:$0xff]  ;;  %v1403_v44 = vld [vmem:[%s19911_s1 + $0x2980] sm:$0xff] }
 0x1fb   :  { %9728 = vmatprep.subr.bf16.mxu0 %v13703_v6  ;;  %v13233_v6 = vcombine.high %v860_v56, %v864_v59  ;;  %v896_v43 = vld [vmem:[%s19911_s1 + $0x19a8] sm:$0xff]  ;;  %v1407_v45 = vld [vmem:[%s19911_s1 + $0x29a0] sm:$0xff] }
 0x1fd   :  { %10057 = vmatpush1.bf16.msra.mxu1 %v13192_v13  ;;  %v1383_v13 = vld [vmem:[%s19911_s1 + $0x28e0] sm:$0xff] }
 0x1fe   :  { %9729 = vmatpush1.bf16.msra.mxu0 %v13702_v14  ;;  %10058 = vmatprep.subr.bf16.mxu1 %v13201_v15  ;;  %v13232_v14 = vcombine.low %v860_v56, %v864_v59  ;;  %v13742_v15 = vcombine.low %v1371_v0, %v1375_v2  ;;  %v13751_v18 = vcombine.high %v1379_v12, %v1383_v13  ;;  %v904_v56 = vld [vmem:[%s19911_s1 + $0x19e8] sm:$0xff]  ;;  %v1411_v59 = vld [vmem:[%s19911_s1 + $0x29c0] sm:$0xff] }
 0x1ff   :  { %9730 = vmatprep.subr.bf16.mxu0 %v13711_v17  ;;  %v13241_v17 = vcombine.high %v868_v9, %v872_v11  ;;  %v1415_v0 = vld [vmem:[%s19911_s1 + $0x29e0] sm:$0xff]  ;;  %v13264_v2 = vcombine.low %v892_v42, %v896_v43 }
 0x201   :  { %10059 = vmatpush1.bf16.msra.mxu1 %v13200_v23  ;;  %v1391_v23 = vld [vmem:[%s19911_s1 + $0x2920] sm:$0xff] }
 0x202   :  { %9731 = vmatpush1.bf16.msra.mxu0 %v13710_v24  ;;  %10060 = vmatprep.subr.bf16.mxu1 %v13209_v25  ;;  %v13240_v24 = vcombine.low %v868_v9, %v872_v11  ;;  %v13750_v25 = vcombine.low %v1379_v12, %v1383_v13  ;;  %v13759_v27 = vcombine.high %v1387_v22, %v1391_v23  ;;  %v912_v9 = vld [vmem:[%s19911_s1 + $0x1a28] sm:$0xff]  ;;  %v1419_v11 = vld [vmem:[%s19911_s1 + $0x2a00] sm:$0xff] }
 0x203   :  { %9732 = vmatprep.subr.bf16.mxu0 %v13719_v26  ;;  %v13249_v26 = vcombine.high %v876_v19, %v880_v20  ;;  %v1423_v12 = vld [vmem:[%s19911_s1 + $0x2a20] sm:$0xff] }
 0x205   :  { %10061 = vmatpush1.bf16.msra.mxu1 %v13208_v34  ;;  %v1399_v34 = vld [vmem:[%s19911_s1 + $0x2960] sm:$0xff] }
 0x206   :  { %9733 = vmatpush1.bf16.msra.mxu0 %v13718_v35  ;;  %10071 = vmatprep.subr.bf16.mxu1 %v13217_v37  ;;  %v13248_v35 = vcombine.low %v876_v19, %v880_v20  ;;  %v13758_v37 = vcombine.low %v1387_v22, %v1391_v23  ;;  %v920_v19 = vld [vmem:[%s19911_s1 + $0x1a68] sm:$0xff]  ;;  %v1427_v20 = vld [vmem:[%s19911_s1 + $0x2a40] sm:$0xff] }
 0x207   :  { %9743 = vmatprep.subr.bf16.mxu0 %v13727_v40  ;;  %v13767_v40 = vcombine.high %v1395_v33, %v1399_v34  ;;  %v1431_v22 = vld [vmem:[%s19911_s1 + $0x2a60] sm:$0xff] }
 0x208   :  { %10063 = vmatmul.mubr.bf16.vlgmr.msra.gmra.mrb[4].mxu1 %v15462_v30 }
 0x209   :  { %9735 = vmatmul.mubr.bf16.vlgmr.msra.gmra.mrb[0].mxu0 %v16290_v50  ;;  %10072 = vmatpush1.bf16.msra.mxu1 %v13216_v49  ;;  %v13766_v49 = vcombine.low %v1395_v33, %v1399_v34  ;;  %v1439_v33 = vld [vmem:[%s19911_s1 + $0x2aa0] sm:$0xff] }
 0x20a   :  { %9744 = vmatpush1.bf16.msra.mxu0 %v13726_v51  ;;  %10073 = vmatprep.subr.bf16.mxu1 %v13225_v52  ;;  %v13265_v51 = vcombine.high %v892_v42, %v896_v43  ;;  %v13775_v52 = vcombine.high %v1403_v44, %v1407_v45  ;;  %v936_v42 = vld [vmem:[%s19911_s1 + $0x1ae8] sm:$0xff]  ;;  %v1443_v43 = vld [vmem:[%s19911_s1 + $0x2ac0] sm:$0xff] }
 0x20b   :  { %9745 = vmatprep.subr.bf16.mxu0 %v13735_v54  ;;  %9775 = vmatprep.mubr.bf16.mxu0 %v16298_v60  ;;  %v900_v54 = vld [vmem:[%s19911_s1 + $0x19c8] sm:$0xff] }
 0x20c   :  { %10103 = vmatprep.mubr.bf16.mxu1 %v15470_v38  ;;  %v13272_v13 = vcombine.low %v900_v54, %v904_v56 }
 0x20d   :  { %10074 = vmatpush1.bf16.msra.mxu1 %v13224_v4  ;;  %v13774_v4 = vcombine.low %v1403_v44, %v1407_v45  ;;  %v1447_v44 = vld [vmem:[%s19911_s1 + $0x2ae0] sm:$0xff] }
 0x20e   :  { %9746 = vmatpush1.bf16.msra.mxu0 %v13734_v5  ;;  %10075 = vmatprep.subr.bf16.mxu1 %v13233_v6  ;;  %v13273_v5 = vcombine.high %v900_v54, %v904_v56  ;;  %v13783_v6 = vcombine.high %v1411_v59, %v1415_v0  ;;  %v944_v54 = vld [vmem:[%s19911_s1 + $0x1b28] sm:$0xff]  ;;  %v1451_v56 = vld [vmem:[%s19911_s1 + $0x2b00] sm:$0xff] }
 0x20f   :  { %9747 = vmatprep.subr.bf16.mxu0 %v13743_v8  ;;  %v908_v8 = vld [vmem:[%s19911_s1 + $0x1a08] sm:$0xff] }
 0x210   :  { %v13280_v23 = vcombine.low %v908_v8, %v912_v9 }
 0x211   :  { %10076 = vmatpush1.bf16.msra.mxu1 %v13232_v14  ;;  %v13782_v14 = vcombine.low %v1411_v59, %v1415_v0  ;;  %v1455_v59 = vld [vmem:[%s19911_s1 + $0x2b20] sm:$0xff] }
 0x212   :  { %9748 = vmatpush1.bf16.msra.mxu0 %v13742_v15  ;;  %10077 = vmatprep.subr.bf16.mxu1 %v13241_v17  ;;  %v13281_v15 = vcombine.high %v908_v8, %v912_v9  ;;  %v13791_v17 = vcombine.high %v1419_v11, %v1423_v12  ;;  %v952_v8 = vld [vmem:[%s19911_s1 + $0x1b68] sm:$0xff]  ;;  %v1459_v9 = vld [vmem:[%s19911_s1 + $0x2b40] sm:$0xff] }
 0x213   :  { %9749 = vmatprep.subr.bf16.mxu0 %v13751_v18  ;;  %v916_v18 = vld [vmem:[%s19911_s1 + $0x1a48] sm:$0xff] }
 0x214   :  { %v13288_v34 = vcombine.low %v916_v18, %v920_v19 }
 0x215   :  { %10078 = vmatpush1.bf16.msra.mxu1 %v13240_v24  ;;  %v13790_v24 = vcombine.low %v1419_v11, %v1423_v12  ;;  %v1463_v11 = vld [vmem:[%s19911_s1 + $0x2b60] sm:$0xff] }
 0x216   :  { %9750 = vmatpush1.bf16.msra.mxu0 %v13750_v25  ;;  %10079 = vmatprep.subr.bf16.mxu1 %v13249_v26  ;;  %v13289_v25 = vcombine.high %v916_v18, %v920_v19  ;;  %v13799_v26 = vcombine.high %v1427_v20, %v1431_v22  ;;  %v960_v18 = vld [vmem:[%s19911_s1 + $0x1ba8] sm:$0xff]  ;;  %v1467_v19 = vld [vmem:[%s19911_s1 + $0x2b80] sm:$0xff] }
 0x217   :  { %9751 = vmatprep.subr.bf16.mxu0 %v13759_v27  ;;  %v924_v27 = vld [vmem:[%s19911_s1 + $0x1a88] sm:$0xff] }
 0x218   :  { %v13296_v45 = vcombine.low %v924_v27, %v928_v29 }
 0x219   :  { %10080 = vmatpush1.bf16.msra.mxu1 %v13248_v35  ;;  %v13798_v35 = vcombine.low %v1427_v20, %v1431_v22  ;;  %v1471_v20 = vld [vmem:[%s19911_s1 + $0x2ba0] sm:$0xff] }
 0x21a   :  { %9752 = vmatpush1.bf16.msra.mxu0 %v13758_v37  ;;  %10081 = vmatprep.subr.bf16.mxu1 %v13257_v39  ;;  %v13297_v37 = vcombine.high %v924_v27, %v928_v29  ;;  %v13807_v39 = vcombine.high %v1435_v32, %v1439_v33  ;;  %v968_v27 = vld [vmem:[%s19911_s1 + $0x1be8] sm:$0xff]  ;;  %v1475_v29 = vld [vmem:[%s19911_s1 + $0x2bc0] sm:$0xff] }
 0x21b   :  { %9753 = vmatprep.subr.bf16.mxu0 %v13767_v40  ;;  %v932_v40 = vld [vmem:[%s19911_s1 + $0x1ac8] sm:$0xff] }
 0x21c   :  { %v13304_v0 = vcombine.low %v932_v40, %v936_v42 }
 0x21d   :  { %10082 = vmatpush1.bf16.msra.mxu1 %v13256_v46  ;;  %v13806_v46 = vcombine.low %v1435_v32, %v1439_v33  ;;  %v1479_v32 = vld [vmem:[%s19911_s1 + $0x2be0] sm:$0xff] }
 0x21e   :  { %9754 = vmatpush1.bf16.msra.mxu0 %v13766_v49  ;;  %10083 = vmatprep.subr.bf16.mxu1 %v13265_v51  ;;  %v13305_v49 = vcombine.high %v932_v40, %v936_v42  ;;  %v13815_v51 = vcombine.high %v1443_v43, %v1447_v44  ;;  %v976_v40 = vld [vmem:[%s19911_s1 + $0x1c28] sm:$0xff]  ;;  %v1483_v42 = vld [vmem:[%s19911_s1 + $0x2c00] sm:$0xff] }
 0x21f   :  { %9755 = vmatprep.subr.bf16.mxu0 %v13775_v52  ;;  %v940_v52 = vld [vmem:[%s19911_s1 + $0x1b08] sm:$0xff] }
 0x220   :  { %v13312_v12 = vcombine.low %v940_v52, %v944_v54 }
 0x221   :  { %10084 = vmatpush1.bf16.msra.mxu1 %v13264_v2  ;;  %v13814_v2 = vcombine.low %v1443_v43, %v1447_v44  ;;  %v1487_v43 = vld [vmem:[%s19911_s1 + $0x2c20] sm:$0xff] }
 0x222   :  { %9756 = vmatpush1.bf16.msra.mxu0 %v13774_v4  ;;  %10085 = vmatprep.subr.bf16.mxu1 %v13273_v5  ;;  %v13313_v4 = vcombine.high %v940_v52, %v944_v54  ;;  %v13823_v5 = vcombine.high %v1451_v56, %v1455_v59  ;;  %v980_v52 = vld [vmem:[%s19911_s1 + $0x1c48] sm:$0xff] }
 0x223   :  { %9757 = vmatprep.subr.bf16.mxu0 %v13783_v6  ;;  %v948_v6 = vld [vmem:[%s19911_s1 + $0x1b48] sm:$0xff] }
 0x224   :  { %v13320_v22 = vcombine.low %v948_v6, %v952_v8  ;;  %v984_v54 = vld [vmem:[%s19911_s1 + $0x1c68] sm:$0xff] }
 0x225   :  { %10086 = vmatpush1.bf16.msra.mxu1 %v13272_v13  ;;  %v13822_v13 = vcombine.low %v1451_v56, %v1455_v59  ;;  %v1491_v56 = vld [vmem:[%s19911_s1 + $0x2c40] sm:$0xff] }
 0x226   :  { %9758 = vmatpush1.bf16.msra.mxu0 %v13782_v14  ;;  %10087 = vmatprep.subr.bf16.mxu1 %v13281_v15  ;;  %v13321_v14 = vcombine.high %v948_v6, %v952_v8  ;;  %v13831_v15 = vcombine.high %v1459_v9, %v1463_v11  ;;  %v1495_v59 = vld [vmem:[%s19911_s1 + $0x2c60] sm:$0xff]  ;;  %v13353_v6 = vcombine.high %v980_v52, %v984_v54 }
 0x227   :  { %9759 = vmatprep.subr.bf16.mxu0 %v13791_v17  ;;  %v956_v17 = vld [vmem:[%s19911_s1 + $0x1b88] sm:$0xff]  ;;  %v13863_v8 = vcombine.high %v1491_v56, %v1495_v59 }
 0x228   :  { %v13328_v33 = vcombine.low %v956_v17, %v960_v18 }
 0x229   :  { %10088 = vmatpush1.bf16.msra.mxu1 %v13280_v23  ;;  %v13830_v23 = vcombine.low %v1459_v9, %v1463_v11  ;;  %v988_v9 = vld [vmem:[%s19911_s1 + $0x1c88] sm:$0xff] }
 0x22a   :  { %9760 = vmatpush1.bf16.msra.mxu0 %v13790_v24  ;;  %10089 = vmatprep.subr.bf16.mxu1 %v13289_v25  ;;  %v13329_v24 = vcombine.high %v956_v17, %v960_v18  ;;  %v13839_v25 = vcombine.high %v1467_v19, %v1471_v20  ;;  %v992_v11 = vld [vmem:[%s19911_s1 + $0x1ca8] sm:$0xff]  ;;  %v13862_v17 = vcombine.low %v1491_v56, %v1495_v59 }
 0x22b   :  { %9761 = vmatprep.subr.bf16.mxu0 %v13799_v26  ;;  %v964_v26 = vld [vmem:[%s19911_s1 + $0x1bc8] sm:$0xff]  ;;  %v13361_v18 = vcombine.high %v988_v9, %v992_v11 }
 0x22c   :  { %v13336_v44 = vcombine.low %v964_v26, %v968_v27  ;;  %v1020_v56 = vld [vmem:[%s19911_s1 + $0x1d88] sm:$0xff] }
 0x22d   :  { %10090 = vmatpush1.bf16.msra.mxu1 %v13288_v34  ;;  %v13838_v34 = vcombine.low %v1467_v19, %v1471_v20  ;;  %v996_v20 = vld [vmem:[%s19911_s1 + $0x1cc8] sm:$0xff] }
 0x22e   :  { %9762 = vmatpush1.bf16.msra.mxu0 %v13798_v35  ;;  %10091 = vmatprep.subr.bf16.mxu1 %v13297_v37  ;;  %v13337_v35 = vcombine.high %v964_v26, %v968_v27  ;;  %v13847_v37 = vcombine.high %v1475_v29, %v1479_v32  ;;  %v1024_v59 = vld [vmem:[%s19911_s1 + $0x1da8] sm:$0xff] }
 0x22f   :  { %9763 = vmatprep.subr.bf16.mxu0 %v13807_v39  ;;  %v972_v39 = vld [vmem:[%s19911_s1 + $0x1c08] sm:$0xff] }
 0x231   :  { %10092 = vmatpush1.bf16.msra.mxu1 %v13296_v45  ;;  %v13846_v45 = vcombine.low %v1475_v29, %v1479_v32  ;;  %v1004_v32 = vld [vmem:[%s19911_s1 + $0x1d08] sm:$0xff] }
 0x232   :  { %9764 = vmatpush1.bf16.msra.mxu0 %v13806_v46  ;;  %10093 = vmatprep.subr.bf16.mxu1 %v13305_v49  ;;  %v13345_v46 = vcombine.high %v972_v39, %v976_v40  ;;  %v47_v49 = vld [vmem:[%s19912_s0 + $0xa0] sm:$0xff] }
 0x233   :  { %9765 = vmatprep.subr.bf16.mxu0 %v13815_v51  ;;  %v13855_v51 = vcombine.high %v1483_v42, %v1487_v43 }
 0x235   :  { %10094 = vmatpush1.bf16.msra.mxu1 %v13304_v0  ;;  %v50_v0 = vld [vmem:[%s19912_s0 + $0xb8] sm:$0xff] }
 0x236   :  { %9766 = vmatpush1.bf16.msra.mxu0 %v13814_v2  ;;  %10095 = vmatprep.subr.bf16.mxu1 %v13313_v4  ;;  %v13344_v2 = vcombine.low %v972_v39, %v976_v40  ;;  %v16496_v4 = vpack.c.bf16 %v47_v49, %v47_v49 }
 0x237   :  { %9767 = vmatprep.subr.bf16.mxu0 %v13823_v5  ;;  %v13854_v5 = vcombine.low %v1483_v42, %v1487_v43  ;;  %v1012_v43 = vld [vmem:[%s19911_s1 + $0x1d48] sm:$0xff] }
 0x239   :  { %10096 = vmatpush1.bf16.msra.mxu1 %v13312_v12  ;;  %v16504_v12 = vpack.c.bf16 %v50_v0, %v50_v0  ;;  %v1531_v0 = vld [vmem:[%s19911_s1 + $0x2d80] sm:$0xff] }
 0x23a   :  { %9768 = vmatpush1.bf16.msra.mxu0 %v13822_v13  ;;  %10097 = vmatprep.subr.bf16.mxu1 %v13321_v14  ;;  %v1499_v13 = vld [vmem:[%s19911_s1 + $0x2c80] sm:$0xff] }
 0x23b   :  { %9769 = vmatprep.subr.bf16.mxu0 %v13831_v15  ;;  %v1503_v14 = vld [vmem:[%s19911_s1 + $0x2ca0] sm:$0xff]  ;;  %v13352_v15 = vcombine.low %v980_v52, %v984_v54 }
 0x23c   :  { %v13871_v19 = vcombine.high %v1499_v13, %v1503_v14  ;;  %v13870_v26 = vcombine.low %v1499_v13, %v1503_v14  ;;  %v1032_v13 = vld [vmem:[%s19911_s1 + $0x1de8] sm:$0xff]  ;;  %v1539_v14 = vld [vmem:[%s19911_s1 + $0x2dc0] sm:$0xff] }
 0x23d   :  { %10098 = vmatpush1.bf16.msra.mxu1 %v13320_v22  ;;  %v1000_v22 = vld [vmem:[%s19911_s1 + $0x1ce8] sm:$0xff] }
 0x23e   :  { %9770 = vmatpush1.bf16.msra.mxu0 %v13830_v23  ;;  %10099 = vmatprep.subr.bf16.mxu1 %v13329_v24  ;;  %v1507_v23 = vld [vmem:[%s19911_s1 + $0x2cc0] sm:$0xff]  ;;  %v13369_v27 = vcombine.high %v996_v20, %v1000_v22 }
 0x23f   :  { %9771 = vmatprep.subr.bf16.mxu0 %v13839_v25  ;;  %v1511_v24 = vld [vmem:[%s19911_s1 + $0x2ce0] sm:$0xff]  ;;  %v13360_v25 = vcombine.low %v988_v9, %v992_v11  ;;  %v1028_v11 = vld [vmem:[%s19911_s1 + $0x1dc8] sm:$0xff] }
 0x240   :  { %v13879_v29 = vcombine.high %v1507_v23, %v1511_v24  ;;  %v13878_v39 = vcombine.low %v1507_v23, %v1511_v24  ;;  %v1040_v23 = vld [vmem:[%s19911_s1 + $0x1e28] sm:$0xff]  ;;  %v1547_v24 = vld [vmem:[%s19911_s1 + $0x2e00] sm:$0xff] }
 0x241   :  { %10100 = vmatpush1.bf16.msra.mxu1 %v13328_v33  ;;  %v1008_v33 = vld [vmem:[%s19911_s1 + $0x1d28] sm:$0xff] }
 0x242   :  { %9772 = vmatpush1.bf16.msra.mxu0 %v13838_v34  ;;  %10101 = vmatprep.subr.bf16.mxu1 %v13337_v35  ;;  %v1515_v34 = vld [vmem:[%s19911_s1 + $0x2d00] sm:$0xff]  ;;  %v13377_v40 = vcombine.high %v1004_v32, %v1008_v33  ;;  %v13376_v49 = vcombine.low %v1004_v32, %v1008_v33  ;;  %v1044_v33 = vld [vmem:[%s19911_s1 + $0x1e48] sm:$0xff] }
 0x243   :  { %9773 = vmatprep.subr.bf16.mxu0 %v13847_v37  ;;  %v1519_v35 = vld [vmem:[%s19911_s1 + $0x2d20] sm:$0xff]  ;;  %v13368_v37 = vcombine.low %v996_v20, %v1000_v22  ;;  %v1036_v22 = vld [vmem:[%s19911_s1 + $0x1e08] sm:$0xff] }
 0x244   :  { %v13887_v42 = vcombine.high %v1515_v34, %v1519_v35 }
 0x245   :  { %10102 = vmatpush1.bf16.msra.mxu1 %v13336_v44  ;;  %v1016_v44 = vld [vmem:[%s19911_s1 + $0x1d68] sm:$0xff] }
 0x246   :  { %9774 = vmatpush1.bf16.msra.mxu0 %v13846_v45  ;;  %10112 = vmatprep.subr.bf16.mxu1 %v13345_v46  ;;  %v1523_v45 = vld [vmem:[%s19911_s1 + $0x2d40] sm:$0xff]  ;;  %v13385_v52 = vcombine.high %v1012_v43, %v1016_v44 }
 0x247   :  { %9784 = vmatprep.subr.bf16.mxu0 %v13855_v51  ;;  %v1527_v46 = vld [vmem:[%s19911_s1 + $0x2d60] sm:$0xff]  ;;  %v13886_v51 = vcombine.low %v1515_v34, %v1519_v35  ;;  %v1048_v34 = vld [vmem:[%s19911_s1 + $0x1e68] sm:$0xff] }
 0x248   :  { %10104 = vmatmul.mubr.bf16.vlgmr.msra.gmra.mrb[4].mxu1 %v15668_v3  ;;  %v13895_v54 = vcombine.high %v1523_v45, %v1527_v46  ;;  %v1555_v35 = vld [vmem:[%s19911_s1 + $0x2e40] sm:$0xff] }
 0x249   :  { %9776 = vmatmul.mubr.bf16.vlgmr.msra.gmra.mrb[0].mxu0 %v16496_v4  ;;  %10113 = vmatpush1.bf16.msra.mxu1 %v13344_v2  ;;  %v1535_v2 = vld [vmem:[%s19911_s1 + $0x2da0] sm:$0xff] }
 0x24a   :  { %9785 = vmatpush1.bf16.msra.mxu0 %v13854_v5  ;;  %10114 = vmatprep.subr.bf16.mxu1 %v13353_v6  ;;  %v13384_v5 = vcombine.low %v1012_v43, %v1016_v44  ;;  %v13894_v6 = vcombine.low %v1523_v45, %v1527_v46  ;;  %v13903_v9 = vcombine.high %v1531_v0, %v1535_v2  ;;  %v1052_v44 = vld [vmem:[%s19911_s1 + $0x1e88] sm:$0xff]  ;;  %v1563_v46 = vld [vmem:[%s19911_s1 + $0x2e80] sm:$0xff] }
 0x24b   :  { %9786 = vmatprep.subr.bf16.mxu0 %v13863_v8  ;;  %9816 = vmatprep.mubr.bf16.mxu0 %v16504_v12  ;;  %v13393_v8 = vcombine.high %v1020_v56, %v1024_v59  ;;  %v1056_v45 = vld [vmem:[%s19911_s1 + $0x1ea8] sm:$0xff] }
 0x24c   :  { %10144 = vmatprep.mubr.bf16.mxu1 %v15676_v10 }
 0x24d   :  { %10115 = vmatpush1.bf16.msra.mxu1 %v13352_v15  ;;  %v1543_v15 = vld [vmem:[%s19911_s1 + $0x2de0] sm:$0xff] }
 0x24e   :  { %9787 = vmatpush1.bf16.msra.mxu0 %v13862_v17  ;;  %10116 = vmatprep.subr.bf16.mxu1 %v13361_v18  ;;  %v13392_v17 = vcombine.low %v1020_v56, %v1024_v59  ;;  %v13902_v18 = vcombine.low %v1531_v0, %v1535_v2  ;;  %v13911_v20 = vcombine.high %v1539_v14, %v1543_v15  ;;  %v1060_v59 = vld [vmem:[%s19911_s1 + $0x1ec8] sm:$0xff]  ;;  %v1571_v2 = vld [vmem:[%s19911_s1 + $0x2ec0] sm:$0xff] }
 0x24f   :  { %9788 = vmatprep.subr.bf16.mxu0 %v13871_v19  ;;  %v13401_v19 = vcombine.high %v1028_v11, %v1032_v13  ;;  %v1064_v0 = vld [vmem:[%s19911_s1 + $0x1ee8] sm:$0xff] }
 0x251   :  { %10117 = vmatpush1.bf16.msra.mxu1 %v13360_v25  ;;  %v1551_v25 = vld [vmem:[%s19911_s1 + $0x2e20] sm:$0xff] }
 0x252   :  { %9789 = vmatpush1.bf16.msra.mxu0 %v13870_v26  ;;  %10118 = vmatprep.subr.bf16.mxu1 %v13369_v27  ;;  %v13400_v26 = vcombine.low %v1028_v11, %v1032_v13  ;;  %v13910_v27 = vcombine.low %v1539_v14, %v1543_v15  ;;  %v13919_v32 = vcombine.high %v1547_v24, %v1551_v25  ;;  %v1068_v13 = vld [vmem:[%s19911_s1 + $0x1f08] sm:$0xff]  ;;  %v1579_v15 = vld [vmem:[%s19911_s1 + $0x2f00] sm:$0xff] }
 0x253   :  { %9790 = vmatprep.subr.bf16.mxu0 %v13879_v29  ;;  %v13409_v29 = vcombine.high %v1036_v22, %v1040_v23  ;;  %v1072_v14 = vld [vmem:[%s19911_s1 + $0x1f28] sm:$0xff] }
 0x255   :  { %10119 = vmatpush1.bf16.msra.mxu1 %v13368_v37  ;;  %v1559_v37 = vld [vmem:[%s19911_s1 + $0x2e60] sm:$0xff] }
 0x256   :  { %9791 = vmatpush1.bf16.msra.mxu0 %v13878_v39  ;;  %10120 = vmatprep.subr.bf16.mxu1 %v13377_v40  ;;  %v13408_v39 = vcombine.low %v1036_v22, %v1040_v23  ;;  %v13918_v40 = vcombine.low %v1547_v24, %v1551_v25  ;;  %v13927_v43 = vcombine.high %v1555_v35, %v1559_v37  ;;  %v1076_v23 = vld [vmem:[%s19911_s1 + $0x1f48] sm:$0xff]  ;;  %v1587_v25 = vld [vmem:[%s19911_s1 + $0x2f40] sm:$0xff] }
 0x257   :  { %9792 = vmatprep.subr.bf16.mxu0 %v13887_v42  ;;  %v13417_v42 = vcombine.high %v1044_v33, %v1048_v34  ;;  %v1080_v24 = vld [vmem:[%s19911_s1 + $0x1f68] sm:$0xff] }
 0x259   :  { %10121 = vmatpush1.bf16.msra.mxu1 %v13376_v49  ;;  %v1567_v49 = vld [vmem:[%s19911_s1 + $0x2ea0] sm:$0xff] }
 0x25a   :  { %9793 = vmatpush1.bf16.msra.mxu0 %v13886_v51  ;;  %10122 = vmatprep.subr.bf16.mxu1 %v13385_v52  ;;  %v13416_v51 = vcombine.low %v1044_v33, %v1048_v34  ;;  %v13926_v52 = vcombine.low %v1555_v35, %v1559_v37  ;;  %v13935_v56 = vcombine.high %v1563_v46, %v1567_v49  ;;  %v1084_v34 = vld [vmem:[%s19911_s1 + $0x1f88] sm:$0xff]  ;;  %v1595_v37 = vld [vmem:[%s19911_s1 + $0x2f80] sm:$0xff] }
 0x25b   :  { %9794 = vmatprep.subr.bf16.mxu0 %v13895_v54  ;;  %v13425_v54 = vcombine.high %v1052_v44, %v1056_v45  ;;  %v1088_v35 = vld [vmem:[%s19911_s1 + $0x1fa8] sm:$0xff] }
 0x25d   :  { %10123 = vmatpush1.bf16.msra.mxu1 %v13384_v5  ;;  %v1575_v5 = vld [vmem:[%s19911_s1 + $0x2ee0] sm:$0xff] }
 0x25e   :  { %9795 = vmatpush1.bf16.msra.mxu0 %v13894_v6  ;;  %10124 = vmatprep.subr.bf16.mxu1 %v13393_v8  ;;  %v13424_v6 = vcombine.low %v1052_v44, %v1056_v45  ;;  %v13934_v8 = vcombine.low %v1563_v46, %v1567_v49  ;;  %v13943_v11 = vcombine.high %v1571_v2, %v1575_v5  ;;  %v1092_v45 = vld [vmem:[%s19911_s1 + $0x1fc8] sm:$0xff]  ;;  %v1603_v49 = vld [vmem:[%s19911_s1 + $0x2fc0] sm:$0xff] }
 0x25f   :  { %9796 = vmatprep.subr.bf16.mxu0 %v13903_v9  ;;  %v13433_v9 = vcombine.high %v1060_v59, %v1064_v0  ;;  %v1096_v46 = vld [vmem:[%s19911_s1 + $0x1fe8] sm:$0xff] }
 0x261   :  { %10125 = vmatpush1.bf16.msra.mxu1 %v13392_v17  ;;  %v1583_v17 = vld [vmem:[%s19911_s1 + $0x2f20] sm:$0xff] }
 0x262   :  { %9797 = vmatpush1.bf16.msra.mxu0 %v13902_v18  ;;  %10126 = vmatprep.subr.bf16.mxu1 %v13401_v19  ;;  %v13432_v18 = vcombine.low %v1060_v59, %v1064_v0  ;;  %v13942_v19 = vcombine.low %v1571_v2, %v1575_v5  ;;  %v13951_v22 = vcombine.high %v1579_v15, %v1583_v17  ;;  %v1100_v0 = vld [vmem:[%s19911_s1 + $0x2008] sm:$0xff]  ;;  %v77_v5 = vld [vmem:[%s19911_s1 + $0x10] sm:$0xff] }
 0x263   :  { %9798 = vmatprep.subr.bf16.mxu0 %v13911_v20  ;;  %v13441_v20 = vcombine.high %v1068_v13, %v1072_v14  ;;  %v1104_v2 = vld [vmem:[%s19911_s1 + $0x2028] sm:$0xff] }
 0x265   :  { %10127 = vmatpush1.bf16.msra.mxu1 %v13400_v26  ;;  %v1591_v26 = vld [vmem:[%s19911_s1 + $0x2f60] sm:$0xff] }
 0x266   :  { %9799 = vmatpush1.bf16.msra.mxu0 %v13910_v27  ;;  %10128 = vmatprep.subr.bf16.mxu1 %v13409_v29  ;;  %v13440_v27 = vcombine.low %v1068_v13, %v1072_v14  ;;  %v13950_v29 = vcombine.low %v1579_v15, %v1583_v17  ;;  %v13959_v33 = vcombine.high %v1587_v25, %v1591_v26  ;;  %v1108_v15 = vld [vmem:[%s19911_s1 + $0x2048] sm:$0xff] }
 0x267   :  { %9800 = vmatprep.subr.bf16.mxu0 %v13919_v32  ;;  %v13449_v32 = vcombine.high %v1076_v23, %v1080_v24  ;;  %v13473_v13 = vcombine.high %v1100_v0, %v1104_v2  ;;  %v1112_v17 = vld [vmem:[%s19911_s1 + $0x2068] sm:$0xff] }
 0x269   :  { %10129 = vmatpush1.bf16.msra.mxu1 %v13408_v39  ;;  %v1599_v39 = vld [vmem:[%s19911_s1 + $0x2fa0] sm:$0xff] }
 0x26a   :  { %9801 = vmatpush1.bf16.msra.mxu0 %v13918_v40  ;;  %10130 = vmatprep.subr.bf16.mxu1 %v13417_v42  ;;  %v13448_v40 = vcombine.low %v1076_v23, %v1080_v24  ;;  %v13958_v42 = vcombine.low %v1587_v25, %v1591_v26  ;;  %v13967_v44 = vcombine.high %v1595_v37, %v1599_v39  ;;  %v1116_v26 = vld [vmem:[%s19911_s1 + $0x2088] sm:$0xff] }
 0x26b   :  { %9802 = vmatprep.subr.bf16.mxu0 %v13927_v43  ;;  %v13457_v43 = vcombine.high %v1084_v34, %v1088_v35  ;;  %v13481_v24 = vcombine.high %v1108_v15, %v1112_v17 }
 0x26d   :  { %10131 = vmatpush1.bf16.msra.mxu1 %v13416_v51  ;;  %v1607_v51 = vld [vmem:[%s19911_s1 + $0x2fe0] sm:$0xff] }
 0x26e   :  { %9803 = vmatpush1.bf16.msra.mxu0 %v13926_v52  ;;  %10132 = vmatprep.subr.bf16.mxu1 %v13425_v54  ;;  %v13456_v52 = vcombine.low %v1084_v34, %v1088_v35  ;;  %v13966_v54 = vcombine.low %v1595_v37, %v1599_v39  ;;  %v13975_v59 = vcombine.high %v1603_v49, %v1607_v51  ;;  %v1124_v39 = vld [vmem:[%s19911_s1 + $0x20c8] sm:$0xff] }
 0x26f   :  { %9804 = vmatprep.subr.bf16.mxu0 %v13935_v56  ;;  %v13465_v56 = vcombine.high %v1092_v45, %v1096_v46 }
 0x271   :  { %10133 = vmatpush1.bf16.msra.mxu1 %v13424_v6  ;;  %v81_v6 = vld [vmem:[%s19911_s1 + $0x30] sm:$0xff] }
 0x272   :  { %9805 = vmatpush1.bf16.msra.mxu0 %v13934_v8  ;;  %10134 = vmatprep.subr.bf16.mxu1 %v13433_v9  ;;  %v13464_v8 = vcombine.low %v1092_v45, %v1096_v46  ;;  %v13974_v9 = vcombine.low %v1603_v49, %v1607_v51  ;;  %v12451_v14 = vcombine.high %v77_v5, %v81_v6  ;;  %v1132_v51 = vld [vmem:[%s19911_s1 + $0x2108] sm:$0xff] }
 0x273   :  { %9806 = vmatprep.subr.bf16.mxu0 %v13943_v11  ;;  %v49_v11 = vld [vmem:[%s19912_s0 + $0xb0] sm:$0xff]  ;;  %v12450_v23 = vcombine.low %v77_v5, %v81_v6  ;;  %v1140_v6 = vld [vmem:[%s19911_s1 + $0x2148] sm:$0xff] }
 0x275   :  { %10135 = vmatpush1.bf16.msra.mxu1 %v13432_v18  ;;  %v85_v18 = vld [vmem:[%s19911_s1 + $0x50] sm:$0xff] }
 0x276   :  { %9807 = vmatpush1.bf16.msra.mxu0 %v13942_v19  ;;  %10136 = vmatprep.subr.bf16.mxu1 %v13441_v20  ;;  %v89_v19 = vld [vmem:[%s19911_s1 + $0x70] sm:$0xff]  ;;  %v16699_v20 = vpack.c.bf16 %v49_v11, %v49_v11 }
 0x277   :  { %9808 = vmatprep.subr.bf16.mxu0 %v13951_v22  ;;  %v13472_v22 = vcombine.low %v1100_v0, %v1104_v2  ;;  %v12459_v25 = vcombine.high %v85_v18, %v89_v19  ;;  %v12458_v34 = vcombine.low %v85_v18, %v89_v19  ;;  %v121_v11 = vld [vmem:[%s19911_s1 + $0x170] sm:$0xff]  ;;  %v1148_v18 = vld [vmem:[%s19911_s1 + $0x2188] sm:$0xff] }
 0x278   :  { %v1152_v19 = vld [vmem:[%s19911_s1 + $0x21a8] sm:$0xff] }
 0x279   :  { %10137 = vmatpush1.bf16.msra.mxu1 %v13440_v27  ;;  %v1120_v27 = vld [vmem:[%s19911_s1 + $0x20a8] sm:$0xff] }
 0x27a   :  { %9809 = vmatpush1.bf16.msra.mxu0 %v13950_v29  ;;  %10138 = vmatprep.subr.bf16.mxu1 %v13449_v32  ;;  %v93_v29 = vld [vmem:[%s19911_s1 + $0x90] sm:$0xff]  ;;  %v13489_v35 = vcombine.high %v1116_v26, %v1120_v27 }
 0x27b   :  { %9810 = vmatprep.subr.bf16.mxu0 %v13959_v33  ;;  %v97_v32 = vld [vmem:[%s19911_s1 + $0xb0] sm:$0xff]  ;;  %v13480_v33 = vcombine.low %v1108_v15, %v1112_v17 }
 0x27c   :  { %v12467_v37 = vcombine.high %v93_v29, %v97_v32  ;;  %v12466_v45 = vcombine.low %v93_v29, %v97_v32  ;;  %v1156_v29 = vld [vmem:[%s19911_s1 + $0x21c8] sm:$0xff] }
 0x27d   :  { %10139 = vmatpush1.bf16.msra.mxu1 %v13448_v40  ;;  %v1128_v40 = vld [vmem:[%s19911_s1 + $0x20e8] sm:$0xff] }
 0x27e   :  { %9811 = vmatpush1.bf16.msra.mxu0 %v13958_v42  ;;  %10140 = vmatprep.subr.bf16.mxu1 %v13457_v43  ;;  %v101_v42 = vld [vmem:[%s19911_s1 + $0xd0] sm:$0xff]  ;;  %v13497_v46 = vcombine.high %v1124_v39, %v1128_v40  ;;  %v1160_v32 = vld [vmem:[%s19911_s1 + $0x21e8] sm:$0xff] }
 0x27f   :  { %9812 = vmatprep.subr.bf16.mxu0 %v13967_v44  ;;  %v105_v43 = vld [vmem:[%s19911_s1 + $0xf0] sm:$0xff]  ;;  %v13488_v44 = vcombine.low %v1116_v26, %v1120_v27  ;;  %v13521_v26 = vcombine.high %v1148_v18, %v1152_v19 }
 0x280   :  { %v12475_v49 = vcombine.high %v101_v42, %v105_v43  ;;  %v12474_v0 = vcombine.low %v101_v42, %v105_v43  ;;  %v1164_v42 = vld [vmem:[%s19911_s1 + $0x2208] sm:$0xff] }
 0x281   :  { %10141 = vmatpush1.bf16.msra.mxu1 %v13456_v52  ;;  %v1136_v52 = vld [vmem:[%s19911_s1 + $0x2128] sm:$0xff] }
 0x282   :  { %9813 = vmatpush1.bf16.msra.mxu0 %v13966_v54  ;;  %10142 = vmatprep.subr.bf16.mxu1 %v13465_v56  ;;  %v109_v54 = vld [vmem:[%s19911_s1 + $0x110] sm:$0xff]  ;;  %v13505_v2 = vcombine.high %v1132_v51, %v1136_v52  ;;  %v1168_v43 = vld [vmem:[%s19911_s1 + $0x2228] sm:$0xff] }
 0x283   :  { %9814 = vmatprep.subr.bf16.mxu0 %v13975_v59  ;;  %v113_v56 = vld [vmem:[%s19911_s1 + $0x130] sm:$0xff]  ;;  %v13496_v59 = vcombine.low %v1124_v39, %v1128_v40  ;;  %v13529_v39 = vcombine.high %v1156_v29, %v1160_v32 }
 0x284   :  { %v12483_v5 = vcombine.high %v109_v54, %v113_v56 }
 0x285   :  { %10143 = vmatpush1.bf16.msra.mxu1 %v13464_v8  ;;  %v1144_v8 = vld [vmem:[%s19911_s1 + $0x2168] sm:$0xff] }
 0x286   :  { %9815 = vmatpush1.bf16.msra.mxu0 %v13974_v9  ;;  %10153 = vmatprep.subr.bf16.mxu1 %v13473_v13  ;;  %v117_v9 = vld [vmem:[%s19911_s1 + $0x150] sm:$0xff]  ;;  %v13504_v13 = vcombine.low %v1132_v51, %v1136_v52  ;;  %v13513_v15 = vcombine.high %v1140_v6, %v1144_v8  ;;  %v13537_v51 = vcombine.high %v1164_v42, %v1168_v43 }
 0x287   :  { %10317 = vmatprep.subr.bf16.mxu0 %v12451_v14  ;;  %v12482_v14 = vcombine.low %v109_v54, %v113_v56  ;;  %v12491_v17 = vcombine.high %v117_v9, %v121_v11  ;;  %v1172_v54 = vld [vmem:[%s19911_s1 + $0x2248] sm:$0xff] }
 0x288   :  { %10145 = vmatmul.mubr.bf16.vlgmr.msra.gmra.mrb[4].mxu1 %v15878_v53  ;;  %v1176_v56 = vld [vmem:[%s19911_s1 + $0x2268] sm:$0xff] }
 0x289   :  { %9817 = vmatmul.mubr.bf16.vlgmr.msra.gmra.mrb[0].mxu0 %v16699_v20  ;;  %10154 = vmatpush1.bf16.msra.mxu1 %v13472_v22  ;;  %v125_v22 = vld [vmem:[%s19911_s1 + $0x190] sm:$0xff] }
 0x28a   :  { %10318 = vmatpush1.bf16.msra.mxu0 %v12450_v23  ;;  %10155 = vmatprep.subr.bf16.mxu1 %v13481_v24  ;;  %v129_v23 = vld [vmem:[%s19911_s1 + $0x1b0] sm:$0xff]  ;;  %v13512_v24 = vcombine.low %v1140_v6, %v1144_v8  ;;  %v13545_v6 = vcombine.high %v1172_v54, %v1176_v56 }
 0x28b   :  { %10319 = vmatprep.subr.bf16.mxu0 %v12459_v25  ;;  %10185 = vmatprep.mubr.bf16.mxu1 %v15886_v62  ;;  %v12490_v25 = vcombine.low %v117_v9, %v121_v11  ;;  %v12499_v27 = vcombine.high %v125_v22, %v129_v23  ;;  %v1180_v9 = vld [vmem:[%s19911_s1 + $0x2288] sm:$0xff] }
 0x28c   :  { %10349 = vmatprep.mubr.bf16.mxu0 %v14688_v57  ;;  %v1184_v11 = vld [vmem:[%s19911_s1 + $0x22a8] sm:$0xff] }
 0x28d   :  { %10156 = vmatpush1.bf16.msra.mxu1 %v13480_v33  ;;  %v133_v33 = vld [vmem:[%s19911_s1 + $0x1d0] sm:$0xff] }
 0x28e   :  { %10320 = vmatpush1.bf16.msra.mxu0 %v12458_v34  ;;  %10157 = vmatprep.subr.bf16.mxu1 %v13489_v35  ;;  %v137_v34 = vld [vmem:[%s19911_s1 + $0x1f0] sm:$0xff]  ;;  %v13520_v35 = vcombine.low %v1148_v18, %v1152_v19  ;;  %v13553_v18 = vcombine.high %v1180_v9, %v1184_v11 }
 0x28f   :  { %10321 = vmatprep.subr.bf16.mxu0 %v12467_v37  ;;  %v12498_v37 = vcombine.low %v125_v22, %v129_v23  ;;  %v12507_v40 = vcombine.high %v133_v33, %v137_v34  ;;  %v1188_v22 = vld [vmem:[%s19911_s1 + $0x22c8] sm:$0xff] }
 0x290   :  { %v1192_v23 = vld [vmem:[%s19911_s1 + $0x22e8] sm:$0xff] }
 0x291   :  { %10158 = vmatpush1.bf16.msra.mxu1 %v13488_v44  ;;  %v141_v44 = vld [vmem:[%s19911_s1 + $0x210] sm:$0xff] }
 0x292   :  { %10322 = vmatpush1.bf16.msra.mxu0 %v12466_v45  ;;  %10159 = vmatprep.subr.bf16.mxu1 %v13497_v46  ;;  %v145_v45 = vld [vmem:[%s19911_s1 + $0x230] sm:$0xff]  ;;  %v13528_v46 = vcombine.low %v1156_v29, %v1160_v32  ;;  %v13561_v29 = vcombine.high %v1188_v22, %v1192_v23 }
 0x293   :  { %10323 = vmatprep.subr.bf16.mxu0 %v12475_v49  ;;  %v12506_v49 = vcombine.low %v133_v33, %v137_v34  ;;  %v12515_v52 = vcombine.high %v141_v44, %v145_v45  ;;  %v1196_v33 = vld [vmem:[%s19911_s1 + $0x2308] sm:$0xff] }
 0x294   :  { %v1200_v34 = vld [vmem:[%s19911_s1 + $0x2328] sm:$0xff] }
 0x295   :  { %10160 = vmatpush1.bf16.msra.mxu1 %v13496_v59  ;;  %v149_v59 = vld [vmem:[%s19911_s1 + $0x250] sm:$0xff] }
 0x296   :  { %10324 = vmatpush1.bf16.msra.mxu0 %v12474_v0  ;;  %10161 = vmatprep.subr.bf16.mxu1 %v13505_v2  ;;  %v153_v0 = vld [vmem:[%s19911_s1 + $0x270] sm:$0xff]  ;;  %v13536_v2 = vcombine.low %v1164_v42, %v1168_v43  ;;  %v13569_v42 = vcombine.high %v1196_v33, %v1200_v34 }
 0x297   :  { %10325 = vmatprep.subr.bf16.mxu0 %v12483_v5  ;;  %v12514_v5 = vcombine.low %v141_v44, %v145_v45  ;;  %v12523_v8 = vcombine.high %v149_v59, %v153_v0  ;;  %v1204_v44 = vld [vmem:[%s19911_s1 + $0x2348] sm:$0xff] }
 0x298   :  { %v1208_v45 = vld [vmem:[%s19911_s1 + $0x2368] sm:$0xff] }
 0x299   :  { %10162 = vmatpush1.bf16.msra.mxu1 %v13504_v13  ;;  %v157_v13 = vld [vmem:[%s19911_s1 + $0x290] sm:$0xff] }
 0x29a   :  { %10326 = vmatpush1.bf16.msra.mxu0 %v12482_v14  ;;  %10163 = vmatprep.subr.bf16.mxu1 %v13513_v15  ;;  %v161_v14 = vld [vmem:[%s19911_s1 + $0x2b0] sm:$0xff]  ;;  %v13544_v15 = vcombine.low %v1172_v54, %v1176_v56  ;;  %v13577_v54 = vcombine.high %v1204_v44, %v1208_v45 }
 0x29b   :  { %10327 = vmatprep.subr.bf16.mxu0 %v12491_v17  ;;  %v12522_v17 = vcombine.low %v149_v59, %v153_v0  ;;  %v12531_v19 = vcombine.high %v157_v13, %v161_v14  ;;  %v1212_v59 = vld [vmem:[%s19911_s1 + $0x2388] sm:$0xff] }
 0x29c   :  { %v1216_v0 = vld [vmem:[%s19911_s1 + $0x23a8] sm:$0xff] }
 0x29d   :  { %10164 = vmatpush1.bf16.msra.mxu1 %v13512_v24  ;;  %v165_v24 = vld [vmem:[%s19911_s1 + $0x2d0] sm:$0xff] }
 0x29e   :  { %10328 = vmatpush1.bf16.msra.mxu0 %v12490_v25  ;;  %10165 = vmatprep.subr.bf16.mxu1 %v13521_v26  ;;  %v169_v25 = vld [vmem:[%s19911_s1 + $0x2f0] sm:$0xff]  ;;  %v13552_v26 = vcombine.low %v1180_v9, %v1184_v11  ;;  %v13585_v9 = vcombine.high %v1212_v59, %v1216_v0 }
 0x29f   :  { %10329 = vmatprep.subr.bf16.mxu0 %v12499_v27  ;;  %v12530_v27 = vcombine.low %v157_v13, %v161_v14  ;;  %v12539_v32 = vcombine.high %v165_v24, %v169_v25  ;;  %v1220_v13 = vld [vmem:[%s19911_s1 + $0x23c8] sm:$0xff] }
 0x2a0   :  { %v1224_v14 = vld [vmem:[%s19911_s1 + $0x23e8] sm:$0xff] }
 0x2a1   :  { %10166 = vmatpush1.bf16.msra.mxu1 %v13520_v35  ;;  %v173_v35 = vld [vmem:[%s19911_s1 + $0x310] sm:$0xff] }
 0x2a2   :  { %10330 = vmatpush1.bf16.msra.mxu0 %v12498_v37  ;;  %10167 = vmatprep.subr.bf16.mxu1 %v13529_v39  ;;  %v177_v37 = vld [vmem:[%s19911_s1 + $0x330] sm:$0xff]  ;;  %v13560_v39 = vcombine.low %v1188_v22, %v1192_v23  ;;  %v13593_v22 = vcombine.high %v1220_v13, %v1224_v14 }
 0x2a3   :  { %10331 = vmatprep.subr.bf16.mxu0 %v12507_v40  ;;  %v12538_v40 = vcombine.low %v165_v24, %v169_v25  ;;  %v12547_v43 = vcombine.high %v173_v35, %v177_v37  ;;  %v1228_v24 = vld [vmem:[%s19911_s1 + $0x2408] sm:$0xff] }
 0x2a4   :  { %v1232_v25 = vld [vmem:[%s19911_s1 + $0x2428] sm:$0xff] }
 0x2a5   :  { %10168 = vmatpush1.bf16.msra.mxu1 %v13528_v46  ;;  %v181_v46 = vld [vmem:[%s19911_s1 + $0x350] sm:$0xff] }
 0x2a6   :  { %10332 = vmatpush1.bf16.msra.mxu0 %v12506_v49  ;;  %10169 = vmatprep.subr.bf16.mxu1 %v13537_v51  ;;  %v185_v49 = vld [vmem:[%s19911_s1 + $0x370] sm:$0xff]  ;;  %v13568_v51 = vcombine.low %v1196_v33, %v1200_v34  ;;  %v13601_v33 = vcombine.high %v1228_v24, %v1232_v25 }
 0x2a7   :  { %10333 = vmatprep.subr.bf16.mxu0 %v12515_v52  ;;  %v12546_v52 = vcombine.low %v173_v35, %v177_v37  ;;  %v12555_v56 = vcombine.high %v181_v46, %v185_v49  ;;  %v1236_v35 = vld [vmem:[%s19911_s1 + $0x2448] sm:$0xff] }
 0x2a8   :  { %v1240_v37 = vld [vmem:[%s19911_s1 + $0x2468] sm:$0xff] }
 0x2a9   :  { %10170 = vmatpush1.bf16.msra.mxu1 %v13536_v2  ;;  %v189_v2 = vld [vmem:[%s19911_s1 + $0x390] sm:$0xff] }
 0x2aa   :  { %10334 = vmatpush1.bf16.msra.mxu0 %v12514_v5  ;;  %10171 = vmatprep.subr.bf16.mxu1 %v13545_v6  ;;  %v193_v5 = vld [vmem:[%s19911_s1 + $0x3b0] sm:$0xff]  ;;  %v13576_v6 = vcombine.low %v1204_v44, %v1208_v45  ;;  %v13609_v44 = vcombine.high %v1236_v35, %v1240_v37 }
 0x2ab   :  { %10335 = vmatprep.subr.bf16.mxu0 %v12523_v8  ;;  %v12554_v8 = vcombine.low %v181_v46, %v185_v49  ;;  %v12563_v11 = vcombine.high %v189_v2, %v193_v5  ;;  %v1244_v46 = vld [vmem:[%s19911_s1 + $0x2488] sm:$0xff] }
 0x2ac   :  { %v1248_v49 = vld [vmem:[%s19911_s1 + $0x24a8] sm:$0xff] }
 0x2ad   :  { %10172 = vmatpush1.bf16.msra.mxu1 %v13544_v15  ;;  %v197_v15 = vld [vmem:[%s19911_s1 + $0x3d0] sm:$0xff] }
 0x2ae   :  { %10336 = vmatpush1.bf16.msra.mxu0 %v12522_v17  ;;  %10173 = vmatprep.subr.bf16.mxu1 %v13553_v18  ;;  %v201_v17 = vld [vmem:[%s19911_s1 + $0x3f0] sm:$0xff]  ;;  %v13584_v18 = vcombine.low %v1212_v59, %v1216_v0  ;;  %v13617_v59 = vcombine.high %v1244_v46, %v1248_v49 }
 0x2af   :  { %10337 = vmatprep.subr.bf16.mxu0 %v12531_v19  ;;  %v12562_v19 = vcombine.low %v189_v2, %v193_v5  ;;  %v12571_v23 = vcombine.high %v197_v15, %v201_v17  ;;  %v1252_v2 = vld [vmem:[%s19911_s1 + $0x24c8] sm:$0xff] }
 0x2b0   :  { %v1256_v5 = vld [vmem:[%s19911_s1 + $0x24e8] sm:$0xff] }
 0x2b1   :  { %10174 = vmatpush1.bf16.msra.mxu1 %v13552_v26  ;;  %v205_v26 = vld [vmem:[%s19911_s1 + $0x410] sm:$0xff] }
 0x2b2   :  { %10338 = vmatpush1.bf16.msra.mxu0 %v12530_v27  ;;  %10175 = vmatprep.subr.bf16.mxu1 %v13561_v29  ;;  %v209_v27 = vld [vmem:[%s19911_s1 + $0x430] sm:$0xff]  ;;  %v13592_v29 = vcombine.low %v1220_v13, %v1224_v14  ;;  %v13625_v13 = vcombine.high %v1252_v2, %v1256_v5 }
 0x2b3   :  { %10339 = vmatprep.subr.bf16.mxu0 %v12539_v32  ;;  %v12570_v32 = vcombine.low %v197_v15, %v201_v17  ;;  %v12579_v34 = vcombine.high %v205_v26, %v209_v27  ;;  %v1260_v15 = vld [vmem:[%s19911_s1 + $0x2508] sm:$0xff] }
 0x2b4   :  { %v1264_v17 = vld [vmem:[%s19911_s1 + $0x2528] sm:$0xff] }
 0x2b5   :  { %10176 = vmatpush1.bf16.msra.mxu1 %v13560_v39  ;;  %v213_v39 = vld [vmem:[%s19911_s1 + $0x450] sm:$0xff] }
 0x2b6   :  { %10340 = vmatpush1.bf16.msra.mxu0 %v12538_v40  ;;  %10177 = vmatprep.subr.bf16.mxu1 %v13569_v42  ;;  %v217_v40 = vld [vmem:[%s19911_s1 + $0x470] sm:$0xff]  ;;  %v13600_v42 = vcombine.low %v1228_v24, %v1232_v25  ;;  %v13633_v24 = vcombine.high %v1260_v15, %v1264_v17 }
 0x2b7   :  { %10341 = vmatprep.subr.bf16.mxu0 %v12547_v43  ;;  %v12578_v43 = vcombine.low %v205_v26, %v209_v27  ;;  %v12587_v45 = vcombine.high %v213_v39, %v217_v40  ;;  %v1268_v26 = vld [vmem:[%s19911_s1 + $0x2548] sm:$0xff] }
 0x2b8   :  { %v1272_v27 = vld [vmem:[%s19911_s1 + $0x2568] sm:$0xff] }
 0x2b9   :  { %10178 = vmatpush1.bf16.msra.mxu1 %v13568_v51  ;;  %v221_v51 = vld [vmem:[%s19911_s1 + $0x490] sm:$0xff] }
 0x2ba   :  { %10342 = vmatpush1.bf16.msra.mxu0 %v12546_v52  ;;  %10179 = vmatprep.subr.bf16.mxu1 %v13577_v54  ;;  %v225_v52 = vld [vmem:[%s19911_s1 + $0x4b0] sm:$0xff]  ;;  %v13608_v54 = vcombine.low %v1236_v35, %v1240_v37  ;;  %v13641_v35 = vcombine.high %v1268_v26, %v1272_v27 }
 0x2bb   :  { %10343 = vmatprep.subr.bf16.mxu0 %v12555_v56  ;;  %v12586_v56 = vcombine.low %v213_v39, %v217_v40  ;;  %v12595_v0 = vcombine.high %v221_v51, %v225_v52  ;;  %v1276_v39 = vld [vmem:[%s19911_s1 + $0x2588] sm:$0xff] }
 0x2bc   :  { %v1280_v40 = vld [vmem:[%s19911_s1 + $0x25a8] sm:$0xff] }
 0x2bd   :  { %10180 = vmatpush1.bf16.msra.mxu1 %v13576_v6  ;;  %v229_v6 = vld [vmem:[%s19911_s1 + $0x4d0] sm:$0xff] }
 0x2be   :  { %10344 = vmatpush1.bf16.msra.mxu0 %v12554_v8  ;;  %10181 = vmatprep.subr.bf16.mxu1 %v13585_v9  ;;  %v233_v8 = vld [vmem:[%s19911_s1 + $0x4f0] sm:$0xff]  ;;  %v13616_v9 = vcombine.low %v1244_v46, %v1248_v49  ;;  %v13649_v46 = vcombine.high %v1276_v39, %v1280_v40 }
 0x2bf   :  { %10345 = vmatprep.subr.bf16.mxu0 %v12563_v11  ;;  %v12594_v11 = vcombine.low %v221_v51, %v225_v52  ;;  %v12603_v14 = vcombine.high %v229_v6, %v233_v8  ;;  %v1284_v51 = vld [vmem:[%s19911_s1 + $0x25c8] sm:$0xff] }
 0x2c0   :  { %v1288_v52 = vld [vmem:[%s19911_s1 + $0x25e8] sm:$0xff] }
 0x2c1   :  { %10182 = vmatpush1.bf16.msra.mxu1 %v13584_v18  ;;  %v237_v18 = vld [vmem:[%s19911_s1 + $0x510] sm:$0xff] }
 0x2c2   :  { %10346 = vmatpush1.bf16.msra.mxu0 %v12562_v19  ;;  %10183 = vmatprep.subr.bf16.mxu1 %v13593_v22  ;;  %v241_v19 = vld [vmem:[%s19911_s1 + $0x530] sm:$0xff]  ;;  %v13624_v22 = vcombine.low %v1252_v2, %v1256_v5  ;;  %v13657_v2 = vcombine.high %v1284_v51, %v1288_v52 }
 0x2c3   :  { %10347 = vmatprep.subr.bf16.mxu0 %v12571_v23  ;;  %v12602_v23 = vcombine.low %v229_v6, %v233_v8  ;;  %v12611_v25 = vcombine.high %v237_v18, %v241_v19  ;;  %v1292_v6 = vld [vmem:[%s19911_s1 + $0x2608] sm:$0xff] }
 0x2c4   :  { %v1296_v8 = vld [vmem:[%s19911_s1 + $0x2628] sm:$0xff] }
 0x2c5   :  { %10184 = vmatpush1.bf16.msra.mxu1 %v13592_v29  ;;  %v245_v29 = vld [vmem:[%s19911_s1 + $0x550] sm:$0xff] }
 0x2c6   :  { %10348 = vmatpush1.bf16.msra.mxu0 %v12570_v32  ;;  %10194 = vmatprep.subr.bf16.mxu1 %v13601_v33  ;;  %v249_v32 = vld [vmem:[%s19911_s1 + $0x570] sm:$0xff]  ;;  %v13632_v33 = vcombine.low %v1260_v15, %v1264_v17  ;;  %v13665_v15 = vcombine.high %v1292_v6, %v1296_v8 }
 0x2c7   :  { %10358 = vmatprep.subr.bf16.mxu0 %v12579_v34  ;;  %v12610_v34 = vcombine.low %v237_v18, %v241_v19  ;;  %v12619_v37 = vcombine.high %v245_v29, %v249_v32  ;;  %v1300_v18 = vld [vmem:[%s19911_s1 + $0x2648] sm:$0xff] }
 0x2c8   :  { %10186 = vmatmul.mubr.bf16.vlgmr.msra.gmra.mrb[4].mxu1 %v16084_v48  ;;  %v1304_v19 = vld [vmem:[%s19911_s1 + $0x2668] sm:$0xff] }
 0x2c9   :  { %10195 = vmatpush1.bf16.msra.mxu1 %v13600_v42  ;;  %10350 = vmatmul.mubr.bf16.vlgmr.msra.gmra.mrb[4].mxu0 %v14823_v16  ;;  %v253_v42 = vld [vmem:[%s19911_s1 + $0x590] sm:$0xff] }
 0x2ca   :  { %10359 = vmatpush1.bf16.msra.mxu0 %v12578_v43  ;;  %10196 = vmatprep.subr.bf16.mxu1 %v13609_v44  ;;  %v257_v43 = vld [vmem:[%s19911_s1 + $0x5b0] sm:$0xff]  ;;  %v13640_v44 = vcombine.low %v1268_v26, %v1272_v27  ;;  %v13673_v26 = vcombine.high %v1300_v18, %v1304_v19 }
 0x2cb   :  { %10360 = vmatprep.subr.bf16.mxu0 %v12587_v45  ;;  %10226 = vmatprep.mubr.bf16.mxu1 %v16092_v55  ;;  %v12618_v45 = vcombine.low %v245_v29, %v249_v32  ;;  %v12627_v49 = vcombine.high %v253_v42, %v257_v43  ;;  %v1308_v29 = vld [vmem:[%s19911_s1 + $0x2688] sm:$0xff] }
 0x2cc   :  { %10390 = vmatprep.mubr.bf16.mxu0 %v14845_v28  ;;  %v1312_v32 = vld [vmem:[%s19911_s1 + $0x26a8] sm:$0xff] }
 0x2cd   :  { %10197 = vmatpush1.bf16.msra.mxu1 %v13608_v54  ;;  %v261_v54 = vld [vmem:[%s19911_s1 + $0x5d0] sm:$0xff] }
 0x2ce   :  { %10361 = vmatpush1.bf16.msra.mxu0 %v12586_v56  ;;  %10198 = vmatprep.subr.bf16.mxu1 %v13617_v59  ;;  %v265_v56 = vld [vmem:[%s19911_s1 + $0x5f0] sm:$0xff]  ;;  %v13648_v59 = vcombine.low %v1276_v39, %v1280_v40  ;;  %v13681_v39 = vcombine.high %v1308_v29, %v1312_v32 }
 0x2cf   :  { %10362 = vmatprep.subr.bf16.mxu0 %v12595_v0  ;;  %v12626_v0 = vcombine.low %v253_v42, %v257_v43  ;;  %v12635_v5 = vcombine.high %v261_v54, %v265_v56  ;;  %v1316_v42 = vld [vmem:[%s19911_s1 + $0x26c8] sm:$0xff] }
 0x2d0   :  { %v1320_v43 = vld [vmem:[%s19911_s1 + $0x26e8] sm:$0xff] }
 0x2d1   :  { %10199 = vmatpush1.bf16.msra.mxu1 %v13616_v9  ;;  %v269_v9 = vld [vmem:[%s19911_s1 + $0x610] sm:$0xff] }
 0x2d2   :  { %10363 = vmatpush1.bf16.msra.mxu0 %v12594_v11  ;;  %10200 = vmatprep.subr.bf16.mxu1 %v13625_v13  ;;  %v273_v11 = vld [vmem:[%s19911_s1 + $0x630] sm:$0xff]  ;;  %v13656_v13 = vcombine.low %v1284_v51, %v1288_v52  ;;  %v13689_v51 = vcombine.high %v1316_v42, %v1320_v43 }
 0x2d3   :  { %10364 = vmatprep.subr.bf16.mxu0 %v12603_v14  ;;  %v12634_v14 = vcombine.low %v261_v54, %v265_v56  ;;  %v12643_v17 = vcombine.high %v269_v9, %v273_v11  ;;  %v1324_v54 = vld [vmem:[%s19911_s1 + $0x2708] sm:$0xff] }
 0x2d4   :  { %v1328_v56 = vld [vmem:[%s19911_s1 + $0x2728] sm:$0xff] }
 0x2d5   :  { %10201 = vmatpush1.bf16.msra.mxu1 %v13624_v22  ;;  %v277_v22 = vld [vmem:[%s19911_s1 + $0x650] sm:$0xff] }
 0x2d6   :  { %10365 = vmatpush1.bf16.msra.mxu0 %v12602_v23  ;;  %10202 = vmatprep.subr.bf16.mxu1 %v13633_v24  ;;  %v281_v23 = vld [vmem:[%s19911_s1 + $0x670] sm:$0xff]  ;;  %v13664_v24 = vcombine.low %v1292_v6, %v1296_v8  ;;  %v13697_v6 = vcombine.high %v1324_v54, %v1328_v56 }
 0x2d7   :  { %10366 = vmatprep.subr.bf16.mxu0 %v12611_v25  ;;  %v12642_v25 = vcombine.low %v269_v9, %v273_v11  ;;  %v12651_v27 = vcombine.high %v277_v22, %v281_v23  ;;  %v1332_v9 = vld [vmem:[%s19911_s1 + $0x2748] sm:$0xff] }
 0x2d8   :  { %v1336_v11 = vld [vmem:[%s19911_s1 + $0x2768] sm:$0xff] }
 0x2d9   :  { %10203 = vmatpush1.bf16.msra.mxu1 %v13632_v33  ;;  %v285_v33 = vld [vmem:[%s19911_s1 + $0x690] sm:$0xff] }
 0x2da   :  { %10367 = vmatpush1.bf16.msra.mxu0 %v12610_v34  ;;  %10204 = vmatprep.subr.bf16.mxu1 %v13641_v35  ;;  %v289_v34 = vld [vmem:[%s19911_s1 + $0x6b0] sm:$0xff]  ;;  %v13672_v35 = vcombine.low %v1300_v18, %v1304_v19  ;;  %v13705_v18 = vcombine.high %v1332_v9, %v1336_v11 }
 0x2db   :  { %10368 = vmatprep.subr.bf16.mxu0 %v12619_v37  ;;  %v12650_v37 = vcombine.low %v277_v22, %v281_v23  ;;  %v12659_v40 = vcombine.high %v285_v33, %v289_v34  ;;  %v1340_v22 = vld [vmem:[%s19911_s1 + $0x2788] sm:$0xff] }
 0x2dc   :  { %v1344_v23 = vld [vmem:[%s19911_s1 + $0x27a8] sm:$0xff] }
 0x2dd   :  { %10205 = vmatpush1.bf16.msra.mxu1 %v13640_v44  ;;  %v293_v44 = vld [vmem:[%s19911_s1 + $0x6d0] sm:$0xff] }
 0x2de   :  { %10369 = vmatpush1.bf16.msra.mxu0 %v12618_v45  ;;  %10206 = vmatprep.subr.bf16.mxu1 %v13649_v46  ;;  %v297_v45 = vld [vmem:[%s19911_s1 + $0x6f0] sm:$0xff]  ;;  %v13680_v46 = vcombine.low %v1308_v29, %v1312_v32  ;;  %v13713_v29 = vcombine.high %v1340_v22, %v1344_v23 }
 0x2df   :  { %10370 = vmatprep.subr.bf16.mxu0 %v12627_v49  ;;  %v12658_v49 = vcombine.low %v285_v33, %v289_v34  ;;  %v12667_v52 = vcombine.high %v293_v44, %v297_v45  ;;  %v1348_v33 = vld [vmem:[%s19911_s1 + $0x27c8] sm:$0xff] }
 0x2e0   :  { %v1352_v34 = vld [vmem:[%s19911_s1 + $0x27e8] sm:$0xff] }
 0x2e1   :  { %10207 = vmatpush1.bf16.msra.mxu1 %v13648_v59  ;;  %v301_v59 = vld [vmem:[%s19911_s1 + $0x710] sm:$0xff] }
 0x2e2   :  { %10371 = vmatpush1.bf16.msra.mxu0 %v12626_v0  ;;  %10208 = vmatprep.subr.bf16.mxu1 %v13657_v2  ;;  %v305_v0 = vld [vmem:[%s19911_s1 + $0x730] sm:$0xff]  ;;  %v13688_v2 = vcombine.low %v1316_v42, %v1320_v43  ;;  %v13721_v42 = vcombine.high %v1348_v33, %v1352_v34 }
 0x2e3   :  { %10372 = vmatprep.subr.bf16.mxu0 %v12635_v5  ;;  %v12666_v5 = vcombine.low %v293_v44, %v297_v45  ;;  %v12675_v8 = vcombine.high %v301_v59, %v305_v0  ;;  %v1356_v44 = vld [vmem:[%s19911_s1 + $0x2808] sm:$0xff] }
 0x2e4   :  { %v1360_v45 = vld [vmem:[%s19911_s1 + $0x2828] sm:$0xff] }
 0x2e5   :  { %10209 = vmatpush1.bf16.msra.mxu1 %v13656_v13  ;;  %v309_v13 = vld [vmem:[%s19911_s1 + $0x750] sm:$0xff] }
 0x2e6   :  { %10373 = vmatpush1.bf16.msra.mxu0 %v12634_v14  ;;  %10210 = vmatprep.subr.bf16.mxu1 %v13665_v15  ;;  %v313_v14 = vld [vmem:[%s19911_s1 + $0x770] sm:$0xff]  ;;  %v13696_v15 = vcombine.low %v1324_v54, %v1328_v56  ;;  %v13729_v54 = vcombine.high %v1356_v44, %v1360_v45 }
 0x2e7   :  { %10374 = vmatprep.subr.bf16.mxu0 %v12643_v17  ;;  %v12674_v17 = vcombine.low %v301_v59, %v305_v0  ;;  %v12683_v19 = vcombine.high %v309_v13, %v313_v14  ;;  %v1364_v59 = vld [vmem:[%s19911_s1 + $0x2848] sm:$0xff] }
 0x2e8   :  { %v1368_v0 = vld [vmem:[%s19911_s1 + $0x2868] sm:$0xff] }
 0x2e9   :  { %10211 = vmatpush1.bf16.msra.mxu1 %v13664_v24  ;;  %v317_v24 = vld [vmem:[%s19911_s1 + $0x790] sm:$0xff] }
 0x2ea   :  { %10375 = vmatpush1.bf16.msra.mxu0 %v12642_v25  ;;  %10212 = vmatprep.subr.bf16.mxu1 %v13673_v26  ;;  %v321_v25 = vld [vmem:[%s19911_s1 + $0x7b0] sm:$0xff]  ;;  %v13704_v26 = vcombine.low %v1332_v9, %v1336_v11  ;;  %v13737_v9 = vcombine.high %v1364_v59, %v1368_v0 }
 0x2eb   :  { %10376 = vmatprep.subr.bf16.mxu0 %v12651_v27  ;;  %v12682_v27 = vcombine.low %v309_v13, %v313_v14  ;;  %v12691_v32 = vcombine.high %v317_v24, %v321_v25  ;;  %v1372_v13 = vld [vmem:[%s19911_s1 + $0x2888] sm:$0xff] }
 0x2ec   :  { %v1376_v14 = vld [vmem:[%s19911_s1 + $0x28a8] sm:$0xff] }
 0x2ed   :  { %10213 = vmatpush1.bf16.msra.mxu1 %v13672_v35  ;;  %v325_v35 = vld [vmem:[%s19911_s1 + $0x7d0] sm:$0xff] }
 0x2ee   :  { %10377 = vmatpush1.bf16.msra.mxu0 %v12650_v37  ;;  %10214 = vmatprep.subr.bf16.mxu1 %v13681_v39  ;;  %v329_v37 = vld [vmem:[%s19911_s1 + $0x7f0] sm:$0xff]  ;;  %v13712_v39 = vcombine.low %v1340_v22, %v1344_v23  ;;  %v13745_v22 = vcombine.high %v1372_v13, %v1376_v14 }
 0x2ef   :  { %10378 = vmatprep.subr.bf16.mxu0 %v12659_v40  ;;  %v12690_v40 = vcombine.low %v317_v24, %v321_v25  ;;  %v12699_v43 = vcombine.high %v325_v35, %v329_v37  ;;  %v1380_v24 = vld [vmem:[%s19911_s1 + $0x28c8] sm:$0xff] }
 0x2f0   :  { %v1384_v25 = vld [vmem:[%s19911_s1 + $0x28e8] sm:$0xff] }
 0x2f1   :  { %10215 = vmatpush1.bf16.msra.mxu1 %v13680_v46  ;;  %v333_v46 = vld [vmem:[%s19911_s1 + $0x810] sm:$0xff] }
 0x2f2   :  { %10379 = vmatpush1.bf16.msra.mxu0 %v12658_v49  ;;  %10216 = vmatprep.subr.bf16.mxu1 %v13689_v51  ;;  %v337_v49 = vld [vmem:[%s19911_s1 + $0x830] sm:$0xff]  ;;  %v13720_v51 = vcombine.low %v1348_v33, %v1352_v34  ;;  %v13753_v33 = vcombine.high %v1380_v24, %v1384_v25 }
 0x2f3   :  { %10380 = vmatprep.subr.bf16.mxu0 %v12667_v52  ;;  %v12698_v52 = vcombine.low %v325_v35, %v329_v37  ;;  %v12707_v56 = vcombine.high %v333_v46, %v337_v49  ;;  %v1388_v35 = vld [vmem:[%s19911_s1 + $0x2908] sm:$0xff] }
 0x2f4   :  { %v1392_v37 = vld [vmem:[%s19911_s1 + $0x2928] sm:$0xff] }
 0x2f5   :  { %10217 = vmatpush1.bf16.msra.mxu1 %v13688_v2  ;;  %v341_v2 = vld [vmem:[%s19911_s1 + $0x850] sm:$0xff] }
 0x2f6   :  { %10381 = vmatpush1.bf16.msra.mxu0 %v12666_v5  ;;  %10218 = vmatprep.subr.bf16.mxu1 %v13697_v6  ;;  %v345_v5 = vld [vmem:[%s19911_s1 + $0x870] sm:$0xff]  ;;  %v13728_v6 = vcombine.low %v1356_v44, %v1360_v45  ;;  %v13761_v44 = vcombine.high %v1388_v35, %v1392_v37 }
 0x2f7   :  { %10382 = vmatprep.subr.bf16.mxu0 %v12675_v8  ;;  %v12706_v8 = vcombine.low %v333_v46, %v337_v49  ;;  %v12715_v11 = vcombine.high %v341_v2, %v345_v5  ;;  %v1396_v46 = vld [vmem:[%s19911_s1 + $0x2948] sm:$0xff] }
 0x2f8   :  { %v1400_v49 = vld [vmem:[%s19911_s1 + $0x2968] sm:$0xff] }
 0x2f9   :  { %10219 = vmatpush1.bf16.msra.mxu1 %v13696_v15  ;;  %v349_v15 = vld [vmem:[%s19911_s1 + $0x890] sm:$0xff] }
 0x2fa   :  { %10383 = vmatpush1.bf16.msra.mxu0 %v12674_v17  ;;  %10220 = vmatprep.subr.bf16.mxu1 %v13705_v18  ;;  %v353_v17 = vld [vmem:[%s19911_s1 + $0x8b0] sm:$0xff]  ;;  %v13736_v18 = vcombine.low %v1364_v59, %v1368_v0  ;;  %v13769_v59 = vcombine.high %v1396_v46, %v1400_v49 }
 0x2fb   :  { %10384 = vmatprep.subr.bf16.mxu0 %v12683_v19  ;;  %v12714_v19 = vcombine.low %v341_v2, %v345_v5  ;;  %v12723_v23 = vcombine.high %v349_v15, %v353_v17  ;;  %v1404_v2 = vld [vmem:[%s19911_s1 + $0x2988] sm:$0xff] }
 0x2fc   :  { %v1408_v5 = vld [vmem:[%s19911_s1 + $0x29a8] sm:$0xff] }
 0x2fd   :  { %10221 = vmatpush1.bf16.msra.mxu1 %v13704_v26  ;;  %v357_v26 = vld [vmem:[%s19911_s1 + $0x8d0] sm:$0xff] }
 0x2fe   :  { %10385 = vmatpush1.bf16.msra.mxu0 %v12682_v27  ;;  %10222 = vmatprep.subr.bf16.mxu1 %v13713_v29  ;;  %v361_v27 = vld [vmem:[%s19911_s1 + $0x8f0] sm:$0xff]  ;;  %v13744_v29 = vcombine.low %v1372_v13, %v1376_v14  ;;  %v13777_v13 = vcombine.high %v1404_v2, %v1408_v5 }
 0x2ff   :  { %10386 = vmatprep.subr.bf16.mxu0 %v12691_v32  ;;  %v12722_v32 = vcombine.low %v349_v15, %v353_v17  ;;  %v12731_v34 = vcombine.high %v357_v26, %v361_v27  ;;  %v1412_v15 = vld [vmem:[%s19911_s1 + $0x29c8] sm:$0xff] }
 0x300   :  { %v1416_v17 = vld [vmem:[%s19911_s1 + $0x29e8] sm:$0xff] }
 0x301   :  { %10223 = vmatpush1.bf16.msra.mxu1 %v13712_v39  ;;  %v365_v39 = vld [vmem:[%s19911_s1 + $0x910] sm:$0xff] }
 0x302   :  { %10387 = vmatpush1.bf16.msra.mxu0 %v12690_v40  ;;  %10224 = vmatprep.subr.bf16.mxu1 %v13721_v42  ;;  %v369_v40 = vld [vmem:[%s19911_s1 + $0x930] sm:$0xff]  ;;  %v13752_v42 = vcombine.low %v1380_v24, %v1384_v25  ;;  %v13785_v24 = vcombine.high %v1412_v15, %v1416_v17 }
 0x303   :  { %10388 = vmatprep.subr.bf16.mxu0 %v12699_v43  ;;  %v12730_v43 = vcombine.low %v357_v26, %v361_v27  ;;  %v12739_v45 = vcombine.high %v365_v39, %v369_v40  ;;  %v1420_v26 = vld [vmem:[%s19911_s1 + $0x2a08] sm:$0xff] }
 0x304   :  { %v1424_v27 = vld [vmem:[%s19911_s1 + $0x2a28] sm:$0xff] }
 0x305   :  { %10225 = vmatpush1.bf16.msra.mxu1 %v13720_v51  ;;  %v373_v51 = vld [vmem:[%s19911_s1 + $0x950] sm:$0xff] }
 0x306   :  { %10389 = vmatpush1.bf16.msra.mxu0 %v12698_v52  ;;  %10235 = vmatprep.subr.bf16.mxu1 %v13729_v54  ;;  %v377_v52 = vld [vmem:[%s19911_s1 + $0x970] sm:$0xff]  ;;  %v13760_v54 = vcombine.low %v1388_v35, %v1392_v37  ;;  %v13793_v35 = vcombine.high %v1420_v26, %v1424_v27 }
 0x307   :  { %10399 = vmatprep.subr.bf16.mxu0 %v12707_v56  ;;  %v12738_v56 = vcombine.low %v365_v39, %v369_v40  ;;  %v12747_v0 = vcombine.high %v373_v51, %v377_v52  ;;  %v1428_v39 = vld [vmem:[%s19911_s1 + $0x2a48] sm:$0xff] }
 0x308   :  { %10227 = vmatmul.mubr.bf16.vlgmr.msra.gmra.mrb[4].mxu1 %v16290_v50  ;;  %v1432_v40 = vld [vmem:[%s19911_s1 + $0x2a68] sm:$0xff] }
 0x309   :  { %10236 = vmatpush1.bf16.msra.mxu1 %v13728_v6  ;;  %10391 = vmatmul.mubr.bf16.vlgmr.msra.gmra.mrb[4].mxu0 %v15039_v36  ;;  %v381_v6 = vld [vmem:[%s19911_s1 + $0x990] sm:$0xff] }
 0x30a   :  { %10400 = vmatpush1.bf16.msra.mxu0 %v12706_v8  ;;  %10237 = vmatprep.subr.bf16.mxu1 %v13737_v9  ;;  %v385_v8 = vld [vmem:[%s19911_s1 + $0x9b0] sm:$0xff]  ;;  %v13768_v9 = vcombine.low %v1396_v46, %v1400_v49  ;;  %v13801_v46 = vcombine.high %v1428_v39, %v1432_v40 }
 0x30b   :  { %10401 = vmatprep.subr.bf16.mxu0 %v12715_v11  ;;  %10267 = vmatprep.mubr.bf16.mxu1 %v16298_v60  ;;  %v12746_v11 = vcombine.low %v373_v51, %v377_v52  ;;  %v12755_v14 = vcombine.high %v381_v6, %v385_v8  ;;  %v1436_v51 = vld [vmem:[%s19911_s1 + $0x2a88] sm:$0xff] }
 0x30c   :  { %10431 = vmatprep.mubr.bf16.mxu0 %v14699_v61  ;;  %v1440_v52 = vld [vmem:[%s19911_s1 + $0x2aa8] sm:$0xff] }
 0x30d   :  { %10238 = vmatpush1.bf16.msra.mxu1 %v13736_v18  ;;  %v389_v18 = vld [vmem:[%s19911_s1 + $0x9d0] sm:$0xff] }
 0x30e   :  { %10402 = vmatpush1.bf16.msra.mxu0 %v12714_v19  ;;  %10239 = vmatprep.subr.bf16.mxu1 %v13745_v22  ;;  %v393_v19 = vld [vmem:[%s19911_s1 + $0x9f0] sm:$0xff]  ;;  %v13776_v22 = vcombine.low %v1404_v2, %v1408_v5  ;;  %v13809_v2 = vcombine.high %v1436_v51, %v1440_v52 }
 0x30f   :  { %10403 = vmatprep.subr.bf16.mxu0 %v12723_v23  ;;  %v12754_v23 = vcombine.low %v381_v6, %v385_v8  ;;  %v12763_v25 = vcombine.high %v389_v18, %v393_v19  ;;  %v1444_v6 = vld [vmem:[%s19911_s1 + $0x2ac8] sm:$0xff] }
 0x310   :  { %v1448_v8 = vld [vmem:[%s19911_s1 + $0x2ae8] sm:$0xff] }
 0x311   :  { %10240 = vmatpush1.bf16.msra.mxu1 %v13744_v29  ;;  %v397_v29 = vld [vmem:[%s19911_s1 + $0xa10] sm:$0xff] }
 0x312   :  { %10404 = vmatpush1.bf16.msra.mxu0 %v12722_v32  ;;  %10241 = vmatprep.subr.bf16.mxu1 %v13753_v33  ;;  %v401_v32 = vld [vmem:[%s19911_s1 + $0xa30] sm:$0xff]  ;;  %v13784_v33 = vcombine.low %v1412_v15, %v1416_v17  ;;  %v13817_v15 = vcombine.high %v1444_v6, %v1448_v8 }
 0x313   :  { %10405 = vmatprep.subr.bf16.mxu0 %v12731_v34  ;;  %v12762_v34 = vcombine.low %v389_v18, %v393_v19  ;;  %v12771_v37 = vcombine.high %v397_v29, %v401_v32  ;;  %v1452_v18 = vld [vmem:[%s19911_s1 + $0x2b08] sm:$0xff] }
 0x314   :  { %v1456_v19 = vld [vmem:[%s19911_s1 + $0x2b28] sm:$0xff] }
 0x315   :  { %10242 = vmatpush1.bf16.msra.mxu1 %v13752_v42  ;;  %v405_v42 = vld [vmem:[%s19911_s1 + $0xa50] sm:$0xff] }
 0x316   :  { %10406 = vmatpush1.bf16.msra.mxu0 %v12730_v43  ;;  %10243 = vmatprep.subr.bf16.mxu1 %v13761_v44  ;;  %v409_v43 = vld [vmem:[%s19911_s1 + $0xa70] sm:$0xff]  ;;  %v13792_v44 = vcombine.low %v1420_v26, %v1424_v27  ;;  %v13825_v26 = vcombine.high %v1452_v18, %v1456_v19 }
 0x317   :  { %10407 = vmatprep.subr.bf16.mxu0 %v12739_v45  ;;  %v12770_v45 = vcombine.low %v397_v29, %v401_v32  ;;  %v12779_v49 = vcombine.high %v405_v42, %v409_v43  ;;  %v1460_v29 = vld [vmem:[%s19911_s1 + $0x2b48] sm:$0xff] }
 0x318   :  { %v1464_v32 = vld [vmem:[%s19911_s1 + $0x2b68] sm:$0xff] }
 0x319   :  { %10244 = vmatpush1.bf16.msra.mxu1 %v13760_v54  ;;  %v413_v54 = vld [vmem:[%s19911_s1 + $0xa90] sm:$0xff] }
 0x31a   :  { %10408 = vmatpush1.bf16.msra.mxu0 %v12738_v56  ;;  %10245 = vmatprep.subr.bf16.mxu1 %v13769_v59  ;;  %v417_v56 = vld [vmem:[%s19911_s1 + $0xab0] sm:$0xff]  ;;  %v13800_v59 = vcombine.low %v1428_v39, %v1432_v40  ;;  %v13833_v39 = vcombine.high %v1460_v29, %v1464_v32 }
 0x31b   :  { %10409 = vmatprep.subr.bf16.mxu0 %v12747_v0  ;;  %v12778_v0 = vcombine.low %v405_v42, %v409_v43  ;;  %v12787_v5 = vcombine.high %v413_v54, %v417_v56  ;;  %v1468_v42 = vld [vmem:[%s19911_s1 + $0x2b88] sm:$0xff] }
 0x31c   :  { %v1472_v43 = vld [vmem:[%s19911_s1 + $0x2ba8] sm:$0xff] }
 0x31d   :  { %10246 = vmatpush1.bf16.msra.mxu1 %v13768_v9  ;;  %v421_v9 = vld [vmem:[%s19911_s1 + $0xad0] sm:$0xff] }
 0x31e   :  { %10410 = vmatpush1.bf16.msra.mxu0 %v12746_v11  ;;  %10247 = vmatprep.subr.bf16.mxu1 %v13777_v13  ;;  %v425_v11 = vld [vmem:[%s19911_s1 + $0xaf0] sm:$0xff]  ;;  %v13808_v13 = vcombine.low %v1436_v51, %v1440_v52  ;;  %v13841_v51 = vcombine.high %v1468_v42, %v1472_v43 }
 0x31f   :  { %10411 = vmatprep.subr.bf16.mxu0 %v12755_v14  ;;  %v12786_v14 = vcombine.low %v413_v54, %v417_v56  ;;  %v12795_v17 = vcombine.high %v421_v9, %v425_v11  ;;  %v1476_v54 = vld [vmem:[%s19911_s1 + $0x2bc8] sm:$0xff] }
 0x320   :  { %v1480_v56 = vld [vmem:[%s19911_s1 + $0x2be8] sm:$0xff] }
 0x321   :  { %10248 = vmatpush1.bf16.msra.mxu1 %v13776_v22  ;;  %v429_v22 = vld [vmem:[%s19911_s1 + $0xb10] sm:$0xff] }
 0x322   :  { %10412 = vmatpush1.bf16.msra.mxu0 %v12754_v23  ;;  %10249 = vmatprep.subr.bf16.mxu1 %v13785_v24  ;;  %v433_v23 = vld [vmem:[%s19911_s1 + $0xb30] sm:$0xff]  ;;  %v13816_v24 = vcombine.low %v1444_v6, %v1448_v8  ;;  %v13849_v6 = vcombine.high %v1476_v54, %v1480_v56 }
 0x323   :  { %10413 = vmatprep.subr.bf16.mxu0 %v12763_v25  ;;  %v12794_v25 = vcombine.low %v421_v9, %v425_v11  ;;  %v12803_v27 = vcombine.high %v429_v22, %v433_v23  ;;  %v1484_v9 = vld [vmem:[%s19911_s1 + $0x2c08] sm:$0xff] }
 0x324   :  { %v1488_v11 = vld [vmem:[%s19911_s1 + $0x2c28] sm:$0xff] }
 0x325   :  { %10250 = vmatpush1.bf16.msra.mxu1 %v13784_v33  ;;  %v437_v33 = vld [vmem:[%s19911_s1 + $0xb50] sm:$0xff] }
 0x326   :  { %10414 = vmatpush1.bf16.msra.mxu0 %v12762_v34  ;;  %10251 = vmatprep.subr.bf16.mxu1 %v13793_v35  ;;  %v441_v34 = vld [vmem:[%s19911_s1 + $0xb70] sm:$0xff]  ;;  %v13824_v35 = vcombine.low %v1452_v18, %v1456_v19  ;;  %v13857_v18 = vcombine.high %v1484_v9, %v1488_v11 }
 0x327   :  { %10415 = vmatprep.subr.bf16.mxu0 %v12771_v37  ;;  %v12802_v37 = vcombine.low %v429_v22, %v433_v23  ;;  %v12811_v40 = vcombine.high %v437_v33, %v441_v34  ;;  %v1492_v22 = vld [vmem:[%s19911_s1 + $0x2c48] sm:$0xff] }
 0x328   :  { %v1496_v23 = vld [vmem:[%s19911_s1 + $0x2c68] sm:$0xff] }
 0x329   :  { %10252 = vmatpush1.bf16.msra.mxu1 %v13792_v44  ;;  %v445_v44 = vld [vmem:[%s19911_s1 + $0xb90] sm:$0xff] }
 0x32a   :  { %10416 = vmatpush1.bf16.msra.mxu0 %v12770_v45  ;;  %10253 = vmatprep.subr.bf16.mxu1 %v13801_v46  ;;  %v449_v45 = vld [vmem:[%s19911_s1 + $0xbb0] sm:$0xff]  ;;  %v13832_v46 = vcombine.low %v1460_v29, %v1464_v32  ;;  %v13865_v29 = vcombine.high %v1492_v22, %v1496_v23 }
 0x32b   :  { %10417 = vmatprep.subr.bf16.mxu0 %v12779_v49  ;;  %v12810_v49 = vcombine.low %v437_v33, %v441_v34  ;;  %v12819_v52 = vcombine.high %v445_v44, %v449_v45  ;;  %v1500_v33 = vld [vmem:[%s19911_s1 + $0x2c88] sm:$0xff] }
 0x32c   :  { %v1504_v34 = vld [vmem:[%s19911_s1 + $0x2ca8] sm:$0xff] }
 0x32d   :  { %10254 = vmatpush1.bf16.msra.mxu1 %v13800_v59  ;;  %v453_v59 = vld [vmem:[%s19911_s1 + $0xbd0] sm:$0xff] }
 0x32e   :  { %10418 = vmatpush1.bf16.msra.mxu0 %v12778_v0  ;;  %10255 = vmatprep.subr.bf16.mxu1 %v13809_v2  ;;  %v457_v0 = vld [vmem:[%s19911_s1 + $0xbf0] sm:$0xff]  ;;  %v13840_v2 = vcombine.low %v1468_v42, %v1472_v43  ;;  %v13873_v42 = vcombine.high %v1500_v33, %v1504_v34  ;;  %v1613_v43 = vlaneseq }
 0x32f   :  { %10419 = vmatprep.subr.bf16.mxu0 %v12787_v5  ;;  %v12818_v5 = vcombine.low %v445_v44, %v449_v45  ;;  %v12827_v8 = vcombine.high %v453_v59, %v457_v0  ;;  %v1508_v45 = vld [vmem:[%s19911_s1 + $0x2cc8] sm:$0xff] }
 0x331   :  { %10256 = vmatpush1.bf16.msra.mxu1 %v13808_v13  ;;  %v461_v13 = vld [vmem:[%s19911_s1 + $0xc10] sm:$0xff] }
 0x332   :  { %10420 = vmatpush1.bf16.msra.mxu0 %v12786_v14  ;;  %10257 = vmatprep.subr.bf16.mxu1 %v13817_v15  ;;  %v465_v14 = vld [vmem:[%s19911_s1 + $0xc30] sm:$0xff]  ;;  %v13848_v15 = vcombine.low %v1476_v54, %v1480_v56 }
 0x333   :  { %10421 = vmatprep.subr.bf16.mxu0 %v12795_v17  ;;  %v12826_v17 = vcombine.low %v453_v59, %v457_v0  ;;  %v12835_v19 = vcombine.high %v461_v13, %v465_v14  ;;  %v17317_v59 = vshrl.u32 %v1613_v43, 7 }
 0x335   :  { %10258 = vmatpush1.bf16.msra.mxu1 %v13816_v24  ;;  %v469_v24 = vld [vmem:[%s19911_s1 + $0xc50] sm:$0xff] }
 0x336   :  { %10422 = vmatpush1.bf16.msra.mxu0 %v12794_v25  ;;  %10259 = vmatprep.subr.bf16.mxu1 %v13825_v26  ;;  %v473_v25 = vld [vmem:[%s19911_s1 + $0xc70] sm:$0xff]  ;;  %v13856_v26 = vcombine.low %v1484_v9, %v1488_v11 }
 0x337   :  { %10423 = vmatprep.subr.bf16.mxu0 %v12803_v27  ;;  %v12834_v27 = vcombine.low %v461_v13, %v465_v14  ;;  %v12843_v32 = vcombine.high %v469_v24, %v473_v25  ;;  %v1615_v14 = vsub.s32 0, %v17317_v59 }
 0x339   :  { %10260 = vmatpush1.bf16.msra.mxu1 %v13824_v35  ;;  %v477_v35 = vld [vmem:[%s19911_s1 + $0xc90] sm:$0xff] }
 0x33a   :  { %10424 = vmatpush1.bf16.msra.mxu0 %v12802_v37  ;;  %10261 = vmatprep.subr.bf16.mxu1 %v13833_v39  ;;  %v481_v37 = vld [vmem:[%s19911_s1 + $0xcb0] sm:$0xff]  ;;  %v13864_v39 = vcombine.low %v1492_v22, %v1496_v23  ;;  %v1619_v22 = vsub.s32 1, %v17317_v59 }
 0x33b   :  { %10425 = vmatprep.subr.bf16.mxu0 %v12811_v40  ;;  %v12842_v40 = vcombine.low %v469_v24, %v473_v25  ;;  %v12851_v44 = vcombine.high %v477_v35, %v481_v37  ;;  %v12850_v54 = vcombine.low %v477_v35, %v481_v37  ;;  %v501_v23 = vld [vmem:[%s19911_s1 + $0xd50] sm:$0xff] }
 0x33c   :  { %v505_v24 = vld [vmem:[%s19911_s1 + $0xd70] sm:$0xff] }
 0x33d   :  { %10262 = vmatpush1.bf16.msra.mxu1 %v13832_v46  ;;  %v1512_v46 = vld [vmem:[%s19911_s1 + $0x2ce8] sm:$0xff]  ;;  %v509_v37 = vld [vmem:[%s19911_s1 + $0xd90] sm:$0xff] }
 0x33e   :  { %10426 = vmatpush1.bf16.msra.mxu0 %v12810_v49  ;;  %10263 = vmatprep.subr.bf16.mxu1 %v13841_v51  ;;  %v485_v49 = vld [vmem:[%s19911_s1 + $0xcd0] sm:$0xff]  ;;  %v13881_v56 = vcombine.high %v1508_v45, %v1512_v46  ;;  %v13880_v9 = vcombine.low %v1508_v45, %v1512_v46  ;;  %v1540_v46 = vld [vmem:[%s19911_s1 + $0x2dc8] sm:$0xff] }
 0x33f   :  { %10427 = vmatprep.subr.bf16.mxu0 %v12819_v52  ;;  %v489_v51 = vld [vmem:[%s19911_s1 + $0xcf0] sm:$0xff]  ;;  %v13872_v52 = vcombine.low %v1500_v33, %v1504_v34  ;;  %v1532_v33 = vld [vmem:[%s19911_s1 + $0x2d88] sm:$0xff] }
 0x340   :  { %v12859_v0 = vcombine.high %v485_v49, %v489_v51  ;;  %v12858_v11 = vcombine.low %v485_v49, %v489_v51  ;;  %v1536_v34 = vld [vmem:[%s19911_s1 + $0x2da8] sm:$0xff] }
 0x341   :  { %10264 = vmatpush1.bf16.msra.mxu1 %v13840_v2  ;;  %v1516_v2 = vld [vmem:[%s19911_s1 + $0x2d08] sm:$0xff]  ;;  %v13905_v43 = vcombine.high %v1532_v33, %v1536_v34 }
 0x342   :  { %10428 = vmatpush1.bf16.msra.mxu0 %v12818_v5  ;;  %10265 = vmatprep.subr.bf16.mxu1 %v13849_v6  ;;  %v1520_v5 = vld [vmem:[%s19911_s1 + $0x2d28] sm:$0xff]  ;;  %v493_v6 = vld [vmem:[%s19911_s1 + $0xd10] sm:$0xff] }
 0x343   :  { %10429 = vmatprep.subr.bf16.mxu0 %v12827_v8  ;;  %v497_v8 = vld [vmem:[%s19911_s1 + $0xd30] sm:$0xff]  ;;  %v13889_v13 = vcombine.high %v1516_v2, %v1520_v5  ;;  %v13888_v25 = vcombine.low %v1516_v2, %v1520_v5  ;;  %v1544_v49 = vld [vmem:[%s19911_s1 + $0x2de8] sm:$0xff]  ;;  %v13904_v2 = vcombine.low %v1532_v33, %v1536_v34 }
 0x345   :  { %10266 = vmatpush1.bf16.msra.mxu1 %v13848_v15  ;;  %v12867_v15 = vcombine.high %v493_v6, %v497_v8 }
 0x346   :  { %10430 = vmatpush1.bf16.msra.mxu0 %v12826_v17  ;;  %10276 = vmatprep.subr.bf16.mxu1 %v13857_v18  ;;  %v1524_v17 = vld [vmem:[%s19911_s1 + $0x2d48] sm:$0xff] }
 0x347   :  { %10440 = vmatprep.subr.bf16.mxu0 %v12835_v19  ;;  %v1528_v18 = vld [vmem:[%s19911_s1 + $0x2d68] sm:$0xff]  ;;  %v1611_v19 = vld [vmem:[%s19913_s2] sm:$0xff] }
 0x348   :  { %10268 = vmatmul.mubr.bf16.vlgmr.msra.gmra.mrb[4].mxu1 %v16496_v4  ;;  %v1620_v35 = vrot.slane %v1611_v19, %v1619_v22 }
 0x349   :  { %10277 = vmatpush1.bf16.msra.mxu1 %v13856_v26  ;;  %10432 = vmatmul.mubr.bf16.vlgmr.msra.gmra.mrb[4].mxu0 %v14834_v21  ;;  %v12866_v26 = vcombine.low %v493_v6, %v497_v8  ;;  %v13913_v8 = vcombine.high %v1540_v46, %v1544_v49 }
 0x34a   :  { %10441 = vmatpush1.bf16.msra.mxu0 %v12834_v27  ;;  %10278 = vmatprep.subr.bf16.mxu1 %v13865_v29  ;;  %v13897_v27 = vcombine.high %v1524_v17, %v1528_v18  ;;  %v1616_v29 = vrot.slane %v1611_v19, %v1615_v14  ;;  %v14151_v51 = vadd.f32 %v15744_v63, %v1620_v35 }
 0x34b   :  { %10442 = vmatprep.subr.bf16.mxu0 %v12843_v32  ;;  %10308 = vmatprep.mubr.bf16.mxu1 %v16504_v12  ;;  %v12875_v32 = vcombine.high %v501_v23, %v505_v24  ;;  %v13912_v19 = vcombine.low %v1540_v46, %v1544_v49 }
 0x34c   :  { %10472 = vmatprep.mubr.bf16.mxu0 %v14854_v31 }
 0x34d   :  { %10279 = vmatpush1.bf16.msra.mxu1 %v13864_v39  ;;  %v513_v39 = vld [vmem:[%s19911_s1 + $0xdb0] sm:$0xff] }
 0x34e   :  { %10443 = vmatpush1.bf16.msra.mxu0 %v12842_v40  ;;  %10280 = vmatprep.subr.bf16.mxu1 %v13873_v42  ;;  %v13896_v40 = vcombine.low %v1524_v17, %v1528_v18  ;;  %v12874_v42 = vcombine.low %v501_v23, %v505_v24  ;;  %v12883_v45 = vcombine.high %v509_v37, %v513_v39  ;;  %v525_v17 = vld [vmem:[%s19911_s1 + $0xe10] sm:$0xff] }
 0x34f   :  { %10444 = vmatprep.subr.bf16.mxu0 %v12851_v44  ;;  %v14149_v44 = vadd.f32 %v15736_v58, %v1616_v29  ;;  %v521_v58 = vld [vmem:[%s19911_s1 + $0xdf0] sm:$0xff]  ;;  %v12882_v63 = vcombine.low %v509_v37, %v513_v39  ;;  %v1564_v39 = vld [vmem:[%s19911_s1 + $0x2e88] sm:$0xff] }
 0x350   :  { %v529_v18 = vld [vmem:[%s19911_s1 + $0xe30] sm:$0xff] }
 0x351   :  { %10281 = vmatpush1.bf16.msra.mxu1 %v13872_v52  ;;  %v533_v29 = vld [vmem:[%s19911_s1 + $0xe50] sm:$0xff]  ;;  %v12898_v34 = vcombine.low %v525_v17, %v529_v18 }
 0x352   :  { %10445 = vmatpush1.bf16.msra.mxu0 %v12850_v54  ;;  %10282 = vmatprep.subr.bf16.mxu1 %v13881_v56  ;;  %v517_v54 = vld [vmem:[%s19911_s1 + $0xdd0] sm:$0xff] }
 0x353   :  { %10446 = vmatprep.subr.bf16.mxu0 %v12859_v0  ;;  %v12890_v23 = vcombine.low %v517_v54, %v521_v58 }
 0x355   :  { %10283 = vmatpush1.bf16.msra.mxu1 %v13880_v9 }
 0x356   :  { %10447 = vmatpush1.bf16.msra.mxu0 %v12858_v11  ;;  %10284 = vmatprep.subr.bf16.mxu1 %v13889_v13  ;;  %v12891_v11 = vcombine.high %v517_v54, %v521_v58  ;;  %v1548_v13 = vld [vmem:[%s19911_s1 + $0x2e08] sm:$0xff]  ;;  %v549_v54 = vld [vmem:[%s19911_s1 + $0xed0] sm:$0xff] }
 0x357   :  { %10448 = vmatprep.subr.bf16.mxu0 %v12867_v15  ;;  %v1552_v15 = vld [vmem:[%s19911_s1 + $0x2e28] sm:$0xff]  ;;  %v553_v58 = vld [vmem:[%s19911_s1 + $0xef0] sm:$0xff] }
 0x358   :  { %v13921_v24 = vcombine.high %v1548_v13, %v1552_v15  ;;  %v13920_v33 = vcombine.low %v1548_v13, %v1552_v15  ;;  %v561_v13 = vld [vmem:[%s19911_s1 + $0xf30] sm:$0xff] }
 0x359   :  { %10285 = vmatpush1.bf16.msra.mxu1 %v13888_v25  ;;  %v12899_v25 = vcombine.high %v525_v17, %v529_v18  ;;  %v12922_v17 = vcombine.low %v549_v54, %v553_v58 }
 0x35a   :  { %10449 = vmatpush1.bf16.msra.mxu0 %v12866_v26  ;;  %10286 = vmatprep.subr.bf16.mxu1 %v13897_v27  ;;  %v1556_v26 = vld [vmem:[%s19911_s1 + $0x2e48] sm:$0xff] }
 0x35b   :  { %10450 = vmatprep.subr.bf16.mxu0 %v12875_v32  ;;  %v1560_v27 = vld [vmem:[%s19911_s1 + $0x2e68] sm:$0xff]  ;;  %v537_v32 = vld [vmem:[%s19911_s1 + $0xe70] sm:$0xff] }
 0x35c   :  { %v9818_v52 = vpop.f32.mrb[0].mxu0  ;;  %v13929_v35 = vcombine.high %v1556_v26, %v1560_v27  ;;  %v12907_v37 = vcombine.high %v533_v29, %v537_v32 }
 0x35d   :  { %v17378_v56 = vadd.f32 %v14149_v44, %v9818_v52  ;;  %v9820_v0 = vpop.f32.mrb[1].mxu0  ;;  %10287 = vmatpush1.bf16.msra.mxu1 %v13896_v40  ;;  %v1568_v40 = vld [vmem:[%s19911_s1 + $0x2ea8] sm:$0xff]  ;;  %v13928_v44 = vcombine.low %v1556_v26, %v1560_v27  ;;  %v569_v26 = vld [vmem:[%s19911_s1 + $0xf70] sm:$0xff] }
 0x35e   :  { %v17380_v5 = vadd.f32 %v14151_v51, %v9820_v0  ;;  %v9822_v6 = vpop.f32.mrb[2].mxu0  ;;  %10451 = vmatpush1.bf16.msra.mxu0 %v12874_v42  ;;  %10288 = vmatprep.subr.bf16.mxu1 %v13905_v43  ;;  %v541_v42 = vld [vmem:[%s19911_s1 + $0xe90] sm:$0xff]  ;;  %v13937_v46 = vcombine.high %v1564_v39, %v1568_v40  ;;  %v1572_v51 = vld [vmem:[%s19911_s1 + $0x2ec8] sm:$0xff]  ;;  %v13936_v0 = vcombine.low %v1564_v39, %v1568_v40 }
 0x35f   :  { %v9823_v9 = vpop.f32.mrb[3].mxu0  ;;  %10452 = vmatprep.subr.bf16.mxu0 %v12883_v45  ;;  %v545_v43 = vld [vmem:[%s19911_s1 + $0xeb0] sm:$0xff]  ;;  %v12906_v45 = vcombine.low %v533_v29, %v537_v32  ;;  %v1576_v52 = vld [vmem:[%s19911_s1 + $0x2ee8] sm:$0xff] }
 0x360   :  { %v12915_v49 = vcombine.high %v541_v42, %v545_v43  ;;  %v13945_v6 = vcombine.high %v1572_v51, %v1576_v52  ;;  %v1584_v9 = vld [vmem:[%s19911_s1 + $0x2f28] sm:$0xff]  ;;  %v13944_v15 = vcombine.low %v1572_v51, %v1576_v52  ;;  %v577_v39 = vld [vmem:[%s19911_s1 + $0xfb0] sm:$0xff] }
 0x361   :  { %10289 = vmatpush1.bf16.msra.mxu1 %v13904_v2  ;;  %v12914_v2 = vcombine.low %v541_v42, %v545_v43  ;;  %v585_v51 = vld [vmem:[%s19911_s1 + $0xff0] sm:$0xff] }
 0x362   :  { %10453 = vmatpush1.bf16.msra.mxu0 %v12882_v63  ;;  %10290 = vmatprep.subr.bf16.mxu1 %v13913_v8  ;;  %v12923_v63 = vcombine.high %v549_v54, %v553_v58  ;;  %v1580_v8 = vld [vmem:[%s19911_s1 + $0x2f08] sm:$0xff] }
 0x363   :  { %10454 = vmatprep.subr.bf16.mxu0 %v12891_v11  ;;  %v557_v11 = vld [vmem:[%s19911_s1 + $0xf10] sm:$0xff]  ;;  %v13953_v18 = vcombine.high %v1580_v8, %v1584_v9  ;;  %v13952_v27 = vcombine.low %v1580_v8, %v1584_v9 }
 0x364   :  { %v12930_v29 = vcombine.low %v557_v11, %v561_v13  ;;  %v593_v8 = vld [vmem:[%s19911_s1 + $0x1030] sm:$0xff] }
 0x365   :  { %10291 = vmatpush1.bf16.msra.mxu1 %v13912_v19  ;;  %v12931_v19 = vcombine.high %v557_v11, %v561_v13 }
 0x366   :  { %10455 = vmatpush1.bf16.msra.mxu0 %v12890_v23  ;;  %10292 = vmatprep.subr.bf16.mxu1 %v13921_v24  ;;  %v1588_v23 = vld [vmem:[%s19911_s1 + $0x2f48] sm:$0xff] }
 0x367   :  { %10456 = vmatprep.subr.bf16.mxu0 %v12899_v25  ;;  %v1592_v24 = vld [vmem:[%s19911_s1 + $0x2f68] sm:$0xff]  ;;  %v565_v25 = vld [vmem:[%s19911_s1 + $0xf50] sm:$0xff] }
 0x368   :  { %v13961_v32 = vcombine.high %v1588_v23, %v1592_v24  ;;  %v13960_v40 = vcombine.low %v1588_v23, %v1592_v24  ;;  %v12938_v42 = vcombine.low %v565_v25, %v569_v26  ;;  %v601_v23 = vld [vmem:[%s19911_s1 + $0x1070] sm:$0xff] }
 0x369   :  { %10293 = vmatpush1.bf16.msra.mxu1 %v13920_v33  ;;  %v12939_v33 = vcombine.high %v565_v25, %v569_v26 }
 0x36a   :  { %10457 = vmatpush1.bf16.msra.mxu0 %v12898_v34  ;;  %10294 = vmatprep.subr.bf16.mxu1 %v13929_v35  ;;  %v1596_v34 = vld [vmem:[%s19911_s1 + $0x2f88] sm:$0xff] }
 0x36b   :  { %10458 = vmatprep.subr.bf16.mxu0 %v12907_v37  ;;  %v1600_v35 = vld [vmem:[%s19911_s1 + $0x2fa8] sm:$0xff]  ;;  %v573_v37 = vld [vmem:[%s19911_s1 + $0xf90] sm:$0xff] }
 0x36c   :  { %v13969_v43 = vcombine.high %v1596_v34, %v1600_v35  ;;  %v13968_v52 = vcombine.low %v1596_v34, %v1600_v35  ;;  %v12946_v54 = vcombine.low %v573_v37, %v577_v39  ;;  %v609_v34 = vld [vmem:[%s19911_s1 + $0x10b0] sm:$0xff] }
 0x36d   :  { %10295 = vmatpush1.bf16.msra.mxu1 %v13928_v44  ;;  %v12947_v44 = vcombine.high %v573_v37, %v577_v39 }
 0x36e   :  { %10459 = vmatpush1.bf16.msra.mxu0 %v12906_v45  ;;  %10296 = vmatprep.subr.bf16.mxu1 %v13937_v46  ;;  %v1604_v45 = vld [vmem:[%s19911_s1 + $0x2fc8] sm:$0xff] }
 0x36f   :  { %10460 = vmatprep.subr.bf16.mxu0 %v12915_v49  ;;  %v1608_v46 = vld [vmem:[%s19911_s1 + $0x2fe8] sm:$0xff]  ;;  %v581_v49 = vld [vmem:[%s19911_s1 + $0xfd0] sm:$0xff] }
 0x370   :  { %v13977_v58 = vcombine.high %v1604_v45, %v1608_v46  ;;  %v13976_v9 = vcombine.low %v1604_v45, %v1608_v46  ;;  %v12954_v11 = vcombine.low %v581_v49, %v585_v51  ;;  %v617_v45 = vld [vmem:[%s19911_s1 + $0x10f0] sm:$0xff] }
 0x371   :  { %10297 = vmatpush1.bf16.msra.mxu1 %v13936_v0  ;;  %v12955_v0 = vcombine.high %v581_v49, %v585_v51 }
 0x372   :  { %10461 = vmatpush1.bf16.msra.mxu0 %v12914_v2  ;;  %10298 = vmatprep.subr.bf16.mxu1 %v13945_v6  ;;  %v78_v2 = vld [vmem:[%s19911_s1 + $0x18] sm:$0xff] }
 0x373   :  { %10462 = vmatprep.subr.bf16.mxu0 %v12923_v63  ;;  %v82_v6 = vld [vmem:[%s19911_s1 + $0x38] sm:$0xff]  ;;  %v589_v63 = vld [vmem:[%s19911_s1 + $0x1010] sm:$0xff] }
 0x374   :  { %v12453_v13 = vcombine.high %v78_v2, %v82_v6  ;;  %v12452_v24 = vcombine.low %v78_v2, %v82_v6  ;;  %v12962_v25 = vcombine.low %v589_v63, %v593_v8 }
 0x375   :  { %10299 = vmatpush1.bf16.msra.mxu1 %v13944_v15  ;;  %v12963_v15 = vcombine.high %v589_v63, %v593_v8 }
 0x376   :  { %10463 = vmatpush1.bf16.msra.mxu0 %v12922_v17  ;;  %10300 = vmatprep.subr.bf16.mxu1 %v13953_v18  ;;  %v86_v17 = vld [vmem:[%s19911_s1 + $0x58] sm:$0xff] }
 0x377   :  { %10464 = vmatprep.subr.bf16.mxu0 %v12931_v19  ;;  %v90_v18 = vld [vmem:[%s19911_s1 + $0x78] sm:$0xff]  ;;  %v597_v19 = vld [vmem:[%s19911_s1 + $0x1050] sm:$0xff] }
 0x378   :  { %v12461_v26 = vcombine.high %v86_v17, %v90_v18  ;;  %v12460_v35 = vcombine.low %v86_v17, %v90_v18  ;;  %v12970_v37 = vcombine.low %v597_v19, %v601_v23 }
 0x379   :  { %10301 = vmatpush1.bf16.msra.mxu1 %v13952_v27  ;;  %v12971_v27 = vcombine.high %v597_v19, %v601_v23 }
 0x37a   :  { %10465 = vmatpush1.bf16.msra.mxu0 %v12930_v29  ;;  %10302 = vmatprep.subr.bf16.mxu1 %v13961_v32  ;;  %v94_v29 = vld [vmem:[%s19911_s1 + $0x98] sm:$0xff] }
 0x37b   :  { %10466 = vmatprep.subr.bf16.mxu0 %v12939_v33  ;;  %v98_v32 = vld [vmem:[%s19911_s1 + $0xb8] sm:$0xff]  ;;  %v605_v33 = vld [vmem:[%s19911_s1 + $0x1090] sm:$0xff] }
 0x37c   :  { %v12469_v39 = vcombine.high %v94_v29, %v98_v32  ;;  %v12468_v46 = vcombine.low %v94_v29, %v98_v32  ;;  %v12978_v49 = vcombine.low %v605_v33, %v609_v34 }
 0x37d   :  { %10303 = vmatpush1.bf16.msra.mxu1 %v13960_v40  ;;  %v12979_v40 = vcombine.high %v605_v33, %v609_v34 }
 0x37e   :  { %10467 = vmatpush1.bf16.msra.mxu0 %v12938_v42  ;;  %10304 = vmatprep.subr.bf16.mxu1 %v13969_v43  ;;  %v102_v42 = vld [vmem:[%s19911_s1 + $0xd8] sm:$0xff] }
 0x37f   :  { %10468 = vmatprep.subr.bf16.mxu0 %v12947_v44  ;;  %v106_v43 = vld [vmem:[%s19911_s1 + $0xf8] sm:$0xff]  ;;  %v613_v44 = vld [vmem:[%s19911_s1 + $0x10d0] sm:$0xff] }
 0x380   :  { %v12477_v51 = vcombine.high %v102_v42, %v106_v43  ;;  %v12476_v2 = vcombine.low %v102_v42, %v106_v43  ;;  %v12986_v6 = vcombine.low %v613_v44, %v617_v45 }
 0x381   :  { %10305 = vmatpush1.bf16.msra.mxu1 %v13968_v52  ;;  %v12987_v52 = vcombine.high %v613_v44, %v617_v45 }
 0x382   :  { %10469 = vmatpush1.bf16.msra.mxu0 %v12946_v54  ;;  %10306 = vmatprep.subr.bf16.mxu1 %v13977_v58  ;;  %v110_v54 = vld [vmem:[%s19911_s1 + $0x118] sm:$0xff] }
 0x383   :  { %10470 = vmatprep.subr.bf16.mxu0 %v12955_v0  ;;  %v114_v58 = vld [vmem:[%s19911_s1 + $0x138] sm:$0xff]  ;;  %v625_v0 = vld [vmem:[%s19911_s1 + $0x1130] sm:$0xff] }
 0x384   :  { %v12485_v63 = vcombine.high %v110_v54, %v114_v58  ;;  %v12484_v17 = vcombine.low %v110_v54, %v114_v58 }
 0x385   :  { %10307 = vmatpush1.bf16.msra.mxu1 %v13976_v9  ;;  %v118_v9 = vld [vmem:[%s19911_s1 + $0x158] sm:$0xff] }
 0x386   :  { %10471 = vmatpush1.bf16.msra.mxu0 %v12954_v11  ;;  %10809 = vmatprep.subr.bf16.mxu1 %v12453_v13  ;;  %v122_v11 = vld [vmem:[%s19911_s1 + $0x178] sm:$0xff]  ;;  %v629_v13 = vld [vmem:[%s19911_s1 + $0x1150] sm:$0xff] }
 0x387   :  { %10481 = vmatprep.subr.bf16.mxu0 %v12963_v15  ;;  %v633_v15 = vld [vmem:[%s19911_s1 + $0x1170] sm:$0xff]  ;;  %v12493_v19 = vcombine.high %v118_v9, %v122_v11  ;;  %v12492_v29 = vcombine.low %v118_v9, %v122_v11 }
 0x388   :  { %10309 = vmatmul.mubr.bf16.vlgmr.msra.gmra.mrb[4].mxu1 %v16699_v20  ;;  %v13003_v23 = vcombine.high %v629_v13, %v633_v15  ;;  %v13002_v32 = vcombine.low %v629_v13, %v633_v15 }
 0x389   :  { %10473 = vmatmul.mubr.bf16.vlgmr.msra.gmra.mrb[4].mxu0 %v15050_v41  ;;  %10810 = vmatpush1.bf16.msra.mxu1 %v12452_v24  ;;  %v126_v24 = vld [vmem:[%s19911_s1 + $0x198] sm:$0xff] }
 0x38a   :  { %10482 = vmatpush1.bf16.msra.mxu0 %v12962_v25  ;;  %10811 = vmatprep.subr.bf16.mxu1 %v12461_v26  ;;  %v130_v25 = vld [vmem:[%s19911_s1 + $0x1b8] sm:$0xff]  ;;  %v637_v26 = vld [vmem:[%s19911_s1 + $0x1190] sm:$0xff] }
 0x38b   :  { %10483 = vmatprep.subr.bf16.mxu0 %v12971_v27  ;;  %10513 = vmatprep.mubr.bf16.mxu0 %v15058_v47  ;;  %v641_v27 = vld [vmem:[%s19911_s1 + $0x11b0] sm:$0xff]  ;;  %v12501_v33 = vcombine.high %v126_v24, %v130_v25  ;;  %v12500_v42 = vcombine.low %v126_v24, %v130_v25 }
 0x38c   :  { %10841 = vmatprep.mubr.bf16.mxu1 %v14688_v57  ;;  %v621_v57 = vld [vmem:[%s19911_s1 + $0x1110] sm:$0xff]  ;;  %v13011_v34 = vcombine.high %v637_v26, %v641_v27  ;;  %v13010_v43 = vcombine.low %v637_v26, %v641_v27 }
 0x38d   :  { %10812 = vmatpush1.bf16.msra.mxu1 %v12460_v35  ;;  %v12995_v8 = vcombine.high %v621_v57, %v625_v0  ;;  %v12994_v18 = vcombine.low %v621_v57, %v625_v0  ;;  %v134_v35 = vld [vmem:[%s19911_s1 + $0x1d8] sm:$0xff] }
 0x38e   :  { %10484 = vmatpush1.bf16.msra.mxu0 %v12970_v37  ;;  %10813 = vmatprep.subr.bf16.mxu1 %v12469_v39  ;;  %v138_v37 = vld [vmem:[%s19911_s1 + $0x1f8] sm:$0xff]  ;;  %v645_v39 = vld [vmem:[%s19911_s1 + $0x11d0] sm:$0xff] }
 0x38f   :  { %10485 = vmatprep.subr.bf16.mxu0 %v12979_v40  ;;  %v649_v40 = vld [vmem:[%s19911_s1 + $0x11f0] sm:$0xff]  ;;  %v12509_v44 = vcombine.high %v134_v35, %v138_v37  ;;  %v12508_v54 = vcombine.low %v134_v35, %v138_v37 }
 0x390   :  { %v13019_v45 = vcombine.high %v645_v39, %v649_v40  ;;  %v13018_v58 = vcombine.low %v645_v39, %v649_v40 }
 0x391   :  { %10814 = vmatpush1.bf16.msra.mxu1 %v12468_v46  ;;  %v142_v46 = vld [vmem:[%s19911_s1 + $0x218] sm:$0xff] }
 0x392   :  { %10486 = vmatpush1.bf16.msra.mxu0 %v12978_v49  ;;  %10815 = vmatprep.subr.bf16.mxu1 %v12477_v51  ;;  %v146_v49 = vld [vmem:[%s19911_s1 + $0x238] sm:$0xff]  ;;  %v653_v51 = vld [vmem:[%s19911_s1 + $0x1210] sm:$0xff] }
 0x393   :  { %10487 = vmatprep.subr.bf16.mxu0 %v12987_v52  ;;  %v657_v52 = vld [vmem:[%s19911_s1 + $0x1230] sm:$0xff]  ;;  %v12517_v57 = vcombine.high %v142_v46, %v146_v49  ;;  %v12516_v9 = vcombine.low %v142_v46, %v146_v49 }
 0x394   :  { %v13027_v0 = vcombine.high %v653_v51, %v657_v52  ;;  %v13026_v11 = vcombine.low %v653_v51, %v657_v52 }
 0x395   :  { %10816 = vmatpush1.bf16.msra.mxu1 %v12476_v2  ;;  %v150_v2 = vld [vmem:[%s19911_s1 + $0x258] sm:$0xff] }
 0x396   :  { %10488 = vmatpush1.bf16.msra.mxu0 %v12986_v6  ;;  %10817 = vmatprep.subr.bf16.mxu1 %v12485_v63  ;;  %v154_v6 = vld [vmem:[%s19911_s1 + $0x278] sm:$0xff]  ;;  %v661_v63 = vld [vmem:[%s19911_s1 + $0x1250] sm:$0xff] }
 0x397   :  { %10489 = vmatprep.subr.bf16.mxu0 %v12995_v8  ;;  %v665_v8 = vld [vmem:[%s19911_s1 + $0x1270] sm:$0xff]  ;;  %v12525_v13 = vcombine.high %v150_v2, %v154_v6  ;;  %v12524_v24 = vcombine.low %v150_v2, %v154_v6 }
 0x398   :  { %v13035_v15 = vcombine.high %v661_v63, %v665_v8  ;;  %v13034_v25 = vcombine.low %v661_v63, %v665_v8 }
 0x399   :  { %10818 = vmatpush1.bf16.msra.mxu1 %v12484_v17  ;;  %v158_v17 = vld [vmem:[%s19911_s1 + $0x298] sm:$0xff] }
 0x39a   :  { %10490 = vmatpush1.bf16.msra.mxu0 %v12994_v18  ;;  %10819 = vmatprep.subr.bf16.mxu1 %v12493_v19  ;;  %v162_v18 = vld [vmem:[%s19911_s1 + $0x2b8] sm:$0xff]  ;;  %v669_v19 = vld [vmem:[%s19911_s1 + $0x1290] sm:$0xff] }
 0x39b   :  { %10491 = vmatprep.subr.bf16.mxu0 %v13003_v23  ;;  %v673_v23 = vld [vmem:[%s19911_s1 + $0x12b0] sm:$0xff]  ;;  %v12533_v26 = vcombine.high %v158_v17, %v162_v18  ;;  %v12532_v35 = vcombine.low %v158_v17, %v162_v18 }
 0x39c   :  { %v13043_v27 = vcombine.high %v669_v19, %v673_v23  ;;  %v13042_v37 = vcombine.low %v669_v19, %v673_v23 }
 0x39d   :  { %10820 = vmatpush1.bf16.msra.mxu1 %v12492_v29  ;;  %v166_v29 = vld [vmem:[%s19911_s1 + $0x2d8] sm:$0xff] }
 0x39e   :  { %10492 = vmatpush1.bf16.msra.mxu0 %v13002_v32  ;;  %10821 = vmatprep.subr.bf16.mxu1 %v12501_v33  ;;  %v170_v32 = vld [vmem:[%s19911_s1 + $0x2f8] sm:$0xff]  ;;  %v677_v33 = vld [vmem:[%s19911_s1 + $0x12d0] sm:$0xff] }
 0x39f   :  { %10493 = vmatprep.subr.bf16.mxu0 %v13011_v34  ;;  %v681_v34 = vld [vmem:[%s19911_s1 + $0x12f0] sm:$0xff]  ;;  %v12541_v39 = vcombine.high %v166_v29, %v170_v32  ;;  %v12540_v46 = vcombine.low %v166_v29, %v170_v32 }
 0x3a0   :  { %v13051_v40 = vcombine.high %v677_v33, %v681_v34  ;;  %v13050_v49 = vcombine.low %v677_v33, %v681_v34 }
 0x3a1   :  { %10822 = vmatpush1.bf16.msra.mxu1 %v12500_v42  ;;  %v174_v42 = vld [vmem:[%s19911_s1 + $0x318] sm:$0xff] }
 0x3a2   :  { %10494 = vmatpush1.bf16.msra.mxu0 %v13010_v43  ;;  %10823 = vmatprep.subr.bf16.mxu1 %v12509_v44  ;;  %v178_v43 = vld [vmem:[%s19911_s1 + $0x338] sm:$0xff]  ;;  %v685_v44 = vld [vmem:[%s19911_s1 + $0x1310] sm:$0xff] }
 0x3a3   :  { %10495 = vmatprep.subr.bf16.mxu0 %v13019_v45  ;;  %v689_v45 = vld [vmem:[%s19911_s1 + $0x1330] sm:$0xff]  ;;  %v12549_v51 = vcombine.high %v174_v42, %v178_v43  ;;  %v12548_v2 = vcombine.low %v174_v42, %v178_v43 }
 0x3a4   :  { %v13059_v52 = vcombine.high %v685_v44, %v689_v45  ;;  %v13058_v6 = vcombine.low %v685_v44, %v689_v45 }
 0x3a5   :  { %10824 = vmatpush1.bf16.msra.mxu1 %v12508_v54  ;;  %v182_v54 = vld [vmem:[%s19911_s1 + $0x358] sm:$0xff] }
 0x3a6   :  { %10496 = vmatpush1.bf16.msra.mxu0 %v13018_v58  ;;  %10825 = vmatprep.subr.bf16.mxu1 %v12517_v57  ;;  %v186_v58 = vld [vmem:[%s19911_s1 + $0x378] sm:$0xff]  ;;  %v693_v57 = vld [vmem:[%s19911_s1 + $0x1350] sm:$0xff] }
 0x3a7   :  { %10497 = vmatprep.subr.bf16.mxu0 %v13027_v0  ;;  %v697_v0 = vld [vmem:[%s19911_s1 + $0x1370] sm:$0xff]  ;;  %v12557_v63 = vcombine.high %v182_v54, %v186_v58  ;;  %v12556_v17 = vcombine.low %v182_v54, %v186_v58 }
 0x3a8   :  { %v13067_v8 = vcombine.high %v693_v57, %v697_v0  ;;  %v13066_v18 = vcombine.low %v693_v57, %v697_v0 }
 0x3a9   :  { %10826 = vmatpush1.bf16.msra.mxu1 %v12516_v9  ;;  %v190_v9 = vld [vmem:[%s19911_s1 + $0x398] sm:$0xff] }
 0x3aa   :  { %10498 = vmatpush1.bf16.msra.mxu0 %v13026_v11  ;;  %10827 = vmatprep.subr.bf16.mxu1 %v12525_v13  ;;  %v194_v11 = vld [vmem:[%s19911_s1 + $0x3b8] sm:$0xff]  ;;  %v701_v13 = vld [vmem:[%s19911_s1 + $0x1390] sm:$0xff] }
 0x3ab   :  { %10499 = vmatprep.subr.bf16.mxu0 %v13035_v15  ;;  %v705_v15 = vld [vmem:[%s19911_s1 + $0x13b0] sm:$0xff]  ;;  %v12565_v19 = vcombine.high %v190_v9, %v194_v11  ;;  %v12564_v29 = vcombine.low %v190_v9, %v194_v11 }
 0x3ac   :  { %v13075_v23 = vcombine.high %v701_v13, %v705_v15  ;;  %v13074_v32 = vcombine.low %v701_v13, %v705_v15 }
 0x3ad   :  { %10828 = vmatpush1.bf16.msra.mxu1 %v12524_v24  ;;  %v198_v24 = vld [vmem:[%s19911_s1 + $0x3d8] sm:$0xff] }
 0x3ae   :  { %10500 = vmatpush1.bf16.msra.mxu0 %v13034_v25  ;;  %10829 = vmatprep.subr.bf16.mxu1 %v12533_v26  ;;  %v202_v25 = vld [vmem:[%s19911_s1 + $0x3f8] sm:$0xff]  ;;  %v709_v26 = vld [vmem:[%s19911_s1 + $0x13d0] sm:$0xff] }
 0x3af   :  { %10501 = vmatprep.subr.bf16.mxu0 %v13043_v27  ;;  %v713_v27 = vld [vmem:[%s19911_s1 + $0x13f0] sm:$0xff]  ;;  %v12573_v33 = vcombine.high %v198_v24, %v202_v25  ;;  %v12572_v42 = vcombine.low %v198_v24, %v202_v25 }
 0x3b0   :  { %v13083_v34 = vcombine.high %v709_v26, %v713_v27  ;;  %v13082_v43 = vcombine.low %v709_v26, %v713_v27  ;;  %v238_v27 = vld [vmem:[%s19911_s1 + $0x518] sm:$0xff] }
 0x3b1   :  { %10830 = vmatpush1.bf16.msra.mxu1 %v12532_v35  ;;  %v206_v35 = vld [vmem:[%s19911_s1 + $0x418] sm:$0xff] }
 0x3b2   :  { %10502 = vmatpush1.bf16.msra.mxu0 %v13042_v37  ;;  %10831 = vmatprep.subr.bf16.mxu1 %v12541_v39  ;;  %v210_v37 = vld [vmem:[%s19911_s1 + $0x438] sm:$0xff]  ;;  %v717_v39 = vld [vmem:[%s19911_s1 + $0x1410] sm:$0xff] }
 0x3b3   :  { %10503 = vmatprep.subr.bf16.mxu0 %v13051_v40  ;;  %v721_v40 = vld [vmem:[%s19911_s1 + $0x1430] sm:$0xff]  ;;  %v12581_v44 = vcombine.high %v206_v35, %v210_v37  ;;  %v12580_v54 = vcombine.low %v206_v35, %v210_v37 }
 0x3b4   :  { %v13091_v45 = vcombine.high %v717_v39, %v721_v40  ;;  %v13090_v58 = vcombine.low %v717_v39, %v721_v40  ;;  %v246_v39 = vld [vmem:[%s19911_s1 + $0x558] sm:$0xff] }
 0x3b5   :  { %10832 = vmatpush1.bf16.msra.mxu1 %v12540_v46  ;;  %v214_v46 = vld [vmem:[%s19911_s1 + $0x458] sm:$0xff] }
 0x3b6   :  { %10504 = vmatpush1.bf16.msra.mxu0 %v13050_v49  ;;  %10833 = vmatprep.subr.bf16.mxu1 %v12549_v51  ;;  %v218_v49 = vld [vmem:[%s19911_s1 + $0x478] sm:$0xff]  ;;  %v725_v51 = vld [vmem:[%s19911_s1 + $0x1450] sm:$0xff] }
 0x3b7   :  { %10505 = vmatprep.subr.bf16.mxu0 %v13059_v52  ;;  %v729_v52 = vld [vmem:[%s19911_s1 + $0x1470] sm:$0xff]  ;;  %v12589_v57 = vcombine.high %v214_v46, %v218_v49  ;;  %v12588_v9 = vcombine.low %v214_v46, %v218_v49  ;;  %v250_v40 = vld [vmem:[%s19911_s1 + $0x578] sm:$0xff] }
 0x3b8   :  { %v13099_v0 = vcombine.high %v725_v51, %v729_v52  ;;  %v13098_v11 = vcombine.low %v725_v51, %v729_v52  ;;  %v12621_v46 = vcombine.high %v246_v39, %v250_v40  ;;  %v254_v51 = vld [vmem:[%s19911_s1 + $0x598] sm:$0xff] }
 0x3b9   :  { %10834 = vmatpush1.bf16.msra.mxu1 %v12548_v2  ;;  %v222_v2 = vld [vmem:[%s19911_s1 + $0x498] sm:$0xff] }
 0x3ba   :  { %10506 = vmatpush1.bf16.msra.mxu0 %v13058_v6  ;;  %10835 = vmatprep.subr.bf16.mxu1 %v12557_v63  ;;  %v226_v6 = vld [vmem:[%s19911_s1 + $0x4b8] sm:$0xff]  ;;  %v733_v63 = vld [vmem:[%s19911_s1 + $0x1490] sm:$0xff] }
 0x3bb   :  { %10507 = vmatprep.subr.bf16.mxu0 %v13067_v8  ;;  %v737_v8 = vld [vmem:[%s19911_s1 + $0x14b0] sm:$0xff]  ;;  %v12597_v13 = vcombine.high %v222_v2, %v226_v6  ;;  %v258_v52 = vld [vmem:[%s19911_s1 + $0x5b8] sm:$0xff] }
 0x3bc   :  { %v13107_v15 = vcombine.high %v733_v63, %v737_v8  ;;  %v13106_v24 = vcombine.low %v733_v63, %v737_v8  ;;  %v262_v63 = vld [vmem:[%s19911_s1 + $0x5d8] sm:$0xff] }
 0x3bd   :  { %10836 = vmatpush1.bf16.msra.mxu1 %v12556_v17  ;;  %v234_v17 = vld [vmem:[%s19911_s1 + $0x4f8] sm:$0xff] }
 0x3be   :  { %10508 = vmatpush1.bf16.msra.mxu0 %v13066_v18  ;;  %10837 = vmatprep.subr.bf16.mxu1 %v12565_v19  ;;  %v741_v18 = vld [vmem:[%s19911_s1 + $0x14d0] sm:$0xff]  ;;  %v266_v8 = vld [vmem:[%s19911_s1 + $0x5f8] sm:$0xff] }
 0x3bf   :  { %10509 = vmatprep.subr.bf16.mxu0 %v13075_v23  ;;  %v745_v19 = vld [vmem:[%s19911_s1 + $0x14f0] sm:$0xff]  ;;  %v12596_v23 = vcombine.low %v222_v2, %v226_v6  ;;  %v12629_v2 = vcombine.high %v254_v51, %v258_v52 }
 0x3c0   :  { %v13115_v26 = vcombine.high %v741_v18, %v745_v19 }
 0x3c1   :  { %10838 = vmatpush1.bf16.msra.mxu1 %v12564_v29  ;;  %v242_v29 = vld [vmem:[%s19911_s1 + $0x538] sm:$0xff] }
 0x3c2   :  { %10510 = vmatpush1.bf16.msra.mxu0 %v13074_v32  ;;  %10839 = vmatprep.subr.bf16.mxu1 %v12573_v33  ;;  %v753_v32 = vld [vmem:[%s19911_s1 + $0x1530] sm:$0xff]  ;;  %v12613_v35 = vcombine.high %v238_v27, %v242_v29 }
 0x3c3   :  { %10511 = vmatprep.subr.bf16.mxu0 %v13083_v34  ;;  %v13114_v34 = vcombine.low %v741_v18, %v745_v19  ;;  %v270_v18 = vld [vmem:[%s19911_s1 + $0x618] sm:$0xff] }
 0x3c4   :  { %v274_v19 = vld [vmem:[%s19911_s1 + $0x638] sm:$0xff] }
 0x3c5   :  { %10840 = vmatpush1.bf16.msra.mxu1 %v12572_v42  ;;  %v757_v42 = vld [vmem:[%s19911_s1 + $0x1550] sm:$0xff] }
 0x3c6   :  { %10512 = vmatpush1.bf16.msra.mxu0 %v13082_v43  ;;  %10850 = vmatprep.subr.bf16.mxu1 %v12581_v44  ;;  %v761_v43 = vld [vmem:[%s19911_s1 + $0x1570] sm:$0xff]  ;;  %v12612_v44 = vcombine.low %v238_v27, %v242_v29  ;;  %v12645_v27 = vcombine.high %v270_v18, %v274_v19 }
 0x3c7   :  { %10522 = vmatprep.subr.bf16.mxu0 %v13091_v45  ;;  %v13131_v49 = vcombine.high %v757_v42, %v761_v43 }
 0x3c8   :  { %10842 = vmatmul.mubr.bf16.vlgmr.msra.gmra.mrb[8].mxu1 %v14823_v16  ;;  %v230_v16 = vld [vmem:[%s19911_s1 + $0x4d8] sm:$0xff] }
 0x3c9   :  { %10514 = vmatmul.mubr.bf16.vlgmr.msra.gmra.mrb[4].mxu0 %v15256_v1  ;;  %10851 = vmatpush1.bf16.msra.mxu1 %v12580_v54  ;;  %v12605_v25 = vcombine.high %v230_v16, %v234_v17  ;;  %v12604_v33 = vcombine.low %v230_v16, %v234_v17  ;;  %v765_v54 = vld [vmem:[%s19911_s1 + $0x1590] sm:$0xff]  ;;  %v12637_v16 = vcombine.high %v262_v63, %v266_v8 }
 0x3ca   :  { %10523 = vmatpush1.bf16.msra.mxu0 %v13090_v58  ;;  %10852 = vmatprep.subr.bf16.mxu1 %v12589_v57  ;;  %v769_v58 = vld [vmem:[%s19911_s1 + $0x15b0] sm:$0xff]  ;;  %v12620_v57 = vcombine.low %v246_v39, %v250_v40 }
 0x3cb   :  { %10524 = vmatprep.subr.bf16.mxu0 %v13099_v0  ;;  %10554 = vmatprep.mubr.bf16.mxu0 %v15264_v7  ;;  %v13130_v0 = vcombine.low %v757_v42, %v761_v43  ;;  %v13139_v6 = vcombine.high %v765_v54, %v769_v58  ;;  %v286_v42 = vld [vmem:[%s19911_s1 + $0x698] sm:$0xff] }
 0x3cc   :  { %10882 = vmatprep.mubr.bf16.mxu1 %v14845_v28  ;;  %v749_v28 = vld [vmem:[%s19911_s1 + $0x1510] sm:$0xff]  ;;  %v290_v43 = vld [vmem:[%s19911_s1 + $0x6b8] sm:$0xff] }
 0x3cd   :  { %10853 = vmatpush1.bf16.msra.mxu1 %v12588_v9  ;;  %v13123_v37 = vcombine.high %v749_v28, %v753_v32  ;;  %v13122_v45 = vcombine.low %v749_v28, %v753_v32  ;;  %v773_v9 = vld [vmem:[%s19911_s1 + $0x15d0] sm:$0xff]  ;;  %v278_v28 = vld [vmem:[%s19911_s1 + $0x658] sm:$0xff] }
 0x3ce   :  { %10525 = vmatpush1.bf16.msra.mxu0 %v13098_v11  ;;  %10854 = vmatprep.subr.bf16.mxu1 %v12597_v13  ;;  %v777_v11 = vld [vmem:[%s19911_s1 + $0x15f0] sm:$0xff]  ;;  %v12628_v13 = vcombine.low %v254_v51, %v258_v52  ;;  %v282_v32 = vld [vmem:[%s19911_s1 + $0x678] sm:$0xff]  ;;  %v12661_v51 = vcombine.high %v286_v42, %v290_v43 }
 0x3cf   :  { %10526 = vmatprep.subr.bf16.mxu0 %v13107_v15  ;;  %v13138_v15 = vcombine.low %v765_v54, %v769_v58  ;;  %v13147_v17 = vcombine.high %v773_v9, %v777_v11  ;;  %v12653_v39 = vcombine.high %v278_v28, %v282_v32  ;;  %v294_v54 = vld [vmem:[%s19911_s1 + $0x6d8] sm:$0xff] }
 0x3d0   :  { %v298_v58 = vld [vmem:[%s19911_s1 + $0x6f8] sm:$0xff] }
 0x3d1   :  { %10855 = vmatpush1.bf16.msra.mxu1 %v12596_v23  ;;  %v781_v23 = vld [vmem:[%s19911_s1 + $0x1610] sm:$0xff] }
 0x3d2   :  { %10527 = vmatpush1.bf16.msra.mxu0 %v13106_v24  ;;  %10856 = vmatprep.subr.bf16.mxu1 %v12605_v25  ;;  %v785_v24 = vld [vmem:[%s19911_s1 + $0x1630] sm:$0xff]  ;;  %v12636_v25 = vcombine.low %v262_v63, %v266_v8  ;;  %v12669_v63 = vcombine.high %v294_v54, %v298_v58 }
 0x3d3   :  { %10528 = vmatprep.subr.bf16.mxu0 %v13115_v26  ;;  %v13146_v26 = vcombine.low %v773_v9, %v777_v11  ;;  %v13155_v29 = vcombine.high %v781_v23, %v785_v24  ;;  %v302_v9 = vld [vmem:[%s19911_s1 + $0x718] sm:$0xff] }
 0x3d4   :  { %v306_v11 = vld [vmem:[%s19911_s1 + $0x738] sm:$0xff] }
 0x3d5   :  { %10857 = vmatpush1.bf16.msra.mxu1 %v12604_v33  ;;  %v789_v33 = vld [vmem:[%s19911_s1 + $0x1650] sm:$0xff] }
 0x3d6   :  { %10529 = vmatpush1.bf16.msra.mxu0 %v13114_v34  ;;  %10858 = vmatprep.subr.bf16.mxu1 %v12613_v35  ;;  %v793_v34 = vld [vmem:[%s19911_s1 + $0x1670] sm:$0xff]  ;;  %v12644_v35 = vcombine.low %v270_v18, %v274_v19  ;;  %v12677_v18 = vcombine.high %v302_v9, %v306_v11 }
 0x3d7   :  { %10530 = vmatprep.subr.bf16.mxu0 %v13123_v37  ;;  %v13154_v37 = vcombine.low %v781_v23, %v785_v24  ;;  %v13163_v40 = vcombine.high %v789_v33, %v793_v34  ;;  %v310_v23 = vld [vmem:[%s19911_s1 + $0x758] sm:$0xff] }
 0x3d8   :  { %v314_v24 = vld [vmem:[%s19911_s1 + $0x778] sm:$0xff] }
 0x3d9   :  { %10859 = vmatpush1.bf16.msra.mxu1 %v12612_v44  ;;  %v797_v44 = vld [vmem:[%s19911_s1 + $0x1690] sm:$0xff] }
 0x3da   :  { %10531 = vmatpush1.bf16.msra.mxu0 %v13122_v45  ;;  %10860 = vmatprep.subr.bf16.mxu1 %v12621_v46  ;;  %v801_v45 = vld [vmem:[%s19911_s1 + $0x16b0] sm:$0xff]  ;;  %v12652_v46 = vcombine.low %v278_v28, %v282_v32  ;;  %v12685_v28 = vcombine.high %v310_v23, %v314_v24 }
 0x3db   :  { %10532 = vmatprep.subr.bf16.mxu0 %v13131_v49  ;;  %v13162_v49 = vcombine.low %v789_v33, %v793_v34  ;;  %v13171_v52 = vcombine.high %v797_v44, %v801_v45  ;;  %v318_v33 = vld [vmem:[%s19911_s1 + $0x798] sm:$0xff] }
 0x3dc   :  { %v322_v34 = vld [vmem:[%s19911_s1 + $0x7b8] sm:$0xff] }
 0x3dd   :  { %10861 = vmatpush1.bf16.msra.mxu1 %v12620_v57  ;;  %v805_v57 = vld [vmem:[%s19911_s1 + $0x16d0] sm:$0xff] }
 0x3de   :  { %10533 = vmatpush1.bf16.msra.mxu0 %v13130_v0  ;;  %10862 = vmatprep.subr.bf16.mxu1 %v12629_v2  ;;  %v809_v0 = vld [vmem:[%s19911_s1 + $0x16f0] sm:$0xff]  ;;  %v12660_v2 = vcombine.low %v286_v42, %v290_v43  ;;  %v12693_v42 = vcombine.high %v318_v33, %v322_v34 }
 0x3df   :  { %10534 = vmatprep.subr.bf16.mxu0 %v13139_v6  ;;  %v13170_v6 = vcombine.low %v797_v44, %v801_v45  ;;  %v13179_v8 = vcombine.high %v805_v57, %v809_v0  ;;  %v326_v44 = vld [vmem:[%s19911_s1 + $0x7d8] sm:$0xff] }
 0x3e0   :  { %v330_v45 = vld [vmem:[%s19911_s1 + $0x7f8] sm:$0xff] }
 0x3e1   :  { %10863 = vmatpush1.bf16.msra.mxu1 %v12628_v13  ;;  %v813_v13 = vld [vmem:[%s19911_s1 + $0x1710] sm:$0xff] }
 0x3e2   :  { %10535 = vmatpush1.bf16.msra.mxu0 %v13138_v15  ;;  %10864 = vmatprep.subr.bf16.mxu1 %v12637_v16  ;;  %v817_v15 = vld [vmem:[%s19911_s1 + $0x1730] sm:$0xff]  ;;  %v12668_v16 = vcombine.low %v294_v54, %v298_v58  ;;  %v12701_v54 = vcombine.high %v326_v44, %v330_v45 }
 0x3e3   :  { %10536 = vmatprep.subr.bf16.mxu0 %v13147_v17  ;;  %v13178_v17 = vcombine.low %v805_v57, %v809_v0  ;;  %v13187_v19 = vcombine.high %v813_v13, %v817_v15  ;;  %v334_v57 = vld [vmem:[%s19911_s1 + $0x818] sm:$0xff] }
 0x3e4   :  { %v338_v0 = vld [vmem:[%s19911_s1 + $0x838] sm:$0xff] }
 0x3e5   :  { %10865 = vmatpush1.bf16.msra.mxu1 %v12636_v25  ;;  %v821_v25 = vld [vmem:[%s19911_s1 + $0x1750] sm:$0xff] }
 0x3e6   :  { %10537 = vmatpush1.bf16.msra.mxu0 %v13146_v26  ;;  %10866 = vmatprep.subr.bf16.mxu1 %v12645_v27  ;;  %v825_v26 = vld [vmem:[%s19911_s1 + $0x1770] sm:$0xff]  ;;  %v12676_v27 = vcombine.low %v302_v9, %v306_v11  ;;  %v12709_v9 = vcombine.high %v334_v57, %v338_v0 }
 0x3e7   :  { %10538 = vmatprep.subr.bf16.mxu0 %v13155_v29  ;;  %v13186_v29 = vcombine.low %v813_v13, %v817_v15  ;;  %v13195_v32 = vcombine.high %v821_v25, %v825_v26  ;;  %v342_v13 = vld [vmem:[%s19911_s1 + $0x858] sm:$0xff] }
 0x3e8   :  { %v346_v15 = vld [vmem:[%s19911_s1 + $0x878] sm:$0xff] }
 0x3e9   :  { %10867 = vmatpush1.bf16.msra.mxu1 %v12644_v35  ;;  %v829_v35 = vld [vmem:[%s19911_s1 + $0x1790] sm:$0xff] }
 0x3ea   :  { %10539 = vmatpush1.bf16.msra.mxu0 %v13154_v37  ;;  %10868 = vmatprep.subr.bf16.mxu1 %v12653_v39  ;;  %v833_v37 = vld [vmem:[%s19911_s1 + $0x17b0] sm:$0xff]  ;;  %v12684_v39 = vcombine.low %v310_v23, %v314_v24  ;;  %v12717_v23 = vcombine.high %v342_v13, %v346_v15 }
 0x3eb   :  { %10540 = vmatprep.subr.bf16.mxu0 %v13163_v40  ;;  %v13194_v40 = vcombine.low %v821_v25, %v825_v26  ;;  %v13203_v43 = vcombine.high %v829_v35, %v833_v37  ;;  %v350_v25 = vld [vmem:[%s19911_s1 + $0x898] sm:$0xff] }
 0x3ec   :  { %v354_v26 = vld [vmem:[%s19911_s1 + $0x8b8] sm:$0xff] }
 0x3ed   :  { %10869 = vmatpush1.bf16.msra.mxu1 %v12652_v46  ;;  %v837_v46 = vld [vmem:[%s19911_s1 + $0x17d0] sm:$0xff] }
 0x3ee   :  { %10541 = vmatpush1.bf16.msra.mxu0 %v13162_v49  ;;  %10870 = vmatprep.subr.bf16.mxu1 %v12661_v51  ;;  %v841_v49 = vld [vmem:[%s19911_s1 + $0x17f0] sm:$0xff]  ;;  %v12692_v51 = vcombine.low %v318_v33, %v322_v34  ;;  %v12725_v33 = vcombine.high %v350_v25, %v354_v26 }
 0x3ef   :  { %10542 = vmatprep.subr.bf16.mxu0 %v13171_v52  ;;  %v13202_v52 = vcombine.low %v829_v35, %v833_v37  ;;  %v13211_v58 = vcombine.high %v837_v46, %v841_v49  ;;  %v362_v35 = vld [vmem:[%s19911_s1 + $0x8f8] sm:$0xff]  ;;  %v869_v37 = vld [vmem:[%s19911_s1 + $0x18d0] sm:$0xff] }
 0x3f1   :  { %10871 = vmatpush1.bf16.msra.mxu1 %v12660_v2  ;;  %v845_v2 = vld [vmem:[%s19911_s1 + $0x1810] sm:$0xff] }
 0x3f2   :  { %10543 = vmatpush1.bf16.msra.mxu0 %v13170_v6  ;;  %10872 = vmatprep.subr.bf16.mxu1 %v12669_v63  ;;  %v849_v6 = vld [vmem:[%s19911_s1 + $0x1830] sm:$0xff]  ;;  %v12700_v63 = vcombine.low %v326_v44, %v330_v45  ;;  %v366_v45 = vld [vmem:[%s19911_s1 + $0x918] sm:$0xff] }
 0x3f3   :  { %10544 = vmatprep.subr.bf16.mxu0 %v13179_v8  ;;  %v13210_v8 = vcombine.low %v837_v46, %v841_v49  ;;  %v13219_v11 = vcombine.high %v845_v2, %v849_v6  ;;  %v370_v46 = vld [vmem:[%s19911_s1 + $0x938] sm:$0xff]  ;;  %v881_v49 = vld [vmem:[%s19911_s1 + $0x1930] sm:$0xff] }
 0x3f5   :  { %10873 = vmatpush1.bf16.msra.mxu1 %v12668_v16  ;;  %v853_v16 = vld [vmem:[%s19911_s1 + $0x1850] sm:$0xff] }
 0x3f6   :  { %10545 = vmatpush1.bf16.msra.mxu0 %v13178_v17  ;;  %10874 = vmatprep.subr.bf16.mxu1 %v12677_v18  ;;  %v857_v17 = vld [vmem:[%s19911_s1 + $0x1870] sm:$0xff]  ;;  %v12708_v18 = vcombine.low %v334_v57, %v338_v0  ;;  %v374_v57 = vld [vmem:[%s19911_s1 + $0x958] sm:$0xff] }
 0x3f7   :  { %10546 = vmatprep.subr.bf16.mxu0 %v13187_v19  ;;  %v13218_v19 = vcombine.low %v845_v2, %v849_v6  ;;  %v13227_v24 = vcombine.high %v853_v16, %v857_v17  ;;  %v378_v0 = vld [vmem:[%s19911_s1 + $0x978] sm:$0xff]  ;;  %v885_v2 = vld [vmem:[%s19911_s1 + $0x1950] sm:$0xff] }
 0x3f8   :  { %v889_v6 = vld [vmem:[%s19911_s1 + $0x1970] sm:$0xff] }
 0x3f9   :  { %10875 = vmatpush1.bf16.msra.mxu1 %v12676_v27  ;;  %v861_v27 = vld [vmem:[%s19911_s1 + $0x1890] sm:$0xff] }
 0x3fa   :  { %10547 = vmatpush1.bf16.msra.mxu0 %v13186_v29  ;;  %10876 = vmatprep.subr.bf16.mxu1 %v12685_v28  ;;  %v865_v29 = vld [vmem:[%s19911_s1 + $0x18b0] sm:$0xff]  ;;  %v12716_v28 = vcombine.low %v342_v13, %v346_v15  ;;  %v382_v13 = vld [vmem:[%s19911_s1 + $0x998] sm:$0xff] }
 0x3fb   :  { %10548 = vmatprep.subr.bf16.mxu0 %v13195_v32  ;;  %v13226_v32 = vcombine.low %v853_v16, %v857_v17  ;;  %v13235_v34 = vcombine.high %v861_v27, %v865_v29  ;;  %v386_v15 = vld [vmem:[%s19911_s1 + $0x9b8] sm:$0xff]  ;;  %v893_v16 = vld [vmem:[%s19911_s1 + $0x1990] sm:$0xff] }
 0x3fc   :  { %v897_v17 = vld [vmem:[%s19911_s1 + $0x19b0] sm:$0xff] }
 0x3fd   :  { %10877 = vmatpush1.bf16.msra.mxu1 %v12684_v39  ;;  %v873_v39 = vld [vmem:[%s19911_s1 + $0x18f0] sm:$0xff] }
 0x3fe   :  { %10549 = vmatpush1.bf16.msra.mxu0 %v13194_v40  ;;  %10878 = vmatprep.subr.bf16.mxu1 %v12693_v42  ;;  %v12724_v40 = vcombine.low %v350_v25, %v354_v26  ;;  %v13234_v42 = vcombine.low %v861_v27, %v865_v29  ;;  %v13243_v44 = vcombine.high %v869_v37, %v873_v39  ;;  %v390_v25 = vld [vmem:[%s19911_s1 + $0x9d8] sm:$0xff]  ;;  %v901_v27 = vld [vmem:[%s19911_s1 + $0x19d0] sm:$0xff] }
 0x3ff   :  { %10550 = vmatprep.subr.bf16.mxu0 %v13203_v43  ;;  %v394_v26 = vld [vmem:[%s19911_s1 + $0x9f8] sm:$0xff]  ;;  %v905_v29 = vld [vmem:[%s19911_s1 + $0x19f0] sm:$0xff] }
 0x401   :  { %10879 = vmatpush1.bf16.msra.mxu1 %v12692_v51 }
 0x402   :  { %10551 = vmatpush1.bf16.msra.mxu0 %v13202_v52  ;;  %10880 = vmatprep.subr.bf16.mxu1 %v12701_v54  ;;  %v13242_v52 = vcombine.low %v869_v37, %v873_v39  ;;  %v12741_v54 = vcombine.high %v366_v45, %v370_v46  ;;  %v909_v37 = vld [vmem:[%s19911_s1 + $0x1a10] sm:$0xff] }
 0x403   :  { %10552 = vmatprep.subr.bf16.mxu0 %v13211_v58  ;;  %v913_v39 = vld [vmem:[%s19911_s1 + $0x1a30] sm:$0xff] }
 0x405   :  { %10881 = vmatpush1.bf16.msra.mxu1 %v12700_v63  ;;  %v12740_v63 = vcombine.low %v366_v45, %v370_v46  ;;  %v406_v45 = vld [vmem:[%s19911_s1 + $0xa58] sm:$0xff] }
 0x406   :  { %10553 = vmatpush1.bf16.msra.mxu0 %v13210_v8  ;;  %10891 = vmatprep.subr.bf16.mxu1 %v12709_v9  ;;  %v12749_v9 = vcombine.high %v374_v57, %v378_v0  ;;  %v410_v46 = vld [vmem:[%s19911_s1 + $0xa78] sm:$0xff] }
 0x407   :  { %10563 = vmatprep.subr.bf16.mxu0 %v13219_v11  ;;  %v13259_v11 = vcombine.high %v885_v2, %v889_v6 }
 0x408   :  { %10883 = vmatmul.mubr.bf16.vlgmr.msra.gmra.mrb[8].mxu1 %v15039_v36  ;;  %v358_v36 = vld [vmem:[%s19911_s1 + $0x8d8] sm:$0xff] }
 0x409   :  { %10555 = vmatmul.mubr.bf16.vlgmr.msra.gmra.mrb[4].mxu0 %v15462_v30  ;;  %10892 = vmatpush1.bf16.msra.mxu1 %v12708_v18  ;;  %v12733_v43 = vcombine.high %v358_v36, %v362_v35  ;;  %v12732_v51 = vcombine.low %v358_v36, %v362_v35  ;;  %v12748_v18 = vcombine.low %v374_v57, %v378_v0  ;;  %v398_v36 = vld [vmem:[%s19911_s1 + $0xa18] sm:$0xff] }
 0x40a   :  { %10564 = vmatpush1.bf16.msra.mxu0 %v13218_v19  ;;  %10893 = vmatprep.subr.bf16.mxu1 %v12717_v23  ;;  %v13258_v19 = vcombine.low %v885_v2, %v889_v6  ;;  %v12757_v23 = vcombine.high %v382_v13, %v386_v15  ;;  %v402_v35 = vld [vmem:[%s19911_s1 + $0xa38] sm:$0xff]  ;;  %v925_v2 = vld [vmem:[%s19911_s1 + $0x1a90] sm:$0xff] }
 0x40b   :  { %10565 = vmatprep.subr.bf16.mxu0 %v13227_v24  ;;  %10595 = vmatprep.mubr.bf16.mxu0 %v15470_v38  ;;  %v13267_v24 = vcombine.high %v893_v16, %v897_v17  ;;  %v414_v57 = vld [vmem:[%s19911_s1 + $0xa98] sm:$0xff]  ;;  %v929_v6 = vld [vmem:[%s19911_s1 + $0x1ab0] sm:$0xff] }
 0x40c   :  { %10923 = vmatprep.mubr.bf16.mxu1 %v14699_v61  ;;  %v877_v61 = vld [vmem:[%s19911_s1 + $0x1910] sm:$0xff]  ;;  %v418_v0 = vld [vmem:[%s19911_s1 + $0xab8] sm:$0xff] }
 0x40d   :  { %10894 = vmatpush1.bf16.msra.mxu1 %v12716_v28  ;;  %v13251_v58 = vcombine.high %v877_v61, %v881_v49  ;;  %v13250_v8 = vcombine.low %v877_v61, %v881_v49  ;;  %v12756_v28 = vcombine.low %v382_v13, %v386_v15  ;;  %v917_v61 = vld [vmem:[%s19911_s1 + $0x1a50] sm:$0xff]  ;;  %v422_v13 = vld [vmem:[%s19911_s1 + $0xad8] sm:$0xff] }
 0x40e   :  { %10566 = vmatpush1.bf16.msra.mxu0 %v13226_v32  ;;  %10895 = vmatprep.subr.bf16.mxu1 %v12725_v33  ;;  %v13266_v32 = vcombine.low %v893_v16, %v897_v17  ;;  %v12765_v33 = vcombine.high %v390_v25, %v394_v26  ;;  %v921_v49 = vld [vmem:[%s19911_s1 + $0x1a70] sm:$0xff]  ;;  %v426_v15 = vld [vmem:[%s19911_s1 + $0xaf8] sm:$0xff] }
 0x40f   :  { %10567 = vmatprep.subr.bf16.mxu0 %v13235_v34  ;;  %v13275_v34 = vcombine.high %v901_v27, %v905_v29  ;;  %v933_v16 = vld [vmem:[%s19911_s1 + $0x1ad0] sm:$0xff] }
 0x410   :  { %v937_v17 = vld [vmem:[%s19911_s1 + $0x1af0] sm:$0xff] }
 0x411   :  { %10896 = vmatpush1.bf16.msra.mxu1 %v12724_v40  ;;  %v12764_v40 = vcombine.low %v390_v25, %v394_v26  ;;  %v430_v25 = vld [vmem:[%s19911_s1 + $0xb18] sm:$0xff] }
 0x412   :  { %10568 = vmatpush1.bf16.msra.mxu0 %v13234_v42  ;;  %10897 = vmatprep.subr.bf16.mxu1 %v12733_v43  ;;  %v13274_v42 = vcombine.low %v901_v27, %v905_v29  ;;  %v12773_v43 = vcombine.high %v398_v36, %v402_v35  ;;  %v434_v26 = vld [vmem:[%s19911_s1 + $0xb38] sm:$0xff]  ;;  %v941_v27 = vld [vmem:[%s19911_s1 + $0x1b10] sm:$0xff] }
 0x413   :  { %10569 = vmatprep.subr.bf16.mxu0 %v13243_v44  ;;  %v13283_v44 = vcombine.high %v909_v37, %v913_v39  ;;  %v945_v29 = vld [vmem:[%s19911_s1 + $0x1b30] sm:$0xff] }
 0x415   :  { %10898 = vmatpush1.bf16.msra.mxu1 %v12732_v51  ;;  %v12772_v51 = vcombine.low %v398_v36, %v402_v35  ;;  %v438_v36 = vld [vmem:[%s19911_s1 + $0xb58] sm:$0xff] }
 0x416   :  { %10570 = vmatpush1.bf16.msra.mxu0 %v13242_v52  ;;  %10899 = vmatprep.subr.bf16.mxu1 %v12741_v54  ;;  %v13282_v52 = vcombine.low %v909_v37, %v913_v39  ;;  %v12781_v54 = vcombine.high %v406_v45, %v410_v46  ;;  %v442_v35 = vld [vmem:[%s19911_s1 + $0xb78] sm:$0xff]  ;;  %v949_v37 = vld [vmem:[%s19911_s1 + $0x1b50] sm:$0xff] }
 0x417   :  { %10571 = vmatprep.subr.bf16.mxu0 %v13251_v58  ;;  %v13291_v58 = vcombine.high %v917_v61, %v921_v49  ;;  %v953_v39 = vld [vmem:[%s19911_s1 + $0x1b70] sm:$0xff] }
 0x419   :  { %10900 = vmatpush1.bf16.msra.mxu1 %v12740_v63  ;;  %v12780_v63 = vcombine.low %v406_v45, %v410_v46  ;;  %v446_v45 = vld [vmem:[%s19911_s1 + $0xb98] sm:$0xff] }
 0x41a   :  { %10572 = vmatpush1.bf16.msra.mxu0 %v13250_v8  ;;  %10901 = vmatprep.subr.bf16.mxu1 %v12749_v9  ;;  %v13290_v8 = vcombine.low %v917_v61, %v921_v49  ;;  %v12789_v9 = vcombine.high %v414_v57, %v418_v0  ;;  %v450_v46 = vld [vmem:[%s19911_s1 + $0xbb8] sm:$0xff]  ;;  %v957_v61 = vld [vmem:[%s19911_s1 + $0x1b90] sm:$0xff] }
 0x41b   :  { %10573 = vmatprep.subr.bf16.mxu0 %v13259_v11  ;;  %v13299_v11 = vcombine.high %v925_v2, %v929_v6  ;;  %v961_v49 = vld [vmem:[%s19911_s1 + $0x1bb0] sm:$0xff] }
 0x41d   :  { %10902 = vmatpush1.bf16.msra.mxu1 %v12748_v18  ;;  %v12788_v18 = vcombine.low %v414_v57, %v418_v0  ;;  %v454_v57 = vld [vmem:[%s19911_s1 + $0xbd8] sm:$0xff] }
 0x41e   :  { %10574 = vmatpush1.bf16.msra.mxu0 %v13258_v19  ;;  %10903 = vmatprep.subr.bf16.mxu1 %v12757_v23  ;;  %v13298_v19 = vcombine.low %v925_v2, %v929_v6  ;;  %v12797_v23 = vcombine.high %v422_v13, %v426_v15  ;;  %v458_v0 = vld [vmem:[%s19911_s1 + $0xbf8] sm:$0xff]  ;;  %v965_v2 = vld [vmem:[%s19911_s1 + $0x1bd0] sm:$0xff] }
 0x41f   :  { %10575 = vmatprep.subr.bf16.mxu0 %v13267_v24  ;;  %v13307_v24 = vcombine.high %v933_v16, %v937_v17  ;;  %v969_v6 = vld [vmem:[%s19911_s1 + $0x1bf0] sm:$0xff] }
 0x421   :  { %10904 = vmatpush1.bf16.msra.mxu1 %v12756_v28  ;;  %v12796_v28 = vcombine.low %v422_v13, %v426_v15  ;;  %v462_v13 = vld [vmem:[%s19911_s1 + $0xc18] sm:$0xff] }
 0x422   :  { %10576 = vmatpush1.bf16.msra.mxu0 %v13266_v32  ;;  %10905 = vmatprep.subr.bf16.mxu1 %v12765_v33  ;;  %v13306_v32 = vcombine.low %v933_v16, %v937_v17  ;;  %v12805_v33 = vcombine.high %v430_v25, %v434_v26  ;;  %v466_v15 = vld [vmem:[%s19911_s1 + $0xc38] sm:$0xff]  ;;  %v973_v16 = vld [vmem:[%s19911_s1 + $0x1c10] sm:$0xff] }
 0x423   :  { %10577 = vmatprep.subr.bf16.mxu0 %v13275_v34  ;;  %v13315_v34 = vcombine.high %v941_v27, %v945_v29  ;;  %v977_v17 = vld [vmem:[%s19911_s1 + $0x1c30] sm:$0xff] }
 0x425   :  { %10906 = vmatpush1.bf16.msra.mxu1 %v12764_v40  ;;  %v12804_v40 = vcombine.low %v430_v25, %v434_v26  ;;  %v470_v25 = vld [vmem:[%s19911_s1 + $0xc58] sm:$0xff] }
 0x426   :  { %10578 = vmatpush1.bf16.msra.mxu0 %v13274_v42  ;;  %10907 = vmatprep.subr.bf16.mxu1 %v12773_v43  ;;  %v13314_v42 = vcombine.low %v941_v27, %v945_v29  ;;  %v12813_v43 = vcombine.high %v438_v36, %v442_v35  ;;  %v474_v26 = vld [vmem:[%s19911_s1 + $0xc78] sm:$0xff]  ;;  %v981_v27 = vld [vmem:[%s19911_s1 + $0x1c50] sm:$0xff] }
 0x427   :  { %10579 = vmatprep.subr.bf16.mxu0 %v13283_v44  ;;  %v13323_v44 = vcombine.high %v949_v37, %v953_v39  ;;  %v985_v29 = vld [vmem:[%s19911_s1 + $0x1c70] sm:$0xff] }
 0x429   :  { %10908 = vmatpush1.bf16.msra.mxu1 %v12772_v51  ;;  %v12812_v51 = vcombine.low %v438_v36, %v442_v35  ;;  %v478_v36 = vld [vmem:[%s19911_s1 + $0xc98] sm:$0xff] }
 0x42a   :  { %10580 = vmatpush1.bf16.msra.mxu0 %v13282_v52  ;;  %10909 = vmatprep.subr.bf16.mxu1 %v12781_v54  ;;  %v13322_v52 = vcombine.low %v949_v37, %v953_v39  ;;  %v12821_v54 = vcombine.high %v446_v45, %v450_v46  ;;  %v482_v35 = vld [vmem:[%s19911_s1 + $0xcb8] sm:$0xff]  ;;  %v989_v37 = vld [vmem:[%s19911_s1 + $0x1c90] sm:$0xff] }
 0x42b   :  { %10581 = vmatprep.subr.bf16.mxu0 %v13291_v58  ;;  %v13331_v58 = vcombine.high %v957_v61, %v961_v49  ;;  %v993_v39 = vld [vmem:[%s19911_s1 + $0x1cb0] sm:$0xff] }
 0x42d   :  { %10910 = vmatpush1.bf16.msra.mxu1 %v12780_v63  ;;  %v12820_v63 = vcombine.low %v446_v45, %v450_v46  ;;  %v490_v45 = vld [vmem:[%s19911_s1 + $0xcf8] sm:$0xff]  ;;  %v997_v46 = vld [vmem:[%s19911_s1 + $0x1cd0] sm:$0xff] }
 0x42e   :  { %10582 = vmatpush1.bf16.msra.mxu0 %v13290_v8  ;;  %10911 = vmatprep.subr.bf16.mxu1 %v12789_v9  ;;  %v13330_v8 = vcombine.low %v957_v61, %v961_v49  ;;  %v12829_v9 = vcombine.high %v454_v57, %v458_v0  ;;  %v1001_v61 = vld [vmem:[%s19911_s1 + $0x1cf0] sm:$0xff]  ;;  %v12852_v49 = vcombine.low %v478_v36, %v482_v35 }
 0x42f   :  { %10583 = vmatprep.subr.bf16.mxu0 %v13299_v11  ;;  %v13339_v11 = vcombine.high %v965_v2, %v969_v6 }
 0x431   :  { %10912 = vmatpush1.bf16.msra.mxu1 %v12788_v18  ;;  %v12828_v18 = vcombine.low %v454_v57, %v458_v0  ;;  %v498_v57 = vld [vmem:[%s19911_s1 + $0xd38] sm:$0xff]  ;;  %v1009_v0 = vld [vmem:[%s19911_s1 + $0x1d30] sm:$0xff] }
 0x432   :  { %10584 = vmatpush1.bf16.msra.mxu0 %v13298_v19  ;;  %10913 = vmatprep.subr.bf16.mxu1 %v12797_v23  ;;  %v13338_v19 = vcombine.low %v965_v2, %v969_v6  ;;  %v12837_v23 = vcombine.high %v462_v13, %v466_v15  ;;  %v13370_v6 = vcombine.low %v997_v46, %v1001_v61 }
 0x433   :  { %10585 = vmatprep.subr.bf16.mxu0 %v13307_v24  ;;  %v13347_v24 = vcombine.high %v973_v16, %v977_v17 }
 0x435   :  { %10914 = vmatpush1.bf16.msra.mxu1 %v12796_v28  ;;  %v12836_v28 = vcombine.low %v462_v13, %v466_v15  ;;  %v1013_v13 = vld [vmem:[%s19911_s1 + $0x1d50] sm:$0xff] }
 0x436   :  { %10586 = vmatpush1.bf16.msra.mxu0 %v13306_v32  ;;  %10915 = vmatprep.subr.bf16.mxu1 %v12805_v33  ;;  %v13346_v32 = vcombine.low %v973_v16, %v977_v17  ;;  %v12845_v33 = vcombine.high %v470_v25, %v474_v26  ;;  %v1017_v15 = vld [vmem:[%s19911_s1 + $0x1d70] sm:$0xff] }
 0x437   :  { %10587 = vmatprep.subr.bf16.mxu0 %v13315_v34  ;;  %v13355_v34 = vcombine.high %v981_v27, %v985_v29 }
 0x439   :  { %10916 = vmatpush1.bf16.msra.mxu1 %v12804_v40  ;;  %v12844_v40 = vcombine.low %v470_v25, %v474_v26  ;;  %v1021_v25 = vld [vmem:[%s19911_s1 + $0x1d90] sm:$0xff] }
 0x43a   :  { %10588 = vmatpush1.bf16.msra.mxu0 %v13314_v42  ;;  %10917 = vmatprep.subr.bf16.mxu1 %v12813_v43  ;;  %v13354_v42 = vcombine.low %v981_v27, %v985_v29  ;;  %v12853_v43 = vcombine.high %v478_v36, %v482_v35  ;;  %v1025_v26 = vld [vmem:[%s19911_s1 + $0x1db0] sm:$0xff]  ;;  %v13386_v29 = vcombine.low %v1013_v13, %v1017_v15  ;;  %v522_v36 = vld [vmem:[%s19911_s1 + $0xdf8] sm:$0xff] }
 0x43b   :  { %10589 = vmatprep.subr.bf16.mxu0 %v13323_v44  ;;  %v13363_v44 = vcombine.high %v989_v37, %v993_v39 }
 0x43d   :  { %10918 = vmatpush1.bf16.msra.mxu1 %v12812_v51  ;;  %v13362_v51 = vcombine.low %v989_v37, %v993_v39  ;;  %v1029_v37 = vld [vmem:[%s19911_s1 + $0x1dd0] sm:$0xff] }
 0x43e   :  { %10590 = vmatpush1.bf16.msra.mxu0 %v13322_v52  ;;  %10919 = vmatprep.subr.bf16.mxu1 %v12821_v54  ;;  %v13371_v54 = vcombine.high %v997_v46, %v1001_v61  ;;  %v1033_v39 = vld [vmem:[%s19911_s1 + $0x1df0] sm:$0xff]  ;;  %v526_v46 = vld [vmem:[%s19911_s1 + $0xe18] sm:$0xff] }
 0x43f   :  { %10591 = vmatprep.subr.bf16.mxu0 %v13331_v58  ;;  %v494_v58 = vld [vmem:[%s19911_s1 + $0xd18] sm:$0xff] }
 0x440   :  { %v12868_v16 = vcombine.low %v494_v58, %v498_v57  ;;  %v530_v61 = vld [vmem:[%s19911_s1 + $0xe38] sm:$0xff] }
 0x441   :  { %10920 = vmatpush1.bf16.msra.mxu1 %v12820_v63  ;;  %v12869_v63 = vcombine.high %v494_v58, %v498_v57  ;;  %v12901_v58 = vcombine.high %v526_v46, %v530_v61 }
 0x442   :  { %10592 = vmatpush1.bf16.msra.mxu0 %v13330_v8  ;;  %10921 = vmatprep.subr.bf16.mxu1 %v12829_v9  ;;  %v502_v9 = vld [vmem:[%s19911_s1 + $0xd58] sm:$0xff] }
 0x443   :  { %10593 = vmatprep.subr.bf16.mxu0 %v13339_v11  ;;  %v506_v11 = vld [vmem:[%s19911_s1 + $0xd78] sm:$0xff] }
 0x444   :  { %v12876_v27 = vcombine.low %v502_v9, %v506_v11 }
 0x445   :  { %10922 = vmatpush1.bf16.msra.mxu1 %v12828_v18  ;;  %v12877_v18 = vcombine.high %v502_v9, %v506_v11 }
 0x446   :  { %10594 = vmatpush1.bf16.msra.mxu0 %v13338_v19  ;;  %10932 = vmatprep.subr.bf16.mxu1 %v12837_v23  ;;  %v13387_v19 = vcombine.high %v1013_v13, %v1017_v15  ;;  %v510_v23 = vld [vmem:[%s19911_s1 + $0xd98] sm:$0xff] }
 0x447   :  { %10604 = vmatprep.subr.bf16.mxu0 %v13347_v24  ;;  %v514_v24 = vld [vmem:[%s19911_s1 + $0xdb8] sm:$0xff] }
 0x448   :  { %10924 = vmatmul.mubr.bf16.vlgmr.msra.gmra.mrb[8].mxu1 %v14834_v21  ;;  %v486_v21 = vld [vmem:[%s19911_s1 + $0xcd8] sm:$0xff] }
 0x449   :  { %10596 = vmatmul.mubr.bf16.vlgmr.msra.gmra.mrb[4].mxu0 %v15668_v3  ;;  %10933 = vmatpush1.bf16.msra.mxu1 %v12836_v28  ;;  %v12861_v52 = vcombine.high %v486_v21, %v490_v45  ;;  %v12860_v2 = vcombine.low %v486_v21, %v490_v45  ;;  %v12885_v28 = vcombine.high %v510_v23, %v514_v24  ;;  %v542_v13 = vld [vmem:[%s19911_s1 + $0xe98] sm:$0xff] }
 0x44a   :  { %10605 = vmatpush1.bf16.msra.mxu0 %v13346_v32  ;;  %10934 = vmatprep.subr.bf16.mxu1 %v12845_v33  ;;  %v13395_v33 = vcombine.high %v1021_v25, %v1025_v26  ;;  %v13403_v45 = vcombine.high %v1029_v37, %v1033_v39  ;;  %v546_v15 = vld [vmem:[%s19911_s1 + $0xeb8] sm:$0xff] }
 0x44b   :  { %10606 = vmatprep.subr.bf16.mxu0 %v13355_v34  ;;  %10636 = vmatprep.mubr.bf16.mxu0 %v15676_v10  ;;  %v518_v34 = vld [vmem:[%s19911_s1 + $0xdd8] sm:$0xff] }
 0x44c   :  { %10964 = vmatprep.mubr.bf16.mxu1 %v14854_v31  ;;  %v1005_v31 = vld [vmem:[%s19911_s1 + $0x1d10] sm:$0xff]  ;;  %v12893_v21 = vcombine.high %v518_v34, %v522_v36 }
 0x44d   :  { %10935 = vmatpush1.bf16.msra.mxu1 %v12844_v40  ;;  %v13379_v8 = vcombine.high %v1005_v31, %v1009_v0  ;;  %v13378_v17 = vcombine.low %v1005_v31, %v1009_v0  ;;  %v534_v31 = vld [vmem:[%s19911_s1 + $0xe58] sm:$0xff] }
 0x44e   :  { %10607 = vmatpush1.bf16.msra.mxu0 %v13354_v42  ;;  %10936 = vmatprep.subr.bf16.mxu1 %v12853_v43  ;;  %v12884_v42 = vcombine.low %v510_v23, %v514_v24  ;;  %v538_v0 = vld [vmem:[%s19911_s1 + $0xe78] sm:$0xff]  ;;  %v12917_v23 = vcombine.high %v542_v13, %v546_v15 }
 0x44f   :  { %10608 = vmatprep.subr.bf16.mxu0 %v13363_v44  ;;  %v13394_v44 = vcombine.low %v1021_v25, %v1025_v26  ;;  %v12909_v9 = vcombine.high %v534_v31, %v538_v0  ;;  %v550_v25 = vld [vmem:[%s19911_s1 + $0xed8] sm:$0xff] }
 0x450   :  { %v554_v26 = vld [vmem:[%s19911_s1 + $0xef8] sm:$0xff] }
 0x451   :  { %10937 = vmatpush1.bf16.msra.mxu1 %v12852_v49  ;;  %v1037_v49 = vld [vmem:[%s19911_s1 + $0x1e10] sm:$0xff] }
 0x452   :  { %10609 = vmatpush1.bf16.msra.mxu0 %v13362_v51  ;;  %10938 = vmatprep.subr.bf16.mxu1 %v12861_v52  ;;  %v1041_v51 = vld [vmem:[%s19911_s1 + $0x1e30] sm:$0xff]  ;;  %v12892_v52 = vcombine.low %v518_v34, %v522_v36  ;;  %v12925_v34 = vcombine.high %v550_v25, %v554_v26 }
 0x453   :  { %10610 = vmatprep.subr.bf16.mxu0 %v13371_v54  ;;  %v13402_v54 = vcombine.low %v1029_v37, %v1033_v39  ;;  %v13411_v57 = vcombine.high %v1037_v49, %v1041_v51  ;;  %v558_v37 = vld [vmem:[%s19911_s1 + $0xf18] sm:$0xff] }
 0x454   :  { %v562_v39 = vld [vmem:[%s19911_s1 + $0xf38] sm:$0xff] }
 0x455   :  { %10939 = vmatpush1.bf16.msra.mxu1 %v12860_v2  ;;  %v1045_v2 = vld [vmem:[%s19911_s1 + $0x1e50] sm:$0xff] }
 0x456   :  { %10611 = vmatpush1.bf16.msra.mxu0 %v13370_v6  ;;  %10940 = vmatprep.subr.bf16.mxu1 %v12869_v63  ;;  %v1049_v6 = vld [vmem:[%s19911_s1 + $0x1e70] sm:$0xff]  ;;  %v12900_v63 = vcombine.low %v526_v46, %v530_v61  ;;  %v566_v46 = vld [vmem:[%s19911_s1 + $0xf58] sm:$0xff] }
 0x457   :  { %10612 = vmatprep.subr.bf16.mxu0 %v13379_v8  ;;  %v13410_v8 = vcombine.low %v1037_v49, %v1041_v51  ;;  %v13419_v11 = vcombine.high %v1045_v2, %v1049_v6  ;;  %v570_v61 = vld [vmem:[%s19911_s1 + $0xf78] sm:$0xff]  ;;  %v1077_v49 = vld [vmem:[%s19911_s1 + $0x1f50] sm:$0xff] }
 0x458   :  { %v1081_v51 = vld [vmem:[%s19911_s1 + $0x1f70] sm:$0xff] }
 0x459   :  { %10941 = vmatpush1.bf16.msra.mxu1 %v12868_v16  ;;  %v1053_v16 = vld [vmem:[%s19911_s1 + $0x1e90] sm:$0xff] }
 0x45a   :  { %10613 = vmatpush1.bf16.msra.mxu0 %v13378_v17  ;;  %10942 = vmatprep.subr.bf16.mxu1 %v12877_v18  ;;  %v1057_v17 = vld [vmem:[%s19911_s1 + $0x1eb0] sm:$0xff]  ;;  %v12908_v18 = vcombine.low %v534_v31, %v538_v0  ;;  %v574_v31 = vld [vmem:[%s19911_s1 + $0xf98] sm:$0xff] }
 0x45b   :  { %v18154_v32 = vpop.f32.mrb[4].mxu1  ;;  %10614 = vmatprep.subr.bf16.mxu0 %v13387_v19  ;;  %v13418_v19 = vcombine.low %v1045_v2, %v1049_v6  ;;  %v13427_v24 = vcombine.high %v1053_v16, %v1057_v17  ;;  %v578_v0 = vld [vmem:[%s19911_s1 + $0xfb8] sm:$0xff]  ;;  %v1085_v2 = vld [vmem:[%s19911_s1 + $0x1f90] sm:$0xff] }
 0x45c   :  { %v18162_v35 = vpop.f32.mrb[5].mxu1  ;;  %v1089_v6 = vld [vmem:[%s19911_s1 + $0x1fb0] sm:$0xff] }
 0x45d   :  { %v10314_v40 = vpop.f32.mrb[6].mxu1  ;;  %10943 = vmatpush1.bf16.msra.mxu1 %v12876_v27  ;;  %v1061_v27 = vld [vmem:[%s19911_s1 + $0x1ed0] sm:$0xff] }
 0x45e   :  { %10615 = vmatpush1.bf16.msra.mxu0 %v13386_v29  ;;  %v10315_v43 = vpop.f32.mrb[7].mxu1  ;;  %10944 = vmatprep.subr.bf16.mxu1 %v12885_v28  ;;  %v1065_v29 = vld [vmem:[%s19911_s1 + $0x1ef0] sm:$0xff]  ;;  %v12916_v28 = vcombine.low %v542_v13, %v546_v15  ;;  %v582_v13 = vld [vmem:[%s19911_s1 + $0xfd8] sm:$0xff] }
 0x45f   :  { %10616 = vmatprep.subr.bf16.mxu0 %v13395_v33  ;;  %v13426_v33 = vcombine.low %v1053_v16, %v1057_v17  ;;  %v13435_v36 = vcombine.high %v1061_v27, %v1065_v29  ;;  %v1069_v40 = vld [vmem:[%s19911_s1 + $0x1f10] sm:$0xff]  ;;  %v12924_v43 = vcombine.low %v550_v25, %v554_v26  ;;  %v586_v15 = vld [vmem:[%s19911_s1 + $0xff8] sm:$0xff] }
 0x460   :  { %v1093_v16 = vld [vmem:[%s19911_s1 + $0x1fd0] sm:$0xff]  ;;  %v590_v25 = vld [vmem:[%s19911_s1 + $0x1018] sm:$0xff] }
 0x461   :  { %10945 = vmatpush1.bf16.msra.mxu1 %v12884_v42  ;;  %v1073_v42 = vld [vmem:[%s19911_s1 + $0x1f30] sm:$0xff]  ;;  %v594_v26 = vld [vmem:[%s19911_s1 + $0x1038] sm:$0xff] }
 0x462   :  { %10617 = vmatpush1.bf16.msra.mxu0 %v13394_v44  ;;  %10946 = vmatprep.subr.bf16.mxu1 %v12893_v21  ;;  %v13434_v44 = vcombine.low %v1061_v27, %v1065_v29  ;;  %v12933_v21 = vcombine.high %v558_v37, %v562_v39  ;;  %v1097_v17 = vld [vmem:[%s19911_s1 + $0x1ff0] sm:$0xff] }
 0x463   :  { %10618 = vmatprep.subr.bf16.mxu0 %v13403_v45  ;;  %v13443_v45 = vcombine.high %v1069_v40, %v1073_v42  ;;  %v1101_v27 = vld [vmem:[%s19911_s1 + $0x2010] sm:$0xff] }
 0x464   :  { %v1105_v29 = vld [vmem:[%s19911_s1 + $0x2030] sm:$0xff] }
 0x465   :  { %10947 = vmatpush1.bf16.msra.mxu1 %v12892_v52  ;;  %v12932_v52 = vcombine.low %v558_v37, %v562_v39  ;;  %v598_v37 = vld [vmem:[%s19911_s1 + $0x1058] sm:$0xff] }
 0x466   :  { %10619 = vmatpush1.bf16.msra.mxu0 %v13402_v54  ;;  %10948 = vmatprep.subr.bf16.mxu1 %v12901_v58  ;;  %v13442_v54 = vcombine.low %v1069_v40, %v1073_v42  ;;  %v12941_v58 = vcombine.high %v566_v46, %v570_v61  ;;  %v602_v39 = vld [vmem:[%s19911_s1 + $0x1078] sm:$0xff]  ;;  %v1109_v40 = vld [vmem:[%s19911_s1 + $0x2050] sm:$0xff] }
 0x467   :  { %10620 = vmatprep.subr.bf16.mxu0 %v13411_v57  ;;  %v13451_v57 = vcombine.high %v1077_v49, %v1081_v51  ;;  %v1113_v42 = vld [vmem:[%s19911_s1 + $0x2070] sm:$0xff] }
 0x469   :  { %10949 = vmatpush1.bf16.msra.mxu1 %v12900_v63  ;;  %v12940_v63 = vcombine.low %v566_v46, %v570_v61  ;;  %v606_v46 = vld [vmem:[%s19911_s1 + $0x1098] sm:$0xff] }
 0x46a   :  { %10621 = vmatpush1.bf16.msra.mxu0 %v13410_v8  ;;  %10950 = vmatprep.subr.bf16.mxu1 %v12909_v9  ;;  %v13450_v8 = vcombine.low %v1077_v49, %v1081_v51  ;;  %v12949_v9 = vcombine.high %v574_v31, %v578_v0  ;;  %v610_v61 = vld [vmem:[%s19911_s1 + $0x10b8] sm:$0xff]  ;;  %v1117_v49 = vld [vmem:[%s19911_s1 + $0x2090] sm:$0xff] }
 0x46b   :  { %10622 = vmatprep.subr.bf16.mxu0 %v13419_v11  ;;  %v13459_v11 = vcombine.high %v1085_v2, %v1089_v6  ;;  %v1121_v51 = vld [vmem:[%s19911_s1 + $0x20b0] sm:$0xff] }
 0x46d   :  { %10951 = vmatpush1.bf16.msra.mxu1 %v12908_v18  ;;  %v12948_v18 = vcombine.low %v574_v31, %v578_v0  ;;  %v618_v31 = vld [vmem:[%s19911_s1 + $0x10f8] sm:$0xff]  ;;  %v1125_v0 = vld [vmem:[%s19911_s1 + $0x20d0] sm:$0xff] }
 0x46e   :  { %10623 = vmatpush1.bf16.msra.mxu0 %v13418_v19  ;;  %10952 = vmatprep.subr.bf16.mxu1 %v12917_v23  ;;  %v13458_v19 = vcombine.low %v1085_v2, %v1089_v6  ;;  %v12957_v23 = vcombine.high %v582_v13, %v586_v15  ;;  %v1129_v2 = vld [vmem:[%s19911_s1 + $0x20f0] sm:$0xff]  ;;  %v12980_v6 = vcombine.low %v606_v46, %v610_v61 }
 0x46f   :  { %10624 = vmatprep.subr.bf16.mxu0 %v13427_v24  ;;  %v13467_v24 = vcombine.high %v1093_v16, %v1097_v17 }
 0x471   :  { %10953 = vmatpush1.bf16.msra.mxu1 %v12916_v28  ;;  %v12956_v28 = vcombine.low %v582_v13, %v586_v15  ;;  %v626_v13 = vld [vmem:[%s19911_s1 + $0x1138] sm:$0xff]  ;;  %v1137_v15 = vld [vmem:[%s19911_s1 + $0x2130] sm:$0xff] }
 0x472   :  { %10625 = vmatpush1.bf16.msra.mxu0 %v13426_v33  ;;  %10954 = vmatprep.subr.bf16.mxu1 %v12925_v34  ;;  %v13466_v33 = vcombine.low %v1093_v16, %v1097_v17  ;;  %v12965_v34 = vcombine.high %v590_v25, %v594_v26  ;;  %v13498_v17 = vcombine.low %v1125_v0, %v1129_v2 }
 0x473   :  { %10626 = vmatprep.subr.bf16.mxu0 %v13435_v36  ;;  %v13475_v36 = vcombine.high %v1101_v27, %v1105_v29 }
 0x475   :  { %10955 = vmatpush1.bf16.msra.mxu1 %v12924_v43  ;;  %v12964_v43 = vcombine.low %v590_v25, %v594_v26  ;;  %v1141_v25 = vld [vmem:[%s19911_s1 + $0x2150] sm:$0xff] }
 0x476   :  { %10627 = vmatpush1.bf16.msra.mxu0 %v13434_v44  ;;  %10956 = vmatprep.subr.bf16.mxu1 %v12933_v21  ;;  %v13474_v44 = vcombine.low %v1101_v27, %v1105_v29  ;;  %v12973_v21 = vcombine.high %v598_v37, %v602_v39  ;;  %v1145_v26 = vld [vmem:[%s19911_s1 + $0x2170] sm:$0xff] }
 0x477   :  { %10628 = vmatprep.subr.bf16.mxu0 %v13443_v45  ;;  %v13483_v45 = vcombine.high %v1109_v40, %v1113_v42 }
 0x479   :  { %10957 = vmatpush1.bf16.msra.mxu1 %v12932_v52  ;;  %v12972_v52 = vcombine.low %v598_v37, %v602_v39  ;;  %v1149_v37 = vld [vmem:[%s19911_s1 + $0x2190] sm:$0xff] }
 0x47a   :  { %10629 = vmatpush1.bf16.msra.mxu0 %v13442_v54  ;;  %10958 = vmatprep.subr.bf16.mxu1 %v12941_v58  ;;  %v13482_v54 = vcombine.low %v1109_v40, %v1113_v42  ;;  %v12981_v58 = vcombine.high %v606_v46, %v610_v61  ;;  %v1153_v39 = vld [vmem:[%s19911_s1 + $0x21b0] sm:$0xff]  ;;  %v13514_v42 = vcombine.low %v1141_v25, %v1145_v26 }
 0x47b   :  { %10630 = vmatprep.subr.bf16.mxu0 %v13451_v57  ;;  %v13491_v57 = vcombine.high %v1117_v49, %v1121_v51  ;;  %v1157_v46 = vld [vmem:[%s19911_s1 + $0x21d0] sm:$0xff] }
 0x47c   :  { %v1161_v61 = vld [vmem:[%s19911_s1 + $0x21f0] sm:$0xff] }
 0x47d   :  { %10959 = vmatpush1.bf16.msra.mxu1 %v12940_v63  ;;  %v13490_v63 = vcombine.low %v1117_v49, %v1121_v51  ;;  %v13522_v51 = vcombine.low %v1149_v37, %v1153_v39 }
 0x47e   :  { %10631 = vmatpush1.bf16.msra.mxu0 %v13450_v8  ;;  %10960 = vmatprep.subr.bf16.mxu1 %v12949_v9  ;;  %v13499_v9 = vcombine.high %v1125_v0, %v1129_v2  ;;  %v13530_v2 = vcombine.low %v1157_v46, %v1161_v61 }
 0x47f   :  { %10632 = vmatprep.subr.bf16.mxu0 %v13459_v11  ;;  %v622_v11 = vld [vmem:[%s19911_s1 + $0x1118] sm:$0xff] }
 0x480   :  { %v12996_v27 = vcombine.low %v622_v11, %v626_v13 }
 0x481   :  { %10961 = vmatpush1.bf16.msra.mxu1 %v12948_v18  ;;  %v12997_v18 = vcombine.high %v622_v11, %v626_v13  ;;  %v1173_v11 = vld [vmem:[%s19911_s1 + $0x2250] sm:$0xff] }
 0x482   :  { %10633 = vmatpush1.bf16.msra.mxu0 %v13458_v19  ;;  %10962 = vmatprep.subr.bf16.mxu1 %v12957_v23  ;;  %v630_v23 = vld [vmem:[%s19911_s1 + $0x1158] sm:$0xff]  ;;  %v1177_v13 = vld [vmem:[%s19911_s1 + $0x2270] sm:$0xff] }
 0x483   :  { %10634 = vmatprep.subr.bf16.mxu0 %v13467_v24  ;;  %v634_v24 = vld [vmem:[%s19911_s1 + $0x1178] sm:$0xff] }
 0x484   :  { %v13004_v40 = vcombine.low %v630_v23, %v634_v24 }
 0x485   :  { %10963 = vmatpush1.bf16.msra.mxu1 %v12956_v28  ;;  %v13005_v28 = vcombine.high %v630_v23, %v634_v24  ;;  %v1181_v23 = vld [vmem:[%s19911_s1 + $0x2290] sm:$0xff] }
 0x486   :  { %10635 = vmatpush1.bf16.msra.mxu0 %v13466_v33  ;;  %10973 = vmatprep.subr.bf16.mxu1 %v12965_v34  ;;  %v13515_v33 = vcombine.high %v1141_v25, %v1145_v26  ;;  %v638_v34 = vld [vmem:[%s19911_s1 + $0x1198] sm:$0xff]  ;;  %v1185_v24 = vld [vmem:[%s19911_s1 + $0x22b0] sm:$0xff]  ;;  %v13546_v26 = vcombine.low %v1173_v11, %v1177_v13 }
 0x487   :  { %10645 = vmatprep.subr.bf16.mxu0 %v13475_v36  ;;  %v642_v36 = vld [vmem:[%s19911_s1 + $0x11b8] sm:$0xff] }
 0x488   :  { %10965 = vmatmul.mubr.bf16.vlgmr.msra.gmra.mrb[8].mxu1 %v15050_v41  ;;  %v614_v41 = vld [vmem:[%s19911_s1 + $0x10d8] sm:$0xff]  ;;  %v13012_v49 = vcombine.low %v638_v34, %v642_v36 }
 0x489   :  { %10637 = vmatmul.mubr.bf16.vlgmr.msra.gmra.mrb[4].mxu0 %v15878_v53  ;;  %10974 = vmatpush1.bf16.msra.mxu1 %v12964_v43  ;;  %v12989_v8 = vcombine.high %v614_v41, %v618_v31  ;;  %v12988_v16 = vcombine.low %v614_v41, %v618_v31  ;;  %v13013_v43 = vcombine.high %v638_v34, %v642_v36  ;;  %v1165_v41 = vld [vmem:[%s19911_s1 + $0x2210] sm:$0xff] }
 0x48a   :  { %10646 = vmatpush1.bf16.msra.mxu0 %v13474_v44  ;;  %10975 = vmatprep.subr.bf16.mxu1 %v12973_v21  ;;  %v13523_v44 = vcombine.high %v1149_v37, %v1153_v39  ;;  %v646_v21 = vld [vmem:[%s19911_s1 + $0x11d8] sm:$0xff]  ;;  %v1169_v31 = vld [vmem:[%s19911_s1 + $0x2230] sm:$0xff]  ;;  %v13554_v39 = vcombine.low %v1181_v23, %v1185_v24 }
 0x48b   :  { %10647 = vmatprep.subr.bf16.mxu0 %v13483_v45  ;;  %10677 = vmatprep.mubr.bf16.mxu0 %v15886_v62  ;;  %v650_v45 = vld [vmem:[%s19911_s1 + $0x11f8] sm:$0xff]  ;;  %v1189_v34 = vld [vmem:[%s19911_s1 + $0x22d0] sm:$0xff] }
 0x48c   :  { %11005 = vmatprep.mubr.bf16.mxu1 %v15058_v47  ;;  %v1133_v47 = vld [vmem:[%s19911_s1 + $0x2110] sm:$0xff]  ;;  %v13020_v0 = vcombine.low %v646_v21, %v650_v45 }
 0x48d   :  { %10976 = vmatpush1.bf16.msra.mxu1 %v12972_v52  ;;  %v13507_v19 = vcombine.high %v1133_v47, %v1137_v15  ;;  %v13506_v29 = vcombine.low %v1133_v47, %v1137_v15  ;;  %v13021_v52 = vcombine.high %v646_v21, %v650_v45  ;;  %v13538_v15 = vcombine.low %v1165_v41, %v1169_v31  ;;  %v1193_v36 = vld [vmem:[%s19911_s1 + $0x22f0] sm:$0xff] }
 0x48e   :  { %10648 = vmatpush1.bf16.msra.mxu0 %v13482_v54  ;;  %10977 = vmatprep.subr.bf16.mxu1 %v12981_v58  ;;  %v13531_v54 = vcombine.high %v1157_v46, %v1161_v61  ;;  %v654_v58 = vld [vmem:[%s19911_s1 + $0x1218] sm:$0xff]  ;;  %v1197_v21 = vld [vmem:[%s19911_s1 + $0x2310] sm:$0xff]  ;;  %v13562_v61 = vcombine.low %v1189_v34, %v1193_v36 }
 0x48f   :  { %10649 = vmatprep.subr.bf16.mxu0 %v13491_v57  ;;  %v658_v57 = vld [vmem:[%s19911_s1 + $0x1238] sm:$0xff]  ;;  %v1201_v45 = vld [vmem:[%s19911_s1 + $0x2330] sm:$0xff] }
 0x490   :  { %v13028_v47 = vcombine.low %v654_v58, %v658_v57 }
 0x491   :  { %10978 = vmatpush1.bf16.msra.mxu1 %v12980_v6  ;;  %v13029_v6 = vcombine.high %v654_v58, %v658_v57  ;;  %v1205_v58 = vld [vmem:[%s19911_s1 + $0x2350] sm:$0xff] }
 0x492   :  { %10650 = vmatpush1.bf16.msra.mxu0 %v13490_v63  ;;  %10979 = vmatprep.subr.bf16.mxu1 %v12989_v8  ;;  %v13539_v63 = vcombine.high %v1165_v41, %v1169_v31  ;;  %v662_v8 = vld [vmem:[%s19911_s1 + $0x1258] sm:$0xff]  ;;  %v1209_v57 = vld [vmem:[%s19911_s1 + $0x2370] sm:$0xff]  ;;  %v13570_v31 = vcombine.low %v1197_v21, %v1201_v45 }
 0x493   :  { %10651 = vmatprep.subr.bf16.mxu0 %v13499_v9  ;;  %v666_v9 = vld [vmem:[%s19911_s1 + $0x1278] sm:$0xff] }
 0x494   :  { %v13036_v25 = vcombine.low %v662_v8, %v666_v9 }
 0x495   :  { %10980 = vmatpush1.bf16.msra.mxu1 %v12988_v16  ;;  %v13037_v16 = vcombine.high %v662_v8, %v666_v9  ;;  %v1213_v8 = vld [vmem:[%s19911_s1 + $0x2390] sm:$0xff] }
 0x496   :  { %10652 = vmatpush1.bf16.msra.mxu0 %v13498_v17  ;;  %10981 = vmatprep.subr.bf16.mxu1 %v12997_v18  ;;  %v13547_v17 = vcombine.high %v1173_v11, %v1177_v13  ;;  %v670_v18 = vld [vmem:[%s19911_s1 + $0x1298] sm:$0xff]  ;;  %v1217_v9 = vld [vmem:[%s19911_s1 + $0x23b0] sm:$0xff]  ;;  %v13578_v13 = vcombine.low %v1205_v58, %v1209_v57 }
 0x497   :  { %10653 = vmatprep.subr.bf16.mxu0 %v13507_v19  ;;  %v674_v19 = vld [vmem:[%s19911_s1 + $0x12b8] sm:$0xff] }
 0x498   :  { %v13044_v37 = vcombine.low %v670_v18, %v674_v19 }
 0x499   :  { %10982 = vmatpush1.bf16.msra.mxu1 %v12996_v27  ;;  %v13045_v27 = vcombine.high %v670_v18, %v674_v19  ;;  %v1221_v18 = vld [vmem:[%s19911_s1 + $0x23d0] sm:$0xff] }
 0x49a   :  { %10654 = vmatpush1.bf16.msra.mxu0 %v13506_v29  ;;  %10983 = vmatprep.subr.bf16.mxu1 %v13005_v28  ;;  %v13555_v29 = vcombine.high %v1181_v23, %v1185_v24  ;;  %v678_v28 = vld [vmem:[%s19911_s1 + $0x12d8] sm:$0xff]  ;;  %v1225_v19 = vld [vmem:[%s19911_s1 + $0x23f0] sm:$0xff]  ;;  %v13586_v24 = vcombine.low %v1213_v8, %v1217_v9 }
 0x49b   :  { %10655 = vmatprep.subr.bf16.mxu0 %v13515_v33  ;;  %v682_v33 = vld [vmem:[%s19911_s1 + $0x12f8] sm:$0xff] }
 0x49c   :  { %v13052_v46 = vcombine.low %v678_v28, %v682_v33 }
 0x49d   :  { %10984 = vmatpush1.bf16.msra.mxu1 %v13004_v40  ;;  %v13053_v40 = vcombine.high %v678_v28, %v682_v33  ;;  %v1229_v28 = vld [vmem:[%s19911_s1 + $0x2410] sm:$0xff] }
 0x49e   :  { %10656 = vmatpush1.bf16.msra.mxu0 %v13514_v42  ;;  %10985 = vmatprep.subr.bf16.mxu1 %v13013_v43  ;;  %v13563_v42 = vcombine.high %v1189_v34, %v1193_v36  ;;  %v686_v43 = vld [vmem:[%s19911_s1 + $0x1318] sm:$0xff]  ;;  %v1233_v33 = vld [vmem:[%s19911_s1 + $0x2430] sm:$0xff]  ;;  %v13594_v36 = vcombine.low %v1221_v18, %v1225_v19 }
 0x49f   :  { %10657 = vmatprep.subr.bf16.mxu0 %v13523_v44  ;;  %v690_v44 = vld [vmem:[%s19911_s1 + $0x1338] sm:$0xff] }
 0x4a0   :  { %v13060_v41 = vcombine.low %v686_v43, %v690_v44 }
 0x4a1   :  { %10986 = vmatpush1.bf16.msra.mxu1 %v13012_v49  ;;  %v13061_v49 = vcombine.high %v686_v43, %v690_v44  ;;  %v1237_v43 = vld [vmem:[%s19911_s1 + $0x2450] sm:$0xff] }
 0x4a2   :  { %10658 = vmatpush1.bf16.msra.mxu0 %v13522_v51  ;;  %10987 = vmatprep.subr.bf16.mxu1 %v13021_v52  ;;  %v13571_v51 = vcombine.high %v1197_v21, %v1201_v45  ;;  %v694_v52 = vld [vmem:[%s19911_s1 + $0x1358] sm:$0xff]  ;;  %v1241_v44 = vld [vmem:[%s19911_s1 + $0x2470] sm:$0xff]  ;;  %v13602_v45 = vcombine.low %v1229_v28, %v1233_v33 }
 0x4a3   :  { %10659 = vmatprep.subr.bf16.mxu0 %v13531_v54  ;;  %v698_v54 = vld [vmem:[%s19911_s1 + $0x1378] sm:$0xff] }
 0x4a4   :  { %v13068_v11 = vcombine.low %v694_v52, %v698_v54 }
 0x4a5   :  { %10988 = vmatpush1.bf16.msra.mxu1 %v13020_v0  ;;  %v13069_v0 = vcombine.high %v694_v52, %v698_v54  ;;  %v1245_v52 = vld [vmem:[%s19911_s1 + $0x2490] sm:$0xff] }
 0x4a6   :  { %10660 = vmatpush1.bf16.msra.mxu0 %v13530_v2  ;;  %10989 = vmatprep.subr.bf16.mxu1 %v13029_v6  ;;  %v13579_v2 = vcombine.high %v1205_v58, %v1209_v57  ;;  %v702_v6 = vld [vmem:[%s19911_s1 + $0x1398] sm:$0xff]  ;;  %v1249_v54 = vld [vmem:[%s19911_s1 + $0x24b0] sm:$0xff]  ;;  %v13610_v57 = vcombine.low %v1237_v43, %v1241_v44 }
 0x4a7   :  { %10661 = vmatprep.subr.bf16.mxu0 %v13539_v63  ;;  %v706_v63 = vld [vmem:[%s19911_s1 + $0x13b8] sm:$0xff] }
 0x4a8   :  { %v13076_v23 = vcombine.low %v702_v6, %v706_v63 }
 0x4a9   :  { %10990 = vmatpush1.bf16.msra.mxu1 %v13028_v47  ;;  %v13077_v47 = vcombine.high %v702_v6, %v706_v63  ;;  %v1257_v6 = vld [vmem:[%s19911_s1 + $0x24f0] sm:$0xff] }
 0x4aa   :  { %10662 = vmatpush1.bf16.msra.mxu0 %v13538_v15  ;;  %10991 = vmatprep.subr.bf16.mxu1 %v13037_v16  ;;  %v13587_v15 = vcombine.high %v1213_v8, %v1217_v9  ;;  %v710_v16 = vld [vmem:[%s19911_s1 + $0x13d8] sm:$0xff]  ;;  %v13618_v8 = vcombine.low %v1245_v52, %v1249_v54 }
 0x4ab   :  { %10663 = vmatprep.subr.bf16.mxu0 %v13547_v17  ;;  %v714_v17 = vld [vmem:[%s19911_s1 + $0x13f8] sm:$0xff] }
 0x4ac   :  { %v13084_v34 = vcombine.low %v710_v16, %v714_v17 }
 0x4ad   :  { %10992 = vmatpush1.bf16.msra.mxu1 %v13036_v25  ;;  %v13085_v25 = vcombine.high %v710_v16, %v714_v17 }
 0x4ae   :  { %10664 = vmatpush1.bf16.msra.mxu0 %v13546_v26  ;;  %10993 = vmatprep.subr.bf16.mxu1 %v13045_v27  ;;  %v13595_v26 = vcombine.high %v1221_v18, %v1225_v19  ;;  %v718_v27 = vld [vmem:[%s19911_s1 + $0x1418] sm:$0xff] }
 0x4af   :  { %10665 = vmatprep.subr.bf16.mxu0 %v13555_v29  ;;  %v722_v29 = vld [vmem:[%s19911_s1 + $0x1438] sm:$0xff] }
 0x4b0   :  { %v13092_v21 = vcombine.low %v718_v27, %v722_v29 }
 0x4b1   :  { %10994 = vmatpush1.bf16.msra.mxu1 %v13044_v37  ;;  %v13093_v37 = vcombine.high %v718_v27, %v722_v29 }
 0x4b2   :  { %10666 = vmatpush1.bf16.msra.mxu0 %v13554_v39  ;;  %10995 = vmatprep.subr.bf16.mxu1 %v13053_v40  ;;  %v13603_v39 = vcombine.high %v1229_v28, %v1233_v33  ;;  %v726_v40 = vld [vmem:[%s19911_s1 + $0x1458] sm:$0xff] }
 0x4b3   :  { %10667 = vmatprep.subr.bf16.mxu0 %v13563_v42  ;;  %v730_v42 = vld [vmem:[%s19911_s1 + $0x1478] sm:$0xff] }
 0x4b4   :  { %v13100_v58 = vcombine.low %v726_v40, %v730_v42 }
 0x4b5   :  { %10996 = vmatpush1.bf16.msra.mxu1 %v13052_v46  ;;  %v13101_v46 = vcombine.high %v726_v40, %v730_v42 }
 0x4b6   :  { %10668 = vmatpush1.bf16.msra.mxu0 %v13562_v61  ;;  %10997 = vmatprep.subr.bf16.mxu1 %v13061_v49  ;;  %v13611_v61 = vcombine.high %v1237_v43, %v1241_v44  ;;  %v734_v49 = vld [vmem:[%s19911_s1 + $0x1498] sm:$0xff] }
 0x4b7   :  { %10669 = vmatprep.subr.bf16.mxu0 %v13571_v51  ;;  %v738_v51 = vld [vmem:[%s19911_s1 + $0x14b8] sm:$0xff] }
 0x4b8   :  { %v13108_v63 = vcombine.low %v734_v49, %v738_v51 }
 0x4b9   :  { %10998 = vmatpush1.bf16.msra.mxu1 %v13060_v41  ;;  %v13109_v41 = vcombine.high %v734_v49, %v738_v51 }
 0x4ba   :  { %10670 = vmatpush1.bf16.msra.mxu0 %v13570_v31  ;;  %10999 = vmatprep.subr.bf16.mxu1 %v13069_v0  ;;  %v13619_v31 = vcombine.high %v1245_v52, %v1249_v54  ;;  %v746_v0 = vld [vmem:[%s19911_s1 + $0x14f8] sm:$0xff] }
 0x4bb   :  { %10671 = vmatprep.subr.bf16.mxu0 %v13579_v2  ;;  %v1253_v2 = vld [vmem:[%s19911_s1 + $0x24d0] sm:$0xff] }
 0x4bc   :  { %v13626_v17 = vcombine.low %v1253_v2, %v1257_v6 }
 0x4bd   :  { %11000 = vmatpush1.bf16.msra.mxu1 %v13068_v11  ;;  %v13627_v11 = vcombine.high %v1253_v2, %v1257_v6 }
 0x4be   :  { %10672 = vmatpush1.bf16.msra.mxu0 %v13578_v13  ;;  %11001 = vmatprep.subr.bf16.mxu1 %v13077_v47  ;;  %v750_v13 = vld [vmem:[%s19911_s1 + $0x1518] sm:$0xff] }
 0x4bf   :  { %10673 = vmatprep.subr.bf16.mxu0 %v13587_v15  ;;  %v754_v47 = vld [vmem:[%s19911_s1 + $0x1538] sm:$0xff]  ;;  %v1265_v15 = vld [vmem:[%s19911_s1 + $0x2530] sm:$0xff] }
 0x4c0   :  { %v13125_v18 = vcombine.high %v750_v13, %v754_v47  ;;  %v13124_v27 = vcombine.low %v750_v13, %v754_v47 }
 0x4c1   :  { %11002 = vmatpush1.bf16.msra.mxu1 %v13076_v23  ;;  %v758_v23 = vld [vmem:[%s19911_s1 + $0x1558] sm:$0xff] }
 0x4c2   :  { %10674 = vmatpush1.bf16.msra.mxu0 %v13586_v24  ;;  %11003 = vmatprep.subr.bf16.mxu1 %v13085_v25  ;;  %v762_v24 = vld [vmem:[%s19911_s1 + $0x1578] sm:$0xff]  ;;  %v1269_v25 = vld [vmem:[%s19911_s1 + $0x2550] sm:$0xff] }
 0x4c3   :  { %10675 = vmatprep.subr.bf16.mxu0 %v13595_v26  ;;  %v1273_v26 = vld [vmem:[%s19911_s1 + $0x2570] sm:$0xff]  ;;  %v13133_v28 = vcombine.high %v758_v23, %v762_v24  ;;  %v13132_v40 = vcombine.low %v758_v23, %v762_v24 }
 0x4c4   :  { %v13643_v33 = vcombine.high %v1269_v25, %v1273_v26  ;;  %v13642_v42 = vcombine.low %v1269_v25, %v1273_v26 }
 0x4c5   :  { %11004 = vmatpush1.bf16.msra.mxu1 %v13084_v34  ;;  %v766_v34 = vld [vmem:[%s19911_s1 + $0x1598] sm:$0xff] }
 0x4c6   :  { %10676 = vmatpush1.bf16.msra.mxu0 %v13594_v36  ;;  %11014 = vmatprep.subr.bf16.mxu1 %v13093_v37  ;;  %v770_v36 = vld [vmem:[%s19911_s1 + $0x15b8] sm:$0xff]  ;;  %v1277_v37 = vld [vmem:[%s19911_s1 + $0x2590] sm:$0xff] }
 0x4c7   :  { %10686 = vmatprep.subr.bf16.mxu0 %v13603_v39  ;;  %v1281_v39 = vld [vmem:[%s19911_s1 + $0x25b0] sm:$0xff]  ;;  %v13141_v43 = vcombine.high %v766_v34, %v770_v36  ;;  %v13140_v49 = vcombine.low %v766_v34, %v770_v36 }
 0x4c8   :  { %11006 = vmatmul.mubr.bf16.vlgmr.msra.gmra.mrb[8].mxu1 %v15256_v1  ;;  %v742_v1 = vld [vmem:[%s19911_s1 + $0x14d8] sm:$0xff]  ;;  %v13651_v44 = vcombine.high %v1277_v37, %v1281_v39  ;;  %v13650_v51 = vcombine.low %v1277_v37, %v1281_v39 }
 0x4c9   :  { %10678 = vmatmul.mubr.bf16.vlgmr.msra.gmra.mrb[4].mxu0 %v16084_v48  ;;  %11015 = vmatpush1.bf16.msra.mxu1 %v13092_v21  ;;  %v13117_v9 = vcombine.high %v742_v1, %v746_v0  ;;  %v13116_v16 = vcombine.low %v742_v1, %v746_v0  ;;  %v774_v21 = vld [vmem:[%s19911_s1 + $0x15d8] sm:$0xff] }
 0x4ca   :  { %10687 = vmatpush1.bf16.msra.mxu0 %v13602_v45  ;;  %11016 = vmatprep.subr.bf16.mxu1 %v13101_v46  ;;  %v778_v45 = vld [vmem:[%s19911_s1 + $0x15f8] sm:$0xff]  ;;  %v1285_v46 = vld [vmem:[%s19911_s1 + $0x25d0] sm:$0xff] }
 0x4cb   :  { %10688 = vmatprep.subr.bf16.mxu0 %v13611_v61  ;;  %10718 = vmatprep.mubr.bf16.mxu0 %v16092_v55  ;;  %v1289_v61 = vld [vmem:[%s19911_s1 + $0x25f0] sm:$0xff]  ;;  %v13149_v52 = vcombine.high %v774_v21, %v778_v45  ;;  %v13148_v1 = vcombine.low %v774_v21, %v778_v45 }
 0x4cc   :  { %11046 = vmatprep.mubr.bf16.mxu1 %v15264_v7  ;;  %v1261_v7 = vld [vmem:[%s19911_s1 + $0x2510] sm:$0xff]  ;;  %v13659_v54 = vcombine.high %v1285_v46, %v1289_v61  ;;  %v13658_v0 = vcombine.low %v1285_v46, %v1289_v61 }
 0x4cd   :  { %11017 = vmatpush1.bf16.msra.mxu1 %v13100_v58  ;;  %v13635_v19 = vcombine.high %v1261_v7, %v1265_v15  ;;  %v13634_v29 = vcombine.low %v1261_v7, %v1265_v15  ;;  %v782_v58 = vld [vmem:[%s19911_s1 + $0x1618] sm:$0xff] }
 0x4ce   :  { %10689 = vmatpush1.bf16.msra.mxu0 %v13610_v57  ;;  %11018 = vmatprep.subr.bf16.mxu1 %v13109_v41  ;;  %v786_v57 = vld [vmem:[%s19911_s1 + $0x1638] sm:$0xff]  ;;  %v1293_v41 = vld [vmem:[%s19911_s1 + $0x2610] sm:$0xff] }
 0x4cf   :  { %10690 = vmatprep.subr.bf16.mxu0 %v13619_v31  ;;  %v1297_v31 = vld [vmem:[%s19911_s1 + $0x2630] sm:$0xff]  ;;  %v13157_v2 = vcombine.high %v782_v58, %v786_v57  ;;  %v13156_v13 = vcombine.low %v782_v58, %v786_v57 }
 0x4d0   :  { %v13667_v6 = vcombine.high %v1293_v41, %v1297_v31  ;;  %v13666_v47 = vcombine.low %v1293_v41, %v1297_v31 }
 0x4d1   :  { %11019 = vmatpush1.bf16.msra.mxu1 %v13108_v63  ;;  %v790_v63 = vld [vmem:[%s19911_s1 + $0x1658] sm:$0xff] }
 0x4d2   :  { %10691 = vmatpush1.bf16.msra.mxu0 %v13618_v8  ;;  %11020 = vmatprep.subr.bf16.mxu1 %v13117_v9  ;;  %v794_v8 = vld [vmem:[%s19911_s1 + $0x1678] sm:$0xff]  ;;  %v1301_v9 = vld [vmem:[%s19911_s1 + $0x2650] sm:$0xff] }
 0x4d3   :  { %10692 = vmatprep.subr.bf16.mxu0 %v13627_v11  ;;  %v1305_v11 = vld [vmem:[%s19911_s1 + $0x2670] sm:$0xff]  ;;  %v13165_v7 = vcombine.high %v790_v63, %v794_v8  ;;  %v13164_v23 = vcombine.low %v790_v63, %v794_v8 }
 0x4d4   :  { %v13675_v15 = vcombine.high %v1301_v9, %v1305_v11  ;;  %v13674_v24 = vcombine.low %v1301_v9, %v1305_v11 }
 0x4d5   :  { %11021 = vmatpush1.bf16.msra.mxu1 %v13116_v16  ;;  %v798_v16 = vld [vmem:[%s19911_s1 + $0x1698] sm:$0xff] }
 0x4d6   :  { %10693 = vmatpush1.bf16.msra.mxu0 %v13626_v17  ;;  %11022 = vmatprep.subr.bf16.mxu1 %v13125_v18  ;;  %v802_v17 = vld [vmem:[%s19911_s1 + $0x16b8] sm:$0xff]  ;;  %v1309_v18 = vld [vmem:[%s19911_s1 + $0x2690] sm:$0xff] }
 0x4d7   :  { %10694 = vmatprep.subr.bf16.mxu0 %v13635_v19  ;;  %v1313_v19 = vld [vmem:[%s19911_s1 + $0x26b0] sm:$0xff]  ;;  %v13173_v25 = vcombine.high %v798_v16, %v802_v17  ;;  %v13172_v34 = vcombine.low %v798_v16, %v802_v17 }
 0x4d8   :  { %v13683_v26 = vcombine.high %v1309_v18, %v1313_v19  ;;  %v13682_v36 = vcombine.low %v1309_v18, %v1313_v19 }
 0x4d9   :  { %11023 = vmatpush1.bf16.msra.mxu1 %v13124_v27  ;;  %v806_v27 = vld [vmem:[%s19911_s1 + $0x16d8] sm:$0xff] }
 0x4da   :  { %10695 = vmatpush1.bf16.msra.mxu0 %v13634_v29  ;;  %11024 = vmatprep.subr.bf16.mxu1 %v13133_v28  ;;  %v810_v29 = vld [vmem:[%s19911_s1 + $0x16f8] sm:$0xff]  ;;  %v1317_v28 = vld [vmem:[%s19911_s1 + $0x26d0] sm:$0xff] }
 0x4db   :  { %10696 = vmatprep.subr.bf16.mxu0 %v13643_v33  ;;  %v1321_v33 = vld [vmem:[%s19911_s1 + $0x26f0] sm:$0xff]  ;;  %v13181_v37 = vcombine.high %v806_v27, %v810_v29  ;;  %v13180_v21 = vcombine.low %v806_v27, %v810_v29 }
 0x4dc   :  { %v13691_v39 = vcombine.high %v1317_v28, %v1321_v33  ;;  %v13690_v45 = vcombine.low %v1317_v28, %v1321_v33 }
 0x4dd   :  { %11025 = vmatpush1.bf16.msra.mxu1 %v13132_v40  ;;  %v814_v40 = vld [vmem:[%s19911_s1 + $0x1718] sm:$0xff] }
 0x4de   :  { %10697 = vmatpush1.bf16.msra.mxu0 %v13642_v42  ;;  %11026 = vmatprep.subr.bf16.mxu1 %v13141_v43  ;;  %v818_v42 = vld [vmem:[%s19911_s1 + $0x1738] sm:$0xff]  ;;  %v1325_v43 = vld [vmem:[%s19911_s1 + $0x2710] sm:$0xff] }
 0x4df   :  { %10698 = vmatprep.subr.bf16.mxu0 %v13651_v44  ;;  %v1329_v44 = vld [vmem:[%s19911_s1 + $0x2730] sm:$0xff]  ;;  %v13189_v46 = vcombine.high %v814_v40, %v818_v42  ;;  %v13188_v58 = vcombine.low %v814_v40, %v818_v42 }
 0x4e0   :  { %v13699_v61 = vcombine.high %v1325_v43, %v1329_v44  ;;  %v13698_v57 = vcombine.low %v1325_v43, %v1329_v44  ;;  %v1373_v44 = vld [vmem:[%s19911_s1 + $0x2890] sm:$0xff] }
 0x4e1   :  { %11027 = vmatpush1.bf16.msra.mxu1 %v13140_v49  ;;  %v822_v49 = vld [vmem:[%s19911_s1 + $0x1758] sm:$0xff] }
 0x4e2   :  { %10699 = vmatpush1.bf16.msra.mxu0 %v13650_v51  ;;  %11028 = vmatprep.subr.bf16.mxu1 %v13149_v52  ;;  %v826_v51 = vld [vmem:[%s19911_s1 + $0x1778] sm:$0xff]  ;;  %v1333_v52 = vld [vmem:[%s19911_s1 + $0x2750] sm:$0xff] }
 0x4e3   :  { %10700 = vmatprep.subr.bf16.mxu0 %v13659_v54  ;;  %v1337_v54 = vld [vmem:[%s19911_s1 + $0x2770] sm:$0xff]  ;;  %v13197_v41 = vcombine.high %v822_v49, %v826_v51  ;;  %v13196_v63 = vcombine.low %v822_v49, %v826_v51 }
 0x4e4   :  { %v13707_v31 = vcombine.high %v1333_v52, %v1337_v54  ;;  %v13706_v8 = vcombine.low %v1333_v52, %v1337_v54  ;;  %v1381_v54 = vld [vmem:[%s19911_s1 + $0x28d0] sm:$0xff] }
 0x4e5   :  { %11029 = vmatpush1.bf16.msra.mxu1 %v13148_v1  ;;  %v830_v1 = vld [vmem:[%s19911_s1 + $0x1798] sm:$0xff] }
 0x4e6   :  { %10701 = vmatpush1.bf16.msra.mxu0 %v13658_v0  ;;  %11030 = vmatprep.subr.bf16.mxu1 %v13157_v2  ;;  %v834_v0 = vld [vmem:[%s19911_s1 + $0x17b8] sm:$0xff]  ;;  %v1341_v2 = vld [vmem:[%s19911_s1 + $0x2790] sm:$0xff] }
 0x4e7   :  { %10702 = vmatprep.subr.bf16.mxu0 %v13667_v6  ;;  %v1345_v6 = vld [vmem:[%s19911_s1 + $0x27b0] sm:$0xff]  ;;  %v13205_v9 = vcombine.high %v830_v1, %v834_v0  ;;  %v13204_v16 = vcombine.low %v830_v1, %v834_v0 }
 0x4e8   :  { %v13715_v11 = vcombine.high %v1341_v2, %v1345_v6  ;;  %v13714_v17 = vcombine.low %v1341_v2, %v1345_v6  ;;  %v1389_v2 = vld [vmem:[%s19911_s1 + $0x2910] sm:$0xff] }
 0x4e9   :  { %11031 = vmatpush1.bf16.msra.mxu1 %v13156_v13  ;;  %v838_v13 = vld [vmem:[%s19911_s1 + $0x17d8] sm:$0xff]  ;;  %v1393_v6 = vld [vmem:[%s19911_s1 + $0x2930] sm:$0xff] }
 0x4ea   :  { %10703 = vmatpush1.bf16.msra.mxu0 %v13666_v47  ;;  %11032 = vmatprep.subr.bf16.mxu1 %v13165_v7  ;;  %v842_v47 = vld [vmem:[%s19911_s1 + $0x17f8] sm:$0xff]  ;;  %v1349_v7 = vld [vmem:[%s19911_s1 + $0x27d0] sm:$0xff] }
 0x4eb   :  { %10704 = vmatprep.subr.bf16.mxu0 %v13675_v15  ;;  %v1353_v15 = vld [vmem:[%s19911_s1 + $0x27f0] sm:$0xff]  ;;  %v13213_v18 = vcombine.high %v838_v13, %v842_v47  ;;  %v13212_v27 = vcombine.low %v838_v13, %v842_v47 }
 0x4ec   :  { %v13723_v19 = vcombine.high %v1349_v7, %v1353_v15  ;;  %v13722_v29 = vcombine.low %v1349_v7, %v1353_v15  ;;  %v1397_v47 = vld [vmem:[%s19911_s1 + $0x2950] sm:$0xff]  ;;  %v886_v15 = vld [vmem:[%s19911_s1 + $0x1958] sm:$0xff] }
 0x4ed   :  { %11033 = vmatpush1.bf16.msra.mxu1 %v13164_v23  ;;  %v846_v23 = vld [vmem:[%s19911_s1 + $0x1818] sm:$0xff]  ;;  %v1401_v7 = vld [vmem:[%s19911_s1 + $0x2970] sm:$0xff] }
 0x4ee   :  { %10705 = vmatpush1.bf16.msra.mxu0 %v13674_v24  ;;  %11034 = vmatprep.subr.bf16.mxu1 %v13173_v25  ;;  %v850_v24 = vld [vmem:[%s19911_s1 + $0x1838] sm:$0xff]  ;;  %v1357_v25 = vld [vmem:[%s19911_s1 + $0x2810] sm:$0xff] }
 0x4ef   :  { %10706 = vmatprep.subr.bf16.mxu0 %v13683_v26  ;;  %v1361_v26 = vld [vmem:[%s19911_s1 + $0x2830] sm:$0xff]  ;;  %v13221_v28 = vcombine.high %v846_v23, %v850_v24  ;;  %v13220_v40 = vcombine.low %v846_v23, %v850_v24 }
 0x4f0   :  { %v13731_v33 = vcombine.high %v1357_v25, %v1361_v26  ;;  %v13730_v42 = vcombine.low %v1357_v25, %v1361_v26  ;;  %v1405_v24 = vld [vmem:[%s19911_s1 + $0x2990] sm:$0xff]  ;;  %v894_v26 = vld [vmem:[%s19911_s1 + $0x1998] sm:$0xff] }
 0x4f1   :  { %11035 = vmatpush1.bf16.msra.mxu1 %v13172_v34  ;;  %v854_v34 = vld [vmem:[%s19911_s1 + $0x1858] sm:$0xff]  ;;  %v1409_v25 = vld [vmem:[%s19911_s1 + $0x29b0] sm:$0xff] }
 0x4f2   :  { %10707 = vmatpush1.bf16.msra.mxu0 %v13682_v36  ;;  %11036 = vmatprep.subr.bf16.mxu1 %v13181_v37  ;;  %v858_v36 = vld [vmem:[%s19911_s1 + $0x1878] sm:$0xff]  ;;  %v1365_v37 = vld [vmem:[%s19911_s1 + $0x2850] sm:$0xff] }
 0x4f3   :  { %10708 = vmatprep.subr.bf16.mxu0 %v13691_v39  ;;  %v1369_v39 = vld [vmem:[%s19911_s1 + $0x2870] sm:$0xff]  ;;  %v13229_v43 = vcombine.high %v854_v34, %v858_v36  ;;  %v13228_v49 = vcombine.low %v854_v34, %v858_v36 }
 0x4f4   :  { %v13738_v51 = vcombine.low %v1365_v37, %v1369_v39  ;;  %v1413_v36 = vld [vmem:[%s19911_s1 + $0x29d0] sm:$0xff] }
 0x4f5   :  { %11037 = vmatpush1.bf16.msra.mxu1 %v13180_v21  ;;  %v862_v21 = vld [vmem:[%s19911_s1 + $0x1898] sm:$0xff] }
 0x4f6   :  { %10709 = vmatpush1.bf16.msra.mxu0 %v13690_v45  ;;  %11038 = vmatprep.subr.bf16.mxu1 %v13189_v46  ;;  %v13739_v45 = vcombine.high %v1365_v37, %v1369_v39  ;;  %v866_v46 = vld [vmem:[%s19911_s1 + $0x18b8] sm:$0xff]  ;;  %v1417_v37 = vld [vmem:[%s19911_s1 + $0x29f0] sm:$0xff] }
 0x4f7   :  { %10710 = vmatprep.subr.bf16.mxu0 %v13699_v61  ;;  %v1377_v61 = vld [vmem:[%s19911_s1 + $0x28b0] sm:$0xff]  ;;  %v13237_v52 = vcombine.high %v862_v21, %v866_v46  ;;  %v902_v39 = vld [vmem:[%s19911_s1 + $0x19d8] sm:$0xff] }
 0x4f8   :  { %v13746_v1 = vcombine.low %v1373_v44, %v1377_v61 }
 0x4f9   :  { %11039 = vmatpush1.bf16.msra.mxu1 %v13188_v58  ;;  %v13747_v58 = vcombine.high %v1373_v44, %v1377_v61  ;;  %v13778_v44 = vcombine.low %v1405_v24, %v1409_v25  ;;  %v910_v61 = vld [vmem:[%s19911_s1 + $0x1a18] sm:$0xff] }
 0x4fa   :  { %10711 = vmatpush1.bf16.msra.mxu0 %v13698_v57  ;;  %11040 = vmatprep.subr.bf16.mxu1 %v13197_v41  ;;  %v870_v57 = vld [vmem:[%s19911_s1 + $0x18d8] sm:$0xff] }
 0x4fb   :  { %10712 = vmatprep.subr.bf16.mxu0 %v13707_v31  ;;  %v874_v41 = vld [vmem:[%s19911_s1 + $0x18f8] sm:$0xff]  ;;  %v13236_v31 = vcombine.low %v862_v21, %v866_v46  ;;  %v1425_v46 = vld [vmem:[%s19911_s1 + $0x2a30] sm:$0xff] }
 0x4fc   :  { %v13245_v0 = vcombine.high %v870_v57, %v874_v41 }
 0x4fd   :  { %11041 = vmatpush1.bf16.msra.mxu1 %v13196_v63  ;;  %v878_v63 = vld [vmem:[%s19911_s1 + $0x1918] sm:$0xff] }
 0x4fe   :  { %10713 = vmatpush1.bf16.msra.mxu0 %v13706_v8  ;;  %11042 = vmatprep.subr.bf16.mxu1 %v13205_v9  ;;  %v882_v8 = vld [vmem:[%s19911_s1 + $0x1938] sm:$0xff]  ;;  %v13244_v9 = vcombine.low %v870_v57, %v874_v41  ;;  %v1433_v57 = vld [vmem:[%s19911_s1 + $0x2a70] sm:$0xff] }
 0x4ff   :  { %10714 = vmatprep.subr.bf16.mxu0 %v13715_v11  ;;  %v13253_v13 = vcombine.high %v878_v63, %v882_v8  ;;  %v918_v41 = vld [vmem:[%s19911_s1 + $0x1a58] sm:$0xff] }
 0x501   :  { %11043 = vmatpush1.bf16.msra.mxu1 %v13204_v16  ;;  %v13763_v16 = vcombine.high %v1389_v2, %v1393_v6 }
 0x502   :  { %10715 = vmatpush1.bf16.msra.mxu0 %v13714_v17  ;;  %11044 = vmatprep.subr.bf16.mxu1 %v13213_v18  ;;  %v890_v17 = vld [vmem:[%s19911_s1 + $0x1978] sm:$0xff]  ;;  %v13252_v18 = vcombine.low %v878_v63, %v882_v8  ;;  %v1437_v63 = vld [vmem:[%s19911_s1 + $0x2a90] sm:$0xff] }
 0x503   :  { %10716 = vmatprep.subr.bf16.mxu0 %v13723_v19  ;;  %v13762_v19 = vcombine.low %v1389_v2, %v1393_v6  ;;  %v13261_v23 = vcombine.high %v886_v15, %v890_v17  ;;  %v926_v8 = vld [vmem:[%s19911_s1 + $0x1a98] sm:$0xff] }
 0x505   :  { %11045 = vmatpush1.bf16.msra.mxu1 %v13212_v27  ;;  %v13771_v27 = vcombine.high %v1397_v47, %v1401_v7 }
 0x506   :  { %10717 = vmatpush1.bf16.msra.mxu0 %v13722_v29  ;;  %11055 = vmatprep.subr.bf16.mxu1 %v13221_v28  ;;  %v898_v29 = vld [vmem:[%s19911_s1 + $0x19b8] sm:$0xff]  ;;  %v13260_v28 = vcombine.low %v886_v15, %v890_v17  ;;  %v1445_v15 = vld [vmem:[%s19911_s1 + $0x2ad0] sm:$0xff] }
 0x507   :  { %10727 = vmatprep.subr.bf16.mxu0 %v13731_v33  ;;  %v13770_v33 = vcombine.low %v1397_v47, %v1401_v7  ;;  %v13269_v34 = vcombine.high %v894_v26, %v898_v29  ;;  %v934_v17 = vld [vmem:[%s19911_s1 + $0x1ad8] sm:$0xff] }
 0x508   :  { %11047 = vmatmul.mubr.bf16.vlgmr.msra.gmra.mrb[8].mxu1 %v15462_v30  ;;  %v1385_v30 = vld [vmem:[%s19911_s1 + $0x28f0] sm:$0xff] }
 0x509   :  { %10719 = vmatmul.mubr.bf16.vlgmr.msra.gmra.mrb[4].mxu0 %v16290_v50  ;;  %11056 = vmatpush1.bf16.msra.mxu1 %v13220_v40  ;;  %v13754_v11 = vcombine.low %v1381_v54, %v1385_v30  ;;  %v13779_v40 = vcombine.high %v1405_v24, %v1409_v25 }
 0x50a   :  { %10728 = vmatpush1.bf16.msra.mxu0 %v13730_v42  ;;  %11057 = vmatprep.subr.bf16.mxu1 %v13229_v43  ;;  %v906_v42 = vld [vmem:[%s19911_s1 + $0x19f8] sm:$0xff]  ;;  %v13268_v43 = vcombine.low %v894_v26, %v898_v29  ;;  %v1453_v26 = vld [vmem:[%s19911_s1 + $0x2b10] sm:$0xff] }
 0x50b   :  { %10729 = vmatprep.subr.bf16.mxu0 %v13739_v45  ;;  %10759 = vmatprep.mubr.bf16.mxu0 %v16298_v60  ;;  %v13277_v21 = vcombine.high %v902_v39, %v906_v42  ;;  %v1421_v45 = vld [vmem:[%s19911_s1 + $0x2a10] sm:$0xff]  ;;  %v942_v29 = vld [vmem:[%s19911_s1 + $0x1b18] sm:$0xff] }
 0x50c   :  { %11087 = vmatprep.mubr.bf16.mxu1 %v15470_v38  ;;  %v13755_v38 = vcombine.high %v1381_v54, %v1385_v30  ;;  %v13786_v54 = vcombine.low %v1413_v36, %v1417_v37  ;;  %v13794_v2 = vcombine.low %v1421_v45, %v1425_v46 }
 0x50d   :  { %11058 = vmatpush1.bf16.msra.mxu1 %v13228_v49  ;;  %v13787_v49 = vcombine.high %v1413_v36, %v1417_v37 }
 0x50e   :  { %10730 = vmatpush1.bf16.msra.mxu0 %v13738_v51  ;;  %11059 = vmatprep.subr.bf16.mxu1 %v13237_v52  ;;  %v914_v51 = vld [vmem:[%s19911_s1 + $0x1a38] sm:$0xff]  ;;  %v13276_v52 = vcombine.low %v902_v39, %v906_v42  ;;  %v1461_v39 = vld [vmem:[%s19911_s1 + $0x2b50] sm:$0xff] }
 0x50f   :  { %10731 = vmatprep.subr.bf16.mxu0 %v13747_v58  ;;  %v13285_v30 = vcombine.high %v910_v61, %v914_v51  ;;  %v1429_v58 = vld [vmem:[%s19911_s1 + $0x2a50] sm:$0xff]  ;;  %v950_v42 = vld [vmem:[%s19911_s1 + $0x1b58] sm:$0xff] }
 0x510   :  { %v13802_v47 = vcombine.low %v1429_v58, %v1433_v57 }
 0x511   :  { %11060 = vmatpush1.bf16.msra.mxu1 %v13236_v31  ;;  %v13795_v31 = vcombine.high %v1421_v45, %v1425_v46 }
 0x512   :  { %10732 = vmatpush1.bf16.msra.mxu0 %v13746_v1  ;;  %11061 = vmatprep.subr.bf16.mxu1 %v13245_v0  ;;  %v922_v1 = vld [vmem:[%s19911_s1 + $0x1a78] sm:$0xff]  ;;  %v13284_v0 = vcombine.low %v910_v61, %v914_v51  ;;  %v1469_v61 = vld [vmem:[%s19911_s1 + $0x2b90] sm:$0xff] }
 0x513   :  { %10733 = vmatprep.subr.bf16.mxu0 %v13755_v38  ;;  %v13293_v6 = vcombine.high %v918_v41, %v922_v1  ;;  %v1441_v38 = vld [vmem:[%s19911_s1 + $0x2ab0] sm:$0xff]  ;;  %v958_v51 = vld [vmem:[%s19911_s1 + $0x1b98] sm:$0xff] }
 0x514   :  { %v13810_v24 = vcombine.low %v1437_v63, %v1441_v38 }
 0x515   :  { %11062 = vmatpush1.bf16.msra.mxu1 %v13244_v9  ;;  %v13803_v9 = vcombine.high %v1429_v58, %v1433_v57 }
 0x516   :  { %10734 = vmatpush1.bf16.msra.mxu0 %v13754_v11  ;;  %11063 = vmatprep.subr.bf16.mxu1 %v13253_v13  ;;  %v930_v11 = vld [vmem:[%s19911_s1 + $0x1ab8] sm:$0xff]  ;;  %v13292_v13 = vcombine.low %v918_v41, %v922_v1  ;;  %v1477_v41 = vld [vmem:[%s19911_s1 + $0x2bd0] sm:$0xff] }
 0x517   :  { %10735 = vmatprep.subr.bf16.mxu0 %v13763_v16  ;;  %v13301_v7 = vcombine.high %v926_v8, %v930_v11  ;;  %v1449_v16 = vld [vmem:[%s19911_s1 + $0x2af0] sm:$0xff]  ;;  %v966_v1 = vld [vmem:[%s19911_s1 + $0x1bd8] sm:$0xff] }
 0x518   :  { %v13818_v36 = vcombine.low %v1445_v15, %v1449_v16 }
 0x519   :  { %11064 = vmatpush1.bf16.msra.mxu1 %v13252_v18  ;;  %v13811_v18 = vcombine.high %v1437_v63, %v1441_v38 }
 0x51a   :  { %10736 = vmatpush1.bf16.msra.mxu0 %v13762_v19  ;;  %11065 = vmatprep.subr.bf16.mxu1 %v13261_v23  ;;  %v938_v19 = vld [vmem:[%s19911_s1 + $0x1af8] sm:$0xff]  ;;  %v13300_v23 = vcombine.low %v926_v8, %v930_v11  ;;  %v1485_v8 = vld [vmem:[%s19911_s1 + $0x2c10] sm:$0xff] }
 0x51b   :  { %10737 = vmatprep.subr.bf16.mxu0 %v13771_v27  ;;  %v13309_v25 = vcombine.high %v934_v17, %v938_v19  ;;  %v1457_v27 = vld [vmem:[%s19911_s1 + $0x2b30] sm:$0xff]  ;;  %v974_v11 = vld [vmem:[%s19911_s1 + $0x1c18] sm:$0xff] }
 0x51c   :  { %v13826_v45 = vcombine.low %v1453_v26, %v1457_v27 }
 0x51d   :  { %11066 = vmatpush1.bf16.msra.mxu1 %v13260_v28  ;;  %v13819_v28 = vcombine.high %v1445_v15, %v1449_v16 }
 0x51e   :  { %10738 = vmatpush1.bf16.msra.mxu0 %v13770_v33  ;;  %11067 = vmatprep.subr.bf16.mxu1 %v13269_v34  ;;  %v946_v33 = vld [vmem:[%s19911_s1 + $0x1b38] sm:$0xff]  ;;  %v13308_v34 = vcombine.low %v934_v17, %v938_v19  ;;  %v1493_v17 = vld [vmem:[%s19911_s1 + $0x2c50] sm:$0xff] }
 0x51f   :  { %10739 = vmatprep.subr.bf16.mxu0 %v13779_v40  ;;  %v13317_v37 = vcombine.high %v942_v29, %v946_v33  ;;  %v1465_v40 = vld [vmem:[%s19911_s1 + $0x2b70] sm:$0xff]  ;;  %v982_v19 = vld [vmem:[%s19911_s1 + $0x1c58] sm:$0xff] }
 0x520   :  { %v13834_v58 = vcombine.low %v1461_v39, %v1465_v40 }
 0x521   :  { %11068 = vmatpush1.bf16.msra.mxu1 %v13268_v43  ;;  %v13827_v43 = vcombine.high %v1453_v26, %v1457_v27 }
 0x522   :  { %10740 = vmatpush1.bf16.msra.mxu0 %v13778_v44  ;;  %11069 = vmatprep.subr.bf16.mxu1 %v13277_v21  ;;  %v954_v44 = vld [vmem:[%s19911_s1 + $0x1b78] sm:$0xff]  ;;  %v13316_v21 = vcombine.low %v942_v29, %v946_v33 }
 0x523   :  { %10741 = vmatprep.subr.bf16.mxu0 %v13787_v49  ;;  %v13325_v46 = vcombine.high %v950_v42, %v954_v44  ;;  %v1473_v49 = vld [vmem:[%s19911_s1 + $0x2bb0] sm:$0xff]  ;;  %v994_v33 = vld [vmem:[%s19911_s1 + $0x1cb8] sm:$0xff] }
 0x524   :  { %v13842_v63 = vcombine.low %v1469_v61, %v1473_v49 }
 0x525   :  { %11070 = vmatpush1.bf16.msra.mxu1 %v13276_v52  ;;  %v13835_v52 = vcombine.high %v1461_v39, %v1465_v40 }
 0x526   :  { %10742 = vmatpush1.bf16.msra.mxu0 %v13786_v54  ;;  %11071 = vmatprep.subr.bf16.mxu1 %v13285_v30  ;;  %v962_v54 = vld [vmem:[%s19911_s1 + $0x1bb8] sm:$0xff]  ;;  %v13324_v30 = vcombine.low %v950_v42, %v954_v44  ;;  %v1509_v44 = vld [vmem:[%s19911_s1 + $0x2cd0] sm:$0xff] }
 0x527   :  { %10743 = vmatprep.subr.bf16.mxu0 %v13795_v31  ;;  %v13333_v57 = vcombine.high %v958_v51, %v962_v54  ;;  %v1481_v31 = vld [vmem:[%s19911_s1 + $0x2bf0] sm:$0xff] }
 0x528   :  { %v13850_v15 = vcombine.low %v1477_v41, %v1481_v31 }
 0x529   :  { %11072 = vmatpush1.bf16.msra.mxu1 %v13284_v0  ;;  %v13843_v0 = vcombine.high %v1469_v61, %v1473_v49 }
 0x52a   :  { %10744 = vmatpush1.bf16.msra.mxu0 %v13794_v2  ;;  %11073 = vmatprep.subr.bf16.mxu1 %v13293_v6  ;;  %v970_v2 = vld [vmem:[%s19911_s1 + $0x1bf8] sm:$0xff]  ;;  %v13332_v6 = vcombine.low %v958_v51, %v962_v54  ;;  %v1521_v54 = vld [vmem:[%s19911_s1 + $0x2d30] sm:$0xff] }
 0x52b   :  { %10745 = vmatprep.subr.bf16.mxu0 %v13803_v9  ;;  %v13341_v38 = vcombine.high %v966_v1, %v970_v2  ;;  %v1489_v9 = vld [vmem:[%s19911_s1 + $0x2c30] sm:$0xff]  ;;  %v1006_v51 = vld [vmem:[%s19911_s1 + $0x1d18] sm:$0xff] }
 0x52c   :  { %v13858_v26 = vcombine.low %v1485_v8, %v1489_v9 }
 0x52d   :  { %11074 = vmatpush1.bf16.msra.mxu1 %v13292_v13  ;;  %v13851_v13 = vcombine.high %v1477_v41, %v1481_v31  ;;  %v1014_v31 = vld [vmem:[%s19911_s1 + $0x1d58] sm:$0xff] }
 0x52e   :  { %10746 = vmatpush1.bf16.msra.mxu0 %v13802_v47  ;;  %11075 = vmatprep.subr.bf16.mxu1 %v13301_v7  ;;  %v978_v47 = vld [vmem:[%s19911_s1 + $0x1c38] sm:$0xff]  ;;  %v13340_v7 = vcombine.low %v966_v1, %v970_v2  ;;  %v1529_v2 = vld [vmem:[%s19911_s1 + $0x2d70] sm:$0xff] }
 0x52f   :  { %10747 = vmatprep.subr.bf16.mxu0 %v13811_v18  ;;  %v13349_v16 = vcombine.high %v974_v11, %v978_v47  ;;  %v1497_v18 = vld [vmem:[%s19911_s1 + $0x2c70] sm:$0xff]  ;;  %v1018_v1 = vld [vmem:[%s19911_s1 + $0x1d78] sm:$0xff] }
 0x530   :  { %v13867_v29 = vcombine.high %v1493_v17, %v1497_v18  ;;  %v13866_v39 = vcombine.low %v1493_v17, %v1497_v18  ;;  %v1030_v18 = vld [vmem:[%s19911_s1 + $0x1dd8] sm:$0xff] }
 0x531   :  { %11076 = vmatpush1.bf16.msra.mxu1 %v13300_v23  ;;  %v13859_v23 = vcombine.high %v1485_v8, %v1489_v9  ;;  %v1022_v9 = vld [vmem:[%s19911_s1 + $0x1d98] sm:$0xff] }
 0x532   :  { %10748 = vmatpush1.bf16.msra.mxu0 %v13810_v24  ;;  %11077 = vmatprep.subr.bf16.mxu1 %v13309_v25  ;;  %v986_v24 = vld [vmem:[%s19911_s1 + $0x1c78] sm:$0xff]  ;;  %v13348_v25 = vcombine.low %v974_v11, %v978_v47  ;;  %v1537_v47 = vld [vmem:[%s19911_s1 + $0x2db0] sm:$0xff] }
 0x533   :  { %10749 = vmatprep.subr.bf16.mxu0 %v13819_v28  ;;  %v13357_v27 = vcombine.high %v982_v19, %v986_v24  ;;  %v990_v28 = vld [vmem:[%s19911_s1 + $0x1c98] sm:$0xff] }
 0x534   :  { %v13365_v40 = vcombine.high %v990_v28, %v994_v33  ;;  %v1026_v11 = vld [vmem:[%s19911_s1 + $0x1db8] sm:$0xff] }
 0x535   :  { %11078 = vmatpush1.bf16.msra.mxu1 %v13308_v34  ;;  %v1501_v34 = vld [vmem:[%s19911_s1 + $0x2c90] sm:$0xff] }
 0x536   :  { %10750 = vmatpush1.bf16.msra.mxu0 %v13818_v36  ;;  %11079 = vmatprep.subr.bf16.mxu1 %v13317_v37  ;;  %v1505_v36 = vld [vmem:[%s19911_s1 + $0x2cb0] sm:$0xff]  ;;  %v13356_v37 = vcombine.low %v982_v19, %v986_v24  ;;  %v1034_v19 = vld [vmem:[%s19911_s1 + $0x1df8] sm:$0xff] }
 0x537   :  { %10751 = vmatprep.subr.bf16.mxu0 %v13827_v43  ;;  %v13875_v42 = vcombine.high %v1501_v34, %v1505_v36  ;;  %v1002_v43 = vld [vmem:[%s19911_s1 + $0x1cf8] sm:$0xff]  ;;  %v1545_v24 = vld [vmem:[%s19911_s1 + $0x2df0] sm:$0xff] }
 0x539   :  { %11080 = vmatpush1.bf16.msra.mxu1 %v13316_v21  ;;  %v1513_v21 = vld [vmem:[%s19911_s1 + $0x2cf0] sm:$0xff] }
 0x53a   :  { %10752 = vmatpush1.bf16.msra.mxu0 %v13826_v45  ;;  %11081 = vmatprep.subr.bf16.mxu1 %v13325_v46  ;;  %v13364_v45 = vcombine.low %v990_v28, %v994_v33  ;;  %v13874_v46 = vcombine.low %v1501_v34, %v1505_v36  ;;  %v13883_v49 = vcombine.high %v1509_v44, %v1513_v21  ;;  %v1038_v28 = vld [vmem:[%s19911_s1 + $0x1e18] sm:$0xff]  ;;  %v1549_v34 = vld [vmem:[%s19911_s1 + $0x2e10] sm:$0xff] }
 0x53b   :  { %10753 = vmatprep.subr.bf16.mxu0 %v13835_v52  ;;  %v1010_v52 = vld [vmem:[%s19911_s1 + $0x1d38] sm:$0xff]  ;;  %v1553_v36 = vld [vmem:[%s19911_s1 + $0x2e30] sm:$0xff] }
 0x53c   :  { %v1042_v33 = vld [vmem:[%s19911_s1 + $0x1e38] sm:$0xff] }
 0x53d   :  { %11082 = vmatpush1.bf16.msra.mxu1 %v13324_v30 }
 0x53e   :  { %10754 = vmatpush1.bf16.msra.mxu0 %v13834_v58  ;;  %11083 = vmatprep.subr.bf16.mxu1 %v13333_v57  ;;  %v13882_v58 = vcombine.low %v1509_v44, %v1513_v21  ;;  %v13381_v57 = vcombine.high %v1006_v51, %v1010_v52  ;;  %v1557_v44 = vld [vmem:[%s19911_s1 + $0x2e50] sm:$0xff] }
 0x53f   :  { %10755 = vmatprep.subr.bf16.mxu0 %v13843_v0  ;;  %v1525_v0 = vld [vmem:[%s19911_s1 + $0x2d50] sm:$0xff] }
 0x540   :  { %v13899_v8 = vcombine.high %v1525_v0, %v1529_v2  ;;  %v1561_v21 = vld [vmem:[%s19911_s1 + $0x2e70] sm:$0xff] }
 0x541   :  { %11084 = vmatpush1.bf16.msra.mxu1 %v13332_v6  ;;  %v13380_v6 = vcombine.low %v1006_v51, %v1010_v52  ;;  %v1054_v51 = vld [vmem:[%s19911_s1 + $0x1e98] sm:$0xff] }
 0x542   :  { %10756 = vmatpush1.bf16.msra.mxu0 %v13842_v63  ;;  %11085 = vmatprep.subr.bf16.mxu1 %v13341_v38  ;;  %v13389_v38 = vcombine.high %v1014_v31, %v1018_v1  ;;  %v1058_v52 = vld [vmem:[%s19911_s1 + $0x1eb8] sm:$0xff] }
 0x543   :  { %10757 = vmatprep.subr.bf16.mxu0 %v13851_v13  ;;  %v1533_v13 = vld [vmem:[%s19911_s1 + $0x2d90] sm:$0xff] }
 0x544   :  { %v13907_v17 = vcombine.high %v1533_v13, %v1537_v47 }
 0x545   :  { %11086 = vmatpush1.bf16.msra.mxu1 %v13340_v7  ;;  %v13388_v7 = vcombine.low %v1014_v31, %v1018_v1  ;;  %v1062_v31 = vld [vmem:[%s19911_s1 + $0x1ed8] sm:$0xff] }
 0x546   :  { %10758 = vmatpush1.bf16.msra.mxu0 %v13850_v15  ;;  %11096 = vmatprep.subr.bf16.mxu1 %v13349_v16  ;;  %v13898_v15 = vcombine.low %v1525_v0, %v1529_v2  ;;  %v13397_v16 = vcombine.high %v1022_v9, %v1026_v11  ;;  %v1066_v1 = vld [vmem:[%s19911_s1 + $0x1ef8] sm:$0xff]  ;;  %v1573_v0 = vld [vmem:[%s19911_s1 + $0x2ed0] sm:$0xff] }
 0x547   :  { %10768 = vmatprep.subr.bf16.mxu0 %v13859_v23  ;;  %v1541_v23 = vld [vmem:[%s19911_s1 + $0x2dd0] sm:$0xff] }
 0x548   :  { %11088 = vmatmul.mubr.bf16.vlgmr.msra.gmra.mrb[8].mxu1 %v15668_v3  ;;  %v998_v3 = vld [vmem:[%s19911_s1 + $0x1cd8] sm:$0xff]  ;;  %v1577_v2 = vld [vmem:[%s19911_s1 + $0x2ef0] sm:$0xff] }
 0x549   :  { %10760 = vmatmul.mubr.bf16.vlgmr.msra.gmra.mrb[4].mxu0 %v16496_v4  ;;  %11097 = vmatpush1.bf16.msra.mxu1 %v13348_v25  ;;  %v13373_v61 = vcombine.high %v998_v3, %v1002_v43  ;;  %v13372_v30 = vcombine.low %v998_v3, %v1002_v43  ;;  %v13396_v25 = vcombine.low %v1022_v9, %v1026_v11  ;;  %v1046_v3 = vld [vmem:[%s19911_s1 + $0x1e58] sm:$0xff] }
 0x54a   :  { %10769 = vmatpush1.bf16.msra.mxu0 %v13858_v26  ;;  %11098 = vmatprep.subr.bf16.mxu1 %v13357_v27  ;;  %v13906_v26 = vcombine.low %v1533_v13, %v1537_v47  ;;  %v13405_v27 = vcombine.high %v1030_v18, %v1034_v19  ;;  %v1050_v43 = vld [vmem:[%s19911_s1 + $0x1e78] sm:$0xff]  ;;  %v1581_v13 = vld [vmem:[%s19911_s1 + $0x2f10] sm:$0xff] }
 0x54b   :  { %10770 = vmatprep.subr.bf16.mxu0 %v13867_v29  ;;  %10800 = vmatprep.mubr.bf16.mxu0 %v16504_v12  ;;  %v13915_v29 = vcombine.high %v1541_v23, %v1545_v24  ;;  %v1070_v9 = vld [vmem:[%s19911_s1 + $0x1f18] sm:$0xff]  ;;  %v1585_v47 = vld [vmem:[%s19911_s1 + $0x2f30] sm:$0xff] }
 0x54c   :  { %11128 = vmatprep.mubr.bf16.mxu1 %v15676_v10  ;;  %v1517_v10 = vld [vmem:[%s19911_s1 + $0x2d10] sm:$0xff]  ;;  %v1074_v11 = vld [vmem:[%s19911_s1 + $0x1f38] sm:$0xff] }
 0x54d   :  { %11099 = vmatpush1.bf16.msra.mxu1 %v13356_v37  ;;  %v13891_v41 = vcombine.high %v1517_v10, %v1521_v54  ;;  %v13890_v63 = vcombine.low %v1517_v10, %v1521_v54  ;;  %v13404_v37 = vcombine.low %v1030_v18, %v1034_v19  ;;  %v1565_v10 = vld [vmem:[%s19911_s1 + $0x2e90] sm:$0xff]  ;;  %v1078_v18 = vld [vmem:[%s19911_s1 + $0x1f58] sm:$0xff] }
 0x54e   :  { %10771 = vmatpush1.bf16.msra.mxu0 %v13866_v39  ;;  %11100 = vmatprep.subr.bf16.mxu1 %v13365_v40  ;;  %v13914_v39 = vcombine.low %v1541_v23, %v1545_v24  ;;  %v13413_v40 = vcombine.high %v1038_v28, %v1042_v33  ;;  %v1569_v54 = vld [vmem:[%s19911_s1 + $0x2eb0] sm:$0xff]  ;;  %v1082_v19 = vld [vmem:[%s19911_s1 + $0x1f78] sm:$0xff] }
 0x54f   :  { %10772 = vmatprep.subr.bf16.mxu0 %v13875_v42  ;;  %v13923_v42 = vcombine.high %v1549_v34, %v1553_v36  ;;  %v1589_v23 = vld [vmem:[%s19911_s1 + $0x2f50] sm:$0xff] }
 0x550   :  { %v1593_v24 = vld [vmem:[%s19911_s1 + $0x2f70] sm:$0xff] }
 0x551   :  { %11101 = vmatpush1.bf16.msra.mxu1 %v13364_v45  ;;  %v13412_v45 = vcombine.low %v1038_v28, %v1042_v33  ;;  %v1086_v28 = vld [vmem:[%s19911_s1 + $0x1f98] sm:$0xff] }
 0x552   :  { %10773 = vmatpush1.bf16.msra.mxu0 %v13874_v46  ;;  %11102 = vmatprep.subr.bf16.mxu1 %v13373_v61  ;;  %v13922_v46 = vcombine.low %v1549_v34, %v1553_v36  ;;  %v13421_v61 = vcombine.high %v1046_v3, %v1050_v43  ;;  %v1090_v33 = vld [vmem:[%s19911_s1 + $0x1fb8] sm:$0xff]  ;;  %v1597_v34 = vld [vmem:[%s19911_s1 + $0x2f90] sm:$0xff] }
 0x553   :  { %10774 = vmatprep.subr.bf16.mxu0 %v13883_v49  ;;  %v13931_v49 = vcombine.high %v1557_v44, %v1561_v21  ;;  %v1601_v36 = vld [vmem:[%s19911_s1 + $0x2fb0] sm:$0xff] }
 0x555   :  { %11103 = vmatpush1.bf16.msra.mxu1 %v13372_v30  ;;  %v13420_v30 = vcombine.low %v1046_v3, %v1050_v43  ;;  %v1094_v3 = vld [vmem:[%s19911_s1 + $0x1fd8] sm:$0xff] }
 0x556   :  { %10775 = vmatpush1.bf16.msra.mxu0 %v13882_v58  ;;  %11104 = vmatprep.subr.bf16.mxu1 %v13381_v57  ;;  %v13930_v58 = vcombine.low %v1557_v44, %v1561_v21  ;;  %v13429_v57 = vcombine.high %v1054_v51, %v1058_v52  ;;  %v1098_v43 = vld [vmem:[%s19911_s1 + $0x1ff8] sm:$0xff]  ;;  %v1605_v44 = vld [vmem:[%s19911_s1 + $0x2fd0] sm:$0xff] }
 0x557   :  { %10776 = vmatprep.subr.bf16.mxu0 %v13891_v41  ;;  %v13939_v41 = vcombine.high %v1565_v10, %v1569_v54  ;;  %v1609_v21 = vld [vmem:[%s19911_s1 + $0x2ff0] sm:$0xff] }
 0x559   :  { %11105 = vmatpush1.bf16.msra.mxu1 %v13380_v6  ;;  %v13428_v6 = vcombine.low %v1054_v51, %v1058_v52  ;;  %v1102_v51 = vld [vmem:[%s19911_s1 + $0x2018] sm:$0xff] }
 0x55a   :  { %10777 = vmatpush1.bf16.msra.mxu0 %v13890_v63  ;;  %11106 = vmatprep.subr.bf16.mxu1 %v13389_v38  ;;  %v13938_v63 = vcombine.low %v1565_v10, %v1569_v54  ;;  %v13437_v38 = vcombine.high %v1062_v31, %v1066_v1  ;;  %v1106_v52 = vld [vmem:[%s19911_s1 + $0x2038] sm:$0xff]  ;;  %v13468_v10 = vcombine.low %v1094_v3, %v1098_v43 }
 0x55b   :  { %10778 = vmatprep.subr.bf16.mxu0 %v13899_v8  ;;  %v13947_v8 = vcombine.high %v1573_v0, %v1577_v2  ;;  %v13978_v54 = vcombine.low %v1605_v44, %v1609_v21 }
 0x55d   :  { %11107 = vmatpush1.bf16.msra.mxu1 %v13388_v7  ;;  %v13436_v7 = vcombine.low %v1062_v31, %v1066_v1  ;;  %v1114_v31 = vld [vmem:[%s19911_s1 + $0x2078] sm:$0xff]  ;;  %v13476_v1 = vcombine.low %v1102_v51, %v1106_v52 }
 0x55e   :  { %10779 = vmatpush1.bf16.msra.mxu0 %v13898_v15  ;;  %11108 = vmatprep.subr.bf16.mxu1 %v13397_v16  ;;  %v13946_v15 = vcombine.low %v1573_v0, %v1577_v2  ;;  %v13445_v16 = vcombine.high %v1070_v9, %v1074_v11  ;;  %v14345_v0 = vld [vmem:[%s19914_s3] ss:$8 sps:$4 sm:$0xff]  }
 0x55f   :  { %10780 = vmatprep.subr.bf16.mxu0 %v13907_v17  ;;  %v13955_v17 = vcombine.high %v1581_v13, %v1585_v47 }
 0x561   :  { %11109 = vmatpush1.bf16.msra.mxu1 %v13396_v25  ;;  %v13444_v25 = vcombine.low %v1070_v9, %v1074_v11  ;;  %v14348_v9 = vld [vmem:[%s19914_s3 + $0x10] ss:$8 sps:$4 sm:$0xff]  }
 0x562   :  { %10781 = vmatpush1.bf16.msra.mxu0 %v13906_v26  ;;  %11110 = vmatprep.subr.bf16.mxu1 %v13405_v27  ;;  %v13954_v26 = vcombine.low %v1581_v13, %v1585_v47  ;;  %v13453_v27 = vcombine.high %v1078_v18, %v1082_v19  ;;  %v14353_v13 = vld [vmem:[%s19914_s3 + $0x24] ss:$8 sps:$4 sm:$0xff]   ;;  %v1130_v47 = vld [vmem:[%s19911_s1 + $0x20f8] sm:$0xff] }
 0x563   :  { %10782 = vmatprep.subr.bf16.mxu0 %v13915_v29  ;;  %v13963_v29 = vcombine.high %v1589_v23, %v1593_v24 }
 0x565   :  { %11111 = vmatpush1.bf16.msra.mxu1 %v13404_v37  ;;  %v13452_v37 = vcombine.low %v1078_v18, %v1082_v19  ;;  %v1134_v18 = vld [vmem:[%s19911_s1 + $0x2118] sm:$0xff] }
 0x566   :  { %10783 = vmatpush1.bf16.msra.mxu0 %v13914_v39  ;;  %11112 = vmatprep.subr.bf16.mxu1 %v13413_v40  ;;  %v13962_v39 = vcombine.low %v1589_v23, %v1593_v24  ;;  %v13461_v40 = vcombine.high %v1086_v28, %v1090_v33  ;;  %v14354_v23 = vld [vmem:[%s19914_s3 + $0x30] ss:$8 sps:$4 sm:$0xff]  }
 0x567   :  { %10784 = vmatprep.subr.bf16.mxu0 %v13923_v42  ;;  %v13971_v42 = vcombine.high %v1597_v34, %v1601_v36 }
 0x569   :  { %11113 = vmatpush1.bf16.msra.mxu1 %v13412_v45  ;;  %v13460_v45 = vcombine.low %v1086_v28, %v1090_v33  ;;  %v14357_v28 = vld [vmem:[%s19914_s3 + $0x40] ss:$8 sps:$4 sm:$0xff]  }
 0x56a   :  { %10785 = vmatpush1.bf16.msra.mxu0 %v13922_v46  ;;  %11114 = vmatprep.subr.bf16.mxu1 %v13421_v61  ;;  %v13970_v46 = vcombine.low %v1597_v34, %v1601_v36  ;;  %v13469_v61 = vcombine.high %v1094_v3, %v1098_v43  ;;  %v14362_v34 = vld [vmem:[%s19914_s3 + $0x54] ss:$8 sps:$4 sm:$0xff]   ;;  %v14365_v3 = vld [vmem:[%s19914_s3 + $0x64] ss:$8 sps:$4 sm:$0xff]  }
 0x56b   :  { %10786 = vmatprep.subr.bf16.mxu0 %v13931_v49  ;;  %v13979_v49 = vcombine.high %v1605_v44, %v1609_v21  ;;  %v1150_v36 = vld [vmem:[%s19911_s1 + $0x2198] sm:$0xff] }
 0x56c   :  { %v1158_v43 = vld [vmem:[%s19911_s1 + $0x21d8] sm:$0xff] }
 0x56d   :  { %11115 = vmatpush1.bf16.msra.mxu1 %v13420_v30  ;;  %v13477_v30 = vcombine.high %v1102_v51, %v1106_v52  ;;  %v1162_v44 = vld [vmem:[%s19911_s1 + $0x21f8] sm:$0xff] }
 0x56e   :  { %10787 = vmatpush1.bf16.msra.mxu0 %v13930_v58  ;;  %11116 = vmatprep.subr.bf16.mxu1 %v13429_v57  ;;  %v14347_v58 = vld [vmem:[%s19914_s3 + $0x4] ss:$8 sps:$4 sm:$0xff]   ;;  %v11302_v57 = vmax.f32 %v17380_v5, 0.0  ;;  %v14350_v5 = vld [vmem:[%s19914_s3 + $0x14] ss:$8 sps:$4 sm:$0xff]   ;;  %v13532_v52 = vcombine.low %v1158_v43, %v1162_v44 }
 0x56f   :  { %10788 = vmatprep.subr.bf16.mxu0 %v13939_v41  ;;  %v1110_v41 = vld [vmem:[%s19911_s1 + $0x2058] sm:$0xff] }
 0x570   :  { %v13485_v2 = vcombine.high %v1110_v41, %v1114_v31  ;;  %v1170_v51 = vld [vmem:[%s19911_s1 + $0x2238] sm:$0xff] }
 0x571   :  { %11117 = vmatpush1.bf16.msra.mxu1 %v13428_v6  ;;  %v1118_v6 = vld [vmem:[%s19911_s1 + $0x2098] sm:$0xff] }
 0x572   :  { %10789 = vmatpush1.bf16.msra.mxu0 %v13938_v63  ;;  %11118 = vmatprep.subr.bf16.mxu1 %v13437_v38  ;;  %v1122_v63 = vld [vmem:[%s19911_s1 + $0x20b8] sm:$0xff]  ;;  %v11310_v38 = vpack.c.bf16 %v11302_v57, %v11302_v57 }
 0x573   :  { %10790 = vmatprep.subr.bf16.mxu0 %v13947_v8  ;;  %v13484_v8 = vcombine.low %v1110_v41, %v1114_v31  ;;  %v13493_v11 = vcombine.high %v1118_v6, %v1122_v63  ;;  %v1178_v57 = vld [vmem:[%s19911_s1 + $0x2278] sm:$0xff]  ;;  %v14369_v31 = vld [vmem:[%s19914_s3 + $0x80] ss:$8 sps:$4 sm:$0xff]  }
 0x575   :  { %11119 = vmatpush1.bf16.msra.mxu1 %v13436_v7  ;;  %v13492_v7 = vcombine.low %v1118_v6, %v1122_v63  ;;  %v14372_v63 = vld [vmem:[%s19914_s3 + $0x90] ss:$8 sps:$4 sm:$0xff]  }
 0x576   :  { %10791 = vmatpush1.bf16.msra.mxu0 %v13946_v15  ;;  %11120 = vmatprep.subr.bf16.mxu1 %v13445_v16  ;;  %v14351_v15 = vld [vmem:[%s19914_s3 + $0x20] ss:$8 sps:$4 sm:$0xff]  }
 0x577   :  { %10792 = vmatprep.subr.bf16.mxu0 %v13955_v17  ;;  %v14356_v17 = vld [vmem:[%s19914_s3 + $0x34] ss:$8 sps:$4 sm:$0xff]  }
 0x579   :  { %11121 = vmatpush1.bf16.msra.mxu1 %v13444_v25  ;;  %v14359_v25 = vld [vmem:[%s19914_s3 + $0x44] ss:$8 sps:$4 sm:$0xff]  }
 0x57a   :  { %10793 = vmatpush1.bf16.msra.mxu0 %v13954_v26  ;;  %11122 = vmatprep.subr.bf16.mxu1 %v13453_v27  ;;  %v1142_v26 = vld [vmem:[%s19911_s1 + $0x2158] sm:$0xff] }
 0x57b   :  { %10794 = vmatprep.subr.bf16.mxu0 %v13963_v29  ;;  %v1146_v27 = vld [vmem:[%s19911_s1 + $0x2178] sm:$0xff] }
 0x57c   :  { %v13517_v33 = vcombine.high %v1142_v26, %v1146_v27 }
 0x57d   :  { %11123 = vmatpush1.bf16.msra.mxu1 %v13452_v37  ;;  %v1154_v37 = vld [vmem:[%s19911_s1 + $0x21b8] sm:$0xff] }
 0x57e   :  { %10795 = vmatpush1.bf16.msra.mxu0 %v13962_v39  ;;  %11124 = vmatprep.subr.bf16.mxu1 %v13461_v40  ;;  %v13516_v39 = vcombine.low %v1142_v26, %v1146_v27  ;;  %v14360_v40 = vld [vmem:[%s19914_s3 + $0x50] ss:$8 sps:$4 sm:$0xff]   ;;  %v13524_v21 = vcombine.low %v1150_v36, %v1154_v37  ;;  %v14381_v26 = vld [vmem:[%s19914_s3 + $0xc0] ss:$8 sps:$4 sm:$0xff]  }
 0x57f   :  { %10796 = vmatprep.subr.bf16.mxu0 %v13971_v42  ;;  %v13525_v42 = vcombine.high %v1150_v36, %v1154_v37  ;;  %v14384_v37 = vld [vmem:[%s19914_s3 + $0xd0] ss:$8 sps:$4 sm:$0xff]  }
 0x581   :  { %11125 = vmatpush1.bf16.msra.mxu1 %v13460_v45  ;;  %v14363_v45 = vld [vmem:[%s19914_s3 + $0x60] ss:$8 sps:$4 sm:$0xff]  }
 0x582   :  { %10797 = vmatpush1.bf16.msra.mxu0 %v13970_v46  ;;  %11126 = vmatprep.subr.bf16.mxu1 %v13469_v61  ;;  %v13533_v46 = vcombine.high %v1158_v43, %v1162_v44  ;;  %v14368_v61 = vld [vmem:[%s19914_s3 + $0x74] ss:$8 sps:$4 sm:$0xff]   ;;  %v19241_v43 = vld [vmem:[%s19913_s2] sm:$0xff] }
 0x583   :  { %10798 = vmatprep.subr.bf16.mxu0 %v13979_v49  ;;  %v1166_v49 = vld [vmem:[%s19911_s1 + $0x2218] sm:$0xff] }
 0x584   :  { %v13540_v41 = vcombine.low %v1166_v49, %v1170_v51 }
 0x585   :  { %11127 = vmatpush1.bf16.msra.mxu1 %v13468_v10  ;;  %v14366_v10 = vld [vmem:[%s19914_s3 + $0x70] ss:$8 sps:$4 sm:$0xff]  }
 0x586   :  { %10799 = vmatpush1.bf16.msra.mxu0 %v13978_v54  ;;  %11137 = vmatprep.subr.bf16.mxu1 %v13477_v30  ;;  %v13541_v54 = vcombine.high %v1166_v49, %v1170_v51  ;;  %v14371_v30 = vld [vmem:[%s19914_s3 + $0x84] ss:$8 sps:$4 sm:$0xff]   ;;  %v1230_v49 = vld [vmem:[%s19911_s1 + $0x2418] sm:$0xff] }
 0x587   :  { %12097 = vmatprep.subr.bf16.mxu0 %v14347_v58  ;;  %v1174_v58 = vld [vmem:[%s19911_s1 + $0x2258] sm:$0xff] }
 0x588   :  { %11129 = vmatmul.mubr.bf16.vlgmr.msra.gmra.mrb[8].mxu1 %v15878_v53  ;;  %v1126_v53 = vld [vmem:[%s19911_s1 + $0x20d8] sm:$0xff]  ;;  %v13548_v6 = vcombine.low %v1174_v58, %v1178_v57 }
 0x589   :  { %10801 = vmatmul.mubr.bf16.vlgmr.msra.gmra.mrb[4].mxu0 %v16699_v20  ;;  %11138 = vmatpush1.bf16.msra.mxu1 %v13476_v1  ;;  %v13501_v16 = vcombine.high %v1126_v53, %v1130_v47  ;;  %v13500_v19 = vcombine.low %v1126_v53, %v1130_v47  ;;  %v13549_v1 = vcombine.high %v1174_v58, %v1178_v57  ;;  %v14375_v53 = vld [vmem:[%s19914_s3 + $0xa0] ss:$8 sps:$4 sm:$0xff]   ;;  %v1234_v51 = vld [vmem:[%s19911_s1 + $0x2438] sm:$0xff]  ;;  %v11301_v58 = vmax.f32 %v17378_v56, 0.0  ;;  %v14395_v57 = vld [vmem:[%s19914_s3 + $0x104] ss:$8 sps:$4 sm:$0xff]  }
 0x58a   :  { %12098 = vmatpush1.bf16.msra.mxu0 %v14345_v0  ;;  %12129 = vmatprep.mubr.bf16.mxu0 %v11310_v38  ;;  %v14374_v0 = vld [vmem:[%s19914_s3 + $0x94] ss:$8 sps:$4 sm:$0xff]   ;;  %v14393_v56 = vld [vmem:[%s19914_s3 + $0x100] ss:$8 sps:$4 sm:$0xff]  }
 0x58b   :  { %11139 = vmatprep.subr.bf16.mxu1 %v13485_v2  ;;  %12099 = vmatprep.subr.bf16.mxu0 %v14350_v5  ;;  %v1182_v2 = vld [vmem:[%s19911_s1 + $0x2298] sm:$0xff] }
 0x58c   :  { %11169 = vmatprep.mubr.bf16.mxu1 %v15886_v62  ;;  %v1138_v62 = vld [vmem:[%s19911_s1 + $0x2138] sm:$0xff] }
 0x58d   :  { %11140 = vmatpush1.bf16.msra.mxu1 %v13484_v8  ;;  %v13509_v24 = vcombine.high %v1134_v18, %v1138_v62  ;;  %v13508_v29 = vcombine.low %v1134_v18, %v1138_v62  ;;  %v1186_v5 = vld [vmem:[%s19911_s1 + $0x22b8] sm:$0xff]  ;;  %v14377_v8 = vld [vmem:[%s19914_s3 + $0xa4] ss:$8 sps:$4 sm:$0xff]  }
 0x58e   :  { %12100 = vmatpush1.bf16.msra.mxu0 %v14348_v9  ;;  %11141 = vmatprep.subr.bf16.mxu1 %v13493_v11  ;;  %v13557_v38 = vcombine.high %v1182_v2, %v1186_v5  ;;  %v1190_v9 = vld [vmem:[%s19911_s1 + $0x22d8] sm:$0xff] }
 0x58f   :  { %12101 = vmatprep.subr.bf16.mxu0 %v14353_v13  ;;  %v1194_v11 = vld [vmem:[%s19911_s1 + $0x22f8] sm:$0xff]  ;;  %v13556_v13 = vcombine.low %v1182_v2, %v1186_v5 }
 0x590   :  { %v13565_v47 = vcombine.high %v1190_v9, %v1194_v11  ;;  %v14378_v18 = vld [vmem:[%s19914_s3 + $0xb0] ss:$8 sps:$4 sm:$0xff]   ;;  %v14398_v5 = vld [vmem:[%s19914_s3 + $0x114] ss:$8 sps:$4 sm:$0xff]  }
 0x591   :  { %11142 = vmatpush1.bf16.msra.mxu1 %v13492_v7  ;;  %v14380_v7 = vld [vmem:[%s19914_s3 + $0xb4] ss:$8 sps:$4 sm:$0xff]  }
 0x592   :  { %12102 = vmatpush1.bf16.msra.mxu0 %v14351_v15  ;;  %11143 = vmatprep.subr.bf16.mxu1 %v13501_v16  ;;  %v1198_v15 = vld [vmem:[%s19911_s1 + $0x2318] sm:$0xff] }
 0x593   :  { %12103 = vmatprep.subr.bf16.mxu0 %v14356_v17  ;;  %v1202_v16 = vld [vmem:[%s19911_s1 + $0x2338] sm:$0xff]  ;;  %v13564_v17 = vcombine.low %v1190_v9, %v1194_v11 }
 0x594   :  { %v13573_v62 = vcombine.high %v1198_v15, %v1202_v16  ;;  %v14396_v9 = vld [vmem:[%s19914_s3 + $0x110] ss:$8 sps:$4 sm:$0xff]  }
 0x595   :  { %11144 = vmatpush1.bf16.msra.mxu1 %v13500_v19  ;;  %v14383_v19 = vld [vmem:[%s19914_s3 + $0xc4] ss:$8 sps:$4 sm:$0xff]  }
 0x596   :  { %12104 = vmatpush1.bf16.msra.mxu0 %v14354_v23  ;;  %11145 = vmatprep.subr.bf16.mxu1 %v13509_v24  ;;  %v1206_v23 = vld [vmem:[%s19911_s1 + $0x2358] sm:$0xff] }
 0x597   :  { %12105 = vmatprep.subr.bf16.mxu0 %v14359_v25  ;;  %v1210_v24 = vld [vmem:[%s19911_s1 + $0x2378] sm:$0xff]  ;;  %v13572_v25 = vcombine.low %v1198_v15, %v1202_v16 }
 0x598   :  { %v13581_v27 = vcombine.high %v1206_v23, %v1210_v24  ;;  %v13580_v36 = vcombine.low %v1206_v23, %v1210_v24  ;;  %v14404_v16 = vld [vmem:[%s19914_s3 + $0x134] ss:$8 sps:$4 sm:$0xff]   ;;  %v14407_v23 = vld [vmem:[%s19914_s3 + $0x144] ss:$8 sps:$4 sm:$0xff]  }
 0x599   :  { %11146 = vmatpush1.bf16.msra.mxu1 %v13508_v29  ;;  %v14386_v29 = vld [vmem:[%s19914_s3 + $0xd4] ss:$8 sps:$4 sm:$0xff]  }
 0x59a   :  { %12106 = vmatpush1.bf16.msra.mxu0 %v14357_v28  ;;  %11147 = vmatprep.subr.bf16.mxu1 %v13517_v33  ;;  %v1214_v28 = vld [vmem:[%s19911_s1 + $0x2398] sm:$0xff] }
 0x59b   :  { %12107 = vmatprep.subr.bf16.mxu0 %v14362_v34  ;;  %v1218_v33 = vld [vmem:[%s19911_s1 + $0x23b8] sm:$0xff]  ;;  %v1627_v34 = vsub.s32 3, %v17317_v59 }
 0x59c   :  { %v1270_v24 = vld [vmem:[%s19911_s1 + $0x2558] sm:$0xff] }
 0x59d   :  { %11148 = vmatpush1.bf16.msra.mxu1 %v13516_v39  ;;  %v13589_v39 = vcombine.high %v1214_v28, %v1218_v33  ;;  %v1628_v44 = vrot.slane %v19241_v43, %v1627_v34  ;;  %v1282_v34 = vld [vmem:[%s19911_s1 + $0x25b8] sm:$0xff] }
 0x59e   :  { %12108 = vmatpush1.bf16.msra.mxu0 %v14360_v40  ;;  %11149 = vmatprep.subr.bf16.mxu1 %v13525_v42  ;;  %v14389_v40 = vld [vmem:[%s19914_s3 + $0xe4] ss:$8 sps:$4 sm:$0xff]   ;;  %v1222_v42 = vld [vmem:[%s19911_s1 + $0x23d8] sm:$0xff] }
 0x59f   :  { %12109 = vmatprep.subr.bf16.mxu0 %v14365_v3  ;;  %v1226_v3 = vld [vmem:[%s19911_s1 + $0x23f8] sm:$0xff] }
 0x5a1   :  { %11150 = vmatpush1.bf16.msra.mxu1 %v13524_v21  ;;  %v13588_v21 = vcombine.low %v1214_v28, %v1218_v33  ;;  %v14410_v28 = vld [vmem:[%s19914_s3 + $0x154] ss:$8 sps:$4 sm:$0xff]  }
 0x5a2   :  { %12110 = vmatpush1.bf16.msra.mxu0 %v14363_v45  ;;  %11151 = vmatprep.subr.bf16.mxu1 %v13533_v46  ;;  %v14387_v45 = vld [vmem:[%s19914_s3 + $0xe0] ss:$8 sps:$4 sm:$0xff]   ;;  %v13597_v46 = vcombine.high %v1222_v42, %v1226_v3  ;;  %v1278_v33 = vld [vmem:[%s19911_s1 + $0x2598] sm:$0xff] }
 0x5a3   :  { %12111 = vmatprep.subr.bf16.mxu0 %v14368_v61  ;;  %v14392_v61 = vld [vmem:[%s19914_s3 + $0xf4] ss:$8 sps:$4 sm:$0xff]  }
 0x5a5   :  { %11152 = vmatpush1.bf16.msra.mxu1 %v13532_v52  ;;  %v14154_v52 = vadd.f32 %v18162_v35, %v1628_v44  ;;  %v1238_v35 = vld [vmem:[%s19911_s1 + $0x2458] sm:$0xff]  ;;  %v13652_v44 = vcombine.low %v1278_v33, %v1282_v34 }
 0x5a6   :  { %12112 = vmatpush1.bf16.msra.mxu0 %v14366_v10  ;;  %11153 = vmatprep.subr.bf16.mxu1 %v13541_v54  ;;  %v13596_v10 = vcombine.low %v1222_v42, %v1226_v3  ;;  %v14390_v54 = vld [vmem:[%s19914_s3 + $0xf0] ss:$8 sps:$4 sm:$0xff]  }
 0x5a7   :  { %12113 = vmatprep.subr.bf16.mxu0 %v14371_v30  ;;  %v13605_v30 = vcombine.high %v1230_v49, %v1234_v51  ;;  %v1286_v42 = vld [vmem:[%s19911_s1 + $0x25d8] sm:$0xff] }
 0x5a8   :  { %v1290_v3 = vld [vmem:[%s19911_s1 + $0x25f8] sm:$0xff] }
 0x5a9   :  { %11154 = vmatpush1.bf16.msra.mxu1 %v13540_v41  ;;  %v11304_v41 = vmax.f32 %v14154_v52, 0.0  ;;  %v14414_v52 = vld [vmem:[%s19914_s3 + $0x170] ss:$8 sps:$4 sm:$0xff]  }
 0x5aa   :  { %12114 = vmatpush1.bf16.msra.mxu0 %v14369_v31  ;;  %11155 = vmatprep.subr.bf16.mxu1 %v13549_v1  ;;  %v1242_v31 = vld [vmem:[%s19911_s1 + $0x2478] sm:$0xff]  ;;  %v13604_v1 = vcombine.low %v1230_v49, %v1234_v51  ;;  %v13660_v51 = vcombine.low %v1286_v42, %v1290_v3 }
 0x5ab   :  { %12115 = vmatprep.subr.bf16.mxu0 %v14374_v0  ;;  %v11309_v0 = vpack.c.bf16 %v11301_v58, %v11301_v58  ;;  %v13613_v2 = vcombine.high %v1238_v35, %v1242_v31  ;;  %v1298_v49 = vld [vmem:[%s19911_s1 + $0x2638] sm:$0xff] }
 0x5ac   :  { %v1306_v58 = vld [vmem:[%s19911_s1 + $0x2678] sm:$0xff] }
 0x5ad   :  { %11156 = vmatpush1.bf16.msra.mxu1 %v13548_v6  ;;  %v1246_v6 = vld [vmem:[%s19911_s1 + $0x2498] sm:$0xff] }
 0x5ae   :  { %12116 = vmatpush1.bf16.msra.mxu0 %v14372_v63  ;;  %11157 = vmatprep.subr.bf16.mxu1 %v13557_v38  ;;  %v1250_v63 = vld [vmem:[%s19911_s1 + $0x24b8] sm:$0xff]  ;;  %v11312_v38 = vpack.c.bf16 %v11304_v41, %v11304_v41  ;;  %v14417_v41 = vld [vmem:[%s19914_s3 + $0x180] ss:$8 sps:$4 sm:$0xff]  }
 0x5af   :  { %12117 = vmatprep.subr.bf16.mxu0 %v14377_v8  ;;  %v13612_v8 = vcombine.low %v1238_v35, %v1242_v31  ;;  %v13621_v11 = vcombine.high %v1246_v6, %v1250_v63  ;;  %v14422_v31 = vld [vmem:[%s19914_s3 + $0x194] ss:$8 sps:$4 sm:$0xff]  }
 0x5b1   :  { %11158 = vmatpush1.bf16.msra.mxu1 %v13556_v13  ;;  %v14401_v13 = vld [vmem:[%s19914_s3 + $0x124] ss:$8 sps:$4 sm:$0xff]  }
 0x5b2   :  { %12118 = vmatpush1.bf16.msra.mxu0 %v14375_v53  ;;  %11159 = vmatprep.subr.bf16.mxu1 %v13565_v47  ;;  %v1258_v53 = vld [vmem:[%s19911_s1 + $0x24f8] sm:$0xff]  ;;  %v13620_v47 = vcombine.low %v1246_v6, %v1250_v63  ;;  %v14425_v6 = vld [vmem:[%s19914_s3 + $0x1a4] ss:$8 sps:$4 sm:$0xff]  }
 0x5b3   :  { %12119 = vmatprep.subr.bf16.mxu0 %v14380_v7  ;;  %v14399_v7 = vld [vmem:[%s19914_s3 + $0x120] ss:$8 sps:$4 sm:$0xff]   ;;  %v1318_v63 = vld [vmem:[%s19911_s1 + $0x26d8] sm:$0xff] }
 0x5b5   :  { %11160 = vmatpush1.bf16.msra.mxu1 %v13564_v17  ;;  %v1262_v17 = vld [vmem:[%s19911_s1 + $0x2518] sm:$0xff] }
 0x5b6   :  { %12120 = vmatpush1.bf16.msra.mxu0 %v14378_v18  ;;  %11161 = vmatprep.subr.bf16.mxu1 %v13573_v62  ;;  %v14402_v62 = vld [vmem:[%s19914_s3 + $0x130] ss:$8 sps:$4 sm:$0xff]  }
 0x5b7   :  { %12121 = vmatprep.subr.bf16.mxu0 %v14383_v19 }
 0x5b9   :  { %11162 = vmatpush1.bf16.msra.mxu1 %v13572_v25  ;;  %v1274_v25 = vld [vmem:[%s19911_s1 + $0x2578] sm:$0xff] }
 0x5ba   :  { %12122 = vmatpush1.bf16.msra.mxu0 %v14381_v26  ;;  %11163 = vmatprep.subr.bf16.mxu1 %v13581_v27  ;;  %v14405_v27 = vld [vmem:[%s19914_s3 + $0x140] ss:$8 sps:$4 sm:$0xff]  }
 0x5bb   :  { %12123 = vmatprep.subr.bf16.mxu0 %v14386_v29  ;;  %v13645_v29 = vcombine.high %v1270_v24, %v1274_v25 }
 0x5bd   :  { %11164 = vmatpush1.bf16.msra.mxu1 %v13580_v36  ;;  %v13644_v36 = vcombine.low %v1270_v24, %v1274_v25  ;;  %v14434_v24 = vld [vmem:[%s19914_s3 + $0x1d4] ss:$8 sps:$4 sm:$0xff]  }
 0x5be   :  { %12124 = vmatpush1.bf16.msra.mxu0 %v14384_v37  ;;  %11165 = vmatprep.subr.bf16.mxu1 %v13589_v39  ;;  %v14408_v37 = vld [vmem:[%s19914_s3 + $0x150] ss:$8 sps:$4 sm:$0xff]   ;;  %v13653_v39 = vcombine.high %v1278_v33, %v1282_v34  ;;  %v14437_v34 = vld [vmem:[%s19914_s3 + $0x1e4] ss:$8 sps:$4 sm:$0xff]  }
 0x5bf   :  { %12125 = vmatprep.subr.bf16.mxu0 %v14389_v40  ;;  %v14413_v40 = vld [vmem:[%s19914_s3 + $0x164] ss:$8 sps:$4 sm:$0xff]   ;;  %v1342_v25 = vld [vmem:[%s19911_s1 + $0x2798] sm:$0xff] }
 0x5c1   :  { %11166 = vmatpush1.bf16.msra.mxu1 %v13588_v21  ;;  %v14411_v21 = vld [vmem:[%s19914_s3 + $0x160] ss:$8 sps:$4 sm:$0xff]  }
 0x5c2   :  { %12126 = vmatpush1.bf16.msra.mxu0 %v14387_v45  ;;  %11167 = vmatprep.subr.bf16.mxu1 %v13597_v46  ;;  %v13661_v45 = vcombine.high %v1286_v42, %v1290_v3  ;;  %v14416_v46 = vld [vmem:[%s19914_s3 + $0x174] ss:$8 sps:$4 sm:$0xff]  }
 0x5c3   :  { %12127 = vmatprep.subr.bf16.mxu0 %v14392_v61  ;;  %v1294_v61 = vld [vmem:[%s19911_s1 + $0x2618] sm:$0xff] }
 0x5c5   :  { %11168 = vmatpush1.bf16.msra.mxu1 %v13596_v10  ;;  %v13669_v10 = vcombine.high %v1294_v61, %v1298_v49 }
 0x5c6   :  { %12128 = vmatpush1.bf16.msra.mxu0 %v14390_v54  ;;  %11178 = vmatprep.subr.bf16.mxu1 %v13605_v30  ;;  %v14419_v54 = vld [vmem:[%s19914_s3 + $0x184] ss:$8 sps:$4 sm:$0xff]   ;;  %v1302_v30 = vld [vmem:[%s19911_s1 + $0x2658] sm:$0xff] }
 0x5c7   :  { %12138 = vmatprep.subr.bf16.mxu0 %v14395_v57  ;;  %v13668_v57 = vcombine.low %v1294_v61, %v1298_v49  ;;  %v13677_v35 = vcombine.high %v1302_v30, %v1306_v58 }
 0x5c8   :  { %11170 = vmatmul.mubr.bf16.vlgmr.msra.gmra.mrb[8].mxu1 %v16084_v48  ;;  %v1254_v48 = vld [vmem:[%s19911_s1 + $0x24d8] sm:$0xff] }
 0x5c9   :  { %12130 = vmatmul.mubr.bf16.vlgmr.msra.gmra.mrb[8].mxu0 %v11309_v0  ;;  %11179 = vmatpush1.bf16.msra.mxu1 %v13604_v1  ;;  %v13629_v15 = vcombine.high %v1254_v48, %v1258_v53  ;;  %v13628_v18 = vcombine.low %v1254_v48, %v1258_v53  ;;  %v1310_v1 = vld [vmem:[%s19911_s1 + $0x2698] sm:$0xff]  ;;  %v13676_v0 = vcombine.low %v1302_v30, %v1306_v58  ;;  %v14441_v58 = vld [vmem:[%s19914_s3 + $0x200] ss:$8 sps:$4 sm:$0xff]  }
 0x5ca   :  { %12139 = vmatpush1.bf16.msra.mxu0 %v14393_v56  ;;  %12170 = vmatprep.mubr.bf16.mxu0 %v11312_v38  ;;  %v1314_v56 = vld [vmem:[%s19911_s1 + $0x26b8] sm:$0xff] }
 0x5cb   :  { %11180 = vmatprep.subr.bf16.mxu1 %v13613_v2  ;;  %12140 = vmatprep.subr.bf16.mxu0 %v14398_v5  ;;  %v14420_v2 = vld [vmem:[%s19914_s3 + $0x190] ss:$8 sps:$4 sm:$0xff]   ;;  %v13685_v5 = vcombine.high %v1310_v1, %v1314_v56 }
 0x5cc   :  { %11210 = vmatprep.mubr.bf16.mxu1 %v16092_v55  ;;  %v1266_v55 = vld [vmem:[%s19911_s1 + $0x2538] sm:$0xff] }
 0x5cd   :  { %11181 = vmatpush1.bf16.msra.mxu1 %v13612_v8  ;;  %v13637_v19 = vcombine.high %v1262_v17, %v1266_v55  ;;  %v13636_v26 = vcombine.low %v1262_v17, %v1266_v55  ;;  %v1322_v38 = vld [vmem:[%s19911_s1 + $0x26f8] sm:$0xff]  ;;  %v13684_v8 = vcombine.low %v1310_v1, %v1314_v56 }
 0x5ce   :  { %12141 = vmatpush1.bf16.msra.mxu0 %v14396_v9  ;;  %11182 = vmatprep.subr.bf16.mxu1 %v13621_v11  ;;  %v14423_v9 = vld [vmem:[%s19914_s3 + $0x1a0] ss:$8 sps:$4 sm:$0xff]   ;;  %v13693_v11 = vcombine.high %v1318_v63, %v1322_v38  ;;  %v1326_v48 = vld [vmem:[%s19911_s1 + $0x2718] sm:$0xff] }
 0x5cf   :  { %12142 = vmatprep.subr.bf16.mxu0 %v14401_v13  ;;  %v14428_v13 = vld [vmem:[%s19914_s3 + $0x1b4] ss:$8 sps:$4 sm:$0xff]  }
 0x5d0   :  { %v1330_v53 = vld [vmem:[%s19911_s1 + $0x2738] sm:$0xff] }
 0x5d1   :  { %11183 = vmatpush1.bf16.msra.mxu1 %v13620_v47  ;;  %v13692_v47 = vcombine.low %v1318_v63, %v1322_v38  ;;  %v1334_v17 = vld [vmem:[%s19911_s1 + $0x2758] sm:$0xff]  ;;  %v14447_v38 = vld [vmem:[%s19914_s3 + $0x220] ss:$8 sps:$4 sm:$0xff]  }
 0x5d2   :  { %12143 = vmatpush1.bf16.msra.mxu0 %v14399_v7  ;;  %11184 = vmatprep.subr.bf16.mxu1 %v13629_v15  ;;  %v14426_v7 = vld [vmem:[%s19914_s3 + $0x1b0] ss:$8 sps:$4 sm:$0xff]   ;;  %v13701_v15 = vcombine.high %v1326_v48, %v1330_v53 }
 0x5d3   :  { %12144 = vmatprep.subr.bf16.mxu0 %v14404_v16  ;;  %v14431_v16 = vld [vmem:[%s19914_s3 + $0x1c4] ss:$8 sps:$4 sm:$0xff]   ;;  %v1338_v55 = vld [vmem:[%s19911_s1 + $0x2778] sm:$0xff] }
 0x5d5   :  { %11185 = vmatpush1.bf16.msra.mxu1 %v13628_v18  ;;  %v13700_v18 = vcombine.low %v1326_v48, %v1330_v53  ;;  %v14450_v48 = vld [vmem:[%s19914_s3 + $0x230] ss:$8 sps:$4 sm:$0xff]  }
 0x5d6   :  { %12145 = vmatpush1.bf16.msra.mxu0 %v14402_v62  ;;  %11186 = vmatprep.subr.bf16.mxu1 %v13637_v19  ;;  %v14429_v62 = vld [vmem:[%s19914_s3 + $0x1c0] ss:$8 sps:$4 sm:$0xff]   ;;  %v13709_v19 = vcombine.high %v1334_v17, %v1338_v55  ;;  %v1398_v53 = vld [vmem:[%s19911_s1 + $0x2958] sm:$0xff] }
 0x5d7   :  { %12146 = vmatprep.subr.bf16.mxu0 %v14407_v23  ;;  %v1623_v23 = vsub.s32 2, %v17317_v59 }
 0x5d9   :  { %11187 = vmatpush1.bf16.msra.mxu1 %v13636_v26  ;;  %v1346_v26 = vld [vmem:[%s19911_s1 + $0x27b8] sm:$0xff]  ;;  %v1624_v33 = vrot.slane %v19241_v43, %v1623_v23 }
 0x5da   :  { %12147 = vmatpush1.bf16.msra.mxu0 %v14405_v27  ;;  %11188 = vmatprep.subr.bf16.mxu1 %v13645_v29  ;;  %v13708_v27 = vcombine.low %v1334_v17, %v1338_v55  ;;  %v14432_v29 = vld [vmem:[%s19914_s3 + $0x1d0] ss:$8 sps:$4 sm:$0xff]   ;;  %v14453_v17 = vld [vmem:[%s19914_s3 + $0x240] ss:$8 sps:$4 sm:$0xff]  }
 0x5db   :  { %12148 = vmatprep.subr.bf16.mxu0 %v14410_v28  ;;  %v13717_v28 = vcombine.high %v1342_v25, %v1346_v26  ;;  %v14153_v3 = vadd.f32 %v18154_v32, %v1624_v33  ;;  %v14438_v32 = vld [vmem:[%s19914_s3 + $0x1f0] ss:$8 sps:$4 sm:$0xff]   ;;  %v14459_v33 = vld [vmem:[%s19914_s3 + $0x260] ss:$8 sps:$4 sm:$0xff]  }
 0x5dc   :  { %v1406_v55 = vld [vmem:[%s19911_s1 + $0x2998] sm:$0xff] }
 0x5dd   :  { %11189 = vmatpush1.bf16.msra.mxu1 %v13644_v36  ;;  %v1350_v36 = vld [vmem:[%s19911_s1 + $0x27d8] sm:$0xff]  ;;  %v11303_v49 = vmax.f32 %v14153_v3, 0.0 }
 0x5de   :  { %12149 = vmatpush1.bf16.msra.mxu0 %v14408_v37  ;;  %11190 = vmatprep.subr.bf16.mxu1 %v13653_v39  ;;  %v1354_v37 = vld [vmem:[%s19911_s1 + $0x27f8] sm:$0xff]  ;;  %v13716_v39 = vcombine.low %v1342_v25, %v1346_v26 }
 0x5df   :  { %12150 = vmatprep.subr.bf16.mxu0 %v14413_v40  ;;  %v14435_v40 = vld [vmem:[%s19914_s3 + $0x1e0] ss:$8 sps:$4 sm:$0xff]   ;;  %v13725_v42 = vcombine.high %v1350_v36, %v1354_v37  ;;  %v1414_v25 = vld [vmem:[%s19911_s1 + $0x29d8] sm:$0xff] }
 0x5e0   :  { %v1418_v26 = vld [vmem:[%s19911_s1 + $0x29f8] sm:$0xff] }
 0x5e1   :  { %11191 = vmatpush1.bf16.msra.mxu1 %v13652_v44  ;;  %v14440_v44 = vld [vmem:[%s19914_s3 + $0x1f4] ss:$8 sps:$4 sm:$0xff]  }
 0x5e2   :  { %12151 = vmatpush1.bf16.msra.mxu0 %v14411_v21  ;;  %11192 = vmatprep.subr.bf16.mxu1 %v13661_v45  ;;  %v1358_v21 = vld [vmem:[%s19911_s1 + $0x2818] sm:$0xff] }
 0x5e3   :  { %12152 = vmatprep.subr.bf16.mxu0 %v14416_v46  ;;  %v1362_v45 = vld [vmem:[%s19911_s1 + $0x2838] sm:$0xff]  ;;  %v13724_v46 = vcombine.low %v1350_v36, %v1354_v37 }
 0x5e4   :  { %v13733_v61 = vcombine.high %v1358_v21, %v1362_v45  ;;  %v1426_v36 = vld [vmem:[%s19911_s1 + $0x2a38] sm:$0xff] }
 0x5e5   :  { %11193 = vmatpush1.bf16.msra.mxu1 %v13660_v51  ;;  %v1366_v51 = vld [vmem:[%s19911_s1 + $0x2858] sm:$0xff] }
 0x5e6   :  { %12153 = vmatpush1.bf16.msra.mxu0 %v14414_v52  ;;  %11194 = vmatprep.subr.bf16.mxu1 %v13669_v10  ;;  %v1370_v52 = vld [vmem:[%s19911_s1 + $0x2878] sm:$0xff]  ;;  %v14443_v10 = vld [vmem:[%s19914_s3 + $0x204] ss:$8 sps:$4 sm:$0xff]  }
 0x5e7   :  { %12154 = vmatprep.subr.bf16.mxu0 %v14419_v54  ;;  %v13732_v54 = vcombine.low %v1358_v21, %v1362_v45  ;;  %v13741_v30 = vcombine.high %v1366_v51, %v1370_v52  ;;  %v13740_v1 = vcombine.low %v1366_v51, %v1370_v52  ;;  %v14464_v37 = vld [vmem:[%s19914_s3 + $0x274] ss:$8 sps:$4 sm:$0xff]   ;;  %v14467_v21 = vld [vmem:[%s19914_s3 + $0x284] ss:$8 sps:$4 sm:$0xff]  }
 0x5e8   :  { %v1430_v3 = vld [vmem:[%s19911_s1 + $0x2a58] sm:$0xff] }
 0x5e9   :  { %11195 = vmatpush1.bf16.msra.mxu1 %v13668_v57  ;;  %v11311_v57 = vpack.c.bf16 %v11303_v49, %v11303_v49  ;;  %v1442_v49 = vld [vmem:[%s19911_s1 + $0x2ab8] sm:$0xff] }
 0x5ea   :  { %12155 = vmatpush1.bf16.msra.mxu0 %v14417_v41  ;;  %11196 = vmatprep.subr.bf16.mxu1 %v13677_v35  ;;  %v1374_v41 = vld [vmem:[%s19911_s1 + $0x2898] sm:$0xff] }
 0x5eb   :  { %12156 = vmatprep.subr.bf16.mxu0 %v14422_v31  ;;  %v1378_v35 = vld [vmem:[%s19911_s1 + $0x28b8] sm:$0xff] }
 0x5ec   :  { %v14446_v31 = vld [vmem:[%s19914_s3 + $0x214] ss:$8 sps:$4 sm:$0xff]   ;;  %v13749_v56 = vcombine.high %v1374_v41, %v1378_v35 }
 0x5ed   :  { %11197 = vmatpush1.bf16.msra.mxu1 %v13676_v0  ;;  %v14444_v0 = vld [vmem:[%s19914_s3 + $0x210] ss:$8 sps:$4 sm:$0xff]   ;;  %v14470_v51 = vld [vmem:[%s19914_s3 + $0x294] ss:$8 sps:$4 sm:$0xff]  }
 0x5ee   :  { %12157 = vmatpush1.bf16.msra.mxu0 %v14420_v2  ;;  %11198 = vmatprep.subr.bf16.mxu1 %v13685_v5  ;;  %v1382_v2 = vld [vmem:[%s19911_s1 + $0x28d8] sm:$0xff] }
 0x5ef   :  { %12158 = vmatprep.subr.bf16.mxu0 %v14425_v6  ;;  %v1386_v5 = vld [vmem:[%s19911_s1 + $0x28f8] sm:$0xff]  ;;  %v13748_v6 = vcombine.low %v1374_v41, %v1378_v35 }
 0x5f0   :  { %v13757_v63 = vcombine.high %v1382_v2, %v1386_v5 }
 0x5f1   :  { %11199 = vmatpush1.bf16.msra.mxu1 %v13684_v8  ;;  %v1390_v8 = vld [vmem:[%s19911_s1 + $0x2918] sm:$0xff] }
 0x5f2   :  { %12159 = vmatpush1.bf16.msra.mxu0 %v14423_v9  ;;  %11200 = vmatprep.subr.bf16.mxu1 %v13693_v11  ;;  %v1394_v9 = vld [vmem:[%s19911_s1 + $0x2938] sm:$0xff]  ;;  %v13756_v11 = vcombine.low %v1382_v2, %v1386_v5 }
 0x5f3   :  { %12160 = vmatprep.subr.bf16.mxu0 %v14428_v13  ;;  %v13765_v13 = vcombine.high %v1390_v8, %v1394_v9 }
 0x5f5   :  { %11201 = vmatpush1.bf16.msra.mxu1 %v13692_v47  ;;  %v1402_v47 = vld [vmem:[%s19911_s1 + $0x2978] sm:$0xff] }
 0x5f6   :  { %12161 = vmatpush1.bf16.msra.mxu0 %v14426_v7  ;;  %11202 = vmatprep.subr.bf16.mxu1 %v13701_v15  ;;  %v14455_v7 = vld [vmem:[%s19914_s3 + $0x244] ss:$8 sps:$4 sm:$0xff]   ;;  %v13764_v15 = vcombine.low %v1390_v8, %v1394_v9 }
 0x5f7   :  { %12162 = vmatprep.subr.bf16.mxu0 %v14431_v16  ;;  %v13773_v16 = vcombine.high %v1398_v53, %v1402_v47 }
 0x5f9   :  { %11203 = vmatpush1.bf16.msra.mxu1 %v13700_v18  ;;  %v1410_v18 = vld [vmem:[%s19911_s1 + $0x29b8] sm:$0xff] }
 0x5fa   :  { %12163 = vmatpush1.bf16.msra.mxu0 %v14429_v62  ;;  %11204 = vmatprep.subr.bf16.mxu1 %v13709_v19  ;;  %v14458_v62 = vld [vmem:[%s19914_s3 + $0x254] ss:$8 sps:$4 sm:$0xff]   ;;  %v13772_v19 = vcombine.low %v1398_v53, %v1402_v47  ;;  %v13781_v23 = vcombine.high %v1406_v55, %v1410_v18 }
 0x5fb   :  { %12164 = vmatprep.subr.bf16.mxu0 %v14434_v24  ;;  %v14456_v24 = vld [vmem:[%s19914_s3 + $0x250] ss:$8 sps:$4 sm:$0xff]  }
 0x5fd   :  { %11205 = vmatpush1.bf16.msra.mxu1 %v13708_v27  ;;  %v14461_v27 = vld [vmem:[%s19914_s3 + $0x264] ss:$8 sps:$4 sm:$0xff]  }
 0x5fe   :  { %12165 = vmatpush1.bf16.msra.mxu0 %v14432_v29  ;;  %11206 = vmatprep.subr.bf16.mxu1 %v13717_v28  ;;  %v13780_v29 = vcombine.low %v1406_v55, %v1410_v18  ;;  %v13789_v28 = vcombine.high %v1414_v25, %v1418_v26 }
 0x5ff   :  { %12166 = vmatprep.subr.bf16.mxu0 %v14437_v34  ;;  %v1422_v34 = vld [vmem:[%s19911_s1 + $0x2a18] sm:$0xff] }
 0x600   :  { %v13796_v45 = vcombine.low %v1422_v34, %v1426_v36 }
 0x601   :  { %11207 = vmatpush1.bf16.msra.mxu1 %v13716_v39  ;;  %v13788_v39 = vcombine.low %v1414_v25, %v1418_v26 }
 0x602   :  { %12167 = vmatpush1.bf16.msra.mxu0 %v14435_v40  ;;  %11208 = vmatprep.subr.bf16.mxu1 %v13725_v42  ;;  %v13797_v40 = vcombine.high %v1422_v34, %v1426_v36  ;;  %v14462_v42 = vld [vmem:[%s19914_s3 + $0x270] ss:$8 sps:$4 sm:$0xff]  }
 0x603   :  { %12168 = vmatprep.subr.bf16.mxu0 %v14440_v44  ;;  %v1434_v44 = vld [vmem:[%s19911_s1 + $0x2a78] sm:$0xff] }
 0x604   :  { %v13804_v52 = vcombine.low %v1430_v3, %v1434_v44 }
 0x605   :  { %11209 = vmatpush1.bf16.msra.mxu1 %v13724_v46  ;;  %v13805_v46 = vcombine.high %v1430_v3, %v1434_v44  ;;  %v1510_v3 = vld [vmem:[%s19911_s1 + $0x2cd8] sm:$0xff] }
 0x606   :  { %12169 = vmatpush1.bf16.msra.mxu0 %v14438_v32  ;;  %11219 = vmatprep.subr.bf16.mxu1 %v13733_v61  ;;  %v14465_v32 = vld [vmem:[%s19914_s3 + $0x280] ss:$8 sps:$4 sm:$0xff]   ;;  %v1438_v61 = vld [vmem:[%s19911_s1 + $0x2a98] sm:$0xff] }
 0x607   :  { %12179 = vmatprep.subr.bf16.mxu0 %v14443_v10  ;;  %v13813_v10 = vcombine.high %v1438_v61, %v1442_v49  ;;  %v13812_v41 = vcombine.low %v1438_v61, %v1442_v49  ;;  %v1514_v44 = vld [vmem:[%s19911_s1 + $0x2cf8] sm:$0xff] }
 0x608   :  { %11211 = vmatmul.mubr.bf16.vlgmr.msra.gmra.mrb[8].mxu1 %v16290_v50  ;;  %v14449_v50 = vld [vmem:[%s19914_s3 + $0x224] ss:$8 sps:$4 sm:$0xff]   ;;  %v1526_v61 = vld [vmem:[%s19911_s1 + $0x2d58] sm:$0xff] }
 0x609   :  { %12171 = vmatmul.mubr.bf16.vlgmr.msra.gmra.mrb[8].mxu0 %v11311_v57  ;;  %11220 = vmatpush1.bf16.msra.mxu1 %v13732_v54  ;;  %v14468_v54 = vld [vmem:[%s19914_s3 + $0x290] ss:$8 sps:$4 sm:$0xff]   ;;  %v14473_v57 = vld [vmem:[%s19914_s3 + $0x2a4] ss:$8 sps:$4 sm:$0xff]  }
 0x60a   :  { %11221 = vmatprep.subr.bf16.mxu1 %v13741_v30  ;;  %12180 = vmatpush1.bf16.msra.mxu0 %v14441_v58  ;;  %v1446_v30 = vld [vmem:[%s19911_s1 + $0x2ad8] sm:$0xff] }
 0x60b   :  { %12181 = vmatprep.subr.bf16.mxu0 %v14446_v31  ;;  %11251 = vmatprep.mubr.bf16.mxu1 %v16298_v60  ;;  %v14452_v60 = vld [vmem:[%s19914_s3 + $0x234] ss:$8 sps:$4 sm:$0xff]   ;;  %v14471_v31 = vld [vmem:[%s19914_s3 + $0x2a0] ss:$8 sps:$4 sm:$0xff]  }
 0x60c   :  { %v1450_v58 = vld [vmem:[%s19911_s1 + $0x2af8] sm:$0xff] }
 0x60d   :  { %11222 = vmatpush1.bf16.msra.mxu1 %v13740_v1  ;;  %v13821_v35 = vcombine.high %v1446_v30, %v1450_v58  ;;  %v1454_v1 = vld [vmem:[%s19911_s1 + $0x2b18] sm:$0xff]  ;;  %v13820_v2 = vcombine.low %v1446_v30, %v1450_v58 }
 0x60e   :  { %11223 = vmatprep.subr.bf16.mxu1 %v13749_v56  ;;  %12182 = vmatpush1.bf16.msra.mxu0 %v14444_v0  ;;  %v1458_v56 = vld [vmem:[%s19911_s1 + $0x2b38] sm:$0xff] }
 0x60f   :  { %12183 = vmatprep.subr.bf16.mxu0 %v14449_v50  ;;  %v14476_v0 = vld [vmem:[%s19914_s3 + $0x2b4] ss:$8 sps:$4 sm:$0xff]   ;;  %v13829_v5 = vcombine.high %v1454_v1, %v1458_v56  ;;  %v14474_v50 = vld [vmem:[%s19914_s3 + $0x2b0] ss:$8 sps:$4 sm:$0xff]   ;;  %v13828_v8 = vcombine.low %v1454_v1, %v1458_v56 }
 0x610   :  { %v1530_v49 = vld [vmem:[%s19911_s1 + $0x2d78] sm:$0xff] }
 0x611   :  { %11224 = vmatpush1.bf16.msra.mxu1 %v13748_v6  ;;  %v1462_v6 = vld [vmem:[%s19911_s1 + $0x2b58] sm:$0xff] }
 0x612   :  { %11225 = vmatprep.subr.bf16.mxu1 %v13757_v63  ;;  %12184 = vmatpush1.bf16.msra.mxu0 %v14447_v38  ;;  %v1466_v63 = vld [vmem:[%s19911_s1 + $0x2b78] sm:$0xff]  ;;  %v14479_v38 = vld [vmem:[%s19914_s3 + $0x2c4] ss:$8 sps:$4 sm:$0xff]  }
 0x613   :  { %12185 = vmatprep.subr.bf16.mxu0 %v14452_v60  ;;  %v13837_v9 = vcombine.high %v1462_v6, %v1466_v63  ;;  %v14477_v60 = vld [vmem:[%s19914_s3 + $0x2c0] ss:$8 sps:$4 sm:$0xff]   ;;  %v13836_v53 = vcombine.low %v1462_v6, %v1466_v63  ;;  %v1534_v30 = vld [vmem:[%s19911_s1 + $0x2d98] sm:$0xff] }
 0x614   :  { %v1538_v58 = vld [vmem:[%s19911_s1 + $0x2db8] sm:$0xff] }
 0x615   :  { %11226 = vmatpush1.bf16.msra.mxu1 %v13756_v11  ;;  %v1470_v11 = vld [vmem:[%s19911_s1 + $0x2b98] sm:$0xff] }
 0x616   :  { %11227 = vmatprep.subr.bf16.mxu1 %v13765_v13  ;;  %12186 = vmatpush1.bf16.msra.mxu0 %v14450_v48  ;;  %v1474_v13 = vld [vmem:[%s19911_s1 + $0x2bb8] sm:$0xff] }
 0x617   :  { %12187 = vmatprep.subr.bf16.mxu0 %v14455_v7  ;;  %v14482_v48 = vld [vmem:[%s19914_s3 + $0x2d4] ss:$8 sps:$4 sm:$0xff]   ;;  %v13845_v47 = vcombine.high %v1470_v11, %v1474_v13  ;;  %v14480_v7 = vld [vmem:[%s19914_s3 + $0x2d0] ss:$8 sps:$4 sm:$0xff]   ;;  %v13844_v55 = vcombine.low %v1470_v11, %v1474_v13 }
 0x618   :  { %v1542_v1 = vld [vmem:[%s19911_s1 + $0x2dd8] sm:$0xff] }
 0x619   :  { %11228 = vmatpush1.bf16.msra.mxu1 %v13764_v15  ;;  %v1478_v15 = vld [vmem:[%s19911_s1 + $0x2bd8] sm:$0xff] }
 0x61a   :  { %11229 = vmatprep.subr.bf16.mxu1 %v13773_v16  ;;  %12188 = vmatpush1.bf16.msra.mxu0 %v14453_v17  ;;  %v1482_v16 = vld [vmem:[%s19911_s1 + $0x2bf8] sm:$0xff]  ;;  %v14485_v17 = vld [vmem:[%s19914_s3 + $0x2e4] ss:$8 sps:$4 sm:$0xff]  }
 0x61b   :  { %12189 = vmatprep.subr.bf16.mxu0 %v14458_v62  ;;  %v13853_v18 = vcombine.high %v1478_v15, %v1482_v16  ;;  %v14483_v62 = vld [vmem:[%s19914_s3 + $0x2e0] ss:$8 sps:$4 sm:$0xff]   ;;  %v13852_v25 = vcombine.low %v1478_v15, %v1482_v16  ;;  %v1546_v56 = vld [vmem:[%s19911_s1 + $0x2df8] sm:$0xff] }
 0x61c   :  { %v13916_v13 = vcombine.low %v1542_v1, %v1546_v56  ;;  %v1558_v15 = vld [vmem:[%s19911_s1 + $0x2e58] sm:$0xff] }
 0x61d   :  { %11230 = vmatpush1.bf16.msra.mxu1 %v13772_v19  ;;  %v1486_v19 = vld [vmem:[%s19911_s1 + $0x2c18] sm:$0xff] }
 0x61e   :  { %11231 = vmatprep.subr.bf16.mxu1 %v13781_v23  ;;  %12190 = vmatpush1.bf16.msra.mxu0 %v14456_v24  ;;  %v1490_v23 = vld [vmem:[%s19911_s1 + $0x2c38] sm:$0xff] }
 0x61f   :  { %12191 = vmatprep.subr.bf16.mxu0 %v14461_v27  ;;  %v14488_v24 = vld [vmem:[%s19914_s3 + $0x2f4] ss:$8 sps:$4 sm:$0xff]   ;;  %v13861_v26 = vcombine.high %v1486_v19, %v1490_v23  ;;  %v14486_v27 = vld [vmem:[%s19914_s3 + $0x2f0] ss:$8 sps:$4 sm:$0xff]   ;;  %v13860_v34 = vcombine.low %v1486_v19, %v1490_v23 }
 0x620   :  { %v1562_v16 = vld [vmem:[%s19911_s1 + $0x2e78] sm:$0xff] }
 0x621   :  { %11232 = vmatpush1.bf16.msra.mxu1 %v13780_v29  ;;  %v1494_v29 = vld [vmem:[%s19911_s1 + $0x2c58] sm:$0xff] }
 0x622   :  { %11233 = vmatprep.subr.bf16.mxu1 %v13789_v28  ;;  %12192 = vmatpush1.bf16.msra.mxu0 %v14459_v33  ;;  %v1498_v28 = vld [vmem:[%s19911_s1 + $0x2c78] sm:$0xff]  ;;  %v14491_v33 = vld [vmem:[%s19914_s3 + $0x304] ss:$8 sps:$4 sm:$0xff]  }
 0x623   :  { %12193 = vmatprep.subr.bf16.mxu0 %v14464_v37  ;;  %v13869_v36 = vcombine.high %v1494_v29, %v1498_v28  ;;  %v1502_v37 = vld [vmem:[%s19911_s1 + $0x2c98] sm:$0xff] }
 0x624   :  { %v1566_v19 = vld [vmem:[%s19911_s1 + $0x2e98] sm:$0xff] }
 0x625   :  { %11234 = vmatpush1.bf16.msra.mxu1 %v13788_v39  ;;  %v1506_v39 = vld [vmem:[%s19911_s1 + $0x2cb8] sm:$0xff] }
 0x626   :  { %11235 = vmatprep.subr.bf16.mxu1 %v13797_v40  ;;  %12194 = vmatpush1.bf16.msra.mxu0 %v14462_v42  ;;  %v13868_v40 = vcombine.low %v1494_v29, %v1498_v28  ;;  %v13877_v42 = vcombine.high %v1502_v37, %v1506_v39  ;;  %v1570_v23 = vld [vmem:[%s19911_s1 + $0x2eb8] sm:$0xff] }
 0x627   :  { %12195 = vmatprep.subr.bf16.mxu0 %v14467_v21  ;;  %v13876_v21 = vcombine.low %v1502_v37, %v1506_v39  ;;  %v1574_v29 = vld [vmem:[%s19911_s1 + $0x2ed8] sm:$0xff] }
 0x628   :  { %v1578_v28 = vld [vmem:[%s19911_s1 + $0x2ef8] sm:$0xff] }
 0x629   :  { %11236 = vmatpush1.bf16.msra.mxu1 %v13796_v45  ;;  %v13885_v45 = vcombine.high %v1510_v3, %v1514_v44  ;;  %v14498_v37 = vld [vmem:[%s19914_s3 + $0x330] ss:$8 sps:$4 sm:$0xff]  }
 0x62a   :  { %11237 = vmatprep.subr.bf16.mxu1 %v13805_v46  ;;  %12196 = vmatpush1.bf16.msra.mxu0 %v14465_v32  ;;  %v13884_v46 = vcombine.low %v1510_v3, %v1514_v44  ;;  %v1582_v39 = vld [vmem:[%s19911_s1 + $0x2f18] sm:$0xff]  ;;  %v13948_v3 = vcombine.low %v1574_v29, %v1578_v28 }
 0x62b   :  { %12197 = vmatprep.subr.bf16.mxu0 %v14470_v51 }
 0x62d   :  { %11238 = vmatpush1.bf16.msra.mxu1 %v13804_v52  ;;  %v1631_v52 = vsub.s32 4, %v17317_v59 }
 0x62e   :  { %11239 = vmatprep.subr.bf16.mxu1 %v13813_v10  ;;  %12198 = vmatpush1.bf16.msra.mxu0 %v14468_v54  ;;  %v1635_v10 = vsub.s32 5, %v17317_v59  ;;  %v13901_v54 = vcombine.high %v1526_v61, %v1530_v49 }
 0x62f   :  { %12199 = vmatprep.subr.bf16.mxu0 %v14473_v57  ;;  %v1632_v57 = vrot.slane %v19241_v43, %v1631_v52  ;;  %v14509_v52 = vld [vmem:[%s19914_s3 + $0x364] ss:$8 sps:$4 sm:$0xff]  }
 0x631   :  { %11240 = vmatpush1.bf16.msra.mxu1 %v13812_v41  ;;  %v13900_v41 = vcombine.low %v1526_v61, %v1530_v49  ;;  %v14504_v61 = vld [vmem:[%s19914_s3 + $0x350] ss:$8 sps:$4 sm:$0xff]  }
 0x632   :  { %11241 = vmatprep.subr.bf16.mxu1 %v13821_v35  ;;  %12200 = vmatpush1.bf16.msra.mxu0 %v14471_v31  ;;  %v1636_v35 = vrot.slane %v19241_v43, %v1635_v10  ;;  %v13909_v31 = vcombine.high %v1534_v30, %v1538_v58  ;;  %v1598_v49 = vld [vmem:[%s19911_s1 + $0x2f98] sm:$0xff] }
 0x633   :  { %12201 = vmatprep.subr.bf16.mxu0 %v14476_v0 }
 0x635   :  { %11242 = vmatpush1.bf16.msra.mxu1 %v13820_v2 }
 0x636   :  { %11243 = vmatprep.subr.bf16.mxu1 %v13829_v5  ;;  %12202 = vmatpush1.bf16.msra.mxu0 %v14474_v50  ;;  %v13908_v50 = vcombine.low %v1534_v30, %v1538_v58  ;;  %v14507_v30 = vld [vmem:[%s19914_s3 + $0x360] ss:$8 sps:$4 sm:$0xff]   ;;  %v1606_v58 = vld [vmem:[%s19911_s1 + $0x2fd8] sm:$0xff] }
 0x637   :  { %12203 = vmatprep.subr.bf16.mxu0 %v14479_v38  ;;  %v13917_v38 = vcombine.high %v1542_v1, %v1546_v56  ;;  %v14510_v1 = vld [vmem:[%s19914_s3 + $0x370] ss:$8 sps:$4 sm:$0xff]   ;;  %v14515_v56 = vld [vmem:[%s19914_s3 + $0x384] ss:$8 sps:$4 sm:$0xff]  }
 0x639   :  { %11244 = vmatpush1.bf16.msra.mxu1 %v13828_v8 }
 0x63a   :  { %11245 = vmatprep.subr.bf16.mxu1 %v13837_v9  ;;  %12204 = vmatpush1.bf16.msra.mxu0 %v14477_v60  ;;  %v1550_v9 = vld [vmem:[%s19911_s1 + $0x2e18] sm:$0xff] }
 0x63b   :  { %12205 = vmatprep.subr.bf16.mxu0 %v14482_v48  ;;  %v1554_v60 = vld [vmem:[%s19911_s1 + $0x2e38] sm:$0xff] }
 0x63d   :  { %11246 = vmatpush1.bf16.msra.mxu1 %v13836_v53  ;;  %v13925_v53 = vcombine.high %v1550_v9, %v1554_v60 }
 0x63e   :  { %11247 = vmatprep.subr.bf16.mxu1 %v13845_v47  ;;  %12206 = vmatpush1.bf16.msra.mxu0 %v14480_v7  ;;  %v14489_v47 = vld [vmem:[%s19914_s3 + $0x300] ss:$8 sps:$4 sm:$0xff]  }
 0x63f   :  { %12207 = vmatprep.subr.bf16.mxu0 %v14485_v17  ;;  %v14494_v17 = vld [vmem:[%s19914_s3 + $0x314] ss:$8 sps:$4 sm:$0xff]  }
 0x641   :  { %11248 = vmatpush1.bf16.msra.mxu1 %v13844_v55  ;;  %v13924_v55 = vcombine.low %v1550_v9, %v1554_v60  ;;  %v14530_v9 = vld [vmem:[%s19914_s3 + $0x3d4] ss:$8 sps:$4 sm:$0xff]   ;;  %v14528_v60 = vld [vmem:[%s19914_s3 + $0x3d0] ss:$8 sps:$4 sm:$0xff]  }
 0x642   :  { %11249 = vmatprep.subr.bf16.mxu1 %v13853_v18  ;;  %12208 = vmatpush1.bf16.msra.mxu0 %v14483_v62  ;;  %v13933_v18 = vcombine.high %v1558_v15, %v1562_v16  ;;  %v14492_v62 = vld [vmem:[%s19914_s3 + $0x310] ss:$8 sps:$4 sm:$0xff]  }
 0x643   :  { %12209 = vmatprep.subr.bf16.mxu0 %v14488_v24  ;;  %v14497_v24 = vld [vmem:[%s19914_s3 + $0x324] ss:$8 sps:$4 sm:$0xff]  }
 0x645   :  { %11250 = vmatpush1.bf16.msra.mxu1 %v13852_v25  ;;  %v13932_v25 = vcombine.low %v1558_v15, %v1562_v16  ;;  %v14539_v15 = vld [vmem:[%s19915_s5 + $0x48] sm:$0xff]  }
 0x646   :  { %11260 = vmatprep.subr.bf16.mxu1 %v13861_v26  ;;  %12210 = vmatpush1.bf16.msra.mxu0 %v14486_v27  ;;  %v13941_v26 = vcombine.high %v1566_v19, %v1570_v23  ;;  %v14495_v27 = vld [vmem:[%s19914_s3 + $0x320] ss:$8 sps:$4 sm:$0xff]  }
 0x647   :  { %12220 = vmatprep.subr.bf16.mxu0 %v14491_v33  ;;  %v14500_v33 = vld [vmem:[%s19914_s3 + $0x334] ss:$8 sps:$4 sm:$0xff]   ;;  %v14540_v16 = vld [vmem:[%s19915_s5 + $0x8] sm:$0xff]  }
 0x648   :  { %11252 = vmatmul.mubr.bf16.vlgmr.msra.gmra.mrb[8].mxu1 %v16496_v4  ;;  %v1518_v4 = vld [vmem:[%s19911_s1 + $0x2d18] sm:$0xff] }
 0x649   :  { %11261 = vmatpush1.bf16.msra.mxu1 %v13860_v34  ;;  %11292 = vmatprep.mubr.bf16.mxu1 %v16504_v12  ;;  %v1522_v12 = vld [vmem:[%s19911_s1 + $0x2d38] sm:$0xff]  ;;  %v13940_v34 = vcombine.low %v1566_v19, %v1570_v23  ;;  %v14545_v19 = vld [vmem:[%s19915_s5 + $0x60] sm:$0xff]  }
 0x64a   :  { %11262 = vmatprep.subr.bf16.mxu1 %v13869_v36  ;;  %v13893_v32 = vcombine.high %v1518_v4, %v1522_v12  ;;  %v13892_v51 = vcombine.low %v1518_v4, %v1522_v12  ;;  %v13949_v36 = vcombine.high %v1574_v29, %v1578_v28  ;;  %v1594_v4 = vld [vmem:[%s19911_s1 + $0x2f78] sm:$0xff]  ;;  %v14546_v23 = vld [vmem:[%s19915_s5 + $0x20] sm:$0xff]  }
 0x64b   :  { %v14506_v12 = vld [vmem:[%s19914_s3 + $0x354] ss:$8 sps:$4 sm:$0xff]   ;;  %v14554_v29 = vld [vmem:[%s19913_s2] sm:$0xff] }
 0x64d   :  { %11263 = vmatpush1.bf16.msra.mxu1 %v13868_v40  ;;  %v1586_v40 = vld [vmem:[%s19911_s1 + $0x2f38] sm:$0xff] }
 0x64e   :  { %11264 = vmatprep.subr.bf16.mxu1 %v13877_v42  ;;  %v14503_v42 = vld [vmem:[%s19914_s3 + $0x344] ss:$8 sps:$4 sm:$0xff]   ;;  %v13957_v44 = vcombine.high %v1582_v39, %v1586_v40 }
 0x651   :  { %11265 = vmatpush1.bf16.msra.mxu1 %v13876_v21  ;;  %v14501_v21 = vld [vmem:[%s19914_s3 + $0x340] ss:$8 sps:$4 sm:$0xff]  }
 0x652   :  { %11266 = vmatprep.subr.bf16.mxu1 %v13885_v45  ;;  %v1590_v45 = vld [vmem:[%s19911_s1 + $0x2f58] sm:$0xff] }
 0x653   :  { %v13964_v10 = vcombine.low %v1590_v45, %v1594_v4 }
 0x655   :  { %11267 = vmatpush1.bf16.msra.mxu1 %v13884_v46  ;;  %v13956_v46 = vcombine.low %v1582_v39, %v1586_v40 }
 0x656   :  { %11268 = vmatprep.subr.bf16.mxu1 %v13893_v32  ;;  %v13965_v32 = vcombine.high %v1590_v45, %v1594_v4  ;;  %v14549_v4 = vld [vmem:[%s19915_s5 + $0x70] sm:$0xff]  }
 0x659   :  { %11269 = vmatpush1.bf16.msra.mxu1 %v13892_v51  ;;  %v1602_v51 = vld [vmem:[%s19911_s1 + $0x2fb8] sm:$0xff] }
 0x65a   :  { %11270 = vmatprep.subr.bf16.mxu1 %v13901_v54  ;;  %v13973_v54 = vcombine.high %v1598_v49, %v1602_v51 }
 0x65c   :  { %v10802_v0 = vpop.f32.mrb[4].mxu0 }
 0x65d   :  { %v14155_v2 = vadd.f32 %v10802_v0, %v1632_v57  ;;  %v10804_v5 = vpop.f32.mrb[5].mxu0  ;;  %11271 = vmatpush1.bf16.msra.mxu1 %v13900_v41  ;;  %v1610_v57 = vld [vmem:[%s19911_s1 + $0x2ff8] sm:$0xff] }
 0x65e   :  { %v14156_v6 = vadd.f32 %v10804_v5, %v1636_v35  ;;  %v10806_v63 = vpop.f32.mrb[6].mxu0  ;;  %11272 = vmatprep.subr.bf16.mxu1 %v13909_v31  ;;  %v14512_v41 = vld [vmem:[%s19914_s3 + $0x374] ss:$8 sps:$4 sm:$0xff]   ;;  %v13972_v35 = vcombine.low %v1598_v49, %v1602_v51  ;;  %v13981_v31 = vcombine.high %v1606_v58, %v1610_v57  ;;  %v13980_v0 = vcombine.low %v1606_v58, %v1610_v57 }
 0x65f   :  { %v11305_v43 = vmax.f32 %v14155_v2, 0.0  ;;  %v10807_v8 = vpop.f32.mrb[7].mxu0  ;;  %v14513_v2 = vld [vmem:[%s19914_s3 + $0x380] ss:$8 sps:$4 sm:$0xff]   ;;  %v14518_v5 = vld [vmem:[%s19914_s3 + $0x394] ss:$8 sps:$4 sm:$0xff]  }
 0x660   :  { %v11306_v11 = vmax.f32 %v14156_v6, 0.0  ;;  %v14521_v6 = vld [vmem:[%s19914_s3 + $0x3a4] ss:$8 sps:$4 sm:$0xff]   ;;  %v14519_v63 = vld [vmem:[%s19914_s3 + $0x3a0] ss:$8 sps:$4 sm:$0xff]  }
 0x661   :  { %11273 = vmatpush1.bf16.msra.mxu1 %v13908_v50  ;;  %v11313_v7 = vpack.c.bf16 %v11305_v43, %v11305_v43  ;;  %v14516_v50 = vld [vmem:[%s19914_s3 + $0x390] ss:$8 sps:$4 sm:$0xff]   ;;  %v14525_v8 = vld [vmem:[%s19914_s3 + $0x3c0] ss:$8 sps:$4 sm:$0xff]  }
 0x662   :  { %v11314_v48 = vpack.c.bf16 %v11306_v11, %v11306_v11  ;;  %11274 = vmatprep.subr.bf16.mxu1 %v13917_v38  ;;  %v14524_v38 = vld [vmem:[%s19914_s3 + $0x3b4] ss:$8 sps:$4 sm:$0xff]   ;;  %v14522_v43 = vld [vmem:[%s19914_s3 + $0x3b0] ss:$8 sps:$4 sm:$0xff]   ;;  %v14533_v11 = vld [vmem:[%s19914_s3 + $0x3e4] ss:$8 sps:$4 sm:$0xff]  }
 0x664   :  { %12211 = vmatprep.mubr.bf16.mxu0 %v11314_v48  ;;  %v14536_v48 = vld [vmem:[%s19914_s3 + $0x3f4] ss:$8 sps:$4 sm:$0xff]  }
 0x665   :  { %12212 = vmatmul.mubr.bf16.vlgmr.msra.gmra.mrb[8].mxu0 %v11313_v7  ;;  %11275 = vmatpush1.bf16.msra.mxu1 %v13916_v13  ;;  %v14531_v13 = vld [vmem:[%s19914_s3 + $0x3e0] ss:$8 sps:$4 sm:$0xff]  }
 0x666   :  { %11276 = vmatprep.subr.bf16.mxu1 %v13925_v53  ;;  %12221 = vmatpush1.bf16.msra.mxu0 %v14489_v47  ;;  %v14534_v53 = vld [vmem:[%s19914_s3 + $0x3f0] ss:$8 sps:$4 sm:$0xff]   ;;  %v14537_v47 = vld [vmem:[%s19915_s5 + $0x40] sm:$0xff]  }
 0x667   :  { %12222 = vmatprep.subr.bf16.mxu0 %v14494_v17  ;;  %v14538_v7 = vld [vmem:[%s19915_s5] sm:$0xff]   ;;  %v14541_v17 = vld [vmem:[%s19915_s5 + $0x50] sm:$0xff]  }
 0x669   :  { %11277 = vmatpush1.bf16.msra.mxu1 %v13924_v55  ;;  %v14542_v55 = vld [vmem:[%s19915_s5 + $0x10] sm:$0xff]  }
 0x66a   :  { %11278 = vmatprep.subr.bf16.mxu1 %v13933_v18  ;;  %12223 = vmatpush1.bf16.msra.mxu0 %v14492_v62  ;;  %v14543_v18 = vld [vmem:[%s19915_s5 + $0x58] sm:$0xff]  }
 0x66b   :  { %12224 = vmatprep.subr.bf16.mxu0 %v14497_v24  ;;  %v14544_v62 = vld [vmem:[%s19915_s5 + $0x18] sm:$0xff]   ;;  %v14547_v24 = vld [vmem:[%s19915_s5 + $0x68] sm:$0xff]  }
 0x66d   :  { %11279 = vmatpush1.bf16.msra.mxu1 %v13932_v25  ;;  %v14548_v25 = vld [vmem:[%s19915_s5 + $0x28] sm:$0xff]  }
 0x66e   :  { %11280 = vmatprep.subr.bf16.mxu1 %v13941_v26  ;;  %12225 = vmatpush1.bf16.msra.mxu0 %v14495_v27  ;;  %v1639_v26 = vsub.s32 6, %v17317_v59  ;;  %v1643_v27 = vsub.s32 7, %v17317_v59 }
 0x66f   :  { %12226 = vmatprep.subr.bf16.mxu0 %v14500_v33 }
 0x670   :  { %v1640_v28 = vrot.slane %v14554_v29, %v1639_v26  ;;  %v1644_v33 = vrot.slane %v14554_v29, %v1643_v27 }
 0x671   :  { %11281 = vmatpush1.bf16.msra.mxu1 %v13940_v34 }
 0x672   :  { %11282 = vmatprep.subr.bf16.mxu1 %v13949_v36  ;;  %12227 = vmatpush1.bf16.msra.mxu0 %v14498_v37 }
 0x673   :  { %12228 = vmatprep.subr.bf16.mxu0 %v14503_v42 }
 0x675   :  { %11283 = vmatpush1.bf16.msra.mxu1 %v13948_v3 }
 0x676   :  { %11284 = vmatprep.subr.bf16.mxu1 %v13957_v44  ;;  %12229 = vmatpush1.bf16.msra.mxu0 %v14501_v21 }
 0x677   :  { %12230 = vmatprep.subr.bf16.mxu0 %v14506_v12  ;;  %v14550_v12 = vld [vmem:[%s19915_s5 + $0x30] sm:$0xff]  }
 0x679   :  { %11285 = vmatpush1.bf16.msra.mxu1 %v13956_v46  ;;  %v14551_v46 = vld [vmem:[%s19915_s5 + $0x78] sm:$0xff]  }
 0x67a   :  { %11286 = vmatprep.subr.bf16.mxu1 %v13965_v32  ;;  %12231 = vmatpush1.bf16.msra.mxu0 %v14504_v61  ;;  %v14552_v32 = vld [vmem:[%s19915_s5 + $0x38] sm:$0xff]   ;;  %v11445_v61 = vld [vmem:[%s19916_s4] sm:$0x3] }
 0x67b   :  { %12232 = vmatprep.subr.bf16.mxu0 %v14509_v52  ;;  %v11450_v49 = vrot.slane %v11445_v61, %v1615_v14  ;;  %v11454_v51 = vrot.slane %v11445_v61, %v1619_v22  ;;  %v14110_v14 = vld [vmem:[%s19917_s6] ss:$0 sm:$0xff] }
 0x67d   :  { %11287 = vmatpush1.bf16.msra.mxu1 %v13964_v10 }
 0x67e   :  { %11288 = vmatprep.subr.bf16.mxu1 %v13973_v54  ;;  %12233 = vmatpush1.bf16.msra.mxu0 %v14507_v30 }
 0x67f   :  { %12234 = vmatprep.subr.bf16.mxu0 %v14512_v41 }
 0x681   :  { %11289 = vmatpush1.bf16.msra.mxu1 %v13972_v35 }
 0x682   :  { %11290 = vmatprep.subr.bf16.mxu1 %v13981_v31  ;;  %12235 = vmatpush1.bf16.msra.mxu0 %v14510_v1 }
 0x683   :  { %12236 = vmatprep.subr.bf16.mxu0 %v14515_v56 }
 0x685   :  { %11291 = vmatpush1.bf16.msra.mxu1 %v13980_v0 }
 0x686   :  { %12237 = vmatpush1.bf16.msra.mxu0 %v14513_v2  ;;  %14127 = vmatprep.subr.bf16.mxu1 %v14537_v47 }
 0x687   :  { %12238 = vmatprep.subr.bf16.mxu0 %v14518_v5 }
 0x688   :  { %11293 = vmatmul.mubr.bf16.vlgmr.msra.gmra.mrb[8].mxu1 %v16699_v20  ;;  %v14527_v20 = vld [vmem:[%s19914_s3 + $0x3c4] ss:$8 sps:$4 sm:$0xff]  }
 0x689   :  { %14128 = vmatpush3.bf16.msra.mxu1 %v14538_v7 }
 0x68a   :  { %12239 = vmatpush1.bf16.msra.mxu0 %v14516_v50  ;;  %14129 = vmatprep.subr.bf16.mxu1 %v14539_v15 }
 0x68b   :  { %12240 = vmatprep.subr.bf16.mxu0 %v14521_v6 }
 0x68d   :  { %14130 = vmatpush3.bf16.msra.mxu1 %v14540_v16 }
 0x68e   :  { %12241 = vmatpush1.bf16.msra.mxu0 %v14519_v63  ;;  %14131 = vmatprep.subr.bf16.mxu1 %v14541_v17 }
 0x68f   :  { %12242 = vmatprep.subr.bf16.mxu0 %v14524_v38 }
 0x691   :  { %14132 = vmatpush3.bf16.msra.mxu1 %v14542_v55 }
 0x692   :  { %12243 = vmatpush1.bf16.msra.mxu0 %v14522_v43  ;;  %14133 = vmatprep.subr.bf16.mxu1 %v14543_v18 }
 0x693   :  { %12244 = vmatprep.subr.bf16.mxu0 %v14527_v20 }
 0x695   :  { %14134 = vmatpush3.bf16.msra.mxu1 %v14544_v62 }
 0x696   :  { %12245 = vmatpush1.bf16.msra.mxu0 %v14525_v8  ;;  %14135 = vmatprep.subr.bf16.mxu1 %v14545_v19 }
 0x697   :  { %12246 = vmatprep.subr.bf16.mxu0 %v14530_v9 }
 0x699   :  { %14136 = vmatpush3.bf16.msra.mxu1 %v14546_v23 }
 0x69a   :  { %12247 = vmatpush1.bf16.msra.mxu0 %v14528_v60  ;;  %14137 = vmatprep.subr.bf16.mxu1 %v14547_v24 }
 0x69b   :  { %12248 = vmatprep.subr.bf16.mxu0 %v14533_v11 }
 0x69d   :  { %14138 = vmatpush3.bf16.msra.mxu1 %v14548_v25 }
 0x69e   :  { %12249 = vmatpush1.bf16.msra.mxu0 %v14531_v13  ;;  %14139 = vmatprep.subr.bf16.mxu1 %v14549_v4 }
 0x69f   :  { %12250 = vmatprep.subr.bf16.mxu0 %v14536_v48 }
 0x6a1   :  { %14140 = vmatpush3.bf16.msra.mxu1 %v14550_v12 }
 0x6a2   :  { %12251 = vmatpush1.bf16.msra.mxu0 %v14534_v53  ;;  %14141 = vmatprep.subr.bf16.mxu1 %v14551_v46 }
 0x6a5   :  { %14142 = vmatpush3.bf16.msra.mxu1 %v14552_v32 }
 0x75b   :  { %v11294_v34 = vpop.f32.mrb[8].mxu1 }
 0x75c   :  { %v14157_v36 = vadd.f32 %v11294_v34, %v1640_v28  ;;  %v11296_v37 = vpop.f32.mrb[9].mxu1 }
 0x75d   :  { %v14158_v39 = vadd.f32 %v11296_v37, %v1644_v33  ;;  %v11298_v40 = vpop.f32.mrb[10].mxu1 }
 0x75e   :  { %v11307_v42 = vmax.f32 %v14157_v36, 0.0  ;;  %v11299_v3 = vpop.f32.mrb[11].mxu1 }
 0x75f   :  { %v11308_v44 = vmax.f32 %v14158_v39, 0.0 }
 0x760   :  { %v11315_v45 = vpack.c.bf16 %v11307_v42, %v11307_v42 }
 0x761   :  { %v11316_v21 = vpack.c.bf16 %v11308_v44, %v11308_v44 }
 0x763   :  { %12252 = vmatprep.mubr.bf16.mxu0 %v11316_v21 }
 0x764   :  { %12253 = vmatmul.mubr.bf16.vlgmr.msra.gmra.mrb[8].mxu0 %v11315_v45 }
 0x837   :  { %v12254_v52 = vpop.f32.mrb[8].mxu0 }
 0x838   :  { %v14159_v10 = vadd.f32 %v12254_v52, %v11450_v49  ;;  %v12256_v54 = vpop.f32.mrb[9].mxu0 }
 0x839   :  { %v14160_v30 = vadd.f32 %v12256_v54, %v11454_v51  ;;  %v12258_v58 = vpop.f32.mrb[10].mxu0 }
 0x83a   :  { %v12261_v57 = vmax.f32 %v14159_v10, 0.0  ;;  %v12259_v41 = vpop.f32.mrb[11].mxu0 }
 0x83b   :  { %v12262_v35 = vmax.f32 %v14160_v30, 0.0 }
 0x83c   :  { %v12263_v1 = vpack.c.bf16 %v12261_v57, %v12261_v57 }
 0x83d   :  { %v12264_v31 = vpack.c.bf16 %v12262_v35, %v12262_v35 }
 0x83f   :  { %12432 = vmatprep.mubr.bf16.mxu1 %v12264_v31 }
 0x840   :  { %12433 = vmatmul.mubr.bf16.vlgmr.msra.gmra.mrb[12].mxu1 %v12263_v1 }
 0x913   :  { %v14143_v56 = vpop.f32.mrb[12].mxu1 }
 0x914   :  { %v14144_v0 = vpop.f32.mrb[13].mxu1 }
 0x915   :  { %v14145_v59 = vadd.f32 %v14144_v0, %v14143_v56  ;;  %v14146_v22 = vpop.f32.mrb[14].mxu1 }
 0x916   :  { %v14147_v2 = vpop.f32.mrb[15].mxu1 }
 0x917   :  { %v12435_v5 = vadd.f32 %v14145_v59, %v14110_v14 }
 0x919   :  { %12441 = vst.msk [vmem:[%s19918_s7] sm:$0xff] %vm12440_vm0, %v12435_v5 }

</bundles_post_ra>
